<compile_context>
chip_gen: v6e
topology: v6e:2x2x1
jax: 0.10.0
libtpu: 0.0.40
codegen_flags: <defaults>
</compile_context>

<pallas_src>
import functools
import math

import jax
import jax.numpy as jnp
from jax import lax
from jax.experimental import pallas as pl
from jax.experimental.pallas import tpu as pltpu


# ----------------------------------------------------------------------------
# small helpers (padding / in-kernel math)
# ----------------------------------------------------------------------------
def _rup(n, m=128):
    return ((n + m - 1) // m) * m


def _pad_w(w, rp, cp, dtype=jnp.bfloat16):
    r, c = w.shape
    return jnp.pad(w, ((0, rp - r), (0, cp - c))).astype(dtype)


def _pad_v(v, cp):
    return jnp.pad(v, (0, cp - v.shape[0])).reshape(1, cp).astype(jnp.float32)


def _ln(x, g, b, real_c, eps):
    """LayerNorm over the last dim; if the array is zero-padded beyond real_c lanes,
    statistics are computed over the real lanes only (pad lanes stay zero)."""
    cp = x.shape[-1]
    if real_c == cp:
        mu = jnp.mean(x, axis=-1, keepdims=True)
        xc = x - mu
    else:
        inv = 1.0 / real_c
        mu = jnp.sum(x, axis=-1, keepdims=True) * inv       # pad lanes are zero
        lane = lax.broadcasted_iota(jnp.int32, x.shape, x.ndim - 1)
        xc = jnp.where(lane < real_c, x - mu, 0.0)
    var = jnp.sum(xc * xc, axis=-1, keepdims=True) * (1.0 / real_c)
    return xc * lax.rsqrt(var + eps) * g + b


_SQRT1_2 = 0.7071067811865476


def _erf(x):
    # Abramowitz & Stegun 7.1.26 (|err| < 1.5e-7): keeps PyTorch's exact-GELU semantics to
    # fp32 noise while using only ops guaranteed to lower in Mosaic.
    a1, a2, a3, a4, a5 = 0.254829592, -0.284496736, 1.421413741, -1.453152027, 1.061405429
    pp = 0.3275911
    sgn = jnp.where(x < 0.0, -1.0, 1.0)
    ax = jnp.abs(x)
    t = pl.reciprocal(1.0 + pp * ax, approx=False)           # exact reciprocal (EUP slot)
    poly = ((((a5 * t + a4) * t + a3) * t + a2) * t + a1) * t
    return sgn * (1.0 - poly * jnp.exp(-ax * ax))


def _gelu(x):
    return 0.5 * x * (1.0 + _erf(x * _SQRT1_2))


# ----------------------------------------------------------------------------
# Fused kernel 1: LayerNorm -> Linear -> GELU -> Linear (stage1 / mlp3)
# ----------------------------------------------------------------------------
def _ln_mlp_kernel(x_ref, g_ref, b_ref, w1_ref, b1_ref, w2_ref, b2_ref, o_ref,
                   *, real_in, eps):
    x = x_ref[...]
    xn = _ln(x, g_ref[...], b_ref[...], real_in, eps)
    h = jnp.dot(xn.astype(jnp.bfloat16), w1_ref[...],
                preferred_element_type=jnp.float32) + b1_ref[...]
    h = _gelu(h)
    o_ref[...] = jnp.dot(h.astype(jnp.bfloat16), w2_ref[...],
                         preferred_element_type=jnp.float32) + b2_ref[...]


def ln_mlp(x, p, real_in, eps=1e-5):
    """Fused LayerNorm + 2-layer GELU MLP.  x: (..., Kp) with zero pad lanes beyond real_in.
    Row dimension is split into 2 'parallel' blocks when possible (feeds both TCs on v7x)."""
    shp = x.shape
    kp = shp[-1]
    x2 = x.reshape(-1, kp).astype(jnp.float32)
    m = x2.shape[0]
    hp = p["w1"].shape[1]
    np_ = p["w2"].shape[1]
    if m % 16 == 0:
        bm, gm = m // 2, 2
    else:
        bm, gm = m, 1
    out = pl.pallas_call(
        functools.partial(_ln_mlp_kernel, real_in=real_in, eps=eps),
        out_shape=jax.ShapeDtypeStruct((m, np_), jnp.float32),
        grid=(gm,),
        in_specs=[
            pl.BlockSpec((bm, kp), lambda i: (i, 0)),
            pl.BlockSpec((1, kp), lambda i: (0, 0)),
            pl.BlockSpec((1, kp), lambda i: (0, 0)),
            pl.BlockSpec((kp, hp), lambda i: (0, 0)),
            pl.BlockSpec((1, hp), lambda i: (0, 0)),
            pl.BlockSpec((hp, np_), lambda i: (0, 0)),
            pl.BlockSpec((1, np_), lambda i: (0, 0)),
        ],
        out_specs=pl.BlockSpec((bm, np_), lambda i: (i, 0)),
        compiler_params=pltpu.CompilerParams(dimension_semantics=("parallel",)),
    )(x2, p["g"], p["b"], p["w1"], p["b1"], p["w2"], p["b2"])
    return out.reshape(shp[:-1] + (np_,))


# ----------------------------------------------------------------------------
# Fused kernel 2: mlp1 + mlp1_c merged (stacked weights, grid over module index)
# ----------------------------------------------------------------------------
def _ln_mlp_pair_kernel(x_ref, g_ref, b_ref, w1_ref, b1_ref, w2_ref, b2_ref, o_ref,
                        *, real_in, eps):
    xn = _ln(x_ref[0], g_ref[0], b_ref[0], real_in, eps)
    h = jnp.dot(xn.astype(jnp.bfloat16), w1_ref[0],
                preferred_element_type=jnp.float32) + b1_ref[0]
    h = _gelu(h)
    o_ref[0] = jnp.dot(h.astype(jnp.bfloat16), w2_ref[0],
                       preferred_element_type=jnp.float32) + b2_ref[0]


def ln_mlp_pair(x_pair, p, real_in, eps=1e-5):
    """x_pair: (2, B, Kp) -- row 0 runs through module 0's weights, row 1 through module 1's."""
    two, b, kp = x_pair.shape
    hp = p["w1"].shape[2]
    np_ = p["w2"].shape[2]
    return pl.pallas_call(
        functools.partial(_ln_mlp_pair_kernel, real_in=real_in, eps=eps),
        out_shape=jax.ShapeDtypeStruct((two, b, np_), jnp.float32),
        grid=(two,),
        in_specs=[
            pl.BlockSpec((1, b, kp), lambda i: (i, 0, 0)),
            pl.BlockSpec((1, 1, kp), lambda i: (i, 0, 0)),
            pl.BlockSpec((1, 1, kp), lambda i: (i, 0, 0)),
            pl.BlockSpec((1, kp, hp), lambda i: (i, 0, 0)),
            pl.BlockSpec((1, 1, hp), lambda i: (i, 0, 0)),
            pl.BlockSpec((1, hp, np_), lambda i: (i, 0, 0)),
            pl.BlockSpec((1, 1, np_), lambda i: (i, 0, 0)),
        ],
        out_specs=pl.BlockSpec((1, b, np_), lambda i: (i, 0, 0)),
        compiler_params=pltpu.CompilerParams(dimension_semantics=("parallel",)),
    )(x_pair, p["g"], p["b"], p["w1"], p["b1"], p["w2"], p["b2"])


# ----------------------------------------------------------------------------
# Fused kernel 3: the full token_TransformerEncoder depth-loop in ONE pallas_call
#   grid=(B, depth); activations live in the (resident) output block across the depth axis.
# ----------------------------------------------------------------------------
def _encoder_kernel(fea_ref, pos_ref, g1_ref, b1_ref, wqk_ref, wv_ref, wp_ref,
                    bp_ref, g2_ref, b2_ref, wf1_ref, bf1_ref, wf2_ref, bf2_ref,
                    o_ref, *, num_heads, real_c, eps):
    d = pl.program_id(1)

    @pl.when(d == 0)
    def _():
        o_ref[...] = fea_ref[...]            # seed the resident activation block

    x_in = o_ref[0]                          # (N, Cp) fp32, pad lanes zero
    pos = pos_ref[0].astype(jnp.float32)     # (N, Cp)
    n, cp = x_in.shape
    hd = real_c // num_heads
    scale = float(hd) ** -0.5

    # --- attention branch ----------------------------------------------------
    # TODO(synk): Block_decoder source is not in the provided module; this is a standard
    # pre-norm transformer block with the positional encoding added to q and k only.
    xn = _ln(x_in, g1_ref[0], b1_ref[0], real_c, eps)
    qk_in = (xn + pos).astype(jnp.bfloat16)
    qk = jnp.dot(qk_in, wqk_ref[0], preferred_element_type=jnp.float32)     # (N, 2*Cp)
    v = jnp.dot(xn.astype(jnp.bfloat16), wv_ref[0],
                preferred_element_type=jnp.float32)                          # (N, Cp)
    qb = qk[:, :cp].astype(jnp.bfloat16)
    kb = qk[:, cp:].astype(jnp.bfloat16)
    vb = v.astype(jnp.bfloat16)

    # Per-head attention via lane masks (no reshapes / layout changes); only q and v are masked,
    # k is left whole (masking q already restricts the contraction to head-h lanes).
    lane = lax.broadcasted_iota(jnp.int32, (1, cp), 1)
    attn_cat = jnp.zeros((n, cp), jnp.float32)
    for h in range(num_heads):
        lo, hi = h * hd, (h + 1) * hd
        mb = ((lane >= lo) & (lane < hi)).astype(jnp.bfloat16)               # (1, Cp)
        s = lax.dot_general(qb * mb, kb, (((1,), (1,)), ((), ())),
                            preferred_element_type=jnp.float32) * scale      # (N, N)
        s = s - jnp.max(s, axis=-1, keepdims=True)
        pr = jnp.exp(s)
        pr = pr * pl.reciprocal(jnp.sum(pr, axis=-1, keepdims=True), approx=False)
        attn_cat = attn_cat + jnp.dot(pr.astype(jnp.bfloat16), vb * mb,
                                      preferred_element_type=jnp.float32)

    proj = jnp.dot(attn_cat.astype(jnp.bfloat16), wp_ref[0],
                   preferred_element_type=jnp.float32) + bp_ref[0]
    fea_mid = x_in + proj

    # --- MLP branch -----------------------------------------------------------
    yn = _ln(fea_mid, g2_ref[0], b2_ref[0], real_c, eps)
    hid = jnp.dot(yn.astype(jnp.bfloat16), wf1_ref[0],
                  preferred_element_type=jnp.float32) + bf1_ref[0]
    hid = _gelu(hid)
    mlp_out = jnp.dot(hid.astype(jnp.bfloat16), wf2_ref[0],
                      preferred_element_type=jnp.float32) + bf2_ref[0]
    o_ref[0] = fea_mid + mlp_out


def transformer_encoder(fea, pos_bf16, blk, *, num_heads, real_c, num_blocks, eps=1e-5):
    assert real_c % num_heads == 0, "embed_dim must be divisible by num_heads"
    b, n, cp = fea.shape
    hp = blk["wf1"].shape[2]

    def w_spec(*shape):
        return pl.BlockSpec((1,) + shape, lambda bi, di: (di,) + (0,) * len(shape))

    specs = [
        pl.BlockSpec((1, n, cp), lambda bi, di: (bi, 0, 0)),   # fea (seed)
        pl.BlockSpec((1, n, cp), lambda bi, di: (bi, 0, 0)),   # pos (bf16)
        w_spec(1, cp),          # ln1 gamma
        w_spec(1, cp),          # ln1 beta
        w_spec(cp, 2 * cp),     # Wq|Wk
        w_spec(cp, cp),         # Wv
        w_spec(cp, cp),         # Wproj
        w_spec(1, cp),          # bproj
        w_spec(1, cp),          # ln2 gamma
        w_spec(1, cp),          # ln2 beta
        w_spec(cp, hp),         # fc1 W
        w_spec(1, hp),          # fc1 b
        w_spec(hp, cp),         # fc2 W
        w_spec(1, cp),          # fc2 b
    ]
    return pl.pallas_call(
        functools.partial(_encoder_kernel, num_heads=num_heads, real_c=real_c, eps=eps),
        out_shape=jax.ShapeDtypeStruct((b, n, cp), jnp.float32),
        grid=(b, num_blocks),
        in_specs=specs,
        out_specs=pl.BlockSpec((1, n, cp), lambda bi, di: (bi, 0, 0)),
        compiler_params=pltpu.CompilerParams(
            dimension_semantics=("parallel", "arbitrary")),
    )(fea, pos_bf16, blk["g1"], blk["b1"], blk["wqk"], blk["wv"], blk["wp"],
      blk["bp"], blk["g2"], blk["b2"], blk["wf1"], blk["bf1"], blk["wf2"], blk["bf2"])


# ----------------------------------------------------------------------------
# Fused kernel 4: saliency + contour token inference, merged into one call
#   (LN + q/k|v proj + sigmoid single-token attention + output proj + residual)
# ----------------------------------------------------------------------------
def _token_inf_kernel(t_ref, f_ref, g_ref, b_ref, wq_ref, wkv_ref, wp_ref, bp_ref,
                      o_ref, *, real_c, scale, eps):
    t_in = t_ref[0, 0]                      # (1, Cp)  raw token row
    f_in = f_ref[0]                         # (Nf, Cp) raw patch rows
    g = g_ref[0]
    bb = b_ref[0]
    tn = _ln(t_in, g, bb, real_c, eps)
    fn = _ln(f_in, g, bb, real_c, eps)
    cp = t_in.shape[-1]
    q = jnp.dot(fn.astype(jnp.bfloat16), wq_ref[0], preferred_element_type=jnp.float32)
    kv = jnp.dot(tn.astype(jnp.bfloat16), wkv_ref[0], preferred_element_type=jnp.float32)
    k = kv[:, :cp]
    v = kv[:, cp:]
    s = jnp.sum(q * k, axis=-1, keepdims=True) * scale       # (Nf, 1)
    gate = pl.reciprocal(1.0 + jnp.exp(-s), approx=False)    # sigmoid, fp32
    gated = gate * v                                          # (Nf, Cp)
    out = jnp.dot(gated.astype(jnp.bfloat16), wp_ref[0],
                  preferred_element_type=jnp.float32) + bp_ref[0]
    o_ref[0, 0] = out + f_in


def token_inference_pair(tok, mid, p, *, real_c, eps=1e-5):
    """tok: (2, B, 1, Cp) -- [saliency token rows; contour token rows].  mid: (B, Nf, Cp)."""
    two, b, _, cp = tok.shape
    nf = mid.shape[1]
    # num_heads == 1 in saliency/contour_token_inference, so head_dim == C and scale = C**-0.5.
    scale = float(real_c) ** -0.5
    return pl.pallas_call(
        functools.partial(_token_inf_kernel, real_c=real_c, scale=scale, eps=eps),
        out_shape=jax.ShapeDtypeStruct((two, b, nf, cp), jnp.float32),
        grid=(two, b),
        in_specs=[
            pl.BlockSpec((1, 1, 1, cp), lambda m, bi: (m, bi, 0, 0)),   # token row
            pl.BlockSpec((1, nf, cp), lambda m, bi: (bi, 0, 0)),        # patch rows
            pl.BlockSpec((1, 1, cp), lambda m, bi: (m, 0, 0)),          # ln gamma
            pl.BlockSpec((1, 1, cp), lambda m, bi: (m, 0, 0)),          # ln beta
            pl.BlockSpec((1, cp, cp), lambda m, bi: (m, 0, 0)),         # Wq
            pl.BlockSpec((1, cp, 2 * cp), lambda m, bi: (m, 0, 0)),     # Wk|Wv
            pl.BlockSpec((1, cp, cp), lambda m, bi: (m, 0, 0)),         # Wproj
            pl.BlockSpec((1, 1, cp), lambda m, bi: (m, 0, 0)),          # bproj
        ],
        out_specs=pl.BlockSpec((1, 1, nf, cp), lambda m, bi: (m, bi, 0, 0)),
        compiler_params=pltpu.CompilerParams(
            dimension_semantics=("parallel", "parallel")),
    )(tok, mid, p["g"], p["b"], p["wq"], p["wkv"], p["wp"], p["bp"])


# ----------------------------------------------------------------------------
# Sine position embedding (static y/x groups precomputed; depth group per call)
# ----------------------------------------------------------------------------
def _sine_encode(e, num_pos_feats, temperature=10000.0):
    i = jnp.arange(num_pos_feats)
    dim_t = temperature ** (2.0 * (i // 2).astype(jnp.float32) / num_pos_feats)
    pos = e[..., None] / dim_t
    b, h, w = e.shape
    return jnp.stack([jnp.sin(pos[..., 0::2]), jnp.cos(pos[..., 1::2])],
                     axis=-1).reshape(b, h, w, num_pos_feats)


def pe_static_yx(H, W, num_pos_feats, temperature=10000.0, eps=1e-6):
    # Input-independent (y, x) groups of the DETR-style normalized sine PE; computed once.
    scale = 2.0 * math.pi
    ones = jnp.ones((1, H, W), jnp.float32)
    y = jnp.cumsum(ones, axis=1)
    x = jnp.cumsum(ones, axis=2)
    y = y / (y[:, -1:, :] + eps) * scale
    x = x / (x[:, :, -1:] + eps) * scale
    yx = jnp.concatenate([_sine_encode(y, num_pos_feats, temperature),
                          _sine_encode(x, num_pos_feats, temperature)], axis=-1)
    return yx.reshape(1, H * W, 2 * num_pos_feats)


def pe_depth_group(depth_bhw, zoom, num_pos_feats, temperature=10000.0, eps=1e-6):
    # TODO(synk): PositionEmbeddingSine source is not in the provided module; this is a
    # DETR-style normalized sine PE extended with a zoom-scaled depth group (3*N_steps == C).
    scale = 2.0 * math.pi
    B, H, W = depth_bhw.shape
    z = depth_bhw / (jnp.max(depth_bhw, axis=(1, 2), keepdims=True) + eps) * scale * zoom[0]
    return _sine_encode(z, num_pos_feats, temperature).reshape(B, H * W, num_pos_feats)


# ----------------------------------------------------------------------------
# token_Transformer forward
# ----------------------------------------------------------------------------
def token_transformer_forward(p, rgb_fea, depth_fea, depth, *, num_heads, token_dim):
    B, HW, D = rgb_fea.shape
    Cp = p["blocks"]["wv"].shape[1]
    num_blocks = p["blocks"]["wv"].shape[0]
    npf = D // 3

    # norm(2D) + mlp_s, fused; output is channel-padded to Cp with zero lanes.
    fea_cat = jnp.concatenate([rgb_fea, depth_fea], axis=2).astype(jnp.float32)
    fea = ln_mlp(fea_cat, p["stage1"], real_in=2 * D)                 # (B, HW, Cp)

    sal_tok = jnp.broadcast_to(p["saliency_token"], (B, 1, Cp))
    con_tok = jnp.broadcast_to(p["contour_token"], (B, 1, Cp))
    fea_seq = jnp.concatenate([sal_tok, fea, con_tok], axis=1)        # (B, HW+2, Cp)

    sal_PE = jnp.tile(p["sal_PE"][:, None, :], (B, 1, 1))             # (B, 1, D)
    con_PE = jnp.tile(p["con_PE"][:, None, :], (B, 1, 1))
    back_PE = jnp.tile(p["back_PE"][:, None, :], (B, 1, 1))

    patch_PE = jnp.concatenate(
        [pe_depth_group(depth[:, 0], p["zoom_16"], npf),
         jnp.broadcast_to(p["pe_yx"], (B, HW, 2 * npf))], axis=-1)    # (B, HW, D)
    # TODO(synk): the PyTorch code builds fea_pos with HW+3 rows (incl. back_PE) for HW+2
    # tokens; how Block_decoder consumes the extra row is unknown, so back_PE is dropped here.
    pos_used = jnp.concatenate([sal_PE, patch_PE, con_PE], axis=1)    # (B, HW+2, D)
    pos_used = jnp.pad(pos_used, ((0, 0), (0, 0), (0, Cp - D))).astype(jnp.bfloat16)

    # The whole depth-loop of the encoder runs in a single pallas_call.
    fea_seq = transformer_encoder(fea_seq, pos_used, p["blocks"],
                                  num_heads=num_heads, real_c=D, num_blocks=num_blocks)

    saliency_tokens = fea_seq[:, 0:1, :D]
    contour_tokens = fea_seq[:, HW + 1:HW + 2, :D]
    fea_1_16 = fea_seq[:, 1:HW + 1, :D]

    fea_16 = ln_mlp(fea_seq[:, 1:HW + 1, :], p["mlp3"], real_in=D)[..., :token_dim]

    # mlp1 + mlp1_c merged into one call.
    tok_pair = jnp.stack([fea_seq[:, 0, :], fea_seq[:, HW + 1, :]], axis=0)   # (2, B, Cp)
    tmp_pair = ln_mlp_pair(tok_pair, p["mlp1_pair"], real_in=D)               # (2, B, Tp)
    saliency_tokens_tmp = tmp_pair[0][:, None, :token_dim]
    contour_tokens_tmp = tmp_pair[1][:, None, :token_dim]

    # saliency + contour token inference merged into one call.
    inf_pair = token_inference_pair(tok_pair[:, :, None, :],
                                    fea_seq[:, 1:HW + 1, :],
                                    p["token_pre"], real_c=D)                 # (2, B, HW, Cp)
    saliency_fea_1_16 = inf_pair[0][..., :D]
    contour_fea_1_16 = inf_pair[1][..., :D]

    return (fea_1_16, saliency_tokens, contour_tokens, fea_16, saliency_tokens_tmp,
            contour_tokens_tmp, saliency_fea_1_16, contour_fea_1_16, sal_PE, con_PE, back_PE)


# ----------------------------------------------------------------------------
# Deterministic parameter init (shapes per module __init__), pre-padded + bf16 weights,
# per-block / per-module weights stacked along a leading axis for the fused kernels.
# ----------------------------------------------------------------------------
def init_params(key, D, depth_blocks, num_heads, mlp_ratio, token_dim, H, W):
    assert D % num_heads == 0, "embed_dim must be divisible by num_heads"
    assert D % 3 == 0, "embed_dim must be divisible by 3 (sine PE groups)"
    Cp = _rup(D)
    hidden = int(D * mlp_ratio)
    Hp = _rup(hidden)
    Tp = _rup(token_dim)
    D2 = 2 * D

    it = iter(jax.random.split(key, 1024))

    def nk():
        return next(it)

    def trunc(shape, std=0.02):
        return std * jax.random.truncated_normal(nk(), -2.0, 2.0, shape, jnp.float32)

    def ln_pair(d, dp):
        return (_pad_v(jnp.ones((d,), jnp.float32), dp),
                _pad_v(jnp.zeros((d,), jnp.float32), dp))

    def ln_mlp_p(din, dmid, dout, dinp, dmidp, doutp):
        g, b = ln_pair(din, dinp)
        return dict(g=g, b=b,
                    w1=_pad_w(trunc((din, dmid)), dinp, dmidp),
                    b1=_pad_v(jnp.zeros((dmid,), jnp.float32), dmidp),
                    w2=_pad_w(trunc((dmid, dout)), dmidp, doutp),
                    b2=_pad_v(jnp.zeros((dout,), jnp.float32), doutp))

    def block_p():
        g1, b1 = ln_pair(D, Cp)
        g2, b2 = ln_pair(D, Cp)
        wq = _pad_w(trunc((D, D)), Cp, Cp)                   # qkv_bias=False
        wk = _pad_w(trunc((D, D)), Cp, Cp)
        return dict(g1=g1, b1=b1,
                    wqk=jnp.concatenate([wq, wk], axis=1),   # (Cp, 2*Cp) bf16
                    wv=_pad_w(trunc((D, D)), Cp, Cp),
                    wp=_pad_w(trunc((D, D)), Cp, Cp),
                    bp=_pad_v(jnp.zeros((D,), jnp.float32), Cp),
                    g2=g2, b2=b2,
                    wf1=_pad_w(trunc((D, hidden)), Cp, Hp),
                    bf1=_pad_v(jnp.zeros((hidden,), jnp.float32), Hp),
                    wf2=_pad_w(trunc((hidden, D)), Hp, Cp),
                    bf2=_pad_v(jnp.zeros((D,), jnp.float32), Cp))

    def token_pre_p():
        g, b = ln_pair(D, Cp)
        wk = _pad_w(trunc((D, D)), Cp, Cp)
        wv = _pad_w(trunc((D, D)), Cp, Cp)
        return dict(g=g, b=b,
                    wq=_pad_w(trunc((D, D)), Cp, Cp),
                    wkv=jnp.concatenate([wk, wv], axis=1),   # (Cp, 2*Cp) bf16
                    wp=_pad_w(trunc((D, D)), Cp, Cp),
                    bp=_pad_v(jnp.zeros((D,), jnp.float32), Cp))

    def pad_tok(t):
        return jnp.pad(t, ((0, 0), (0, 0), (0, Cp - D)))

    blocks = [block_p() for _ in range(depth_blocks)]
    blocks_stacked = {k: jnp.stack([blk[k] for blk in blocks], axis=0) for k in blocks[0]}

    mlp1 = ln_mlp_p(D, D, token_dim, Cp, Cp, Tp)
    mlp1_c = ln_mlp_p(D, D, token_dim, Cp, Cp, Tp)
    mlp1_pair = {k: jnp.stack([mlp1[k], mlp1_c[k]], axis=0) for k in mlp1}

    sal_pre = token_pre_p()
    con_pre = token_pre_p()
    token_pre = {k: jnp.stack([sal_pre[k], con_pre[k]], axis=0) for k in sal_pre}

    return dict(
        stage1=ln_mlp_p(D2, D, D, D2, Cp, Cp),
        blocks=blocks_stacked,
        mlp3=ln_mlp_p(D, D, token_dim, Cp, Cp, Tp),
        mlp1_pair=mlp1_pair,
        token_pre=token_pre,
        saliency_token=pad_tok(jax.random.normal(nk(), (1, 1, D), jnp.float32)),
        contour_token=pad_tok(jax.random.normal(nk(), (1, 1, D), jnp.float32)),
        sal_PE=jax.random.normal(nk(), (1, D), jnp.float32),
        con_PE=jax.random.normal(nk(), (1, D), jnp.float32),
        back_PE=jax.random.normal(nk(), (1, D), jnp.float32),
        zoom_16=jnp.ones((1,), jnp.float32) * 0.5,
        pe_yx=pe_static_yx(H, W, D // 3),
    )


# ----------------------------------------------------------------------------
# Main
# ----------------------------------------------------------------------------
if __name__ == "__main__":
    B = 2
    EMBED_DIM = 96      # divisible by 3 (sine PE groups) and by NUM_HEADS
    NUM_HEADS = 6
    DEPTH_BLOCKS = 2    # small encoder depth for this synthetic run
    MLP_RATIO = 3.0
    IN_DIM = 32
    H = W = 8
    HW = H * W

    key = jax.random.PRNGKey(0)
    k0, k1, k2, k3 = jax.random.split(key, 4)
    params = init_params(k0, EMBED_DIM, DEPTH_BLOCKS, NUM_HEADS, MLP_RATIO, IN_DIM, H, W)

    rgb_fea = jax.random.normal(k1, (B, HW, EMBED_DIM), jnp.float32)     # (B, N, C)
    depth_fea = jax.random.normal(k2, (B, HW, EMBED_DIM), jnp.float32)   # (B, N, C)
    depth = jax.random.uniform(k3, (B, 1, H, W), jnp.float32)            # NCHW

    fwd = jax.jit(functools.partial(token_transformer_forward,
                                    num_heads=NUM_HEADS, token_dim=IN_DIM))
    outs = fwd(params, rgb_fea, depth_fea, depth)
    jax.block_until_ready(outs)

    (fea_1_16, sal_tok, con_tok, fea_16, sal_tmp, con_tmp, sal_fea, con_fea,
     sal_PE, con_PE, back_PE) = outs
    assert fea_1_16.shape == (B, HW, EMBED_DIM)
    assert sal_tok.shape == (B, 1, EMBED_DIM) and con_tok.shape == (B, 1, EMBED_DIM)
    assert fea_16.shape == (B, HW, IN_DIM)
    assert sal_tmp.shape == (B, 1, IN_DIM) and con_tmp.shape == (B, 1, IN_DIM)
    assert sal_fea.shape == (B, HW, EMBED_DIM) and con_fea.shape == (B, HW, EMBED_DIM)
    assert sal_PE.shape == (B, 1, EMBED_DIM) and back_PE.shape == (B, 1, EMBED_DIM)
    assert bool(jnp.all(jnp.isfinite(fea_1_16))) and bool(jnp.all(jnp.isfinite(sal_fea)))
    assert bool(jnp.all(jnp.isfinite(fea_16))) and bool(jnp.all(jnp.isfinite(con_fea)))

    print("KERNEL_OK")
</pallas_src>

<mosaic_0001>
module attributes {stable_mosaic.version = 11 : i64} {
  func.func @_ln_mlp_kernel(%arg0: i32, %arg1: memref<64x192xf32, #tpu.memory_space<vmem>>, %arg2: memref<1x192xf32, #tpu.memory_space<vmem>>, %arg3: memref<1x192xf32, #tpu.memory_space<vmem>>, %arg4: memref<192x128xbf16, #tpu.memory_space<vmem>>, %arg5: memref<1x128xf32, #tpu.memory_space<vmem>>, %arg6: memref<128x128xbf16, #tpu.memory_space<vmem>>, %arg7: memref<1x128xf32, #tpu.memory_space<vmem>>, %arg8: memref<64x128xf32, #tpu.memory_space<vmem>>) attributes {dimension_semantics = [#tpu.dimension_semantics<parallel>], iteration_bounds = array<i64: 2>, scalar_prefetch = 0 : i64, scratch_operands = 0 : i64, tpu.core_type = #tpu.core_type<tc>, window_params = [{transform_indices = @transform_0, window_bounds = array<i64: 64, 192>}, {pipeline_mode = #tpu.pipeline_mode<synchronous>, transform_indices = @transform_1, window_bounds = array<i64: 1, 192>}, {pipeline_mode = #tpu.pipeline_mode<synchronous>, transform_indices = @transform_2, window_bounds = array<i64: 1, 192>}, {pipeline_mode = #tpu.pipeline_mode<synchronous>, transform_indices = @transform_3, window_bounds = array<i64: 192, 128>}, {pipeline_mode = #tpu.pipeline_mode<synchronous>, transform_indices = @transform_4, window_bounds = array<i64: 1, 128>}, {pipeline_mode = #tpu.pipeline_mode<synchronous>, transform_indices = @transform_5, window_bounds = array<i64: 128, 128>}, {pipeline_mode = #tpu.pipeline_mode<synchronous>, transform_indices = @transform_6, window_bounds = array<i64: 1, 128>}, {transform_indices = @transform_7, window_bounds = array<i64: 64, 128>}]} {
    %c0 = arith.constant 0 : index
    %c0_0 = arith.constant 0 : index
    %0 = vector.load %arg1[%c0, %c0_0] : memref<64x192xf32, #tpu.memory_space<vmem>>, vector<64x192xf32>
    %c0_1 = arith.constant 0 : index
    %c0_2 = arith.constant 0 : index
    %1 = vector.load %arg2[%c0_1, %c0_2] : memref<1x192xf32, #tpu.memory_space<vmem>>, vector<1x192xf32>
    %c0_3 = arith.constant 0 : index
    %c0_4 = arith.constant 0 : index
    %2 = vector.load %arg3[%c0_3, %c0_4] : memref<1x192xf32, #tpu.memory_space<vmem>>, vector<1x192xf32>
    %cst = arith.constant dense<0.000000e+00> : vector<64xf32>
    %3 = vector.multi_reduction <add>, %0, %cst [1] : vector<64x192xf32> to vector<64xf32>
    %4 = vector.shape_cast %3 : vector<64xf32> to vector<64x1xf32>
    %cst_5 = arith.constant 1.920000e+02 : f32
    %5 = vector.broadcast %cst_5 : f32 to vector<64x1xf32>
    %6 = arith.divf %4, %5 : vector<64x1xf32>
    %7 = vector.broadcast %6 : vector<64x1xf32> to vector<64x192xf32>
    %8 = arith.subf %0, %7 : vector<64x192xf32>
    %9 = arith.mulf %8, %8 : vector<64x192xf32>
    %cst_6 = arith.constant dense<0.000000e+00> : vector<64xf32>
    %10 = vector.multi_reduction <add>, %9, %cst_6 [1] : vector<64x192xf32> to vector<64xf32>
    %11 = vector.shape_cast %10 : vector<64xf32> to vector<64x1xf32>
    %cst_7 = arith.constant 0.00520833349 : f32
    %12 = vector.broadcast %cst_7 : f32 to vector<64x1xf32>
    %13 = arith.mulf %11, %12 : vector<64x1xf32>
    %cst_8 = arith.constant 9.99999974E-6 : f32
    %14 = vector.broadcast %cst_8 : f32 to vector<64x1xf32>
    %15 = arith.addf %13, %14 : vector<64x1xf32>
    %16 = math.rsqrt %15 : vector<64x1xf32>
    %17 = vector.broadcast %16 : vector<64x1xf32> to vector<64x192xf32>
    %18 = arith.mulf %8, %17 : vector<64x192xf32>
    %19 = vector.broadcast %1 : vector<1x192xf32> to vector<64x192xf32>
    %20 = arith.mulf %18, %19 : vector<64x192xf32>
    %21 = vector.broadcast %2 : vector<1x192xf32> to vector<64x192xf32>
    %22 = arith.addf %20, %21 : vector<64x192xf32>
    %23 = arith.truncf %22 : vector<64x192xf32> to vector<64x192xbf16>
    %c0_9 = arith.constant 0 : index
    %c0_10 = arith.constant 0 : index
    %24 = vector.load %arg4[%c0_9, %c0_10] : memref<192x128xbf16, #tpu.memory_space<vmem>>, vector<192x128xbf16>
    %cst_11 = arith.constant dense<0.000000e+00> : vector<64x128xf32>
    %25 = tpu.matmul %23, %24, %cst_11 {dimension_numbers = #tpu.dot_dimension_numbers<[1], [0], [0], [1], [0, 0, 1, 1], [], []>} : vector<64x192xbf16>, vector<192x128xbf16>, vector<64x128xf32> -> vector<64x128xf32>
    %c0_12 = arith.constant 0 : index
    %c0_13 = arith.constant 0 : index
    %26 = vector.load %arg5[%c0_12, %c0_13] : memref<1x128xf32, #tpu.memory_space<vmem>>, vector<1x128xf32>
    %27 = vector.broadcast %26 : vector<1x128xf32> to vector<64x128xf32>
    %28 = arith.addf %25, %27 : vector<64x128xf32>
    %cst_14 = arith.constant 5.000000e-01 : f32
    %29 = vector.broadcast %cst_14 : f32 to vector<64x128xf32>
    %30 = arith.mulf %29, %28 : vector<64x128xf32>
    %cst_15 = arith.constant 0.707106769 : f32
    %31 = vector.broadcast %cst_15 : f32 to vector<64x128xf32>
    %32 = arith.mulf %28, %31 : vector<64x128xf32>
    %cst_16 = arith.constant 0.000000e+00 : f32
    %33 = vector.broadcast %cst_16 : f32 to vector<64x128xf32>
    %34 = arith.cmpf olt, %32, %33 : vector<64x128xf32>
    %cst_17 = arith.constant -1.000000e+00 : f32
    %cst_18 = arith.constant 1.000000e+00 : f32
    %35 = vector.broadcast %cst_17 : f32 to vector<64x128xf32>
    %36 = vector.broadcast %cst_18 : f32 to vector<64x128xf32>
    %37 = arith.select %34, %35, %36 : vector<64x128xi1>, vector<64x128xf32>
    %38 = math.absf %32 : vector<64x128xf32>
    %cst_19 = arith.constant 0.327591091 : f32
    %39 = vector.broadcast %cst_19 : f32 to vector<64x128xf32>
    %40 = arith.mulf %39, %38 : vector<64x128xf32>
    %cst_20 = arith.constant 1.000000e+00 : f32
    %41 = vector.broadcast %cst_20 : f32 to vector<64x128xf32>
    %42 = arith.addf %41, %40 : vector<64x128xf32>
    %43 = tpu.reciprocal %42 : vector<64x128xf32> -> vector<64x128xf32>
    %cst_21 = arith.constant 1.06140542 : f32
    %44 = vector.broadcast %cst_21 : f32 to vector<64x128xf32>
    %45 = arith.mulf %44, %43 : vector<64x128xf32>
    %cst_22 = arith.constant -1.45315206 : f32
    %46 = vector.broadcast %cst_22 : f32 to vector<64x128xf32>
    %47 = arith.addf %45, %46 : vector<64x128xf32>
    %48 = arith.mulf %47, %43 : vector<64x128xf32>
    %cst_23 = arith.constant 1.42141378 : f32
    %49 = vector.broadcast %cst_23 : f32 to vector<64x128xf32>
    %50 = arith.addf %48, %49 : vector<64x128xf32>
    %51 = arith.mulf %50, %43 : vector<64x128xf32>
    %cst_24 = arith.constant -0.284496725 : f32
    %52 = vector.broadcast %cst_24 : f32 to vector<64x128xf32>
    %53 = arith.addf %51, %52 : vector<64x128xf32>
    %54 = arith.mulf %53, %43 : vector<64x128xf32>
    %cst_25 = arith.constant 0.254829586 : f32
    %55 = vector.broadcast %cst_25 : f32 to vector<64x128xf32>
    %56 = arith.addf %54, %55 : vector<64x128xf32>
    %57 = arith.mulf %56, %43 : vector<64x128xf32>
    %cst_26 = arith.constant 0.000000e+00 : f32
    %58 = vector.broadcast %cst_26 : f32 to vector<64x128xf32>
    %59 = arith.subf %58, %38 : vector<64x128xf32>
    %60 = arith.mulf %59, %38 : vector<64x128xf32>
    %61 = math.exp %60 : vector<64x128xf32>
    %62 = arith.mulf %57, %61 : vector<64x128xf32>
    %cst_27 = arith.constant 1.000000e+00 : f32
    %63 = vector.broadcast %cst_27 : f32 to vector<64x128xf32>
    %64 = arith.subf %63, %62 : vector<64x128xf32>
    %65 = arith.mulf %37, %64 : vector<64x128xf32>
    %cst_28 = arith.constant 1.000000e+00 : f32
    %66 = vector.broadcast %cst_28 : f32 to vector<64x128xf32>
    %67 = arith.addf %66, %65 : vector<64x128xf32>
    %68 = arith.mulf %30, %67 : vector<64x128xf32>
    %69 = arith.truncf %68 : vector<64x128xf32> to vector<64x128xbf16>
    %c0_29 = arith.constant 0 : index
    %c0_30 = arith.constant 0 : index
    %70 = vector.load %arg6[%c0_29, %c0_30] : memref<128x128xbf16, #tpu.memory_space<vmem>>, vector<128x128xbf16>
    %cst_31 = arith.constant dense<0.000000e+00> : vector<64x128xf32>
    %71 = tpu.matmul %69, %70, %cst_31 {dimension_numbers = #tpu.dot_dimension_numbers<[1], [0], [0], [1], [0, 0, 1, 1], [], []>} : vector<64x128xbf16>, vector<128x128xbf16>, vector<64x128xf32> -> vector<64x128xf32>
    %c0_32 = arith.constant 0 : index
    %c0_33 = arith.constant 0 : index
    %72 = vector.load %arg7[%c0_32, %c0_33] : memref<1x128xf32, #tpu.memory_space<vmem>>, vector<1x128xf32>
    %73 = vector.broadcast %72 : vector<1x128xf32> to vector<64x128xf32>
    %74 = arith.addf %71, %73 : vector<64x128xf32>
    %c0_34 = arith.constant 0 : index
    %c0_35 = arith.constant 0 : index
    %75 = vector.load %arg8[%c0_34, %c0_35] : memref<64x128xf32, #tpu.memory_space<vmem>>, vector<64x128xf32>
    tpu.vector_store %arg8[%c0_34, %c0_35], %74 {strides = array<i32>} : memref<64x128xf32, #tpu.memory_space<vmem>>, vector<64x128xf32>,
    return
  }
  func.func @transform_0(%arg0: i32) -> (i32, i32) {
    %c0_i32 = arith.constant 0 : i32
    %c0_i32_0 = arith.constant 0 : i32
    return %arg0, %c0_i32 : i32, i32
  }
  func.func @transform_1(%arg0: i32) -> (i32, i32) {
    %c0_i32 = arith.constant 0 : i32
    %c0_i32_0 = arith.constant 0 : i32
    %c0_i32_1 = arith.constant 0 : i32
    return %c0_i32, %c0_i32_0 : i32, i32
  }
  func.func @transform_2(%arg0: i32) -> (i32, i32) {
    %c0_i32 = arith.constant 0 : i32
    %c0_i32_0 = arith.constant 0 : i32
    %c0_i32_1 = arith.constant 0 : i32
    return %c0_i32, %c0_i32_0 : i32, i32
  }
  func.func @transform_3(%arg0: i32) -> (i32, i32) {
    %c0_i32 = arith.constant 0 : i32
    %c0_i32_0 = arith.constant 0 : i32
    %c0_i32_1 = arith.constant 0 : i32
    return %c0_i32, %c0_i32_0 : i32, i32
  }
  func.func @transform_4(%arg0: i32) -> (i32, i32) {
    %c0_i32 = arith.constant 0 : i32
    %c0_i32_0 = arith.constant 0 : i32
    %c0_i32_1 = arith.constant 0 : i32
    return %c0_i32, %c0_i32_0 : i32, i32
  }
  func.func @transform_5(%arg0: i32) -> (i32, i32) {
    %c0_i32 = arith.constant 0 : i32
    %c0_i32_0 = arith.constant 0 : i32
    %c0_i32_1 = arith.constant 0 : i32
    return %c0_i32, %c0_i32_0 : i32, i32
  }
  func.func @transform_6(%arg0: i32) -> (i32, i32) {
    %c0_i32 = arith.constant 0 : i32
    %c0_i32_0 = arith.constant 0 : i32
    %c0_i32_1 = arith.constant 0 : i32
    return %c0_i32, %c0_i32_0 : i32, i32
  }
  func.func @transform_7(%arg0: i32) -> (i32, i32) {
    %c0_i32 = arith.constant 0 : i32
    %c0_i32_0 = arith.constant 0 : i32
    return %arg0, %c0_i32 : i32, i32
  }
}

module attributes {stable_mosaic.version = 11 : i64} {
  func.func @_encoder_kernel(%arg0: i32, %arg1: i32, %arg2: memref<1x66x128xf32, #tpu.memory_space<vmem>>, %arg3: memref<1x66x128xbf16, #tpu.memory_space<vmem>>, %arg4: memref<1x1x128xf32, #tpu.memory_space<vmem>>, %arg5: memref<1x1x128xf32, #tpu.memory_space<vmem>>, %arg6: memref<1x128x256xbf16, #tpu.memory_space<vmem>>, %arg7: memref<1x128x128xbf16, #tpu.memory_space<vmem>>, %arg8: memref<1x128x128xbf16, #tpu.memory_space<vmem>>, %arg9: memref<1x1x128xf32, #tpu.memory_space<vmem>>, %arg10: memref<1x1x128xf32, #tpu.memory_space<vmem>>, %arg11: memref<1x1x128xf32, #tpu.memory_space<vmem>>, %arg12: memref<1x128x384xbf16, #tpu.memory_space<vmem>>, %arg13: memref<1x1x384xf32, #tpu.memory_space<vmem>>, %arg14: memref<1x384x128xbf16, #tpu.memory_space<vmem>>, %arg15: memref<1x1x128xf32, #tpu.memory_space<vmem>>, %arg16: memref<1x66x128xf32, #tpu.memory_space<vmem>>) attributes {dimension_semantics = [#tpu.dimension_semantics<parallel>, #tpu.dimension_semantics<arbitrary>], iteration_bounds = array<i64: 2, 2>, scalar_prefetch = 0 : i64, scratch_operands = 0 : i64, tpu.core_type = #tpu.core_type<tc>, window_params = [{transform_indices = @transform_0, window_bounds = array<i64: 1, 66, 128>}, {transform_indices = @transform_1, window_bounds = array<i64: 1, 66, 128>}, {transform_indices = @transform_2, window_bounds = array<i64: 1, 1, 128>}, {transform_indices = @transform_3, window_bounds = array<i64: 1, 1, 128>}, {transform_indices = @transform_4, window_bounds = array<i64: 1, 128, 256>}, {transform_indices = @transform_5, window_bounds = array<i64: 1, 128, 128>}, {transform_indices = @transform_6, window_bounds = array<i64: 1, 128, 128>}, {transform_indices = @transform_7, window_bounds = array<i64: 1, 1, 128>}, {transform_indices = @transform_8, window_bounds = array<i64: 1, 1, 128>}, {transform_indices = @transform_9, window_bounds = array<i64: 1, 1, 128>}, {transform_indices = @transform_10, window_bounds = array<i64: 1, 128, 384>}, {transform_indices = @transform_11, window_bounds = array<i64: 1, 1, 384>}, {transform_indices = @transform_12, window_bounds = array<i64: 1, 384, 128>}, {transform_indices = @transform_13, window_bounds = array<i64: 1, 1, 128>}, {transform_indices = @transform_14, window_bounds = array<i64: 1, 66, 128>}]} {
    %c0_i32 = arith.constant 0 : i32
    %0 = arith.cmpi eq, %arg1, %c0_i32 : i32
    %1 = arith.extui %0 : i1 to i32
    %c0_i32_0 = arith.constant 0 : i32
    %2 = arith.cmpi ne, %1, %c0_i32_0 : i32
    scf.if %2 {
      %c0_115 = arith.constant 0 : index
      %c0_116 = arith.constant 0 : index
      %c0_117 = arith.constant 0 : index
      %319 = vector.load %arg2[%c0_115, %c0_116, %c0_117] : memref<1x66x128xf32, #tpu.memory_space<vmem>>, vector<1x66x128xf32>
      %c0_118 = arith.constant 0 : index
      %c0_119 = arith.constant 0 : index
      %c0_120 = arith.constant 0 : index
      %320 = vector.load %arg16[%c0_118, %c0_119, %c0_120] : memref<1x66x128xf32, #tpu.memory_space<vmem>>, vector<1x66x128xf32>
      tpu.vector_store %arg16[%c0_118, %c0_119, %c0_120], %319 {strides = array<i32>} : memref<1x66x128xf32, #tpu.memory_space<vmem>>, vector<1x66x128xf32>,
    } else {
    }
    %c0 = arith.constant 0 : index
    %c0_1 = arith.constant 0 : index
    %c0_2 = arith.constant 0 : index
    %3 = vector.load %arg16[%c0, %c0_1, %c0_2] : memref<1x66x128xf32, #tpu.memory_space<vmem>>, vector<1x66x128xf32>
    %4 = vector.shape_cast %3 : vector<1x66x128xf32> to vector<66x128xf32>
    %c0_3 = arith.constant 0 : index
    %c0_4 = arith.constant 0 : index
    %c0_5 = arith.constant 0 : index
    %5 = vector.load %arg3[%c0_3, %c0_4, %c0_5] : memref<1x66x128xbf16, #tpu.memory_space<vmem>>, vector<1x66x128xbf16>
    %6 = vector.shape_cast %5 : vector<1x66x128xbf16> to vector<66x128xbf16>
    %7 = arith.extf %6 : vector<66x128xbf16> to vector<66x128xf32>
    %c0_6 = arith.constant 0 : index
    %c0_7 = arith.constant 0 : index
    %c0_8 = arith.constant 0 : index
    %8 = vector.load %arg4[%c0_6, %c0_7, %c0_8] : memref<1x1x128xf32, #tpu.memory_space<vmem>>, vector<1x1x128xf32>
    %9 = vector.shape_cast %8 : vector<1x1x128xf32> to vector<1x128xf32>
    %c0_9 = arith.constant 0 : index
    %c0_10 = arith.constant 0 : index
    %c0_11 = arith.constant 0 : index
    %10 = vector.load %arg5[%c0_9, %c0_10, %c0_11] : memref<1x1x128xf32, #tpu.memory_space<vmem>>, vector<1x1x128xf32>
    %11 = vector.shape_cast %10 : vector<1x1x128xf32> to vector<1x128xf32>
    %cst = arith.constant dense<0.000000e+00> : vector<66xf32>
    %12 = vector.multi_reduction <add>, %4, %cst [1] : vector<66x128xf32> to vector<66xf32>
    %13 = vector.shape_cast %12 : vector<66xf32> to vector<66x1xf32>
    %cst_12 = arith.constant 0.010416667 : f32
    %14 = vector.broadcast %cst_12 : f32 to vector<66x1xf32>
    %15 = arith.mulf %13, %14 : vector<66x1xf32>
    %16 = tpu.iota {dimensions = array<i32: 1>} : vector<66x128xi32>
    %c96_i32 = arith.constant 96 : i32
    %17 = vector.broadcast %c96_i32 : i32 to vector<66x128xi32>
    %18 = arith.cmpi slt, %16, %17 : vector<66x128xi32>
    %19 = vector.broadcast %15 : vector<66x1xf32> to vector<66x128xf32>
    %20 = arith.subf %4, %19 : vector<66x128xf32>
    %cst_13 = arith.constant 0.000000e+00 : f32
    %21 = vector.broadcast %cst_13 : f32 to vector<66x128xf32>
    %22 = arith.select %18, %20, %21 : vector<66x128xi1>, vector<66x128xf32>
    %23 = arith.mulf %22, %22 : vector<66x128xf32>
    %cst_14 = arith.constant dense<0.000000e+00> : vector<66xf32>
    %24 = vector.multi_reduction <add>, %23, %cst_14 [1] : vector<66x128xf32> to vector<66xf32>
    %25 = vector.shape_cast %24 : vector<66xf32> to vector<66x1xf32>
    %cst_15 = arith.constant 0.010416667 : f32
    %26 = vector.broadcast %cst_15 : f32 to vector<66x1xf32>
    %27 = arith.mulf %25, %26 : vector<66x1xf32>
    %cst_16 = arith.constant 9.99999974E-6 : f32
    %28 = vector.broadcast %cst_16 : f32 to vector<66x1xf32>
    %29 = arith.addf %27, %28 : vector<66x1xf32>
    %30 = math.rsqrt %29 : vector<66x1xf32>
    %31 = vector.broadcast %30 : vector<66x1xf32> to vector<66x128xf32>
    %32 = arith.mulf %22, %31 : vector<66x128xf32>
    %33 = vector.broadcast %9 : vector<1x128xf32> to vector<66x128xf32>
    %34 = arith.mulf %32, %33 : vector<66x128xf32>
    %35 = vector.broadcast %11 : vector<1x128xf32> to vector<66x128xf32>
    %36 = arith.addf %34, %35 : vector<66x128xf32>
    %37 = arith.addf %36, %7 : vector<66x128xf32>
    %38 = arith.truncf %37 : vector<66x128xf32> to vector<66x128xbf16>
    %c0_17 = arith.constant 0 : index
    %c0_18 = arith.constant 0 : index
    %c0_19 = arith.constant 0 : index
    %39 = vector.load %arg6[%c0_17, %c0_18, %c0_19] : memref<1x128x256xbf16, #tpu.memory_space<vmem>>, vector<1x128x256xbf16>
    %40 = vector.shape_cast %39 : vector<1x128x256xbf16> to vector<128x256xbf16>
    %cst_20 = arith.constant dense<0.000000e+00> : vector<66x256xf32>
    %41 = tpu.matmul %38, %40, %cst_20 {dimension_numbers = #tpu.dot_dimension_numbers<[1], [0], [0], [1], [0, 0, 1, 1], [], []>} : vector<66x128xbf16>, vector<128x256xbf16>, vector<66x256xf32> -> vector<66x256xf32>
    %42 = arith.truncf %36 : vector<66x128xf32> to vector<66x128xbf16>
    %c0_21 = arith.constant 0 : index
    %c0_22 = arith.constant 0 : index
    %c0_23 = arith.constant 0 : index
    %43 = vector.load %arg7[%c0_21, %c0_22, %c0_23] : memref<1x128x128xbf16, #tpu.memory_space<vmem>>, vector<1x128x128xbf16>
    %44 = vector.shape_cast %43 : vector<1x128x128xbf16> to vector<128x128xbf16>
    %cst_24 = arith.constant dense<0.000000e+00> : vector<66x128xf32>
    %45 = tpu.matmul %42, %44, %cst_24 {dimension_numbers = #tpu.dot_dimension_numbers<[1], [0], [0], [1], [0, 0, 1, 1], [], []>} : vector<66x128xbf16>, vector<128x128xbf16>, vector<66x128xf32> -> vector<66x128xf32>
    %46 = vector.extract_strided_slice %41 {offsets = [0, 0], sizes = [66, 128], strides = [1, 1]} : vector<66x256xf32> to vector<66x128xf32>
    %47 = arith.truncf %46 : vector<66x128xf32> to vector<66x128xbf16>
    %48 = vector.extract_strided_slice %41 {offsets = [0, 128], sizes = [66, 128], strides = [1, 1]} : vector<66x256xf32> to vector<66x128xf32>
    %49 = arith.truncf %48 : vector<66x128xf32> to vector<66x128xbf16>
    %50 = arith.truncf %45 : vector<66x128xf32> to vector<66x128xbf16>
    %51 = tpu.iota {dimensions = array<i32: 1>} : vector<1x128xi32>
    %cst_25 = arith.constant 0.000000e+00 : f32
    %52 = vector.broadcast %cst_25 : f32 to vector<66x128xf32>
    %c0_i32_26 = arith.constant 0 : i32
    %53 = vector.broadcast %c0_i32_26 : i32 to vector<1x128xi32>
    %54 = arith.cmpi sge, %51, %53 : vector<1x128xi32>
    %c16_i32 = arith.constant 16 : i32
    %55 = vector.broadcast %c16_i32 : i32 to vector<1x128xi32>
    %56 = arith.cmpi slt, %51, %55 : vector<1x128xi32>
    %57 = arith.andi %54, %56 : vector<1x128xi1>
    %58 = arith.extui %57 : vector<1x128xi1> to vector<1x128xi32>
    %59 = arith.sitofp %58 : vector<1x128xi32> to vector<1x128xf32>
    %60 = arith.truncf %59 : vector<1x128xf32> to vector<1x128xbf16>
    %61 = vector.broadcast %60 : vector<1x128xbf16> to vector<66x128xbf16>
    %62 = arith.mulf %47, %61 : vector<66x128xbf16>
    %cst_27 = arith.constant dense<0.000000e+00> : vector<66x66xf32>
    %63 = tpu.matmul %62, %49, %cst_27 {dimension_numbers = #tpu.dot_dimension_numbers<[1], [1], [0], [0], [0, 0, 1, 0], [], []>} : vector<66x128xbf16>, vector<66x128xbf16>, vector<66x66xf32> -> vector<66x66xf32>
    %cst_28 = arith.constant 2.500000e-01 : f32
    %64 = vector.broadcast %cst_28 : f32 to vector<66x66xf32>
    %65 = arith.mulf %63, %64 : vector<66x66xf32>
    %cst_29 = arith.constant dense<0xFF800000> : vector<66xf32>
    %66 = vector.multi_reduction <maximumf>, %65, %cst_29 [1] : vector<66x66xf32> to vector<66xf32>
    %67 = vector.shape_cast %66 : vector<66xf32> to vector<66x1xf32>
    %68 = vector.broadcast %67 : vector<66x1xf32> to vector<66x66xf32>
    %69 = arith.subf %65, %68 : vector<66x66xf32>
    %70 = math.exp %69 : vector<66x66xf32>
    %cst_30 = arith.constant dense<0.000000e+00> : vector<66xf32>
    %71 = vector.multi_reduction <add>, %70, %cst_30 [1] : vector<66x66xf32> to vector<66xf32>
    %72 = vector.shape_cast %71 : vector<66xf32> to vector<66x1xf32>
    %73 = tpu.reciprocal %72 : vector<66x1xf32> -> vector<66x1xf32>
    %74 = vector.broadcast %73 : vector<66x1xf32> to vector<66x66xf32>
    %75 = arith.mulf %70, %74 : vector<66x66xf32>
    %76 = arith.truncf %75 : vector<66x66xf32> to vector<66x66xbf16>
    %77 = vector.broadcast %60 : vector<1x128xbf16> to vector<66x128xbf16>
    %78 = arith.mulf %50, %77 : vector<66x128xbf16>
    %cst_31 = arith.constant dense<0.000000e+00> : vector<66x128xf32>
    %79 = tpu.matmul %76, %78, %cst_31 {dimension_numbers = #tpu.dot_dimension_numbers<[1], [0], [0], [1], [0, 0, 1, 1], [], []>} : vector<66x66xbf16>, vector<66x128xbf16>, vector<66x128xf32> -> vector<66x128xf32>
    %80 = arith.addf %52, %79 : vector<66x128xf32>
    %c16_i32_32 = arith.constant 16 : i32
    %81 = vector.broadcast %c16_i32_32 : i32 to vector<1x128xi32>
    %82 = arith.cmpi sge, %51, %81 : vector<1x128xi32>
    %c32_i32 = arith.constant 32 : i32
    %83 = vector.broadcast %c32_i32 : i32 to vector<1x128xi32>
    %84 = arith.cmpi slt, %51, %83 : vector<1x128xi32>
    %85 = arith.andi %82, %84 : vector<1x128xi1>
    %86 = arith.extui %85 : vector<1x128xi1> to vector<1x128xi32>
    %87 = arith.sitofp %86 : vector<1x128xi32> to vector<1x128xf32>
    %88 = arith.truncf %87 : vector<1x128xf32> to vector<1x128xbf16>
    %89 = vector.broadcast %88 : vector<1x128xbf16> to vector<66x128xbf16>
    %90 = arith.mulf %47, %89 : vector<66x128xbf16>
    %cst_33 = arith.constant dense<0.000000e+00> : vector<66x66xf32>
    %91 = tpu.matmul %90, %49, %cst_33 {dimension_numbers = #tpu.dot_dimension_numbers<[1], [1], [0], [0], [0, 0, 1, 0], [], []>} : vector<66x128xbf16>, vector<66x128xbf16>, vector<66x66xf32> -> vector<66x66xf32>
    %cst_34 = arith.constant 2.500000e-01 : f32
    %92 = vector.broadcast %cst_34 : f32 to vector<66x66xf32>
    %93 = arith.mulf %91, %92 : vector<66x66xf32>
    %cst_35 = arith.constant dense<0xFF800000> : vector<66xf32>
    %94 = vector.multi_reduction <maximumf>, %93, %cst_35 [1] : vector<66x66xf32> to vector<66xf32>
    %95 = vector.shape_cast %94 : vector<66xf32> to vector<66x1xf32>
    %96 = vector.broadcast %95 : vector<66x1xf32> to vector<66x66xf32>
    %97 = arith.subf %93, %96 : vector<66x66xf32>
    %98 = math.exp %97 : vector<66x66xf32>
    %cst_36 = arith.constant dense<0.000000e+00> : vector<66xf32>
    %99 = vector.multi_reduction <add>, %98, %cst_36 [1] : vector<66x66xf32> to vector<66xf32>
    %100 = vector.shape_cast %99 : vector<66xf32> to vector<66x1xf32>
    %101 = tpu.reciprocal %100 : vector<66x1xf32> -> vector<66x1xf32>
    %102 = vector.broadcast %101 : vector<66x1xf32> to vector<66x66xf32>
    %103 = arith.mulf %98, %102 : vector<66x66xf32>
    %104 = arith.truncf %103 : vector<66x66xf32> to vector<66x66xbf16>
    %105 = vector.broadcast %88 : vector<1x128xbf16> to vector<66x128xbf16>
    %106 = arith.mulf %50, %105 : vector<66x128xbf16>
    %cst_37 = arith.constant dense<0.000000e+00> : vector<66x128xf32>
    %107 = tpu.matmul %104, %106, %cst_37 {dimension_numbers = #tpu.dot_dimension_numbers<[1], [0], [0], [1], [0, 0, 1, 1], [], []>} : vector<66x66xbf16>, vector<66x128xbf16>, vector<66x128xf32> -> vector<66x128xf32>
    %108 = arith.addf %80, %107 : vector<66x128xf32>
    %c32_i32_38 = arith.constant 32 : i32
    %109 = vector.broadcast %c32_i32_38 : i32 to vector<1x128xi32>
    %110 = arith.cmpi sge, %51, %109 : vector<1x128xi32>
    %c48_i32 = arith.constant 48 : i32
    %111 = vector.broadcast %c48_i32 : i32 to vector<1x128xi32>
    %112 = arith.cmpi slt, %51, %111 : vector<1x128xi32>
    %113 = arith.andi %110, %112 : vector<1x128xi1>
    %114 = arith.extui %113 : vector<1x128xi1> to vector<1x128xi32>
    %115 = arith.sitofp %114 : vector<1x128xi32> to vector<1x128xf32>
    %116 = arith.truncf %115 : vector<1x128xf32> to vector<1x128xbf16>
    %117 = vector.broadcast %116 : vector<1x128xbf16> to vector<66x128xbf16>
    %118 = arith.mulf %47, %117 : vector<66x128xbf16>
    %cst_39 = arith.constant dense<0.000000e+00> : vector<66x66xf32>
    %119 = tpu.matmul %118, %49, %cst_39 {dimension_numbers = #tpu.dot_dimension_numbers<[1], [1], [0], [0], [0, 0, 1, 0], [], []>} : vector<66x128xbf16>, vector<66x128xbf16>, vector<66x66xf32> -> vector<66x66xf32>
    %cst_40 = arith.constant 2.500000e-01 : f32
    %120 = vector.broadcast %cst_40 : f32 to vector<66x66xf32>
    %121 = arith.mulf %119, %120 : vector<66x66xf32>
    %cst_41 = arith.constant dense<0xFF800000> : vector<66xf32>
    %122 = vector.multi_reduction <maximumf>, %121, %cst_41 [1] : vector<66x66xf32> to vector<66xf32>
    %123 = vector.shape_cast %122 : vector<66xf32> to vector<66x1xf32>
    %124 = vector.broadcast %123 : vector<66x1xf32> to vector<66x66xf32>
    %125 = arith.subf %121, %124 : vector<66x66xf32>
    %126 = math.exp %125 : vector<66x66xf32>
    %cst_42 = arith.constant dense<0.000000e+00> : vector<66xf32>
    %127 = vector.multi_reduction <add>, %126, %cst_42 [1] : vector<66x66xf32> to vector<66xf32>
    %128 = vector.shape_cast %127 : vector<66xf32> to vector<66x1xf32>
    %129 = tpu.reciprocal %128 : vector<66x1xf32> -> vector<66x1xf32>
    %130 = vector.broadcast %129 : vector<66x1xf32> to vector<66x66xf32>
    %131 = arith.mulf %126, %130 : vector<66x66xf32>
    %132 = arith.truncf %131 : vector<66x66xf32> to vector<66x66xbf16>
    %133 = vector.broadcast %116 : vector<1x128xbf16> to vector<66x128xbf16>
    %134 = arith.mulf %50, %133 : vector<66x128xbf16>
    %cst_43 = arith.constant dense<0.000000e+00> : vector<66x128xf32>
    %135 = tpu.matmul %132, %134, %cst_43 {dimension_numbers = #tpu.dot_dimension_numbers<[1], [0], [0], [1], [0, 0, 1, 1], [], []>} : vector<66x66xbf16>, vector<66x128xbf16>, vector<66x128xf32> -> vector<66x128xf32>
    %136 = arith.addf %108, %135 : vector<66x128xf32>
    %c48_i32_44 = arith.constant 48 : i32
    %137 = vector.broadcast %c48_i32_44 : i32 to vector<1x128xi32>
    %138 = arith.cmpi sge, %51, %137 : vector<1x128xi32>
    %c64_i32 = arith.constant 64 : i32
    %139 = vector.broadcast %c64_i32 : i32 to vector<1x128xi32>
    %140 = arith.cmpi slt, %51, %139 : vector<1x128xi32>
    %141 = arith.andi %138, %140 : vector<1x128xi1>
    %142 = arith.extui %141 : vector<1x128xi1> to vector<1x128xi32>
    %143 = arith.sitofp %142 : vector<1x128xi32> to vector<1x128xf32>
    %144 = arith.truncf %143 : vector<1x128xf32> to vector<1x128xbf16>
    %145 = vector.broadcast %144 : vector<1x128xbf16> to vector<66x128xbf16>
    %146 = arith.mulf %47, %145 : vector<66x128xbf16>
    %cst_45 = arith.constant dense<0.000000e+00> : vector<66x66xf32>
    %147 = tpu.matmul %146, %49, %cst_45 {dimension_numbers = #tpu.dot_dimension_numbers<[1], [1], [0], [0], [0, 0, 1, 0], [], []>} : vector<66x128xbf16>, vector<66x128xbf16>, vector<66x66xf32> -> vector<66x66xf32>
    %cst_46 = arith.constant 2.500000e-01 : f32
    %148 = vector.broadcast %cst_46 : f32 to vector<66x66xf32>
    %149 = arith.mulf %147, %148 : vector<66x66xf32>
    %cst_47 = arith.constant dense<0xFF800000> : vector<66xf32>
    %150 = vector.multi_reduction <maximumf>, %149, %cst_47 [1] : vector<66x66xf32> to vector<66xf32>
    %151 = vector.shape_cast %150 : vector<66xf32> to vector<66x1xf32>
    %152 = vector.broadcast %151 : vector<66x1xf32> to vector<66x66xf32>
    %153 = arith.subf %149, %152 : vector<66x66xf32>
    %154 = math.exp %153 : vector<66x66xf32>
    %cst_48 = arith.constant dense<0.000000e+00> : vector<66xf32>
    %155 = vector.multi_reduction <add>, %154, %cst_48 [1] : vector<66x66xf32> to vector<66xf32>
    %156 = vector.shape_cast %155 : vector<66xf32> to vector<66x1xf32>
    %157 = tpu.reciprocal %156 : vector<66x1xf32> -> vector<66x1xf32>
    %158 = vector.broadcast %157 : vector<66x1xf32> to vector<66x66xf32>
    %159 = arith.mulf %154, %158 : vector<66x66xf32>
    %160 = arith.truncf %159 : vector<66x66xf32> to vector<66x66xbf16>
    %161 = vector.broadcast %144 : vector<1x128xbf16> to vector<66x128xbf16>
    %162 = arith.mulf %50, %161 : vector<66x128xbf16>
    %cst_49 = arith.constant dense<0.000000e+00> : vector<66x128xf32>
    %163 = tpu.matmul %160, %162, %cst_49 {dimension_numbers = #tpu.dot_dimension_numbers<[1], [0], [0], [1], [0, 0, 1, 1], [], []>} : vector<66x66xbf16>, vector<66x128xbf16>, vector<66x128xf32> -> vector<66x128xf32>
    %164 = arith.addf %136, %163 : vector<66x128xf32>
    %c64_i32_50 = arith.constant 64 : i32
    %165 = vector.broadcast %c64_i32_50 : i32 to vector<1x128xi32>
    %166 = arith.cmpi sge, %51, %165 : vector<1x128xi32>
    %c80_i32 = arith.constant 80 : i32
    %167 = vector.broadcast %c80_i32 : i32 to vector<1x128xi32>
    %168 = arith.cmpi slt, %51, %167 : vector<1x128xi32>
    %169 = arith.andi %166, %168 : vector<1x128xi1>
    %170 = arith.extui %169 : vector<1x128xi1> to vector<1x128xi32>
    %171 = arith.sitofp %170 : vector<1x128xi32> to vector<1x128xf32>
    %172 = arith.truncf %171 : vector<1x128xf32> to vector<1x128xbf16>
    %173 = vector.broadcast %172 : vector<1x128xbf16> to vector<66x128xbf16>
    %174 = arith.mulf %47, %173 : vector<66x128xbf16>
    %cst_51 = arith.constant dense<0.000000e+00> : vector<66x66xf32>
    %175 = tpu.matmul %174, %49, %cst_51 {dimension_numbers = #tpu.dot_dimension_numbers<[1], [1], [0], [0], [0, 0, 1, 0], [], []>} : vector<66x128xbf16>, vector<66x128xbf16>, vector<66x66xf32> -> vector<66x66xf32>
    %cst_52 = arith.constant 2.500000e-01 : f32
    %176 = vector.broadcast %cst_52 : f32 to vector<66x66xf32>
    %177 = arith.mulf %175, %176 : vector<66x66xf32>
    %cst_53 = arith.constant dense<0xFF800000> : vector<66xf32>
    %178 = vector.multi_reduction <maximumf>, %177, %cst_53 [1] : vector<66x66xf32> to vector<66xf32>
    %179 = vector.shape_cast %178 : vector<66xf32> to vector<66x1xf32>
    %180 = vector.broadcast %179 : vector<66x1xf32> to vector<66x66xf32>
    %181 = arith.subf %177, %180 : vector<66x66xf32>
    %182 = math.exp %181 : vector<66x66xf32>
    %cst_54 = arith.constant dense<0.000000e+00> : vector<66xf32>
    %183 = vector.multi_reduction <add>, %182, %cst_54 [1] : vector<66x66xf32> to vector<66xf32>
    %184 = vector.shape_cast %183 : vector<66xf32> to vector<66x1xf32>
    %185 = tpu.reciprocal %184 : vector<66x1xf32> -> vector<66x1xf32>
    %186 = vector.broadcast %185 : vector<66x1xf32> to vector<66x66xf32>
    %187 = arith.mulf %182, %186 : vector<66x66xf32>
    %188 = arith.truncf %187 : vector<66x66xf32> to vector<66x66xbf16>
    %189 = vector.broadcast %172 : vector<1x128xbf16> to vector<66x128xbf16>
    %190 = arith.mulf %50, %189 : vector<66x128xbf16>
    %cst_55 = arith.constant dense<0.000000e+00> : vector<66x128xf32>
    %191 = tpu.matmul %188, %190, %cst_55 {dimension_numbers = #tpu.dot_dimension_numbers<[1], [0], [0], [1], [0, 0, 1, 1], [], []>} : vector<66x66xbf16>, vector<66x128xbf16>, vector<66x128xf32> -> vector<66x128xf32>
    %192 = arith.addf %164, %191 : vector<66x128xf32>
    %c80_i32_56 = arith.constant 80 : i32
    %193 = vector.broadcast %c80_i32_56 : i32 to vector<1x128xi32>
    %194 = arith.cmpi sge, %51, %193 : vector<1x128xi32>
    %c96_i32_57 = arith.constant 96 : i32
    %195 = vector.broadcast %c96_i32_57 : i32 to vector<1x128xi32>
    %196 = arith.cmpi slt, %51, %195 : vector<1x128xi32>
    %197 = arith.andi %194, %196 : vector<1x128xi1>
    %198 = arith.extui %197 : vector<1x128xi1> to vector<1x128xi32>
    %199 = arith.sitofp %198 : vector<1x128xi32> to vector<1x128xf32>
    %200 = arith.truncf %199 : vector<1x128xf32> to vector<1x128xbf16>
    %201 = vector.broadcast %200 : vector<1x128xbf16> to vector<66x128xbf16>
    %202 = arith.mulf %47, %201 : vector<66x128xbf16>
    %cst_58 = arith.constant dense<0.000000e+00> : vector<66x66xf32>
    %203 = tpu.matmul %202, %49, %cst_58 {dimension_numbers = #tpu.dot_dimension_numbers<[1], [1], [0], [0], [0, 0, 1, 0], [], []>} : vector<66x128xbf16>, vector<66x128xbf16>, vector<66x66xf32> -> vector<66x66xf32>
    %cst_59 = arith.constant 2.500000e-01 : f32
    %204 = vector.broadcast %cst_59 : f32 to vector<66x66xf32>
    %205 = arith.mulf %203, %204 : vector<66x66xf32>
    %cst_60 = arith.constant dense<0xFF800000> : vector<66xf32>
    %206 = vector.multi_reduction <maximumf>, %205, %cst_60 [1] : vector<66x66xf32> to vector<66xf32>
    %207 = vector.shape_cast %206 : vector<66xf32> to vector<66x1xf32>
    %208 = vector.broadcast %207 : vector<66x1xf32> to vector<66x66xf32>
    %209 = arith.subf %205, %208 : vector<66x66xf32>
    %210 = math.exp %209 : vector<66x66xf32>
    %cst_61 = arith.constant dense<0.000000e+00> : vector<66xf32>
    %211 = vector.multi_reduction <add>, %210, %cst_61 [1] : vector<66x66xf32> to vector<66xf32>
    %212 = vector.shape_cast %211 : vector<66xf32> to vector<66x1xf32>
    %213 = tpu.reciprocal %212 : vector<66x1xf32> -> vector<66x1xf32>
    %214 = vector.broadcast %213 : vector<66x1xf32> to vector<66x66xf32>
    %215 = arith.mulf %210, %214 : vector<66x66xf32>
    %216 = arith.truncf %215 : vector<66x66xf32> to vector<66x66xbf16>
    %217 = vector.broadcast %200 : vector<1x128xbf16> to vector<66x128xbf16>
    %218 = arith.mulf %50, %217 : vector<66x128xbf16>
    %cst_62 = arith.constant dense<0.000000e+00> : vector<66x128xf32>
    %219 = tpu.matmul %216, %218, %cst_62 {dimension_numbers = #tpu.dot_dimension_numbers<[1], [0], [0], [1], [0, 0, 1, 1], [], []>} : vector<66x66xbf16>, vector<66x128xbf16>, vector<66x128xf32> -> vector<66x128xf32>
    %220 = arith.addf %192, %219 : vector<66x128xf32>
    %221 = arith.truncf %220 : vector<66x128xf32> to vector<66x128xbf16>
    %c0_63 = arith.constant 0 : index
    %c0_64 = arith.constant 0 : index
    %c0_65 = arith.constant 0 : index
    %222 = vector.load %arg8[%c0_63, %c0_64, %c0_65] : memref<1x128x128xbf16, #tpu.memory_space<vmem>>, vector<1x128x128xbf16>
    %223 = vector.shape_cast %222 : vector<1x128x128xbf16> to vector<128x128xbf16>
    %cst_66 = arith.constant dense<0.000000e+00> : vector<66x128xf32>
    %224 = tpu.matmul %221, %223, %cst_66 {dimension_numbers = #tpu.dot_dimension_numbers<[1], [0], [0], [1], [0, 0, 1, 1], [], []>} : vector<66x128xbf16>, vector<128x128xbf16>, vector<66x128xf32> -> vector<66x128xf32>
    %c0_67 = arith.constant 0 : index
    %c0_68 = arith.constant 0 : index
    %c0_69 = arith.constant 0 : index
    %225 = vector.load %arg9[%c0_67, %c0_68, %c0_69] : memref<1x1x128xf32, #tpu.memory_space<vmem>>, vector<1x1x128xf32>
    %226 = vector.shape_cast %225 : vector<1x1x128xf32> to vector<1x128xf32>
    %227 = vector.broadcast %226 : vector<1x128xf32> to vector<66x128xf32>
    %228 = arith.addf %224, %227 : vector<66x128xf32>
    %229 = arith.addf %4, %228 : vector<66x128xf32>
    %c0_70 = arith.constant 0 : index
    %c0_71 = arith.constant 0 : index
    %c0_72 = arith.constant 0 : index
    %230 = vector.load %arg10[%c0_70, %c0_71, %c0_72] : memref<1x1x128xf32, #tpu.memory_space<vmem>>, vector<1x1x128xf32>
    %231 = vector.shape_cast %230 : vector<1x1x128xf32> to vector<1x128xf32>
    %c0_73 = arith.constant 0 : index
    %c0_74 = arith.constant 0 : index
    %c0_75 = arith.constant 0 : index
    %232 = vector.load %arg11[%c0_73, %c0_74, %c0_75] : memref<1x1x128xf32, #tpu.memory_space<vmem>>, vector<1x1x128xf32>
    %233 = vector.shape_cast %232 : vector<1x1x128xf32> to vector<1x128xf32>
    %cst_76 = arith.constant dense<0.000000e+00> : vector<66xf32>
    %234 = vector.multi_reduction <add>, %229, %cst_76 [1] : vector<66x128xf32> to vector<66xf32>
    %235 = vector.shape_cast %234 : vector<66xf32> to vector<66x1xf32>
    %cst_77 = arith.constant 0.010416667 : f32
    %236 = vector.broadcast %cst_77 : f32 to vector<66x1xf32>
    %237 = arith.mulf %235, %236 : vector<66x1xf32>
    %238 = tpu.iota {dimensions = array<i32: 1>} : vector<66x128xi32>
    %c96_i32_78 = arith.constant 96 : i32
    %239 = vector.broadcast %c96_i32_78 : i32 to vector<66x128xi32>
    %240 = arith.cmpi slt, %238, %239 : vector<66x128xi32>
    %241 = vector.broadcast %237 : vector<66x1xf32> to vector<66x128xf32>
    %242 = arith.subf %229, %241 : vector<66x128xf32>
    %cst_79 = arith.constant 0.000000e+00 : f32
    %243 = vector.broadcast %cst_79 : f32 to vector<66x128xf32>
    %244 = arith.select %240, %242, %243 : vector<66x128xi1>, vector<66x128xf32>
    %245 = arith.mulf %244, %244 : vector<66x128xf32>
    %cst_80 = arith.constant dense<0.000000e+00> : vector<66xf32>
    %246 = vector.multi_reduction <add>, %245, %cst_80 [1] : vector<66x128xf32> to vector<66xf32>
    %247 = vector.shape_cast %246 : vector<66xf32> to vector<66x1xf32>
    %cst_81 = arith.constant 0.010416667 : f32
    %248 = vector.broadcast %cst_81 : f32 to vector<66x1xf32>
    %249 = arith.mulf %247, %248 : vector<66x1xf32>
    %cst_82 = arith.constant 9.99999974E-6 : f32
    %250 = vector.broadcast %cst_82 : f32 to vector<66x1xf32>
    %251 = arith.addf %249, %250 : vector<66x1xf32>
    %252 = math.rsqrt %251 : vector<66x1xf32>
    %253 = vector.broadcast %252 : vector<66x1xf32> to vector<66x128xf32>
    %254 = arith.mulf %244, %253 : vector<66x128xf32>
    %255 = vector.broadcast %231 : vector<1x128xf32> to vector<66x128xf32>
    %256 = arith.mulf %254, %255 : vector<66x128xf32>
    %257 = vector.broadcast %233 : vector<1x128xf32> to vector<66x128xf32>
    %258 = arith.addf %256, %257 : vector<66x128xf32>
    %259 = arith.truncf %258 : vector<66x128xf32> to vector<66x128xbf16>
    %c0_83 = arith.constant 0 : index
    %c0_84 = arith.constant 0 : index
    %c0_85 = arith.constant 0 : index
    %260 = vector.load %arg12[%c0_83, %c0_84, %c0_85] : memref<1x128x384xbf16, #tpu.memory_space<vmem>>, vector<1x128x384xbf16>
    %261 = vector.shape_cast %260 : vector<1x128x384xbf16> to vector<128x384xbf16>
    %cst_86 = arith.constant dense<0.000000e+00> : vector<66x384xf32>
    %262 = tpu.matmul %259, %261, %cst_86 {dimension_numbers = #tpu.dot_dimension_numbers<[1], [0], [0], [1], [0, 0, 1, 1], [], []>} : vector<66x128xbf16>, vector<128x384xbf16>, vector<66x384xf32> -> vector<66x384xf32>
    %c0_87 = arith.constant 0 : index
    %c0_88 = arith.constant 0 : index
    %c0_89 = arith.constant 0 : index
    %263 = vector.load %arg13[%c0_87, %c0_88, %c0_89] : memref<1x1x384xf32, #tpu.memory_space<vmem>>, vector<1x1x384xf32>
    %264 = vector.shape_cast %263 : vector<1x1x384xf32> to vector<1x384xf32>
    %265 = vector.broadcast %264 : vector<1x384xf32> to vector<66x384xf32>
    %266 = arith.addf %262, %265 : vector<66x384xf32>
    %cst_90 = arith.constant 5.000000e-01 : f32
    %267 = vector.broadcast %cst_90 : f32 to vector<66x384xf32>
    %268 = arith.mulf %267, %266 : vector<66x384xf32>
    %cst_91 = arith.constant 0.707106769 : f32
    %269 = vector.broadcast %cst_91 : f32 to vector<66x384xf32>
    %270 = arith.mulf %266, %269 : vector<66x384xf32>
    %cst_92 = arith.constant 0.000000e+00 : f32
    %271 = vector.broadcast %cst_92 : f32 to vector<66x384xf32>
    %272 = arith.cmpf olt, %270, %271 : vector<66x384xf32>
    %cst_93 = arith.constant -1.000000e+00 : f32
    %cst_94 = arith.constant 1.000000e+00 : f32
    %273 = vector.broadcast %cst_93 : f32 to vector<66x384xf32>
    %274 = vector.broadcast %cst_94 : f32 to vector<66x384xf32>
    %275 = arith.select %272, %273, %274 : vector<66x384xi1>, vector<66x384xf32>
    %276 = math.absf %270 : vector<66x384xf32>
    %cst_95 = arith.constant 0.327591091 : f32
    %277 = vector.broadcast %cst_95 : f32 to vector<66x384xf32>
    %278 = arith.mulf %277, %276 : vector<66x384xf32>
    %cst_96 = arith.constant 1.000000e+00 : f32
    %279 = vector.broadcast %cst_96 : f32 to vector<66x384xf32>
    %280 = arith.addf %279, %278 : vector<66x384xf32>
    %281 = tpu.reciprocal %280 : vector<66x384xf32> -> vector<66x384xf32>
    %cst_97 = arith.constant 1.06140542 : f32
    %282 = vector.broadcast %cst_97 : f32 to vector<66x384xf32>
    %283 = arith.mulf %282, %281 : vector<66x384xf32>
    %cst_98 = arith.constant -1.45315206 : f32
    %284 = vector.broadcast %cst_98 : f32 to vector<66x384xf32>
    %285 = arith.addf %283, %284 : vector<66x384xf32>
    %286 = arith.mulf %285, %281 : vector<66x384xf32>
    %cst_99 = arith.constant 1.42141378 : f32
    %287 = vector.broadcast %cst_99 : f32 to vector<66x384xf32>
    %288 = arith.addf %286, %287 : vector<66x384xf32>
    %289 = arith.mulf %288, %281 : vector<66x384xf32>
    %cst_100 = arith.constant -0.284496725 : f32
    %290 = vector.broadcast %cst_100 : f32 to vector<66x384xf32>
    %291 = arith.addf %289, %290 : vector<66x384xf32>
    %292 = arith.mulf %291, %281 : vector<66x384xf32>
    %cst_101 = arith.constant 0.254829586 : f32
    %293 = vector.broadcast %cst_101 : f32 to vector<66x384xf32>
    %294 = arith.addf %292, %293 : vector<66x384xf32>
    %295 = arith.mulf %294, %281 : vector<66x384xf32>
    %cst_102 = arith.constant 0.000000e+00 : f32
    %296 = vector.broadcast %cst_102 : f32 to vector<66x384xf32>
    %297 = arith.subf %296, %276 : vector<66x384xf32>
    %298 = arith.mulf %297, %276 : vector<66x384xf32>
    %299 = math.exp %298 : vector<66x384xf32>
    %300 = arith.mulf %295, %299 : vector<66x384xf32>
    %cst_103 = arith.constant 1.000000e+00 : f32
    %301 = vector.broadcast %cst_103 : f32 to vector<66x384xf32>
    %302 = arith.subf %301, %300 : vector<66x384xf32>
    %303 = arith.mulf %275, %302 : vector<66x384xf32>
    %cst_104 = arith.constant 1.000000e+00 : f32
    %304 = vector.broadcast %cst_104 : f32 to vector<66x384xf32>
    %305 = arith.addf %304, %303 : vector<66x384xf32>
    %306 = arith.mulf %268, %305 : vector<66x384xf32>
    %307 = arith.truncf %306 : vector<66x384xf32> to vector<66x384xbf16>
    %c0_105 = arith.constant 0 : index
    %c0_106 = arith.constant 0 : index
    %c0_107 = arith.constant 0 : index
    %308 = vector.load %arg14[%c0_105, %c0_106, %c0_107] : memref<1x384x128xbf16, #tpu.memory_space<vmem>>, vector<1x384x128xbf16>
    %309 = vector.shape_cast %308 : vector<1x384x128xbf16> to vector<384x128xbf16>
    %cst_108 = arith.constant dense<0.000000e+00> : vector<66x128xf32>
    %310 = tpu.matmul %307, %309, %cst_108 {dimension_numbers = #tpu.dot_dimension_numbers<[1], [0], [0], [1], [0, 0, 1, 1], [], []>} : vector<66x384xbf16>, vector<384x128xbf16>, vector<66x128xf32> -> vector<66x128xf32>
    %c0_109 = arith.constant 0 : index
    %c0_110 = arith.constant 0 : index
    %c0_111 = arith.constant 0 : index
    %311 = vector.load %arg15[%c0_109, %c0_110, %c0_111] : memref<1x1x128xf32, #tpu.memory_space<vmem>>, vector<1x1x128xf32>
    %312 = vector.shape_cast %311 : vector<1x1x128xf32> to vector<1x128xf32>
    %313 = vector.broadcast %312 : vector<1x128xf32> to vector<66x128xf32>
    %314 = arith.addf %310, %313 : vector<66x128xf32>
    %315 = arith.addf %229, %314 : vector<66x128xf32>
    %c0_112 = arith.constant 0 : index
    %c0_113 = arith.constant 0 : index
    %c0_114 = arith.constant 0 : index
    %316 = vector.load %arg16[%c0_112, %c0_113, %c0_114] : memref<1x66x128xf32, #tpu.memory_space<vmem>>, vector<1x66x128xf32>
    %317 = vector.shape_cast %316 : vector<1x66x128xf32> to vector<66x128xf32>
    %318 = vector.shape_cast %315 : vector<66x128xf32> to vector<1x66x128xf32>
    tpu.vector_store %arg16[%c0_112, %c0_113, %c0_114], %318 {strides = array<i32>} : memref<1x66x128xf32, #tpu.memory_space<vmem>>, vector<1x66x128xf32>,
    return
  }
  func.func @transform_0(%arg0: i32, %arg1: i32) -> (i32, i32, i32) {
    %c0_i32 = arith.constant 0 : i32
    %c0_i32_0 = arith.constant 0 : i32
    %c0_i32_1 = arith.constant 0 : i32
    return %arg0, %c0_i32, %c0_i32_0 : i32, i32, i32
  }
  func.func @transform_1(%arg0: i32, %arg1: i32) -> (i32, i32, i32) {
    %c0_i32 = arith.constant 0 : i32
    %c0_i32_0 = arith.constant 0 : i32
    %c0_i32_1 = arith.constant 0 : i32
    return %arg0, %c0_i32, %c0_i32_0 : i32, i32, i32
  }
  func.func @transform_2(%arg0: i32, %arg1: i32) -> (i32, i32, i32) {
    %c0_i32 = arith.constant 0 : i32
    %c0_i32_0 = arith.constant 0 : i32
    %c0_i32_1 = arith.constant 0 : i32
    return %arg1, %c0_i32, %c0_i32_0 : i32, i32, i32
  }
  func.func @transform_3(%arg0: i32, %arg1: i32) -> (i32, i32, i32) {
    %c0_i32 = arith.constant 0 : i32
    %c0_i32_0 = arith.constant 0 : i32
    %c0_i32_1 = arith.constant 0 : i32
    return %arg1, %c0_i32, %c0_i32_0 : i32, i32, i32
  }
  func.func @transform_4(%arg0: i32, %arg1: i32) -> (i32, i32, i32) {
    %c0_i32 = arith.constant 0 : i32
    %c0_i32_0 = arith.constant 0 : i32
    %c0_i32_1 = arith.constant 0 : i32
    return %arg1, %c0_i32, %c0_i32_0 : i32, i32, i32
  }
  func.func @transform_5(%arg0: i32, %arg1: i32) -> (i32, i32, i32) {
    %c0_i32 = arith.constant 0 : i32
    %c0_i32_0 = arith.constant 0 : i32
    %c0_i32_1 = arith.constant 0 : i32
    return %arg1, %c0_i32, %c0_i32_0 : i32, i32, i32
  }
  func.func @transform_6(%arg0: i32, %arg1: i32) -> (i32, i32, i32) {
    %c0_i32 = arith.constant 0 : i32
    %c0_i32_0 = arith.constant 0 : i32
    %c0_i32_1 = arith.constant 0 : i32
    return %arg1, %c0_i32, %c0_i32_0 : i32, i32, i32
  }
  func.func @transform_7(%arg0: i32, %arg1: i32) -> (i32, i32, i32) {
    %c0_i32 = arith.constant 0 : i32
    %c0_i32_0 = arith.constant 0 : i32
    %c0_i32_1 = arith.constant 0 : i32
    return %arg1, %c0_i32, %c0_i32_0 : i32, i32, i32
  }
  func.func @transform_8(%arg0: i32, %arg1: i32) -> (i32, i32, i32) {
    %c0_i32 = arith.constant 0 : i32
    %c0_i32_0 = arith.constant 0 : i32
    %c0_i32_1 = arith.constant 0 : i32
    return %arg1, %c0_i32, %c0_i32_0 : i32, i32, i32
  }
  func.func @transform_9(%arg0: i32, %arg1: i32) -> (i32, i32, i32) {
    %c0_i32 = arith.constant 0 : i32
    %c0_i32_0 = arith.constant 0 : i32
    %c0_i32_1 = arith.constant 0 : i32
    return %arg1, %c0_i32, %c0_i32_0 : i32, i32, i32
  }
  func.func @transform_10(%arg0: i32, %arg1: i32) -> (i32, i32, i32) {
    %c0_i32 = arith.constant 0 : i32
    %c0_i32_0 = arith.constant 0 : i32
    %c0_i32_1 = arith.constant 0 : i32
    return %arg1, %c0_i32, %c0_i32_0 : i32, i32, i32
  }
  func.func @transform_11(%arg0: i32, %arg1: i32) -> (i32, i32, i32) {
    %c0_i32 = arith.constant 0 : i32
    %c0_i32_0 = arith.constant 0 : i32
    %c0_i32_1 = arith.constant 0 : i32
    return %arg1, %c0_i32, %c0_i32_0 : i32, i32, i32
  }
  func.func @transform_12(%arg0: i32, %arg1: i32) -> (i32, i32, i32) {
    %c0_i32 = arith.constant 0 : i32
    %c0_i32_0 = arith.constant 0 : i32
    %c0_i32_1 = arith.constant 0 : i32
    return %arg1, %c0_i32, %c0_i32_0 : i32, i32, i32
  }
  func.func @transform_13(%arg0: i32, %arg1: i32) -> (i32, i32, i32) {
    %c0_i32 = arith.constant 0 : i32
    %c0_i32_0 = arith.constant 0 : i32
    %c0_i32_1 = arith.constant 0 : i32
    return %arg1, %c0_i32, %c0_i32_0 : i32, i32, i32
  }
  func.func @transform_14(%arg0: i32, %arg1: i32) -> (i32, i32, i32) {
    %c0_i32 = arith.constant 0 : i32
    %c0_i32_0 = arith.constant 0 : i32
    %c0_i32_1 = arith.constant 0 : i32
    return %arg0, %c0_i32, %c0_i32_0 : i32, i32, i32
  }
}

module attributes {stable_mosaic.version = 11 : i64} {
  func.func @_ln_mlp_kernel(%arg0: i32, %arg1: memref<64x128xf32, #tpu.memory_space<vmem>>, %arg2: memref<1x128xf32, #tpu.memory_space<vmem>>, %arg3: memref<1x128xf32, #tpu.memory_space<vmem>>, %arg4: memref<128x128xbf16, #tpu.memory_space<vmem>>, %arg5: memref<1x128xf32, #tpu.memory_space<vmem>>, %arg6: memref<128x128xbf16, #tpu.memory_space<vmem>>, %arg7: memref<1x128xf32, #tpu.memory_space<vmem>>, %arg8: memref<64x128xf32, #tpu.memory_space<vmem>>) attributes {dimension_semantics = [#tpu.dimension_semantics<parallel>], iteration_bounds = array<i64: 2>, scalar_prefetch = 0 : i64, scratch_operands = 0 : i64, tpu.core_type = #tpu.core_type<tc>, window_params = [{transform_indices = @transform_0, window_bounds = array<i64: 64, 128>}, {pipeline_mode = #tpu.pipeline_mode<synchronous>, transform_indices = @transform_1, window_bounds = array<i64: 1, 128>}, {pipeline_mode = #tpu.pipeline_mode<synchronous>, transform_indices = @transform_2, window_bounds = array<i64: 1, 128>}, {pipeline_mode = #tpu.pipeline_mode<synchronous>, transform_indices = @transform_3, window_bounds = array<i64: 128, 128>}, {pipeline_mode = #tpu.pipeline_mode<synchronous>, transform_indices = @transform_4, window_bounds = array<i64: 1, 128>}, {pipeline_mode = #tpu.pipeline_mode<synchronous>, transform_indices = @transform_5, window_bounds = array<i64: 128, 128>}, {pipeline_mode = #tpu.pipeline_mode<synchronous>, transform_indices = @transform_6, window_bounds = array<i64: 1, 128>}, {transform_indices = @transform_7, window_bounds = array<i64: 64, 128>}]} {
    %c0 = arith.constant 0 : index
    %c0_0 = arith.constant 0 : index
    %0 = vector.load %arg1[%c0, %c0_0] : memref<64x128xf32, #tpu.memory_space<vmem>>, vector<64x128xf32>
    %c0_1 = arith.constant 0 : index
    %c0_2 = arith.constant 0 : index
    %1 = vector.load %arg2[%c0_1, %c0_2] : memref<1x128xf32, #tpu.memory_space<vmem>>, vector<1x128xf32>
    %c0_3 = arith.constant 0 : index
    %c0_4 = arith.constant 0 : index
    %2 = vector.load %arg3[%c0_3, %c0_4] : memref<1x128xf32, #tpu.memory_space<vmem>>, vector<1x128xf32>
    %cst = arith.constant dense<0.000000e+00> : vector<64xf32>
    %3 = vector.multi_reduction <add>, %0, %cst [1] : vector<64x128xf32> to vector<64xf32>
    %4 = vector.shape_cast %3 : vector<64xf32> to vector<64x1xf32>
    %cst_5 = arith.constant 0.010416667 : f32
    %5 = vector.broadcast %cst_5 : f32 to vector<64x1xf32>
    %6 = arith.mulf %4, %5 : vector<64x1xf32>
    %7 = tpu.iota {dimensions = array<i32: 1>} : vector<64x128xi32>
    %c96_i32 = arith.constant 96 : i32
    %8 = vector.broadcast %c96_i32 : i32 to vector<64x128xi32>
    %9 = arith.cmpi slt, %7, %8 : vector<64x128xi32>
    %10 = vector.broadcast %6 : vector<64x1xf32> to vector<64x128xf32>
    %11 = arith.subf %0, %10 : vector<64x128xf32>
    %cst_6 = arith.constant 0.000000e+00 : f32
    %12 = vector.broadcast %cst_6 : f32 to vector<64x128xf32>
    %13 = arith.select %9, %11, %12 : vector<64x128xi1>, vector<64x128xf32>
    %14 = arith.mulf %13, %13 : vector<64x128xf32>
    %cst_7 = arith.constant dense<0.000000e+00> : vector<64xf32>
    %15 = vector.multi_reduction <add>, %14, %cst_7 [1] : vector<64x128xf32> to vector<64xf32>
    %16 = vector.shape_cast %15 : vector<64xf32> to vector<64x1xf32>
    %cst_8 = arith.constant 0.010416667 : f32
    %17 = vector.broadcast %cst_8 : f32 to vector<64x1xf32>
    %18 = arith.mulf %16, %17 : vector<64x1xf32>
    %cst_9 = arith.constant 9.99999974E-6 : f32
    %19 = vector.broadcast %cst_9 : f32 to vector<64x1xf32>
    %20 = arith.addf %18, %19 : vector<64x1xf32>
    %21 = math.rsqrt %20 : vector<64x1xf32>
    %22 = vector.broadcast %21 : vector<64x1xf32> to vector<64x128xf32>
    %23 = arith.mulf %13, %22 : vector<64x128xf32>
    %24 = vector.broadcast %1 : vector<1x128xf32> to vector<64x128xf32>
    %25 = arith.mulf %23, %24 : vector<64x128xf32>
    %26 = vector.broadcast %2 : vector<1x128xf32> to vector<64x128xf32>
    %27 = arith.addf %25, %26 : vector<64x128xf32>
    %28 = arith.truncf %27 : vector<64x128xf32> to vector<64x128xbf16>
    %c0_10 = arith.constant 0 : index
    %c0_11 = arith.constant 0 : index
    %29 = vector.load %arg4[%c0_10, %c0_11] : memref<128x128xbf16, #tpu.memory_space<vmem>>, vector<128x128xbf16>
    %cst_12 = arith.constant dense<0.000000e+00> : vector<64x128xf32>
    %30 = tpu.matmul %28, %29, %cst_12 {dimension_numbers = #tpu.dot_dimension_numbers<[1], [0], [0], [1], [0, 0, 1, 1], [], []>} : vector<64x128xbf16>, vector<128x128xbf16>, vector<64x128xf32> -> vector<64x128xf32>
    %c0_13 = arith.constant 0 : index
    %c0_14 = arith.constant 0 : index
    %31 = vector.load %arg5[%c0_13, %c0_14] : memref<1x128xf32, #tpu.memory_space<vmem>>, vector<1x128xf32>
    %32 = vector.broadcast %31 : vector<1x128xf32> to vector<64x128xf32>
    %33 = arith.addf %30, %32 : vector<64x128xf32>
    %cst_15 = arith.constant 5.000000e-01 : f32
    %34 = vector.broadcast %cst_15 : f32 to vector<64x128xf32>
    %35 = arith.mulf %34, %33 : vector<64x128xf32>
    %cst_16 = arith.constant 0.707106769 : f32
    %36 = vector.broadcast %cst_16 : f32 to vector<64x128xf32>
    %37 = arith.mulf %33, %36 : vector<64x128xf32>
    %cst_17 = arith.constant 0.000000e+00 : f32
    %38 = vector.broadcast %cst_17 : f32 to vector<64x128xf32>
    %39 = arith.cmpf olt, %37, %38 : vector<64x128xf32>
    %cst_18 = arith.constant -1.000000e+00 : f32
    %cst_19 = arith.constant 1.000000e+00 : f32
    %40 = vector.broadcast %cst_18 : f32 to vector<64x128xf32>
    %41 = vector.broadcast %cst_19 : f32 to vector<64x128xf32>
    %42 = arith.select %39, %40, %41 : vector<64x128xi1>, vector<64x128xf32>
    %43 = math.absf %37 : vector<64x128xf32>
    %cst_20 = arith.constant 0.327591091 : f32
    %44 = vector.broadcast %cst_20 : f32 to vector<64x128xf32>
    %45 = arith.mulf %44, %43 : vector<64x128xf32>
    %cst_21 = arith.constant 1.000000e+00 : f32
    %46 = vector.broadcast %cst_21 : f32 to vector<64x128xf32>
    %47 = arith.addf %46, %45 : vector<64x128xf32>
    %48 = tpu.reciprocal %47 : vector<64x128xf32> -> vector<64x128xf32>
    %cst_22 = arith.constant 1.06140542 : f32
    %49 = vector.broadcast %cst_22 : f32 to vector<64x128xf32>
    %50 = arith.mulf %49, %48 : vector<64x128xf32>
    %cst_23 = arith.constant -1.45315206 : f32
    %51 = vector.broadcast %cst_23 : f32 to vector<64x128xf32>
    %52 = arith.addf %50, %51 : vector<64x128xf32>
    %53 = arith.mulf %52, %48 : vector<64x128xf32>
    %cst_24 = arith.constant 1.42141378 : f32
    %54 = vector.broadcast %cst_24 : f32 to vector<64x128xf32>
    %55 = arith.addf %53, %54 : vector<64x128xf32>
    %56 = arith.mulf %55, %48 : vector<64x128xf32>
    %cst_25 = arith.constant -0.284496725 : f32
    %57 = vector.broadcast %cst_25 : f32 to vector<64x128xf32>
    %58 = arith.addf %56, %57 : vector<64x128xf32>
    %59 = arith.mulf %58, %48 : vector<64x128xf32>
    %cst_26 = arith.constant 0.254829586 : f32
    %60 = vector.broadcast %cst_26 : f32 to vector<64x128xf32>
    %61 = arith.addf %59, %60 : vector<64x128xf32>
    %62 = arith.mulf %61, %48 : vector<64x128xf32>
    %cst_27 = arith.constant 0.000000e+00 : f32
    %63 = vector.broadcast %cst_27 : f32 to vector<64x128xf32>
    %64 = arith.subf %63, %43 : vector<64x128xf32>
    %65 = arith.mulf %64, %43 : vector<64x128xf32>
    %66 = math.exp %65 : vector<64x128xf32>
    %67 = arith.mulf %62, %66 : vector<64x128xf32>
    %cst_28 = arith.constant 1.000000e+00 : f32
    %68 = vector.broadcast %cst_28 : f32 to vector<64x128xf32>
    %69 = arith.subf %68, %67 : vector<64x128xf32>
    %70 = arith.mulf %42, %69 : vector<64x128xf32>
    %cst_29 = arith.constant 1.000000e+00 : f32
    %71 = vector.broadcast %cst_29 : f32 to vector<64x128xf32>
    %72 = arith.addf %71, %70 : vector<64x128xf32>
    %73 = arith.mulf %35, %72 : vector<64x128xf32>
    %74 = arith.truncf %73 : vector<64x128xf32> to vector<64x128xbf16>
    %c0_30 = arith.constant 0 : index
    %c0_31 = arith.constant 0 : index
    %75 = vector.load %arg6[%c0_30, %c0_31] : memref<128x128xbf16, #tpu.memory_space<vmem>>, vector<128x128xbf16>
    %cst_32 = arith.constant dense<0.000000e+00> : vector<64x128xf32>
    %76 = tpu.matmul %74, %75, %cst_32 {dimension_numbers = #tpu.dot_dimension_numbers<[1], [0], [0], [1], [0, 0, 1, 1], [], []>} : vector<64x128xbf16>, vector<128x128xbf16>, vector<64x128xf32> -> vector<64x128xf32>
    %c0_33 = arith.constant 0 : index
    %c0_34 = arith.constant 0 : index
    %77 = vector.load %arg7[%c0_33, %c0_34] : memref<1x128xf32, #tpu.memory_space<vmem>>, vector<1x128xf32>
    %78 = vector.broadcast %77 : vector<1x128xf32> to vector<64x128xf32>
    %79 = arith.addf %76, %78 : vector<64x128xf32>
    %c0_35 = arith.constant 0 : index
    %c0_36 = arith.constant 0 : index
    %80 = vector.load %arg8[%c0_35, %c0_36] : memref<64x128xf32, #tpu.memory_space<vmem>>, vector<64x128xf32>
    tpu.vector_store %arg8[%c0_35, %c0_36], %79 {strides = array<i32>} : memref<64x128xf32, #tpu.memory_space<vmem>>, vector<64x128xf32>,
    return
  }
  func.func @transform_0(%arg0: i32) -> (i32, i32) {
    %c0_i32 = arith.constant 0 : i32
    %c0_i32_0 = arith.constant 0 : i32
    return %arg0, %c0_i32 : i32, i32
  }
  func.func @transform_1(%arg0: i32) -> (i32, i32) {
    %c0_i32 = arith.constant 0 : i32
    %c0_i32_0 = arith.constant 0 : i32
    %c0_i32_1 = arith.constant 0 : i32
    return %c0_i32, %c0_i32_0 : i32, i32
  }
  func.func @transform_2(%arg0: i32) -> (i32, i32) {
    %c0_i32 = arith.constant 0 : i32
    %c0_i32_0 = arith.constant 0 : i32
    %c0_i32_1 = arith.constant 0 : i32
    return %c0_i32, %c0_i32_0 : i32, i32
  }
  func.func @transform_3(%arg0: i32) -> (i32, i32) {
    %c0_i32 = arith.constant 0 : i32
    %c0_i32_0 = arith.constant 0 : i32
    %c0_i32_1 = arith.constant 0 : i32
    return %c0_i32, %c0_i32_0 : i32, i32
  }
  func.func @transform_4(%arg0: i32) -> (i32, i32) {
    %c0_i32 = arith.constant 0 : i32
    %c0_i32_0 = arith.constant 0 : i32
    %c0_i32_1 = arith.constant 0 : i32
    return %c0_i32, %c0_i32_0 : i32, i32
  }
  func.func @transform_5(%arg0: i32) -> (i32, i32) {
    %c0_i32 = arith.constant 0 : i32
    %c0_i32_0 = arith.constant 0 : i32
    %c0_i32_1 = arith.constant 0 : i32
    return %c0_i32, %c0_i32_0 : i32, i32
  }
  func.func @transform_6(%arg0: i32) -> (i32, i32) {
    %c0_i32 = arith.constant 0 : i32
    %c0_i32_0 = arith.constant 0 : i32
    %c0_i32_1 = arith.constant 0 : i32
    return %c0_i32, %c0_i32_0 : i32, i32
  }
  func.func @transform_7(%arg0: i32) -> (i32, i32) {
    %c0_i32 = arith.constant 0 : i32
    %c0_i32_0 = arith.constant 0 : i32
    return %arg0, %c0_i32 : i32, i32
  }
}

module attributes {stable_mosaic.version = 11 : i64} {
  func.func @_ln_mlp_pair_kernel(%arg0: i32, %arg1: memref<1x2x128xf32, #tpu.memory_space<vmem>>, %arg2: memref<1x1x128xf32, #tpu.memory_space<vmem>>, %arg3: memref<1x1x128xf32, #tpu.memory_space<vmem>>, %arg4: memref<1x128x128xbf16, #tpu.memory_space<vmem>>, %arg5: memref<1x1x128xf32, #tpu.memory_space<vmem>>, %arg6: memref<1x128x128xbf16, #tpu.memory_space<vmem>>, %arg7: memref<1x1x128xf32, #tpu.memory_space<vmem>>, %arg8: memref<1x2x128xf32, #tpu.memory_space<vmem>>) attributes {dimension_semantics = [#tpu.dimension_semantics<parallel>], iteration_bounds = array<i64: 2>, scalar_prefetch = 0 : i64, scratch_operands = 0 : i64, tpu.core_type = #tpu.core_type<tc>, window_params = [{transform_indices = @transform_0, window_bounds = array<i64: 1, 2, 128>}, {transform_indices = @transform_1, window_bounds = array<i64: 1, 1, 128>}, {transform_indices = @transform_2, window_bounds = array<i64: 1, 1, 128>}, {transform_indices = @transform_3, window_bounds = array<i64: 1, 128, 128>}, {transform_indices = @transform_4, window_bounds = array<i64: 1, 1, 128>}, {transform_indices = @transform_5, window_bounds = array<i64: 1, 128, 128>}, {transform_indices = @transform_6, window_bounds = array<i64: 1, 1, 128>}, {transform_indices = @transform_7, window_bounds = array<i64: 1, 2, 128>}]} {
    %c0 = arith.constant 0 : index
    %c0_0 = arith.constant 0 : index
    %c0_1 = arith.constant 0 : index
    %0 = vector.load %arg1[%c0, %c0_0, %c0_1] : memref<1x2x128xf32, #tpu.memory_space<vmem>>, vector<1x2x128xf32>
    %1 = vector.shape_cast %0 : vector<1x2x128xf32> to vector<2x128xf32>
    %c0_2 = arith.constant 0 : index
    %c0_3 = arith.constant 0 : index
    %c0_4 = arith.constant 0 : index
    %2 = vector.load %arg2[%c0_2, %c0_3, %c0_4] : memref<1x1x128xf32, #tpu.memory_space<vmem>>, vector<1x1x128xf32>
    %3 = vector.shape_cast %2 : vector<1x1x128xf32> to vector<1x128xf32>
    %c0_5 = arith.constant 0 : index
    %c0_6 = arith.constant 0 : index
    %c0_7 = arith.constant 0 : index
    %4 = vector.load %arg3[%c0_5, %c0_6, %c0_7] : memref<1x1x128xf32, #tpu.memory_space<vmem>>, vector<1x1x128xf32>
    %5 = vector.shape_cast %4 : vector<1x1x128xf32> to vector<1x128xf32>
    %cst = arith.constant dense<0.000000e+00> : vector<2xf32>
    %6 = vector.multi_reduction <add>, %1, %cst [1] : vector<2x128xf32> to vector<2xf32>
    %7 = vector.shape_cast %6 : vector<2xf32> to vector<2x1xf32>
    %cst_8 = arith.constant 0.010416667 : f32
    %8 = vector.broadcast %cst_8 : f32 to vector<2x1xf32>
    %9 = arith.mulf %7, %8 : vector<2x1xf32>
    %10 = tpu.iota {dimensions = array<i32: 1>} : vector<2x128xi32>
    %c96_i32 = arith.constant 96 : i32
    %11 = vector.broadcast %c96_i32 : i32 to vector<2x128xi32>
    %12 = arith.cmpi slt, %10, %11 : vector<2x128xi32>
    %13 = vector.broadcast %9 : vector<2x1xf32> to vector<2x128xf32>
    %14 = arith.subf %1, %13 : vector<2x128xf32>
    %cst_9 = arith.constant 0.000000e+00 : f32
    %15 = vector.broadcast %cst_9 : f32 to vector<2x128xf32>
    %16 = arith.select %12, %14, %15 : vector<2x128xi1>, vector<2x128xf32>
    %17 = arith.mulf %16, %16 : vector<2x128xf32>
    %cst_10 = arith.constant dense<0.000000e+00> : vector<2xf32>
    %18 = vector.multi_reduction <add>, %17, %cst_10 [1] : vector<2x128xf32> to vector<2xf32>
    %19 = vector.shape_cast %18 : vector<2xf32> to vector<2x1xf32>
    %cst_11 = arith.constant 0.010416667 : f32
    %20 = vector.broadcast %cst_11 : f32 to vector<2x1xf32>
    %21 = arith.mulf %19, %20 : vector<2x1xf32>
    %cst_12 = arith.constant 9.99999974E-6 : f32
    %22 = vector.broadcast %cst_12 : f32 to vector<2x1xf32>
    %23 = arith.addf %21, %22 : vector<2x1xf32>
    %24 = math.rsqrt %23 : vector<2x1xf32>
    %25 = vector.broadcast %24 : vector<2x1xf32> to vector<2x128xf32>
    %26 = arith.mulf %16, %25 : vector<2x128xf32>
    %27 = vector.broadcast %3 : vector<1x128xf32> to vector<2x128xf32>
    %28 = arith.mulf %26, %27 : vector<2x128xf32>
    %29 = vector.broadcast %5 : vector<1x128xf32> to vector<2x128xf32>
    %30 = arith.addf %28, %29 : vector<2x128xf32>
    %31 = arith.truncf %30 : vector<2x128xf32> to vector<2x128xbf16>
    %c0_13 = arith.constant 0 : index
    %c0_14 = arith.constant 0 : index
    %c0_15 = arith.constant 0 : index
    %32 = vector.load %arg4[%c0_13, %c0_14, %c0_15] : memref<1x128x128xbf16, #tpu.memory_space<vmem>>, vector<1x128x128xbf16>
    %33 = vector.shape_cast %32 : vector<1x128x128xbf16> to vector<128x128xbf16>
    %cst_16 = arith.constant dense<0.000000e+00> : vector<2x128xf32>
    %34 = tpu.matmul %31, %33, %cst_16 {dimension_numbers = #tpu.dot_dimension_numbers<[1], [0], [0], [1], [0, 0, 1, 1], [], []>} : vector<2x128xbf16>, vector<128x128xbf16>, vector<2x128xf32> -> vector<2x128xf32>
    %c0_17 = arith.constant 0 : index
    %c0_18 = arith.constant 0 : index
    %c0_19 = arith.constant 0 : index
    %35 = vector.load %arg5[%c0_17, %c0_18, %c0_19] : memref<1x1x128xf32, #tpu.memory_space<vmem>>, vector<1x1x128xf32>
    %36 = vector.shape_cast %35 : vector<1x1x128xf32> to vector<1x128xf32>
    %37 = vector.broadcast %36 : vector<1x128xf32> to vector<2x128xf32>
    %38 = arith.addf %34, %37 : vector<2x128xf32>
    %cst_20 = arith.constant 5.000000e-01 : f32
    %39 = vector.broadcast %cst_20 : f32 to vector<2x128xf32>
    %40 = arith.mulf %39, %38 : vector<2x128xf32>
    %cst_21 = arith.constant 0.707106769 : f32
    %41 = vector.broadcast %cst_21 : f32 to vector<2x128xf32>
    %42 = arith.mulf %38, %41 : vector<2x128xf32>
    %cst_22 = arith.constant 0.000000e+00 : f32
    %43 = vector.broadcast %cst_22 : f32 to vector<2x128xf32>
    %44 = arith.cmpf olt, %42, %43 : vector<2x128xf32>
    %cst_23 = arith.constant -1.000000e+00 : f32
    %cst_24 = arith.constant 1.000000e+00 : f32
    %45 = vector.broadcast %cst_23 : f32 to vector<2x128xf32>
    %46 = vector.broadcast %cst_24 : f32 to vector<2x128xf32>
    %47 = arith.select %44, %45, %46 : vector<2x128xi1>, vector<2x128xf32>
    %48 = math.absf %42 : vector<2x128xf32>
    %cst_25 = arith.constant 0.327591091 : f32
    %49 = vector.broadcast %cst_25 : f32 to vector<2x128xf32>
    %50 = arith.mulf %49, %48 : vector<2x128xf32>
    %cst_26 = arith.constant 1.000000e+00 : f32
    %51 = vector.broadcast %cst_26 : f32 to vector<2x128xf32>
    %52 = arith.addf %51, %50 : vector<2x128xf32>
    %53 = tpu.reciprocal %52 : vector<2x128xf32> -> vector<2x128xf32>
    %cst_27 = arith.constant 1.06140542 : f32
    %54 = vector.broadcast %cst_27 : f32 to vector<2x128xf32>
    %55 = arith.mulf %54, %53 : vector<2x128xf32>
    %cst_28 = arith.constant -1.45315206 : f32
    %56 = vector.broadcast %cst_28 : f32 to vector<2x128xf32>
    %57 = arith.addf %55, %56 : vector<2x128xf32>
    %58 = arith.mulf %57, %53 : vector<2x128xf32>
    %cst_29 = arith.constant 1.42141378 : f32
    %59 = vector.broadcast %cst_29 : f32 to vector<2x128xf32>
    %60 = arith.addf %58, %59 : vector<2x128xf32>
    %61 = arith.mulf %60, %53 : vector<2x128xf32>
    %cst_30 = arith.constant -0.284496725 : f32
    %62 = vector.broadcast %cst_30 : f32 to vector<2x128xf32>
    %63 = arith.addf %61, %62 : vector<2x128xf32>
    %64 = arith.mulf %63, %53 : vector<2x128xf32>
    %cst_31 = arith.constant 0.254829586 : f32
    %65 = vector.broadcast %cst_31 : f32 to vector<2x128xf32>
    %66 = arith.addf %64, %65 : vector<2x128xf32>
    %67 = arith.mulf %66, %53 : vector<2x128xf32>
    %cst_32 = arith.constant 0.000000e+00 : f32
    %68 = vector.broadcast %cst_32 : f32 to vector<2x128xf32>
    %69 = arith.subf %68, %48 : vector<2x128xf32>
    %70 = arith.mulf %69, %48 : vector<2x128xf32>
    %71 = math.exp %70 : vector<2x128xf32>
    %72 = arith.mulf %67, %71 : vector<2x128xf32>
    %cst_33 = arith.constant 1.000000e+00 : f32
    %73 = vector.broadcast %cst_33 : f32 to vector<2x128xf32>
    %74 = arith.subf %73, %72 : vector<2x128xf32>
    %75 = arith.mulf %47, %74 : vector<2x128xf32>
    %cst_34 = arith.constant 1.000000e+00 : f32
    %76 = vector.broadcast %cst_34 : f32 to vector<2x128xf32>
    %77 = arith.addf %76, %75 : vector<2x128xf32>
    %78 = arith.mulf %40, %77 : vector<2x128xf32>
    %79 = arith.truncf %78 : vector<2x128xf32> to vector<2x128xbf16>
    %c0_35 = arith.constant 0 : index
    %c0_36 = arith.constant 0 : index
    %c0_37 = arith.constant 0 : index
    %80 = vector.load %arg6[%c0_35, %c0_36, %c0_37] : memref<1x128x128xbf16, #tpu.memory_space<vmem>>, vector<1x128x128xbf16>
    %81 = vector.shape_cast %80 : vector<1x128x128xbf16> to vector<128x128xbf16>
    %cst_38 = arith.constant dense<0.000000e+00> : vector<2x128xf32>
    %82 = tpu.matmul %79, %81, %cst_38 {dimension_numbers = #tpu.dot_dimension_numbers<[1], [0], [0], [1], [0, 0, 1, 1], [], []>} : vector<2x128xbf16>, vector<128x128xbf16>, vector<2x128xf32> -> vector<2x128xf32>
    %c0_39 = arith.constant 0 : index
    %c0_40 = arith.constant 0 : index
    %c0_41 = arith.constant 0 : index
    %83 = vector.load %arg7[%c0_39, %c0_40, %c0_41] : memref<1x1x128xf32, #tpu.memory_space<vmem>>, vector<1x1x128xf32>
    %84 = vector.shape_cast %83 : vector<1x1x128xf32> to vector<1x128xf32>
    %85 = vector.broadcast %84 : vector<1x128xf32> to vector<2x128xf32>
    %86 = arith.addf %82, %85 : vector<2x128xf32>
    %c0_42 = arith.constant 0 : index
    %c0_43 = arith.constant 0 : index
    %c0_44 = arith.constant 0 : index
    %87 = vector.load %arg8[%c0_42, %c0_43, %c0_44] : memref<1x2x128xf32, #tpu.memory_space<vmem>>, vector<1x2x128xf32>
    %88 = vector.shape_cast %87 : vector<1x2x128xf32> to vector<2x128xf32>
    %89 = vector.shape_cast %86 : vector<2x128xf32> to vector<1x2x128xf32>
    tpu.vector_store %arg8[%c0_42, %c0_43, %c0_44], %89 {strides = array<i32>} : memref<1x2x128xf32, #tpu.memory_space<vmem>>, vector<1x2x128xf32>,
    return
  }
  func.func @transform_0(%arg0: i32) -> (i32, i32, i32) {
    %c0_i32 = arith.constant 0 : i32
    %c0_i32_0 = arith.constant 0 : i32
    %c0_i32_1 = arith.constant 0 : i32
    return %arg0, %c0_i32, %c0_i32_0 : i32, i32, i32
  }
  func.func @transform_1(%arg0: i32) -> (i32, i32, i32) {
    %c0_i32 = arith.constant 0 : i32
    %c0_i32_0 = arith.constant 0 : i32
    %c0_i32_1 = arith.constant 0 : i32
    return %arg0, %c0_i32, %c0_i32_0 : i32, i32, i32
  }
  func.func @transform_2(%arg0: i32) -> (i32, i32, i32) {
    %c0_i32 = arith.constant 0 : i32
    %c0_i32_0 = arith.constant 0 : i32
    %c0_i32_1 = arith.constant 0 : i32
    return %arg0, %c0_i32, %c0_i32_0 : i32, i32, i32
  }
  func.func @transform_3(%arg0: i32) -> (i32, i32, i32) {
    %c0_i32 = arith.constant 0 : i32
    %c0_i32_0 = arith.constant 0 : i32
    %c0_i32_1 = arith.constant 0 : i32
    return %arg0, %c0_i32, %c0_i32_0 : i32, i32, i32
  }
  func.func @transform_4(%arg0: i32) -> (i32, i32, i32) {
    %c0_i32 = arith.constant 0 : i32
    %c0_i32_0 = arith.constant 0 : i32
    %c0_i32_1 = arith.constant 0 : i32
    return %arg0, %c0_i32, %c0_i32_0 : i32, i32, i32
  }
  func.func @transform_5(%arg0: i32) -> (i32, i32, i32) {
    %c0_i32 = arith.constant 0 : i32
    %c0_i32_0 = arith.constant 0 : i32
    %c0_i32_1 = arith.constant 0 : i32
    return %arg0, %c0_i32, %c0_i32_0 : i32, i32, i32
  }
  func.func @transform_6(%arg0: i32) -> (i32, i32, i32) {
    %c0_i32 = arith.constant 0 : i32
    %c0_i32_0 = arith.constant 0 : i32
    %c0_i32_1 = arith.constant 0 : i32
    return %arg0, %c0_i32, %c0_i32_0 : i32, i32, i32
  }
  func.func @transform_7(%arg0: i32) -> (i32, i32, i32) {
    %c0_i32 = arith.constant 0 : i32
    %c0_i32_0 = arith.constant 0 : i32
    %c0_i32_1 = arith.constant 0 : i32
    return %arg0, %c0_i32, %c0_i32_0 : i32, i32, i32
  }
}

module attributes {stable_mosaic.version = 11 : i64} {
  func.func @_token_inf_kernel(%arg0: i32, %arg1: i32, %arg2: memref<1x1x1x128xf32, #tpu.memory_space<vmem>>, %arg3: memref<1x64x128xf32, #tpu.memory_space<vmem>>, %arg4: memref<1x1x128xf32, #tpu.memory_space<vmem>>, %arg5: memref<1x1x128xf32, #tpu.memory_space<vmem>>, %arg6: memref<1x128x128xbf16, #tpu.memory_space<vmem>>, %arg7: memref<1x128x256xbf16, #tpu.memory_space<vmem>>, %arg8: memref<1x128x128xbf16, #tpu.memory_space<vmem>>, %arg9: memref<1x1x128xf32, #tpu.memory_space<vmem>>, %arg10: memref<1x1x64x128xf32, #tpu.memory_space<vmem>>) attributes {dimension_semantics = [#tpu.dimension_semantics<parallel>, #tpu.dimension_semantics<parallel>], iteration_bounds = array<i64: 2, 2>, scalar_prefetch = 0 : i64, scratch_operands = 0 : i64, tpu.core_type = #tpu.core_type<tc>, window_params = [{transform_indices = @transform_0, window_bounds = array<i64: 1, 1, 1, 128>}, {transform_indices = @transform_1, window_bounds = array<i64: 1, 64, 128>}, {transform_indices = @transform_2, window_bounds = array<i64: 1, 1, 128>}, {transform_indices = @transform_3, window_bounds = array<i64: 1, 1, 128>}, {transform_indices = @transform_4, window_bounds = array<i64: 1, 128, 128>}, {transform_indices = @transform_5, window_bounds = array<i64: 1, 128, 256>}, {transform_indices = @transform_6, window_bounds = array<i64: 1, 128, 128>}, {transform_indices = @transform_7, window_bounds = array<i64: 1, 1, 128>}, {transform_indices = @transform_8, window_bounds = array<i64: 1, 1, 64, 128>}]} {
    %c0 = arith.constant 0 : index
    %c0_0 = arith.constant 0 : index
    %c0_1 = arith.constant 0 : index
    %c0_2 = arith.constant 0 : index
    %0 = vector.load %arg2[%c0, %c0_0, %c0_1, %c0_2] : memref<1x1x1x128xf32, #tpu.memory_space<vmem>>, vector<1x1x1x128xf32>
    %1 = vector.shape_cast %0 : vector<1x1x1x128xf32> to vector<1x128xf32>
    %c0_3 = arith.constant 0 : index
    %c0_4 = arith.constant 0 : index
    %c0_5 = arith.constant 0 : index
    %2 = vector.load %arg3[%c0_3, %c0_4, %c0_5] : memref<1x64x128xf32, #tpu.memory_space<vmem>>, vector<1x64x128xf32>
    %3 = vector.shape_cast %2 : vector<1x64x128xf32> to vector<64x128xf32>
    %c0_6 = arith.constant 0 : index
    %c0_7 = arith.constant 0 : index
    %c0_8 = arith.constant 0 : index
    %4 = vector.load %arg4[%c0_6, %c0_7, %c0_8] : memref<1x1x128xf32, #tpu.memory_space<vmem>>, vector<1x1x128xf32>
    %5 = vector.shape_cast %4 : vector<1x1x128xf32> to vector<1x128xf32>
    %c0_9 = arith.constant 0 : index
    %c0_10 = arith.constant 0 : index
    %c0_11 = arith.constant 0 : index
    %6 = vector.load %arg5[%c0_9, %c0_10, %c0_11] : memref<1x1x128xf32, #tpu.memory_space<vmem>>, vector<1x1x128xf32>
    %7 = vector.shape_cast %6 : vector<1x1x128xf32> to vector<1x128xf32>
    %cst = arith.constant dense<0.000000e+00> : vector<1xf32>
    %8 = vector.multi_reduction <add>, %1, %cst [1] : vector<1x128xf32> to vector<1xf32>
    %9 = vector.shape_cast %8 : vector<1xf32> to vector<1x1xf32>
    %cst_12 = arith.constant 0.010416667 : f32
    %10 = vector.broadcast %cst_12 : f32 to vector<1x1xf32>
    %11 = arith.mulf %9, %10 : vector<1x1xf32>
    %12 = tpu.iota {dimensions = array<i32: 1>} : vector<1x128xi32>
    %c96_i32 = arith.constant 96 : i32
    %13 = vector.broadcast %c96_i32 : i32 to vector<1x128xi32>
    %14 = arith.cmpi slt, %12, %13 : vector<1x128xi32>
    %15 = vector.broadcast %11 : vector<1x1xf32> to vector<1x128xf32>
    %16 = arith.subf %1, %15 : vector<1x128xf32>
    %cst_13 = arith.constant 0.000000e+00 : f32
    %17 = vector.broadcast %cst_13 : f32 to vector<1x128xf32>
    %18 = arith.select %14, %16, %17 : vector<1x128xi1>, vector<1x128xf32>
    %19 = arith.mulf %18, %18 : vector<1x128xf32>
    %cst_14 = arith.constant dense<0.000000e+00> : vector<1xf32>
    %20 = vector.multi_reduction <add>, %19, %cst_14 [1] : vector<1x128xf32> to vector<1xf32>
    %21 = vector.shape_cast %20 : vector<1xf32> to vector<1x1xf32>
    %cst_15 = arith.constant 0.010416667 : f32
    %22 = vector.broadcast %cst_15 : f32 to vector<1x1xf32>
    %23 = arith.mulf %21, %22 : vector<1x1xf32>
    %cst_16 = arith.constant 9.99999974E-6 : f32
    %24 = vector.broadcast %cst_16 : f32 to vector<1x1xf32>
    %25 = arith.addf %23, %24 : vector<1x1xf32>
    %26 = math.rsqrt %25 : vector<1x1xf32>
    %27 = vector.broadcast %26 : vector<1x1xf32> to vector<1x128xf32>
    %28 = arith.mulf %18, %27 : vector<1x128xf32>
    %29 = arith.mulf %28, %5 : vector<1x128xf32>
    %30 = arith.addf %29, %7 : vector<1x128xf32>
    %cst_17 = arith.constant dense<0.000000e+00> : vector<64xf32>
    %31 = vector.multi_reduction <add>, %3, %cst_17 [1] : vector<64x128xf32> to vector<64xf32>
    %32 = vector.shape_cast %31 : vector<64xf32> to vector<64x1xf32>
    %cst_18 = arith.constant 0.010416667 : f32
    %33 = vector.broadcast %cst_18 : f32 to vector<64x1xf32>
    %34 = arith.mulf %32, %33 : vector<64x1xf32>
    %35 = tpu.iota {dimensions = array<i32: 1>} : vector<64x128xi32>
    %c96_i32_19 = arith.constant 96 : i32
    %36 = vector.broadcast %c96_i32_19 : i32 to vector<64x128xi32>
    %37 = arith.cmpi slt, %35, %36 : vector<64x128xi32>
    %38 = vector.broadcast %34 : vector<64x1xf32> to vector<64x128xf32>
    %39 = arith.subf %3, %38 : vector<64x128xf32>
    %cst_20 = arith.constant 0.000000e+00 : f32
    %40 = vector.broadcast %cst_20 : f32 to vector<64x128xf32>
    %41 = arith.select %37, %39, %40 : vector<64x128xi1>, vector<64x128xf32>
    %42 = arith.mulf %41, %41 : vector<64x128xf32>
    %cst_21 = arith.constant dense<0.000000e+00> : vector<64xf32>
    %43 = vector.multi_reduction <add>, %42, %cst_21 [1] : vector<64x128xf32> to vector<64xf32>
    %44 = vector.shape_cast %43 : vector<64xf32> to vector<64x1xf32>
    %cst_22 = arith.constant 0.010416667 : f32
    %45 = vector.broadcast %cst_22 : f32 to vector<64x1xf32>
    %46 = arith.mulf %44, %45 : vector<64x1xf32>
    %cst_23 = arith.constant 9.99999974E-6 : f32
    %47 = vector.broadcast %cst_23 : f32 to vector<64x1xf32>
    %48 = arith.addf %46, %47 : vector<64x1xf32>
    %49 = math.rsqrt %48 : vector<64x1xf32>
    %50 = vector.broadcast %49 : vector<64x1xf32> to vector<64x128xf32>
    %51 = arith.mulf %41, %50 : vector<64x128xf32>
    %52 = vector.broadcast %5 : vector<1x128xf32> to vector<64x128xf32>
    %53 = arith.mulf %51, %52 : vector<64x128xf32>
    %54 = vector.broadcast %7 : vector<1x128xf32> to vector<64x128xf32>
    %55 = arith.addf %53, %54 : vector<64x128xf32>
    %56 = arith.truncf %55 : vector<64x128xf32> to vector<64x128xbf16>
    %c0_24 = arith.constant 0 : index
    %c0_25 = arith.constant 0 : index
    %c0_26 = arith.constant 0 : index
    %57 = vector.load %arg6[%c0_24, %c0_25, %c0_26] : memref<1x128x128xbf16, #tpu.memory_space<vmem>>, vector<1x128x128xbf16>
    %58 = vector.shape_cast %57 : vector<1x128x128xbf16> to vector<128x128xbf16>
    %cst_27 = arith.constant dense<0.000000e+00> : vector<64x128xf32>
    %59 = tpu.matmul %56, %58, %cst_27 {dimension_numbers = #tpu.dot_dimension_numbers<[1], [0], [0], [1], [0, 0, 1, 1], [], []>} : vector<64x128xbf16>, vector<128x128xbf16>, vector<64x128xf32> -> vector<64x128xf32>
    %60 = arith.truncf %30 : vector<1x128xf32> to vector<1x128xbf16>
    %c0_28 = arith.constant 0 : index
    %c0_29 = arith.constant 0 : index
    %c0_30 = arith.constant 0 : index
    %61 = vector.load %arg7[%c0_28, %c0_29, %c0_30] : memref<1x128x256xbf16, #tpu.memory_space<vmem>>, vector<1x128x256xbf16>
    %62 = vector.shape_cast %61 : vector<1x128x256xbf16> to vector<128x256xbf16>
    %cst_31 = arith.constant dense<0.000000e+00> : vector<1x256xf32>
    %63 = tpu.matmul %60, %62, %cst_31 {dimension_numbers = #tpu.dot_dimension_numbers<[1], [0], [0], [1], [0, 0, 1, 1], [], []>} : vector<1x128xbf16>, vector<128x256xbf16>, vector<1x256xf32> -> vector<1x256xf32>
    %64 = vector.extract_strided_slice %63 {offsets = [0, 0], sizes = [1, 128], strides = [1, 1]} : vector<1x256xf32> to vector<1x128xf32>
    %65 = vector.extract_strided_slice %63 {offsets = [0, 128], sizes = [1, 128], strides = [1, 1]} : vector<1x256xf32> to vector<1x128xf32>
    %66 = vector.broadcast %64 : vector<1x128xf32> to vector<64x128xf32>
    %67 = arith.mulf %59, %66 : vector<64x128xf32>
    %cst_32 = arith.constant dense<0.000000e+00> : vector<64xf32>
    %68 = vector.multi_reduction <add>, %67, %cst_32 [1] : vector<64x128xf32> to vector<64xf32>
    %69 = vector.shape_cast %68 : vector<64xf32> to vector<64x1xf32>
    %cst_33 = arith.constant 0.102062076 : f32
    %70 = vector.broadcast %cst_33 : f32 to vector<64x1xf32>
    %71 = arith.mulf %69, %70 : vector<64x1xf32>
    %cst_34 = arith.constant 0.000000e+00 : f32
    %72 = vector.broadcast %cst_34 : f32 to vector<64x1xf32>
    %73 = arith.subf %72, %71 : vector<64x1xf32>
    %74 = math.exp %73 : vector<64x1xf32>
    %cst_35 = arith.constant 1.000000e+00 : f32
    %75 = vector.broadcast %cst_35 : f32 to vector<64x1xf32>
    %76 = arith.addf %75, %74 : vector<64x1xf32>
    %77 = tpu.reciprocal %76 : vector<64x1xf32> -> vector<64x1xf32>
    %78 = vector.broadcast %77 : vector<64x1xf32> to vector<64x128xf32>
    %79 = vector.broadcast %65 : vector<1x128xf32> to vector<64x128xf32>
    %80 = arith.mulf %78, %79 : vector<64x128xf32>
    %81 = arith.truncf %80 : vector<64x128xf32> to vector<64x128xbf16>
    %c0_36 = arith.constant 0 : index
    %c0_37 = arith.constant 0 : index
    %c0_38 = arith.constant 0 : index
    %82 = vector.load %arg8[%c0_36, %c0_37, %c0_38] : memref<1x128x128xbf16, #tpu.memory_space<vmem>>, vector<1x128x128xbf16>
    %83 = vector.shape_cast %82 : vector<1x128x128xbf16> to vector<128x128xbf16>
    %cst_39 = arith.constant dense<0.000000e+00> : vector<64x128xf32>
    %84 = tpu.matmul %81, %83, %cst_39 {dimension_numbers = #tpu.dot_dimension_numbers<[1], [0], [0], [1], [0, 0, 1, 1], [], []>} : vector<64x128xbf16>, vector<128x128xbf16>, vector<64x128xf32> -> vector<64x128xf32>
    %c0_40 = arith.constant 0 : index
    %c0_41 = arith.constant 0 : index
    %c0_42 = arith.constant 0 : index
    %85 = vector.load %arg9[%c0_40, %c0_41, %c0_42] : memref<1x1x128xf32, #tpu.memory_space<vmem>>, vector<1x1x128xf32>
    %86 = vector.shape_cast %85 : vector<1x1x128xf32> to vector<1x128xf32>
    %87 = vector.broadcast %86 : vector<1x128xf32> to vector<64x128xf32>
    %88 = arith.addf %84, %87 : vector<64x128xf32>
    %89 = arith.addf %88, %3 : vector<64x128xf32>
    %c0_43 = arith.constant 0 : index
    %c0_44 = arith.constant 0 : index
    %c0_45 = arith.constant 0 : index
    %c0_46 = arith.constant 0 : index
    %90 = vector.load %arg10[%c0_43, %c0_44, %c0_45, %c0_46] : memref<1x1x64x128xf32, #tpu.memory_space<vmem>>, vector<1x1x64x128xf32>
    %91 = vector.shape_cast %90 : vector<1x1x64x128xf32> to vector<64x128xf32>
    %92 = vector.shape_cast %89 : vector<64x128xf32> to vector<1x1x64x128xf32>
    tpu.vector_store %arg10[%c0_43, %c0_44, %c0_45, %c0_46], %92 {strides = array<i32>} : memref<1x1x64x128xf32, #tpu.memory_space<vmem>>, vector<1x1x64x128xf32>,
    return
  }
  func.func @transform_0(%arg0: i32, %arg1: i32) -> (i32, i32, i32, i32) {
    %c0_i32 = arith.constant 0 : i32
    %c0_i32_0 = arith.constant 0 : i32
    %c0_i32_1 = arith.constant 0 : i32
    return %arg0, %arg1, %c0_i32, %c0_i32_0 : i32, i32, i32, i32
  }
  func.func @transform_1(%arg0: i32, %arg1: i32) -> (i32, i32, i32) {
    %c0_i32 = arith.constant 0 : i32
    %c0_i32_0 = arith.constant 0 : i32
    %c0_i32_1 = arith.constant 0 : i32
    return %arg1, %c0_i32, %c0_i32_0 : i32, i32, i32
  }
  func.func @transform_2(%arg0: i32, %arg1: i32) -> (i32, i32, i32) {
    %c0_i32 = arith.constant 0 : i32
    %c0_i32_0 = arith.constant 0 : i32
    %c0_i32_1 = arith.constant 0 : i32
    return %arg0, %c0_i32, %c0_i32_0 : i32, i32, i32
  }
  func.func @transform_3(%arg0: i32, %arg1: i32) -> (i32, i32, i32) {
    %c0_i32 = arith.constant 0 : i32
    %c0_i32_0 = arith.constant 0 : i32
    %c0_i32_1 = arith.constant 0 : i32
    return %arg0, %c0_i32, %c0_i32_0 : i32, i32, i32
  }
  func.func @transform_4(%arg0: i32, %arg1: i32) -> (i32, i32, i32) {
    %c0_i32 = arith.constant 0 : i32
    %c0_i32_0 = arith.constant 0 : i32
    %c0_i32_1 = arith.constant 0 : i32
    return %arg0, %c0_i32, %c0_i32_0 : i32, i32, i32
  }
  func.func @transform_5(%arg0: i32, %arg1: i32) -> (i32, i32, i32) {
    %c0_i32 = arith.constant 0 : i32
    %c0_i32_0 = arith.constant 0 : i32
    %c0_i32_1 = arith.constant 0 : i32
    return %arg0, %c0_i32, %c0_i32_0 : i32, i32, i32
  }
  func.func @transform_6(%arg0: i32, %arg1: i32) -> (i32, i32, i32) {
    %c0_i32 = arith.constant 0 : i32
    %c0_i32_0 = arith.constant 0 : i32
    %c0_i32_1 = arith.constant 0 : i32
    return %arg0, %c0_i32, %c0_i32_0 : i32, i32, i32
  }
  func.func @transform_7(%arg0: i32, %arg1: i32) -> (i32, i32, i32) {
    %c0_i32 = arith.constant 0 : i32
    %c0_i32_0 = arith.constant 0 : i32
    %c0_i32_1 = arith.constant 0 : i32
    return %arg0, %c0_i32, %c0_i32_0 : i32, i32, i32
  }
  func.func @transform_8(%arg0: i32, %arg1: i32) -> (i32, i32, i32, i32) {
    %c0_i32 = arith.constant 0 : i32
    %c0_i32_0 = arith.constant 0 : i32
    %c0_i32_1 = arith.constant 0 : i32
    return %arg0, %arg1, %c0_i32, %c0_i32_0 : i32, i32, i32, i32
  }
}

</mosaic_0001>

<bundles_post_ra>
// kernel: token_transformer_forward.5
= control target key start
LH: loop header
LB: loop body
LE: loop exit
PB: predicated region body
PF: predicated region fallthrough
CT: control target
= control target key end

     0   :  { %s1307_s24 = smov 0   ;;  %s1767_s0 = inlined_call_operand.vmem [shape: f32[128,192], index: 0, kind: input, shape index: {}]   ;;  %s1768_s1 = inlined_call_operand.vmem [shape: f32[1,192], index: 1, kind: input, shape index: {}]   ;;  %s1769_s2 = inlined_call_operand.vmem [shape: f32[1,192], index: 2, kind: input, shape index: {}]   ;;  %s1770_s3 = inlined_call_operand.vmem [shape: bf16[192,128], index: 3, kind: input, shape index: {}]   ;;  %s1771_s4 = inlined_call_operand.vmem [shape: f32[1,128], index: 4, kind: input, shape index: {}]   ;;  %s1772_s5 = inlined_call_operand.vmem [shape: bf16[128,128], index: 5, kind: input, shape index: {}]   ;;  %s1773_s6 = inlined_call_operand.vmem [shape: f32[1,128], index: 6, kind: input, shape index: {}]   ;;  %s1774_s7 = inlined_call_operand.vmem [shape: f32[128,128], index: 7, kind: output, shape index: {}]  }
   0x1 LB: > { %s1104_s25 = sadd.s32 4294967295, %s1263_s24   ;;  %p1108_p0 = scmp.ge.s32.totalorder %s1263_s24, 1  ;;  %s1263_s24 = sphi %s1307_s24, %s17_s24  }
   0x2   : > { %p239_p1 = scmp.lt.s32.totalorder %s1263_s24, 3 }
   0x4   : > { %p240_p2 = pnand %p1108_p0, %p239_p1 }
   0x5   : > { %s1109_s26 = sshll.u32 (!%p240_p2), %s1104_s25, 3 }
   0x6   : > { %243 = sbr.rel (%p240_p2) target bundleno = 812 (0x32c), region = 48  ;;  %p273_p3 = scmp.lt.s32.totalorder (!%p240_p2), %s1109_s26, 15 }
   0xb   : > { %s1776_s26 = smov (!%p273_p3, %s1109_s26), 15  ;;  %vm304_vm0 = vcmask 523264   ;;  %v1189_v32 = vld [vmem:[%s1770_s3 + $0x38] sm:$0xff]   ;;  %v1265_v33 = vmov 0   ;;  %v1190_v34 = vld [vmem:[%s1770_s3 + $0x30] sm:$0xff]   ;;  %v1191_v35 = vld [vmem:[%s1770_s3 + $0x28] sm:$0xff]  }
   0xc   : > { %s1142_s27 = sshll.u32 %s1776_s26, 4  ;;  %627 = vmatprep.subr.bf16.mxu0 %v1265_v33  ;;  %v1192_v36 = vld [vmem:[%s1770_s3 + $0x20] sm:$0xff]   ;;  %s1113_s12 = sshll.u32 %s1776_s26, 3 }
   0xd   : > { %s1321_s30 = scalar_lea.vmem %s1767_s0, %s1142_s27  ;;  %628 = vmatpush1.bf16.msra.mxu0 %v1189_v32  ;;  %s283_s17 = scalar_lea.vmem %s1774_s7, %s1113_s12 }
   0xe   : > { %v286_v0 = vld [vmem:[%s1321_s30] sm:$0xff]  ;;  %v287_v1 = vld [vmem:[%s1321_s30 + $0x8] sm:$0xff]  ;;  %v1329_v5 = vld [vmem:[%s1321_s30 + $0x10] sm:$0xff]  ;;  %629 = vmatprep.subr.bf16.mxu0 %v1265_v33 }
   0xf   : > { %v290_v2 = vld [vmem:[%s1321_s30 + $0x20] sm:$0xff]  ;;  %v305_v3 = vsel %vm304_vm0, %v287_v1, 0.0  ;;  %v291_v4 = vld [vmem:[%s1321_s30 + $0x28] sm:$0xff]  ;;  %v1332_v6 = vld [vmem:[%s1321_s30 + $0x18] sm:$0xff] }
  0x10   : > { %v306_v7 = vadd.f32 %v305_v3, %v286_v0  ;;  %v313_v8 = vsel %vm304_vm0, %v291_v4, 0.0  ;;  %v309_v9 = vsel %vm304_vm0, %v1332_v6, 0.0  ;;  %v1338_v10 = vld [vmem:[%s1321_s30 + $0x30] sm:$0xff]  ;;  %v1341_v11 = vld [vmem:[%s1321_s30 + $0x38] sm:$0xff]  ;;  %v1346_v14 = vld [vmem:[%s1321_s30 + $0x48] sm:$0xff] }
  0x11   : > { %v314_v12 = vadd.f32 %v313_v8, %v290_v2  ;;  %v317_v13 = vsel %vm304_vm0, %v1341_v11, 0.0  ;;  %v1349_v15 = vld [vmem:[%s1321_s30 + $0x58] sm:$0xff]  ;;  %v310_v16 = vadd.f32 %v309_v9, %v1329_v5  ;;  %v1353_v17 = vld [vmem:[%s1321_s30 + $0x40] sm:$0xff]  ;;  %v321_v18 = vsel %vm304_vm0, %v1346_v14, 0.0  ;;  %v1358_v19 = vld [vmem:[%s1321_s30 + $0x50] sm:$0xff]  ;;  %630 = vmatpush1.bf16.msra.mxu0 %v1190_v34 }
  0x12   : > { %307 = vadd.xlane.f32.xlu0 %v306_v7  ;;  %v1361_v20 = vld [vmem:[%s1321_s30 + $0x68] sm:$0xff]  ;;  %v318_v21 = vadd.f32 %v317_v13, %v1338_v10  ;;  %v325_v22 = vsel %vm304_vm0, %v1349_v15, 0.0  ;;  %v1367_v23 = vld [vmem:[%s1321_s30 + $0x78] sm:$0xff]  ;;  %v1374_v26 = vld [vmem:[%s1321_s30 + $0x60] sm:$0xff]  ;;  %v322_v27 = vadd.f32 %v321_v18, %v1353_v17  ;;  %631 = vmatprep.subr.bf16.mxu0 %v1265_v33 }
  0x13   : > { %315 = vadd.xlane.f32.xlu1 %v314_v12  ;;  %v329_v24 = vsel %vm304_vm0, %v1361_v20, 0.0  ;;  %v333_v25 = vsel %vm304_vm0, %v1367_v23, 0.0  ;;  %v1378_v28 = vld [vmem:[%s1321_s30 + $0x70] sm:$0xff]  ;;  %v326_v29 = vadd.f32 %v325_v22, %v1358_v19 }
  0x14   : > { %v330_v30 = vadd.f32 %v329_v24, %v1374_v26  ;;  %v334_v31 = vadd.f32 %v333_v25, %v1378_v28 }
  0x15   : > { %632 = vmatpush1.bf16.msra.mxu0 %v1191_v35 }
  0x16   : > { %311 = vadd.xlane.f32.xlu0 %v310_v16  ;;  %633 = vmatprep.subr.bf16.mxu0 %v1265_v33 }
  0x17   : > { %319 = vadd.xlane.f32.xlu1 %v318_v21 }
  0x19   : > { %634 = vmatpush1.bf16.msra.mxu0 %v1192_v36 }
  0x1a   : > { %323 = vadd.xlane.f32.xlu0 %v322_v27  ;;  %635 = vmatprep.subr.bf16.mxu0 %v1265_v33 }
  0x1b   : > { %327 = vadd.xlane.f32.xlu1 %v326_v29 }
  0x1e   : > { %331 = vadd.xlane.f32.xlu0 %v330_v30 }
  0x1f   : > { %335 = vadd.xlane.f32.xlu1 %v334_v31 }
  0x9b   : > { %v308_v37 = vpop.xlane.xlu0 %307 }
  0x9c   : > { %v338_v38 = vmul.f32 0.0052083335, %v308_v37  ;;  %v316_v39 = vpop.xlane.xlu1 %315 }
  0x9d   : > { %v340_v40 = vmul.f32 0.0052083335, %v316_v39  ;;  %v1194_v39 = vld [vmem:[%s1770_s3 + $0x10] sm:$0xff]  }
  0x9e   : > { %v1400_v41 = vsub.f32 %v286_v0, %v338_v38  ;;  %v1402_v42 = vsub.f32 %v287_v1, %v338_v38 }
  0x9f   : > { %v1404_v43 = vsub.f32 %v290_v2, %v340_v40  ;;  %v1406_v44 = vsub.f32 %v291_v4, %v340_v40  ;;  %v312_v45 = vpop.xlane.xlu0 %311  ;;  %v1195_v40 = vld [vmem:[%s1770_s3 + $0x8] sm:$0xff]  }
  0xa0   : > { %v339_v46 = vmul.f32 0.0052083335, %v312_v45  ;;  %v320_v47 = vpop.xlane.xlu1 %319  ;;  %v362_v48 = vmul.f32 %v1400_v41, %v1400_v41  ;;  %v363_v49 = vmul.f32 %v1402_v42, %v1402_v42  ;;  %v1196_v45 = vld [vmem:[%s1770_s3] sm:$0xff]  }
  0xa1   : > { %v341_v50 = vmul.f32 0.0052083335, %v320_v47  ;;  %v366_v51 = vmul.f32 %v1404_v43, %v1404_v43  ;;  %v367_v52 = vmul.f32 %v1406_v44, %v1406_v44  ;;  %v1198_v47 = vld [vmem:[%s1770_s3 + $0x50] sm:$0xff]  }
  0xa2   : > { %v1417_v53 = vsub.f32 %v1329_v5, %v339_v46  ;;  %v1420_v54 = vsub.f32 %v1332_v6, %v339_v46  ;;  %v378_v55 = vsel %vm304_vm0, %v363_v49, 0.0  ;;  %v1197_v46 = vld [vmem:[%s1770_s3 + $0x58] sm:$0xff]   ;;  %v1200_v49 = vld [vmem:[%s1770_s3 + $0x40] sm:$0xff]  }
  0xa3   : > { %v1424_v56 = vsub.f32 %v1338_v10, %v341_v50  ;;  %v1427_v57 = vsub.f32 %v1341_v11, %v341_v50  ;;  %v324_v58 = vpop.xlane.xlu0 %323  ;;  %v379_v59 = vadd.f32 %v378_v55, %v362_v48  ;;  %v386_v60 = vsel %vm304_vm0, %v367_v52, 0.0  ;;  %v1199_v48 = vld [vmem:[%s1770_s3 + $0x48] sm:$0xff]  }
  0xa4   : > { %v342_v61 = vmul.f32 0.0052083335, %v324_v58  ;;  %v328_v62 = vpop.xlane.xlu1 %327  ;;  %v364_v63 = vmul.f32 %v1417_v53, %v1417_v53  ;;  %v365_v0 = vmul.f32 %v1420_v54, %v1420_v54  ;;  %v387_v2 = vadd.f32 %v386_v60, %v366_v51 }
  0xa5   : > { %380 = vadd.xlane.f32.xlu0 %v379_v59  ;;  %v343_v1 = vmul.f32 0.0052083335, %v328_v62  ;;  %v368_v3 = vmul.f32 %v1424_v56, %v1424_v56  ;;  %v369_v4 = vmul.f32 %v1427_v57, %v1427_v57 }
  0xa6   : > { %v1439_v5 = vsub.f32 %v1353_v17, %v342_v61  ;;  %v1442_v6 = vsub.f32 %v1346_v14, %v342_v61  ;;  %v382_v7 = vsel %vm304_vm0, %v365_v0, 0.0  ;;  %v451_v61 = vlaneseq }
  0xa7   : > { %v1446_v8 = vsub.f32 %v1358_v19, %v343_v1  ;;  %v1449_v9 = vsub.f32 %v1349_v15, %v343_v1  ;;  %v332_v10 = vpop.xlane.xlu0 %331  ;;  %v383_v11 = vadd.f32 %v382_v7, %v364_v63  ;;  %v390_v12 = vsel %vm304_vm0, %v369_v4, 0.0 }
  0xa8   : > { %v344_v13 = vmul.f32 0.0052083335, %v332_v10  ;;  %v336_v16 = vpop.xlane.xlu1 %335  ;;  %v370_v17 = vmul.f32 %v1439_v5, %v1439_v5  ;;  %v371_v14 = vmul.f32 %v1442_v6, %v1442_v6  ;;  %v391_v19 = vadd.f32 %v390_v12, %v368_v3 }
  0xa9   : > { %388 = vadd.xlane.f32.xlu0 %v387_v2  ;;  %384 = vadd.xlane.f32.xlu1 %v383_v11  ;;  %v345_v18 = vmul.f32 0.0052083335, %v336_v16  ;;  %v372_v15 = vmul.f32 %v1446_v8, %v1446_v8  ;;  %v373_v21 = vmul.f32 %v1449_v9, %v1449_v9  ;;  %v452_v4 = vshrl.u32 %v451_v61, 7 }
  0xaa   : > { %v1461_v22 = vsub.f32 %v1374_v26, %v344_v13  ;;  %v1464_v24 = vsub.f32 %v1361_v20, %v344_v13  ;;  %v394_v25 = vsel %vm304_vm0, %v371_v14, 0.0 }
  0xab   : > { %v1468_v27 = vsub.f32 %v1378_v28, %v345_v18  ;;  %v1471_v29 = vsub.f32 %v1367_v23, %v345_v18  ;;  %v395_v30 = vadd.f32 %v394_v25, %v370_v17  ;;  %v398_v31 = vsel %vm304_vm0, %v373_v21, 0.0  ;;  %v1193_v23 = vld [vmem:[%s1770_s3 + $0x18] sm:$0xff]   ;;  %v302_v18 = vld [vmem:[%s1768_s1] sm:$0x3] }
  0xac   : > { %v374_v32 = vmul.f32 %v1461_v22, %v1461_v22  ;;  %v375_v26 = vmul.f32 %v1464_v24, %v1464_v24  ;;  %v399_v20 = vadd.f32 %v398_v31, %v372_v15  ;;  %636 = vmatpush1.bf16.msra.mxu0 %v1193_v23  ;;  %v453_v16 = vsub.s32 0, %v452_v4 }
  0xad   : > { %392 = vadd.xlane.f32.xlu1 %v391_v19  ;;  %396 = vadd.xlane.f32.xlu0 %v395_v30  ;;  %v376_v34 = vmul.f32 %v1468_v27, %v1468_v27  ;;  %v377_v28 = vmul.f32 %v1471_v29, %v1471_v29  ;;  %v457_v17 = vsub.s32 1, %v452_v4 }
  0xae   : > { %v402_v35 = vsel %vm304_vm0, %v375_v26, 0.0  ;;  %637 = vmatprep.subr.bf16.mxu0 %v1265_v33  ;;  %v1518_v30 = vrot.slane %v302_v18, %v453_v16  ;;  %v303_v26 = vld [vmem:[%s1769_s2] sm:$0x3] }
  0xaf   : > { %v403_v36 = vadd.f32 %v402_v35, %v374_v32  ;;  %v406_v37 = vsel %vm304_vm0, %v377_v28, 0.0  ;;  %v458_v31 = vrot.slane %v302_v18, %v457_v17  ;;  %v1525_v35 = vrot.slane %v303_v26, %v453_v16 }
  0xb0   : > { %v407_v38 = vadd.f32 %v406_v37, %v376_v34  ;;  %638 = vmatpush1.bf16.msra.mxu0 %v1194_v39 }
  0xb1   : > { %400 = vadd.xlane.f32.xlu1 %v399_v20  ;;  %404 = vadd.xlane.f32.xlu0 %v403_v36  ;;  %v485_v36 = vrot.slane %v303_v26, %v457_v17 }
  0xb2   : > { %639 = vmatprep.subr.bf16.mxu0 %v1265_v33 }
  0xb4   : > { %640 = vmatpush1.bf16.msra.mxu0 %v1195_v40 }
  0xb5   : > { %408 = vadd.xlane.f32.xlu1 %v407_v38  ;;  %641 = vmatprep.subr.bf16.mxu0 %v1265_v33 }
  0xb8   : > { %642 = vmatpush1.bf16.msra.mxu0 %v1196_v45 }
  0xb9   : > { %651 = vmatprep.subr.bf16.mxu0 %v1265_v33 }
  0xbc   : > { %652 = vmatpush2.bf16.msra.mxu0 %v1197_v46 }
  0xbd   : > { %653 = vmatprep.subr.bf16.mxu0 %v1265_v33 }
  0xc0   : > { %654 = vmatpush2.bf16.msra.mxu0 %v1198_v47 }
  0xc1   : > { %655 = vmatprep.subr.bf16.mxu0 %v1265_v33 }
  0xc4   : > { %656 = vmatpush2.bf16.msra.mxu0 %v1199_v48 }
  0xc5   : > { %657 = vmatprep.subr.bf16.mxu0 %v1265_v33 }
  0xc8   : > { %658 = vmatpush2.bf16.msra.mxu0 %v1200_v49 }
 0x12e   : > { %v381_v50 = vpop.xlane.xlu0 %380 }
 0x12f   : > { %v410_v51 = vmul.f32 0.0052083335, %v381_v50 }
 0x131   : > { %v418_v52 = vadd.f32 1e-05, %v410_v51 }
 0x132   : > { %v385_v55 = vpop.xlane.xlu1 %384  ;;  %v389_v58 = vpop.xlane.xlu0 %388 }
 0x133   : > { %1209 = vrsqrt.f32 %v418_v52  ;;  %v411_v59 = vmul.f32 0.0052083335, %v385_v55  ;;  %v412_v60 = vmul.f32 0.0052083335, %v389_v58 }
 0x135   : > { %v419_v62 = vadd.f32 1e-05, %v411_v59  ;;  %v420_v63 = vadd.f32 1e-05, %v412_v60 }
 0x136   : > { %v393_v0 = vpop.xlane.xlu1 %392  ;;  %v397_v1 = vpop.xlane.xlu0 %396 }
 0x137   : > { %1211 = vrsqrt.f32 %v419_v62  ;;  %v413_v2 = vmul.f32 0.0052083335, %v393_v0  ;;  %v414_v3 = vmul.f32 0.0052083335, %v397_v1 }
 0x138   : > { %1213 = vrsqrt.f32 %v420_v63 }
 0x139   : > { %v421_v33 = vadd.f32 1e-05, %v413_v2  ;;  %v422_v7 = vadd.f32 1e-05, %v414_v3 }
 0x13a   : > { %v401_v10 = vpop.xlane.xlu1 %400  ;;  %v405_v11 = vpop.xlane.xlu0 %404 }
 0x13b   : > { %1215 = vrsqrt.f32 %v421_v33  ;;  %v415_v12 = vmul.f32 0.0052083335, %v401_v10  ;;  %v416_v13 = vmul.f32 0.0052083335, %v405_v11 }
 0x13c   : > { %1217 = vrsqrt.f32 %v422_v7 }
 0x13d   : > { %v423_v14 = vadd.f32 1e-05, %v415_v12  ;;  %v424_v19 = vadd.f32 1e-05, %v416_v13 }
 0x13e   : > { %v409_v15 = vpop.xlane.xlu1 %408 }
 0x13f   : > { %1219 = vrsqrt.f32 %v423_v14  ;;  %v417_v21 = vmul.f32 0.0052083335, %v409_v15 }
 0x140   : > { %v1210_v25 = vpop.eup %1209  ;;  %1221 = vrsqrt.f32 %v424_v19 }
 0x141   : > { %v425_v32 = vadd.f32 1e-05, %v417_v21  ;;  %v435_v20 = vmul.f32 %v1210_v25, %v1402_v42  ;;  %v434_v34 = vmul.f32 %v1210_v25, %v1400_v41 }
 0x143   : > { %1223 = vrsqrt.f32 %v425_v32  ;;  %v462_v23 = vmul.f32 %v458_v31, %v435_v20  ;;  %v461_v37 = vmul.f32 %v1518_v30, %v434_v34 }
 0x144   : > { %v1212_v28 = vpop.eup %1211 }
 0x145   : > { %v1214_v38 = vpop.eup %1213  ;;  %v437_v39 = vmul.f32 %v1212_v28, %v1420_v54  ;;  %v436_v40 = vmul.f32 %v1212_v28, %v1417_v53  ;;  %v489_v47 = vadd.f32 %v485_v36, %v462_v23  ;;  %v488_v48 = vadd.f32 %v1525_v35, %v461_v37  ;;  %v1202_v23 = vld [vmem:[%s1772_s5 + $0x30] sm:$0xff]  }
 0x146   : > { %v439_v45 = vmul.f32 %v1214_v38, %v1406_v44  ;;  %v438_v53 = vmul.f32 %v1214_v38, %v1404_v43  ;;  %v1206_v37 = vld [vmem:[%s1772_s5 + $0x10] sm:$0xff]   ;;  %v1207_v38 = vld [vmem:[%s1772_s5 + $0x8] sm:$0xff]  }
 0x147   : > { %v464_v46 = vmul.f32 %v458_v31, %v437_v39  ;;  %v463_v42 = vmul.f32 %v1518_v30, %v436_v40  ;;  %v1208_v39 = vld [vmem:[%s1772_s5] sm:$0xff]  }
 0x148   : > { %v1216_v41 = vpop.eup %1215  ;;  %v466_v49 = vmul.f32 %v458_v31, %v439_v45  ;;  %v1588_v40 = vld [vmem:[%s1771_s4] ss:$0 sm:$0xff] }
 0x149   : > { %v1218_v50 = vpop.eup %1217  ;;  %v491_v51 = vadd.f32 %v485_v36, %v464_v46  ;;  %v490_v52 = vadd.f32 %v1525_v35, %v463_v42  ;;  %v441_v55 = vmul.f32 %v1216_v41, %v1427_v57  ;;  %v440_v54 = vmul.f32 %v1216_v41, %v1424_v56 }
 0x14a   : > { %v443_v60 = vmul.f32 %v1218_v50, %v1442_v6  ;;  %v493_v63 = vadd.f32 %v485_v36, %v466_v49  ;;  %v465_v57 = vmul.f32 %v1518_v30, %v438_v53 }
 0x14b   : > { %v505_v58 = vpack.c.bf16 %v491_v51, %v489_v47  ;;  %v504_v44 = vpack.c.bf16 %v490_v52, %v488_v48  ;;  %v468_v59 = vmul.f32 %v458_v31, %v441_v55  ;;  %v467_v62 = vmul.f32 %v1518_v30, %v440_v54 }
 0x14c   : > { %v1220_v61 = vpop.eup %1219  ;;  %v470_v43 = vmul.f32 %v458_v31, %v443_v60  ;;  %v492_v11 = vadd.f32 %v1525_v35, %v465_v57 }
 0x14d   : > { %1127 = vmatprep.mubr.msk.bf16.mxu0 %vm304_vm0, %v505_v58  ;;  %v495_v0 = vadd.f32 %v485_v36, %v468_v59  ;;  %v445_v1 = vmul.f32 %v1220_v61, %v1449_v9  ;;  %v1222_v56 = vpop.eup %1221  ;;  %v494_v33 = vadd.f32 %v1525_v35, %v467_v62  ;;  %v444_v6 = vmul.f32 %v1220_v61, %v1446_v8 }
 0x14e   : > { %660 = vmatmul.mubr.bf16.vlgmr.msra.gmra.mxu0 %v504_v44  ;;  %v442_v9 = vmul.f32 %v1218_v50, %v1439_v5  ;;  %v497_v12 = vadd.f32 %v485_v36, %v470_v43  ;;  %v447_v13 = vmul.f32 %v1222_v56, %v1464_v24  ;;  %v446_v24 = vmul.f32 %v1222_v56, %v1461_v22  ;;  %v1201_v22 = vld [vmem:[%s1772_s5 + $0x38] sm:$0xff]  }
 0x14f   : > { %v507_v2 = vpack.c.bf16 %v495_v0, %v493_v63  ;;  %v472_v3 = vmul.f32 %v458_v31, %v445_v1  ;;  %v506_v16 = vpack.c.bf16 %v494_v33, %v492_v11  ;;  %v471_v17 = vmul.f32 %v1518_v30, %v444_v6  ;;  %1155 = vmatprep.subr.bf16.mxu1 %v1201_v22 }
 0x150   : > { %v1224_v4 = vpop.eup %1223  ;;  %v469_v8 = vmul.f32 %v1518_v30, %v442_v9  ;;  %v474_v19 = vmul.f32 %v458_v31, %v447_v13  ;;  %v473_v34 = vmul.f32 %v1518_v30, %v446_v24  ;;  %1156 = vmatpush3.bf16.msra.mxu1 %v1201_v22 }
 0x151   : > { %1128 = vmatprep.mubr.msk.bf16.mxu0 %vm304_vm0, %v507_v2  ;;  %v499_v7 = vadd.f32 %v485_v36, %v472_v3  ;;  %v449_v10 = vmul.f32 %v1224_v4, %v1471_v29  ;;  %v498_v29 = vadd.f32 %v1525_v35, %v471_v17  ;;  %v448_v15 = vmul.f32 %v1224_v4, %v1468_v27 }
 0x152   : > { %v496_v5 = vadd.f32 %v1525_v35, %v469_v8  ;;  %v501_v25 = vadd.f32 %v485_v36, %v474_v19  ;;  %v500_v28 = vadd.f32 %v1525_v35, %v473_v34  ;;  %1157 = vmatprep.subr.bf16.mxu1 %v1202_v23 }
 0x153   : > { %v509_v14 = vpack.c.bf16 %v499_v7, %v497_v12  ;;  %v476_v18 = vmul.f32 %v458_v31, %v449_v10  ;;  %v475_v26 = vmul.f32 %v1518_v30, %v448_v15  ;;  %v1203_v30 = vld [vmem:[%s1772_s5 + $0x28] sm:$0xff]  }
 0x154   : > { %v508_v32 = vpack.c.bf16 %v498_v29, %v496_v5  ;;  %1158 = vmatpush3.bf16.msra.mxu1 %v1202_v23 }
 0x155   : > { %v503_v21 = vadd.f32 %v485_v36, %v476_v18  ;;  %v502_v31 = vadd.f32 %v1525_v35, %v475_v26  ;;  %1159 = vmatprep.subr.bf16.mxu1 %v1203_v30  ;;  %v1204_v35 = vld [vmem:[%s1772_s5 + $0x20] sm:$0xff]   ;;  %v1205_v36 = vld [vmem:[%s1772_s5 + $0x18] sm:$0xff]  }
 0x156   : > { %668 = vmatmul.mubr.bf16.gmra.mxu0 %v506_v16 }
 0x157   : > { %1129 = vmatprep.mubr.msk.bf16.mxu0 %vm304_vm0, %v509_v14  ;;  %v511_v20 = vpack.c.bf16 %v503_v21, %v501_v25  ;;  %v510_v27 = vpack.c.bf16 %v502_v31, %v500_v28 }
 0x158   : > { %1160 = vmatpush3.bf16.msra.mxu1 %v1203_v30 }
 0x159   : > { %1161 = vmatprep.subr.bf16.mxu1 %v1204_v35 }
 0x15c   : > { %1162 = vmatpush3.bf16.msra.mxu1 %v1204_v35 }
 0x15d   : > { %1163 = vmatprep.subr.bf16.mxu1 %v1205_v36 }
 0x15e   : > { %676 = vmatmul.mubr.bf16.gmra.mxu0 %v508_v32 }
 0x15f   : > { %1130 = vmatprep.mubr.msk.bf16.mxu0 %vm304_vm0, %v511_v20 }
 0x160   : > { %1164 = vmatpush3.bf16.msra.mxu1 %v1205_v36 }
 0x161   : > { %1165 = vmatprep.subr.bf16.mxu1 %v1206_v37 }
 0x164   : > { %1166 = vmatpush3.bf16.msra.mxu1 %v1206_v37 }
 0x165   : > { %1167 = vmatprep.subr.bf16.mxu1 %v1207_v38 }
 0x166   : > { %684 = vmatmul.mubr.bf16.gmra.mxu0 %v510_v27 }
 0x168   : > { %1168 = vmatpush3.bf16.msra.mxu1 %v1207_v38 }
 0x169   : > { %1169 = vmatprep.subr.bf16.mxu1 %v1208_v39 }
 0x16c   : > { %1170 = vmatpush3.bf16.msra.mxu1 %v1208_v39 }
 0x20e   : > { %v661_v45 = vpop.f32.mrf.mxu0 }
 0x20f   : > { %v662_v46 = vadd.f32 %v1588_v40, %v661_v45 }
 0x210   : > { %v663_v42 = vpop.f32.mrf.mxu0 }
 0x211   : > { %v1591_v41 = vmul.f32 0.70710677, %v662_v46  ;;  %v1637_v20 = vmul.f32 0.5, %v662_v46 }
 0x212   : > { %v664_v47 = vpop.f32.mrf.mxu0 }
 0x213   : > { %v724_v48 = vand.u32 2147483647, %v1591_v41  ;;  %v1595_v49 = vadd.f32 %v1588_v40, %v664_v47  ;;  %vm708_vm1 = vcmp.lt.f32.partialorder %v1591_v41, 0.0 }
 0x214   : > { %v666_v50 = vpop.f32.mrf.mxu0 }
 0x215   : > { %v732_v51 = vmul.f32 0.3275911, %v724_v48  ;;  %v1598_v52 = vmul.f32 0.70710677, %v1595_v49  ;;  %v828_v7 = vsub.f32 0.0, %v724_v48  ;;  %v1653_v47 = vmul.f32 0.5, %v1595_v49 }
 0x216   : > { %v669_v55 = vpop.f32.mrf.mxu0  ;;  %v1266_v50 = vmov 1.0  }
 0x217   : > { %v740_v54 = vadd.f32 1.0, %v732_v51  ;;  %v725_v53 = vand.u32 2147483647, %v1598_v52  ;;  %v1602_v58 = vadd.f32 %v1588_v40, %v669_v55  ;;  %v836_v19 = vmul.f32 %v828_v7, %v724_v48 }
 0x218   : > { %v671_v44 = vpop.f32.mrf.mxu0  ;;  %v1658_v51 = vsel %vm708_vm1, -1.0, %v1266_v50  ;;  %vm709_vm2 = vcmp.lt.f32.partialorder %v1598_v52, 0.0 }
 0x219   : > { %1225 = vrcp.f32 %v740_v54  ;;  %v733_v59 = vmul.f32 0.3275911, %v725_v53  ;;  %v1605_v60 = vmul.f32 0.70710677, %v1602_v58  ;;  %v829_v9 = vsub.f32 0.0, %v725_v53 }
 0x21a   : > { %v672_v61 = vpop.f32.mrf.mxu0  ;;  %v844_v28 = vmul.f32 1.442695, %v836_v19 }
 0x21b   : > { %v741_v62 = vadd.f32 1.0, %v733_v59  ;;  %v1608_v63 = vadd.f32 %v1588_v40, %v672_v61  ;;  %v726_v0 = vand.u32 2147483647, %v1605_v60  ;;  %v837_v15 = vmul.f32 %v829_v9, %v725_v53 }
 0x21c   : > { %v674_v1 = vpop.f32.mrf.mxu0  ;;  %vm710_vm3 = vcmp.lt.f32.partialorder %v1605_v60, 0.0 }
 0x21d   : > { %1227 = vrcp.f32 %v741_v62  ;;  %v734_v57 = vmul.f32 0.3275911, %v726_v0  ;;  %v1612_v56 = vmul.f32 0.70710677, %v1608_v63  ;;  %v830_v21 = vsub.f32 0.0, %v726_v0 }
 0x21e   : > { %v677_v2 = vpop.f32.mrf.mxu0  ;;  %v846_v30 = vmul.f32 1.442695, %v837_v15 }
 0x21f   : > { %v1615_v43 = vadd.f32 %v1588_v40, %v677_v2  ;;  %v742_v3 = vadd.f32 1.0, %v734_v57  ;;  %v727_v4 = vand.u32 2147483647, %v1612_v56  ;;  %v838_v35 = vmul.f32 %v830_v21, %v726_v0 }
 0x220   : > { %v679_v33 = vpop.f32.mrf.mxu0  ;;  %vm711_vm4 = vcmp.lt.f32.partialorder %v1612_v56, 0.0 }
 0x221   : > { %v1619_v6 = vmul.f32 0.70710677, %v1615_v43  ;;  %1229 = vrcp.f32 %v742_v3  ;;  %v735_v10 = vmul.f32 0.3275911, %v727_v4  ;;  %v831_v38 = vsub.f32 0.0, %v727_v4 }
 0x222   : > { %v680_v11 = vpop.f32.mrf.mxu0  ;;  %v848_v53 = vmul.f32 1.442695, %v838_v35  ;;  %v1676_v33 = vsel %vm709_vm2, -1.0, %v1266_v50 }
 0x223   : > { %v728_v12 = vand.u32 2147483647, %v1619_v6  ;;  %v1623_v13 = vadd.f32 %v1588_v40, %v680_v11  ;;  %v743_v16 = vadd.f32 1.0, %v735_v10  ;;  %v839_v61 = vmul.f32 %v831_v38, %v727_v4 }
 0x224   : > { %v682_v17 = vpop.f32.mrf.mxu0  ;;  %vm712_vm5 = vcmp.lt.f32.partialorder %v1619_v6, 0.0 }
 0x225   : > { %v736_v14 = vmul.f32 0.3275911, %v728_v12  ;;  %v1626_v18 = vmul.f32 0.70710677, %v1623_v13  ;;  %1231 = vrcp.f32 %v743_v16  ;;  %v832_v48 = vsub.f32 0.0, %v728_v12 }
 0x226   : > { %v1628_v8 = vpop.eup %1225  ;;  %v685_v29 = vpop.f32.mrf.mxu0 }
 0x227   : > { %v744_v5 = vadd.f32 1.0, %v736_v14  ;;  %v1631_v24 = vand.u32 2147483647, %v1626_v18  ;;  %v1634_v25 = vadd.f32 %v1588_v40, %v685_v29  ;;  %v756_v26 = vmul.f32 1.0614054, %v1628_v8 }
 0x228   : > { %v687_v32 = vpop.f32.mrf.mxu0  ;;  %v840_v41 = vmul.f32 %v832_v48, %v728_v12  ;;  %v850_v12 = vmul.f32 1.442695, %v839_v61  ;;  %vm713_vm6 = vcmp.lt.f32.partialorder %v1626_v18, 0.0  ;;  %v696_v18 = vmul.f32 0.5, %v1615_v43 }
 0x229   : > { %1233 = vrcp.f32 %v744_v5  ;;  %v737_v34 = vmul.f32 0.3275911, %v1631_v24  ;;  %v1644_v27 = vmul.f32 0.70710677, %v1634_v25  ;;  %v764_v23 = vadd.f32 -1.4531521, %v756_v26 }
 0x22a   : > { %v1641_v31 = vpop.eup %1227  ;;  %v688_v22 = vpop.f32.mrf.mxu0  ;;  %v833_v3 = vsub.f32 0.0, %v1631_v24  ;;  %v852_v17 = vmul.f32 1.442695, %v840_v41  ;;  %v1692_v26 = vsel %vm710_vm3, -1.0, %v1266_v50 }
 0x22b   : > { %v745_v36 = vadd.f32 1.0, %v737_v34  ;;  %v1647_v37 = vadd.f32 %v1588_v40, %v688_v22  ;;  %v730_v39 = vand.u32 2147483647, %v1644_v27  ;;  %v757_v46 = vmul.f32 1.0614054, %v1641_v31 }
 0x22c   : > { %v690_v45 = vpop.f32.mrf.mxu0  ;;  %v772_v42 = vmul.f32 %v1628_v8, %v764_v23  ;;  %v841_v5 = vmul.f32 %v833_v3, %v1631_v24  ;;  %vm714_vm7 = vcmp.lt.f32.partialorder %v1644_v27, 0.0 }
 0x22d   : > { %1235 = vrcp.f32 %v745_v36  ;;  %v738_v40 = vmul.f32 0.3275911, %v730_v39  ;;  %v1662_v55 = vmul.f32 0.70710677, %v1647_v37  ;;  %v765_v49 = vadd.f32 -1.4531521, %v757_v46 }
 0x22e   : > { %1237 = vpow2.f32 %v844_v28  ;;  %v1664_v54 = vpop.eup %1229  ;;  %v780_v44 = vadd.f32 1.4214138, %v772_v42  ;;  %v834_v14 = vsub.f32 0.0, %v730_v39  ;;  %v854_v46 = vmul.f32 1.442695, %v841_v5 }
 0x22f   : > { %1239 = vpow2.f32 %v846_v30  ;;  %v758_v59 = vmul.f32 1.0614054, %v1664_v54  ;;  %v746_v62 = vadd.f32 1.0, %v738_v40  ;;  %v1668_v0 = vand.u32 2147483647, %v1662_v55 }
 0x230   : > { %v773_v1 = vmul.f32 %v1641_v31, %v765_v49  ;;  %v788_v57 = vmul.f32 %v1628_v8, %v780_v44  ;;  %v842_v24 = vmul.f32 %v834_v14, %v730_v39  ;;  %vm715_vm8 = vcmp.lt.f32.partialorder %v1662_v55, 0.0  ;;  %v1131_v55 = vld [vmem:[%s1773_s6] ss:$0 sm:$0xff] }
 0x231   : > { %v766_v2 = vadd.f32 -1.4531521, %v758_v59  ;;  %1241 = vrcp.f32 %v746_v62  ;;  %v739_v4 = vmul.f32 0.3275911, %v1668_v0  ;;  %v835_v49 = vsub.f32 0.0, %v1668_v0 }
 0x232   : > { %v1678_v7 = vpop.eup %1231  ;;  %1243 = vpow2.f32 %v848_v53  ;;  %v781_v10 = vadd.f32 1.4214138, %v773_v1  ;;  %v796_v16 = vadd.f32 -0.28449672, %v788_v57  ;;  %v856_v57 = vmul.f32 1.442695, %v842_v24 }
 0x233   : > { %v774_v11 = vmul.f32 %v1664_v54, %v766_v2  ;;  %v759_v9 = vmul.f32 1.0614054, %v1678_v7  ;;  %v747_v19 = vadd.f32 1.0, %v739_v4 }
 0x234   : > { %v789_v52 = vmul.f32 %v1641_v31, %v781_v10  ;;  %v804_v32 = vmul.f32 %v1628_v8, %v796_v16 }
 0x235   : > { %v782_v15 = vadd.f32 1.4214138, %v774_v11  ;;  %v767_v21 = vadd.f32 -1.4531521, %v759_v9  ;;  %1245 = vrcp.f32 %v747_v19 }
 0x236   : > { %v1685_v29 = vpop.eup %1233  ;;  %v797_v28 = vadd.f32 -0.28449672, %v789_v52  ;;  %1247 = vpow2.f32 %v850_v12  ;;  %v812_v30 = vadd.f32 0.2548296, %v804_v32  ;;  %v843_v12 = vmul.f32 %v835_v49, %v1668_v0 }
 0x237   : > { %v760_v34 = vmul.f32 1.0614054, %v1685_v29  ;;  %v790_v22 = vmul.f32 %v1664_v54, %v782_v15  ;;  %v775_v23 = vmul.f32 %v1678_v7, %v767_v21  ;;  %1249 = vpow2.f32 %v852_v17 }
 0x238   : > { %v805_v36 = vmul.f32 %v1641_v31, %v797_v28  ;;  %v820_v42 = vmul.f32 %v1628_v8, %v812_v30  ;;  %1251 = vpow2.f32 %v854_v46  ;;  %v719_v15 = vsel %vm711_vm4, -1.0, %v1266_v50 }
 0x239   : > { %v768_v35 = vadd.f32 -1.4531521, %v760_v34  ;;  %v798_v60 = vadd.f32 -0.28449672, %v790_v22  ;;  %v783_v45 = vadd.f32 1.4214138, %v775_v23  ;;  %1253 = vpow2.f32 %v856_v57 }
 0x23a   : > { %v1698_v38 = vpop.eup %1235  ;;  %v813_v44 = vadd.f32 0.2548296, %v805_v36  ;;  %v858_v23 = vmul.f32 1.442695, %v843_v12 }
 0x23b   : > { %v1238_v48 = vpop.eup %1237  ;;  %v776_v40 = vmul.f32 %v1685_v29, %v768_v35  ;;  %v761_v53 = vmul.f32 1.0614054, %v1698_v38  ;;  %v806_v59 = vmul.f32 %v1664_v54, %v798_v60  ;;  %v791_v39 = vmul.f32 %v1678_v7, %v783_v45 }
 0x23c   : > { %v860_v61 = vmul.f32 %v1238_v48, %v820_v42  ;;  %v1240_v62 = vpop.eup %1239  ;;  %v821_v8 = vmul.f32 %v1641_v31, %v813_v44  ;;  %1255 = vpow2.f32 %v858_v23  ;;  %v697_v23 = vmul.f32 0.5, %v1623_v13 }
 0x23d   : > { %v784_v41 = vadd.f32 1.4214138, %v776_v40  ;;  %v769_v1 = vadd.f32 -1.4531521, %v761_v53  ;;  %v814_v2 = vadd.f32 0.2548296, %v806_v59 }
 0x23e   : > { %v799_v3 = vadd.f32 -0.28449672, %v791_v39  ;;  %v868_v4 = vsub.f32 1.0, %v860_v61  ;;  %v1708_v10 = vpop.eup %1241  ;;  %v861_v16 = vmul.f32 %v1240_v62, %v821_v8  ;;  %v723_v13 = vsel %vm715_vm8, -1.0, %v1266_v50 }
 0x23f   : > { %v792_v11 = vmul.f32 %v1685_v29, %v784_v41  ;;  %v777_v9 = vmul.f32 %v1698_v38, %v769_v1  ;;  %v1244_v17 = vpop.eup %1243  ;;  %v822_v14 = vmul.f32 %v1664_v54, %v814_v2  ;;  %v762_v31 = vmul.f32 1.0614054, %v1708_v10 }
 0x240   : > { %v807_v19 = vmul.f32 %v1678_v7, %v799_v3  ;;  %v876_v52 = vmul.f32 %v868_v4, %v1658_v51  ;;  %v869_v32 = vsub.f32 1.0, %v861_v16 }
 0x241   : > { %v800_v21 = vadd.f32 -0.28449672, %v792_v11  ;;  %v785_v5 = vadd.f32 1.4214138, %v777_v9  ;;  %v862_v34 = vmul.f32 %v1244_v17, %v822_v14  ;;  %v770_v0 = vadd.f32 -1.4531521, %v762_v31 }
 0x242   : > { %v815_v28 = vadd.f32 0.2548296, %v807_v19  ;;  %v877_v30 = vmul.f32 %v869_v32, %v1676_v33  ;;  %v1723_v35 = vpop.eup %1245  ;;  %v884_v36 = vadd.f32 1.0, %v876_v52  ;;  %v694_v11 = vmul.f32 0.5, %v1602_v58 }
 0x243   : > { %v808_v22 = vmul.f32 %v1685_v29, %v800_v21  ;;  %v793_v54 = vmul.f32 %v1698_v38, %v785_v5  ;;  %v870_v51 = vsub.f32 1.0, %v862_v34  ;;  %v778_v24 = vmul.f32 %v1708_v10, %v770_v0  ;;  %v1248_v60 = vpop.eup %1247 }
 0x244   : > { %v823_v56 = vmul.f32 %v1678_v7, %v815_v28  ;;  %v763_v42 = vmul.f32 1.0614054, %v1723_v35  ;;  %v1250_v48 = vpop.eup %1249  ;;  %v885_v44 = vadd.f32 1.0, %v877_v30  ;;  %v892_v62 = vmul.f32 %v884_v36, %v1637_v20 }
 0x245   : > { %v816_v45 = vadd.f32 0.2548296, %v808_v22  ;;  %v801_v46 = vadd.f32 -0.28449672, %v793_v54  ;;  %v878_v40 = vmul.f32 %v870_v51, %v1692_v26  ;;  %v786_v49 = vadd.f32 1.4214138, %v778_v24 }
 0x246   : > { %v863_v53 = vmul.f32 %v1248_v60, %v823_v56  ;;  %v771_v59 = vadd.f32 -1.4531521, %v763_v42  ;;  %v893_v41 = vmul.f32 %v885_v44, %v1653_v47  ;;  %v695_v20 = vmul.f32 0.5, %v1608_v63 }
 0x247   : > { %v824_v33 = vmul.f32 %v1685_v29, %v816_v45  ;;  %v809_v7 = vmul.f32 %v1698_v38, %v801_v46  ;;  %v794_v61 = vmul.f32 %v1708_v10, %v786_v49  ;;  %v886_v8 = vadd.f32 1.0, %v878_v40  ;;  %v1252_v29 = vpop.eup %1251 }
 0x248   : > { %v871_v39 = vsub.f32 1.0, %v863_v53  ;;  %v779_v26 = vmul.f32 %v1723_v35, %v771_v59  ;;  %v900_v4 = vpack.c.bf16 %v893_v41, %v892_v62  ;;  %v720_v47 = vsel %vm712_vm5, -1.0, %v1266_v50  ;;  %v1254_v21 = vpop.eup %1253 }
 0x249   : > { %v864_v1 = vmul.f32 %v1250_v48, %v824_v33  ;;  %v817_v57 = vadd.f32 0.2548296, %v809_v7  ;;  %v802_v3 = vadd.f32 -0.28449672, %v794_v61  ;;  %v894_v52 = vmul.f32 %v886_v8, %v694_v11  ;;  %v1256_v60 = vpop.eup %1255 }
 0x24a   : > { %v879_v2 = vmul.f32 %v871_v39, %v719_v15  ;;  %v787_v16 = vadd.f32 1.4214138, %v779_v26  ;;  %1171 = vmatprep.mubr.bf16.mxu1 %v900_v4  ;;  %v721_v32 = vsel %vm713_vm6, -1.0, %v1266_v50  ;;  %v722_v45 = vsel %vm714_vm7, -1.0, %v1266_v50 }
 0x24b   : > { %v872_v9 = vsub.f32 1.0, %v864_v1  ;;  %v825_v12 = vmul.f32 %v1698_v38, %v817_v57  ;;  %v810_v14 = vmul.f32 %v1708_v10, %v802_v3  ;;  %v698_v53 = vmul.f32 0.5, %v1634_v25 }
 0x24c   : > { %v887_v17 = vadd.f32 1.0, %v879_v2  ;;  %v795_v58 = vmul.f32 %v1723_v35, %v787_v16  ;;  %v699_v49 = vmul.f32 0.5, %v1647_v37 }
 0x24d   : > { %v880_v19 = vmul.f32 %v872_v9, %v720_v47  ;;  %v865_v31 = vmul.f32 %v1252_v29, %v825_v12  ;;  %v818_v38 = vadd.f32 0.2548296, %v810_v14 }
 0x24e   : > { %v895_v15 = vmul.f32 %v887_v17, %v695_v20  ;;  %v803_v63 = vadd.f32 -0.28449672, %v795_v58 }
 0x24f   : > { %v873_v5 = vsub.f32 1.0, %v865_v31  ;;  %v826_v6 = vmul.f32 %v1708_v10, %v818_v38  ;;  %v888_v28 = vadd.f32 1.0, %v880_v19 }
 0x250   : > { %v901_v34 = vpack.c.bf16 %v895_v15, %v894_v52  ;;  %v811_v22 = vmul.f32 %v1723_v35, %v803_v63 }
 0x251   : > { %v881_v0 = vmul.f32 %v873_v5, %v721_v32  ;;  %v866_v54 = vmul.f32 %v1254_v21, %v826_v6  ;;  %v896_v24 = vmul.f32 %v888_v28, %v696_v18 }
 0x252   : > { %1172 = vmatmul.mubr.bf16.vlgmr.msra.gmra.mxu1 %v901_v34  ;;  %v819_v51 = vadd.f32 0.2548296, %v811_v22 }
 0x253   : > { %v889_v30 = vadd.f32 1.0, %v881_v0  ;;  %v874_v56 = vsub.f32 1.0, %v866_v54 }
 0x254   : > { %v827_v10 = vmul.f32 %v1723_v35, %v819_v51 }
 0x255   : > { %v897_v36 = vmul.f32 %v889_v30, %v697_v23  ;;  %v882_v46 = vmul.f32 %v874_v56, %v722_v45 }
 0x256   : > { %v867_v43 = vmul.f32 %v1256_v60, %v827_v10 }
 0x257   : > { %v902_v42 = vpack.c.bf16 %v897_v36, %v896_v24  ;;  %v890_v27 = vadd.f32 1.0, %v882_v46 }
 0x258   : > { %v875_v48 = vsub.f32 1.0, %v867_v43 }
 0x259   : > { %1175 = vmatprep.mubr.bf16.mxu1 %v902_v42  ;;  %v898_v44 = vmul.f32 %v890_v27, %v698_v53 }
 0x25a   : > { %v883_v40 = vmul.f32 %v875_v48, %v723_v13 }
 0x25c   : > { %v891_v35 = vadd.f32 1.0, %v883_v40 }
 0x25e   : > { %v899_v33 = vmul.f32 %v891_v35, %v699_v49 }
 0x260   : > { %v903_v7 = vpack.c.bf16 %v899_v33, %v898_v44 }
 0x262   : > { %1176 = vmatmul.mubr.bf16.gmra.mxu1 %v903_v7 }
 0x312   : > { %v1173_v50 = vpop.f32.mrf.mxu1 }
 0x313   : > { %v1018_v59 = vadd.f32 %v1173_v50, %v1131_v55 }
 0x314   : > { %v1009_v39 = vpop.f32.mrf.mxu1 }
 0x315   : > { %1042 = vst [vmem:[%s283_s17 + $0x10] sm:$0xff] %v1018_v59  ;;  %v1010_v25 = vadd.f32 %v1131_v55, %v1009_v39 }
 0x316   : > { %v1174_v37 = vpop.f32.mrf.mxu1 }
 0x317   : > { %1040 = vst [vmem:[%s283_s17] sm:$0xff] %v1010_v25  ;;  %v1021_v61 = vadd.f32 %v1174_v37, %v1131_v55 }
 0x318   : > { %v1012_v62 = vpop.f32.mrf.mxu1 }
 0x319   : > { %1043 = vst [vmem:[%s283_s17 + $0x18] sm:$0xff] %v1021_v61  ;;  %v1013_v41 = vadd.f32 %v1131_v55, %v1012_v62 }
 0x31b   : > { %1041 = vst [vmem:[%s283_s17 + $0x8] sm:$0xff] %v1013_v41 }
 0x322   : > { %v1177_v1 = vpop.f32.mrf.mxu1 }
 0x323   : > { %v1034_v57 = vadd.f32 %v1177_v1, %v1131_v55 }
 0x324   : > { %v1025_v26 = vpop.f32.mrf.mxu1 }
 0x325   : > { %1046 = vst [vmem:[%s283_s17 + $0x30] sm:$0xff] %v1034_v57  ;;  %v1026_v8 = vadd.f32 %v1131_v55, %v1025_v26 }
 0x326   : > { %v1178_v2 = vpop.f32.mrf.mxu1 }
 0x327   : > { %1044 = vst [vmem:[%s283_s17 + $0x20] sm:$0xff] %v1026_v8  ;;  %v1037_v3 = vadd.f32 %v1178_v2, %v1131_v55 }
 0x328   : > { %v1028_v4 = vpop.f32.mrf.mxu1 }
 0x329   : > { %1047 = vst [vmem:[%s283_s17 + $0x38] sm:$0xff] %v1037_v3  ;;  %v1029_v29 = vadd.f32 %v1131_v55, %v1028_v4 }
 0x32b   : > { %1045 = vst [vmem:[%s283_s17 + $0x28] sm:$0xff] %v1029_v29 }
 0x32c PF: > { %s17_s24 = sadd.s32 1, %s1263_s24  }
 0x32d   : > { %p14_p4 = scmp.ge.s32.totalorder %s17_s24, 4  }
 0x32f   :  { %16 = sbr.rel (!%p14_p4) target bundleno = 1 (0x1), region = 78 }

// kernel: token_transformer_forward.8
= control target key start
LH: loop header
LB: loop body
LE: loop exit
PB: predicated region body
PF: predicated region fallthrough
CT: control target
= control target key end

     0   :  { %s947_s24 = smov 0   ;;  %s1034_s0 = inlined_call_operand.vmem [shape: f32[2,2,128], index: 0, kind: input, shape index: {}]   ;;  %s1035_s1 = inlined_call_operand.vmem [shape: f32[2,1,128], index: 1, kind: input, shape index: {}]   ;;  %s1036_s2 = inlined_call_operand.vmem [shape: f32[2,1,128], index: 2, kind: input, shape index: {}]   ;;  %s1037_s3 = inlined_call_operand.vmem [shape: bf16[2,128,128], index: 3, kind: input, shape index: {}]   ;;  %s1038_s4 = inlined_call_operand.vmem [shape: f32[2,1,128], index: 4, kind: input, shape index: {}]   ;;  %s1039_s5 = inlined_call_operand.vmem [shape: bf16[2,128,128], index: 5, kind: input, shape index: {}]   ;;  %s1040_s6 = inlined_call_operand.vmem [shape: f32[2,1,128], index: 6, kind: input, shape index: {}]   ;;  %s1041_s7 = inlined_call_operand.vmem [shape: f32[2,2,128], index: 7, kind: output, shape index: {}]  }
   0x1 LB: > { %s770_s25 = sadd.s32 4294967295, %s902_s24   ;;  %p774_p0 = scmp.ge.s32.totalorder %s902_s24, 1  ;;  %s902_s24 = sphi %s947_s24, %s17_s24  }
   0x2   : > { %p288_p1 = scmp.lt.s32.totalorder %s902_s24, 3 }
   0x4   : > { %p289_p2 = pnand %p774_p0, %p288_p1 }
   0x5   : > { %p340_p3 = scmp.lt.s32.totalorder (!%p289_p2), %s770_s25, 1 }
   0x6   : > { %292 = sbr.rel (%p289_p2) target bundleno = 772 (0x304), region = 48 }
   0xb   : > { %s1043_s25 = smov (!%p340_p3, %s770_s25), 1  ;;  %vm374_vm0 = vcmask 1041408   ;;  %v904_v3 = vmov 0.0   ;;  %v379_v5 = vlaneseq  ;;  %vm905_vm2 = vmmov 0  }
   0xc   : > { %s775_s26 = sshll.u32 %s1043_s25, 1  ;;  %s803_s27 = sshll.u32 %s1043_s25, 6  ;;  %823 = vmatprep.subr.bf16.mxu0 %v904_v3  ;;  %843 = vmatprep.subr.bf16.mxu1 %v904_v3  ;;  %v906_v63 = vmov 1.0  }
   0xd   : > { %s343_s30 = scalar_lea.vmem %s1034_s0, %s775_s26  ;;  %s967_s10 = scalar_lea.vmem %s1037_s3, %s803_s27  ;;  %v380_v6 = vand.u32 127, %v379_v5  ;;  %839 = vmatprep.mubr.msk.bf16.mxu0 %vm905_vm2, %v904_v3  ;;  %859 = vmatprep.mubr.msk.bf16.mxu1 %vm905_vm2, %v904_v3 }
   0xe   : > { %v371_v0 = vld [vmem:[%s343_s30] sm:$0x3]  ;;  %s973_s13 = scalar_lea.vmem %s1039_s5, %s803_s27  ;;  %v874_v2 = vld [vmem:[%s967_s10 + $0x38] sm:$0xff]   ;;  %v875_v4 = vld [vmem:[%s967_s10 + $0x30] sm:$0xff]   ;;  %s346_s16 = scalar_lea.vmem %s1035_s1, %s1043_s25 }
   0xf   : > { %v375_v1 = vsel %vm374_vm0, %v371_v0, 0.0  ;;  %824 = vmatpush3.bf16.msra.mxu0 %v874_v2  ;;  %vm381_vm1 = vcmp.lt.s32.totalorder %v380_v6, 96  ;;  %v876_v13 = vld [vmem:[%s967_s10 + $0x28] sm:$0xff]   ;;  %v877_v14 = vld [vmem:[%s967_s10 + $0x20] sm:$0xff]   ;;  %v878_v15 = vld [vmem:[%s967_s10 + $0x18] sm:$0xff]   ;;  %s349_s19 = scalar_lea.vmem %s1036_s2, %s1043_s25  ;;  %s357_s22 = scalar_lea.vmem %s1038_s4, %s1043_s25 }
  0x10   : > { %376 = vadd.xlane.f32.xlu0 %v375_v1  ;;  %825 = vmatprep.subr.bf16.mxu0 %v904_v3  ;;  %v879_v16 = vld [vmem:[%s967_s10 + $0x10] sm:$0xff]   ;;  %v880_v17 = vld [vmem:[%s967_s10 + $0x8] sm:$0xff]   ;;  %v881_v18 = vld [vmem:[%s967_s10] sm:$0xff]   ;;  %s365_s28 = scalar_lea.vmem %s1040_s6, %s1043_s25  ;;  %s369_s8 = scalar_lea.vmem %s1041_s7, %s775_s26 }
  0x11   : > { %v781_v23 = vld [vmem:[%s346_s16] ss:$0 sm:$0xff]  ;;  %v882_v29 = vld [vmem:[%s973_s13 + $0x38] sm:$0xff]   ;;  %v883_v30 = vld [vmem:[%s973_s13 + $0x30] sm:$0xff]  }
  0x12   : > { %v782_v25 = vld [vmem:[%s349_s19] ss:$0 sm:$0xff]  ;;  %844 = vmatpush3.bf16.msra.mxu1 %v882_v29  ;;  %v884_v31 = vld [vmem:[%s973_s13 + $0x28] sm:$0xff]   ;;  %v886_v33 = vld [vmem:[%s973_s13 + $0x18] sm:$0xff]  }
  0x13   : > { %826 = vmatpush3.bf16.msra.mxu0 %v875_v4  ;;  %845 = vmatprep.subr.bf16.mxu1 %v904_v3  ;;  %v885_v32 = vld [vmem:[%s973_s13 + $0x20] sm:$0xff]   ;;  %v887_v34 = vld [vmem:[%s973_s13 + $0x10] sm:$0xff]   ;;  %v888_v35 = vld [vmem:[%s973_s13 + $0x8] sm:$0xff]  }
  0x14   : > { %827 = vmatprep.subr.bf16.mxu0 %v904_v3  ;;  %v889_v36 = vld [vmem:[%s973_s13] sm:$0xff]  }
  0x15   : > { %v783_v37 = vld [vmem:[%s357_s22] ss:$0 sm:$0xff] }
  0x16   : > { %846 = vmatpush3.bf16.msra.mxu1 %v883_v30  ;;  %v792_v6 = vld [vmem:[%s365_s28] ss:$0 sm:$0xff] }
  0x17   : > { %828 = vmatpush3.bf16.msra.mxu0 %v876_v13  ;;  %847 = vmatprep.subr.bf16.mxu1 %v904_v3 }
  0x18   : > { %829 = vmatprep.subr.bf16.mxu0 %v904_v3 }
  0x1a   : > { %848 = vmatpush3.bf16.msra.mxu1 %v884_v31 }
  0x1b   : > { %830 = vmatpush3.bf16.msra.mxu0 %v877_v14  ;;  %849 = vmatprep.subr.bf16.mxu1 %v904_v3 }
  0x1c   : > { %831 = vmatprep.subr.bf16.mxu0 %v904_v3 }
  0x1e   : > { %850 = vmatpush3.bf16.msra.mxu1 %v885_v32 }
  0x1f   : > { %832 = vmatpush3.bf16.msra.mxu0 %v878_v15  ;;  %851 = vmatprep.subr.bf16.mxu1 %v904_v3 }
  0x20   : > { %833 = vmatprep.subr.bf16.mxu0 %v904_v3 }
  0x22   : > { %852 = vmatpush3.bf16.msra.mxu1 %v886_v33 }
  0x23   : > { %834 = vmatpush3.bf16.msra.mxu0 %v879_v16  ;;  %853 = vmatprep.subr.bf16.mxu1 %v904_v3 }
  0x24   : > { %835 = vmatprep.subr.bf16.mxu0 %v904_v3 }
  0x26   : > { %854 = vmatpush3.bf16.msra.mxu1 %v887_v34 }
  0x27   : > { %836 = vmatpush3.bf16.msra.mxu0 %v880_v17  ;;  %855 = vmatprep.subr.bf16.mxu1 %v904_v3 }
  0x28   : > { %837 = vmatprep.subr.bf16.mxu0 %v904_v3 }
  0x2a   : > { %856 = vmatpush3.bf16.msra.mxu1 %v888_v35 }
  0x2b   : > { %838 = vmatpush3.bf16.msra.mxu0 %v881_v18  ;;  %857 = vmatprep.subr.bf16.mxu1 %v904_v3 }
  0x2e   : > { %858 = vmatpush3.bf16.msra.mxu1 %v889_v36 }
  0x99   : > { %v377_v7 = vpop.xlane.xlu0 %376 }
  0x9a   : > { %v378_v8 = vmul.f32 0.010416667, %v377_v7 }
  0x9c   : > { %v382_v9 = vsub.f32 %v371_v0, %v378_v8 }
  0x9e   : > { %v383_v10 = vsel %vm381_vm1, %v382_v9, 0.0 }
  0x9f   : > { %v384_v11 = vmul.f32 %v383_v10, %v383_v10 }
  0xa1   : > { %v385_v12 = vsel %vm374_vm0, %v384_v11, 0.0 }
  0xa2   : > { %386 = vadd.xlane.f32.xlu0 %v385_v12 }
 0x12b   : > { %v387_v19 = vpop.xlane.xlu0 %386 }
 0x12c   : > { %v388_v20 = vmul.f32 0.010416667, %v387_v19 }
 0x12e   : > { %v389_v21 = vadd.f32 1e-05, %v388_v20 }
 0x130   : > { %890 = vrsqrt.f32 %v389_v21 }
 0x13d   : > { %v891_v22 = vpop.eup %890 }
 0x13e   : > { %v391_v24 = vmul.f32 %v891_v22, %v383_v10 }
 0x140   : > { %v398_v26 = vmul.f32 %v781_v23, %v391_v24 }
 0x142   : > { %v405_v27 = vadd.f32 %v782_v25, %v398_v26 }
 0x144   : > { %v406_v28 = vpack.c.bf16 %v405_v27, %v405_v27 }
 0x146   : > { %840 = vmatmul.mubr.bf16.vlgmr.msra.gmra.mxu0 %v406_v28 }
 0x206   : > { %v512_v38 = vpop.f32.mrf.mxu0 }
 0x207   : > { %v513_v39 = vadd.f32 %v783_v37, %v512_v38 }
 0x208   : > { %v841_v40 = vpop.f32.mrf.mxu0 }
 0x209   : > { %v519_v41 = vmul.f32 0.70710677, %v513_v39  ;;  %v518_v2 = vmul.f32 0.5, %v513_v39 }
 0x20a   : > { %v515_v42 = vpop.f32.mrf.mxu0 }
 0x20b   : > { %v522_v43 = vand.u32 2147483647, %v519_v41  ;;  %vm520_vm3 = vcmp.lt.f32.partialorder %v519_v41, 0.0 }
 0x20c   : > { %v842_v44 = vpop.f32.mrf.mxu0  ;;  %v521_v0 = vsel %vm520_vm3, -1.0, %v906_v63 }
 0x20d   : > { %v523_v45 = vmul.f32 0.3275911, %v522_v43  ;;  %v535_v47 = vsub.f32 0.0, %v522_v43 }
 0x20f   : > { %v524_v46 = vadd.f32 1.0, %v523_v45  ;;  %v536_v48 = vmul.f32 %v535_v47, %v522_v43 }
 0x211   : > { %892 = vrcp.f32 %v524_v46  ;;  %v537_v51 = vmul.f32 1.442695, %v536_v48 }
 0x213   : > { %894 = vpow2.f32 %v537_v51 }
 0x21e   : > { %v893_v49 = vpop.eup %892 }
 0x21f   : > { %v526_v50 = vmul.f32 1.0614054, %v893_v49 }
 0x220   : > { %v895_v60 = vpop.eup %894 }
 0x221   : > { %v527_v52 = vadd.f32 -1.4531521, %v526_v50 }
 0x223   : > { %v528_v53 = vmul.f32 %v893_v49, %v527_v52 }
 0x225   : > { %v529_v54 = vadd.f32 1.4214138, %v528_v53 }
 0x227   : > { %v530_v55 = vmul.f32 %v893_v49, %v529_v54 }
 0x229   : > { %v531_v56 = vadd.f32 -0.28449672, %v530_v55 }
 0x22b   : > { %v532_v57 = vmul.f32 %v893_v49, %v531_v56 }
 0x22d   : > { %v533_v58 = vadd.f32 0.2548296, %v532_v57 }
 0x22f   : > { %v534_v59 = vmul.f32 %v893_v49, %v533_v58 }
 0x231   : > { %v539_v61 = vmul.f32 %v895_v60, %v534_v59 }
 0x233   : > { %v540_v62 = vsub.f32 1.0, %v539_v61 }
 0x235   : > { %v541_v1 = vmul.f32 %v540_v62, %v521_v0 }
 0x237   : > { %v542_v3 = vadd.f32 1.0, %v541_v1 }
 0x239   : > { %v543_v4 = vmul.f32 %v542_v3, %v518_v2 }
 0x23b   : > { %v544_v5 = vpack.c.bf16 %v543_v4, %v543_v4 }
 0x23d   : > { %860 = vmatmul.mubr.bf16.vlgmr.msra.gmra.mxu1 %v544_v5 }
 0x2fd   : > { %v650_v7 = vpop.f32.mrf.mxu1 }
 0x2fe   : > { %v651_v8 = vadd.f32 %v792_v6, %v650_v7 }
 0x2ff   : > { %v861_v9 = vpop.f32.mrf.mxu1 }
 0x300   : > { %656 = vst [vmem:[%s369_s8] sm:$0x3] %v651_v8 }
 0x301   : > { %v653_v10 = vpop.f32.mrf.mxu1 }
 0x303   : > { %v862_v11 = vpop.f32.mrf.mxu1 }
 0x304 PF: > { %s17_s24 = sadd.s32 1, %s902_s24  }
 0x305   : > { %p14_p4 = scmp.ge.s32.totalorder %s17_s24, 4  }
 0x307   :  { %16 = sbr.rel (!%p14_p4) target bundleno = 1 (0x1), region = 96 }

// kernel: token_transformer_forward.7
= control target key start
LH: loop header
LB: loop body
LE: loop exit
PB: predicated region body
PF: predicated region fallthrough
CT: control target
= control target key end

     0   :  { %s1197_s24 = smov 0   ;;  %s1471_s0 = inlined_call_operand.vmem [shape: f32[128,128], index: 0, kind: input, shape index: {}]   ;;  %s1472_s1 = inlined_call_operand.vmem [shape: f32[1,128], index: 1, kind: input, shape index: {}]   ;;  %s1473_s2 = inlined_call_operand.vmem [shape: f32[1,128], index: 2, kind: input, shape index: {}]   ;;  %s1474_s3 = inlined_call_operand.vmem [shape: bf16[128,128], index: 3, kind: input, shape index: {}]   ;;  %s1475_s4 = inlined_call_operand.vmem [shape: f32[1,128], index: 4, kind: input, shape index: {}]   ;;  %s1476_s5 = inlined_call_operand.vmem [shape: bf16[128,128], index: 5, kind: input, shape index: {}]   ;;  %s1477_s6 = inlined_call_operand.vmem [shape: f32[1,128], index: 6, kind: input, shape index: {}]   ;;  %s1478_s7 = inlined_call_operand.vmem [shape: f32[128,128], index: 7, kind: output, shape index: {}]  }
   0x1 LB: > { %s972_s25 = sadd.s32 4294967295, %s1154_s24   ;;  %p976_p0 = scmp.ge.s32.totalorder %s1154_s24, 1  ;;  %s1154_s24 = sphi %s1197_s24, %s17_s24  }
   0x2   : > { %p238_p1 = scmp.lt.s32.totalorder %s1154_s24, 3 }
   0x4   : > { %p239_p2 = pnand %p976_p0, %p238_p1 }
   0x5   : > { %s977_s26 = sshll.u32 (!%p239_p2), %s972_s25, 3 }
   0x6   : > { %242 = sbr.rel (%p239_p2) target bundleno = 799 (0x31f), region = 48  ;;  %p271_p3 = scmp.lt.s32.totalorder (!%p239_p2), %s977_s26, 15 }
   0xb   : > { %s1480_s26 = smov (!%p271_p3, %s977_s26), 15  ;;  %v317_v8 = vlaneseq  ;;  %v1084_v49 = vld [vmem:[%s1474_s3 + $0x38] sm:$0xff]   ;;  %v1085_v51 = vld [vmem:[%s1474_s3 + $0x30] sm:$0xff]   ;;  %v1086_v52 = vld [vmem:[%s1474_s3 + $0x28] sm:$0xff]  }
   0xc   : > { %s978_s27 = sshll.u32 %s1480_s26, 3  ;;  %1027 = vmatprep.subr.bf16.mxu0 %v1084_v49  ;;  %v1087_v53 = vld [vmem:[%s1474_s3 + $0x20] sm:$0xff]   ;;  %v1088_v54 = vld [vmem:[%s1474_s3 + $0x18] sm:$0xff]   ;;  %v1089_v55 = vld [vmem:[%s1474_s3 + $0x10] sm:$0xff]  }
   0xd   : > { %s274_s30 = scalar_lea.vmem %s1471_s0, %s978_s27  ;;  %v318_v9 = vand.u32 127, %v317_v8  ;;  %1028 = vmatpush3.bf16.msra.mxu0 %v1084_v49  ;;  %v1090_v56 = vld [vmem:[%s1474_s3 + $0x8] sm:$0xff]   ;;  %v1091_v57 = vld [vmem:[%s1474_s3] sm:$0xff]   ;;  %s280_s10 = scalar_lea.vmem %s1478_s7, %s978_s27 }
   0xe   : > { %v283_v0 = vld [vmem:[%s274_s30] sm:$0xff]  ;;  %v285_v1 = vld [vmem:[%s274_s30 + $0x10] sm:$0xff]  ;;  %v284_v2 = vld [vmem:[%s274_s30 + $0x8] sm:$0xff]  ;;  %1029 = vmatprep.subr.bf16.mxu0 %v1085_v51 }
   0xf   : > { %293 = vadd.xlane.f32.xlu0 %v283_v0  ;;  %297 = vadd.xlane.f32.xlu1 %v285_v1  ;;  %v286_v3 = vld [vmem:[%s274_s30 + $0x18] sm:$0xff]  ;;  %v287_v4 = vld [vmem:[%s274_s30 + $0x20] sm:$0xff]  ;;  %v288_v5 = vld [vmem:[%s274_s30 + $0x28] sm:$0xff]  ;;  %vm319_vm0 = vcmp.lt.s32.totalorder %v318_v9, 96 }
  0x10   : > { %v289_v6 = vld [vmem:[%s274_s30 + $0x30] sm:$0xff]  ;;  %v290_v7 = vld [vmem:[%s274_s30 + $0x38] sm:$0xff] }
  0x11   : > { %1030 = vmatpush3.bf16.msra.mxu0 %v1085_v51 }
  0x12   : > { %1031 = vmatprep.subr.bf16.mxu0 %v1086_v52 }
  0x13   : > { %295 = vadd.xlane.f32.xlu0 %v284_v2  ;;  %299 = vadd.xlane.f32.xlu1 %v286_v3 }
  0x15   : > { %1032 = vmatpush3.bf16.msra.mxu0 %v1086_v52 }
  0x16   : > { %1033 = vmatprep.subr.bf16.mxu0 %v1087_v53 }
  0x17   : > { %301 = vadd.xlane.f32.xlu0 %v287_v4  ;;  %303 = vadd.xlane.f32.xlu1 %v288_v5 }
  0x19   : > { %1034 = vmatpush3.bf16.msra.mxu0 %v1087_v53 }
  0x1a   : > { %1035 = vmatprep.subr.bf16.mxu0 %v1088_v54 }
  0x1b   : > { %305 = vadd.xlane.f32.xlu0 %v289_v6  ;;  %307 = vadd.xlane.f32.xlu1 %v290_v7 }
  0x1d   : > { %1036 = vmatpush3.bf16.msra.mxu0 %v1088_v54 }
  0x1e   : > { %1037 = vmatprep.subr.bf16.mxu0 %v1089_v55 }
  0x21   : > { %1038 = vmatpush3.bf16.msra.mxu0 %v1089_v55 }
  0x22   : > { %1039 = vmatprep.subr.bf16.mxu0 %v1090_v56 }
  0x25   : > { %1040 = vmatpush3.bf16.msra.mxu0 %v1090_v56 }
  0x26   : > { %1041 = vmatprep.subr.bf16.mxu0 %v1091_v57 }
  0x29   : > { %1042 = vmatpush3.bf16.msra.mxu0 %v1091_v57 }
  0x98   : > { %v294_v10 = vpop.xlane.xlu0 %293  ;;  %v298_v11 = vpop.xlane.xlu1 %297 }
  0x99   : > { %v309_v12 = vmul.f32 0.010416667, %v294_v10  ;;  %v311_v13 = vmul.f32 0.010416667, %v298_v11 }
  0x9b   : > { %v320_v14 = vsub.f32 %v283_v0, %v309_v12  ;;  %v322_v15 = vsub.f32 %v285_v1, %v311_v13 }
  0x9c   : > { %v296_v16 = vpop.xlane.xlu0 %295  ;;  %v300_v17 = vpop.xlane.xlu1 %299 }
  0x9d   : > { %v310_v18 = vmul.f32 0.010416667, %v296_v16  ;;  %v312_v19 = vmul.f32 0.010416667, %v300_v17  ;;  %v1214_v20 = vsel %vm319_vm0, %v320_v14, 0.0  ;;  %v1217_v21 = vsel %vm319_vm0, %v322_v15, 0.0 }
  0x9e   : > { %v336_v22 = vmul.f32 %v1214_v20, %v1214_v20  ;;  %v338_v27 = vmul.f32 %v1217_v21, %v1217_v21 }
  0x9f   : > { %v321_v23 = vsub.f32 %v284_v2, %v310_v18  ;;  %v323_v24 = vsub.f32 %v286_v3, %v312_v19 }
  0xa0   : > { %344 = vadd.xlane.f32.xlu0 %v336_v22  ;;  %v302_v25 = vpop.xlane.xlu0 %301  ;;  %v304_v26 = vpop.xlane.xlu1 %303  ;;  %v981_v22 = vld [vmem:[%s1472_s1] ss:$0 sm:$0xff] }
  0xa1   : > { %v313_v28 = vmul.f32 0.010416667, %v302_v25  ;;  %v314_v29 = vmul.f32 0.010416667, %v304_v26  ;;  %v1224_v30 = vsel %vm319_vm0, %v321_v23, 0.0  ;;  %v1227_v31 = vsel %vm319_vm0, %v323_v24, 0.0 }
  0xa2   : > { %v337_v32 = vmul.f32 %v1224_v30, %v1224_v30  ;;  %v339_v37 = vmul.f32 %v1227_v31, %v1227_v31 }
  0xa3   : > { %v324_v33 = vsub.f32 %v287_v4, %v313_v28  ;;  %v325_v34 = vsub.f32 %v288_v5, %v314_v29 }
  0xa4   : > { %348 = vadd.xlane.f32.xlu0 %v338_v27  ;;  %346 = vadd.xlane.f32.xlu1 %v337_v32  ;;  %v306_v35 = vpop.xlane.xlu0 %305  ;;  %v308_v36 = vpop.xlane.xlu1 %307  ;;  %v982_v27 = vld [vmem:[%s1473_s2] ss:$0 sm:$0xff] }
  0xa5   : > { %v315_v38 = vmul.f32 0.010416667, %v306_v35  ;;  %v316_v39 = vmul.f32 0.010416667, %v308_v36  ;;  %v1234_v40 = vsel %vm319_vm0, %v324_v33, 0.0  ;;  %v1237_v41 = vsel %vm319_vm0, %v325_v34, 0.0 }
  0xa6   : > { %v340_v42 = vmul.f32 %v1234_v40, %v1234_v40  ;;  %v341_v45 = vmul.f32 %v1237_v41, %v1237_v41 }
  0xa7   : > { %v326_v43 = vsub.f32 %v289_v6, %v315_v38  ;;  %v327_v44 = vsub.f32 %v290_v7, %v316_v39 }
  0xa8   : > { %350 = vadd.xlane.f32.xlu1 %v339_v37  ;;  %352 = vadd.xlane.f32.xlu0 %v340_v42 }
  0xa9   : > { %v1244_v46 = vsel %vm319_vm0, %v326_v43, 0.0  ;;  %v1247_v47 = vsel %vm319_vm0, %v327_v44, 0.0 }
  0xaa   : > { %v342_v48 = vmul.f32 %v1244_v46, %v1244_v46  ;;  %v343_v50 = vmul.f32 %v1247_v47, %v1247_v47 }
  0xac   : > { %354 = vadd.xlane.f32.xlu1 %v341_v45  ;;  %356 = vadd.xlane.f32.xlu0 %v342_v48 }
  0xb0   : > { %358 = vadd.xlane.f32.xlu1 %v343_v50 }
 0x129   : > { %v345_v58 = vpop.xlane.xlu0 %344 }
 0x12a   : > { %v360_v59 = vmul.f32 0.010416667, %v345_v58 }
 0x12c   : > { %v368_v60 = vadd.f32 1e-05, %v360_v59  ;;  %v1095_v59 = vld [vmem:[%s1476_s5 + $0x20] sm:$0xff]  }
 0x12d   : > { %v347_v61 = vpop.xlane.xlu1 %346  ;;  %v349_v62 = vpop.xlane.xlu0 %348 }
 0x12e   : > { %1100 = vrsqrt.f32 %v368_v60  ;;  %v361_v63 = vmul.f32 0.010416667, %v347_v61  ;;  %v362_v0 = vmul.f32 0.010416667, %v349_v62  ;;  %v1096_v60 = vld [vmem:[%s1476_s5 + $0x18] sm:$0xff]   ;;  %v1097_v61 = vld [vmem:[%s1476_s5 + $0x10] sm:$0xff]  }
 0x12f   : > { %v1098_v62 = vld [vmem:[%s1476_s5 + $0x8] sm:$0xff]  }
 0x130   : > { %v369_v1 = vadd.f32 1e-05, %v361_v63  ;;  %v370_v2 = vadd.f32 1e-05, %v362_v0  ;;  %v1099_v63 = vld [vmem:[%s1476_s5] sm:$0xff]  }
 0x131   : > { %v351_v3 = vpop.xlane.xlu1 %350  ;;  %v353_v4 = vpop.xlane.xlu0 %352  ;;  %v983_v0 = vld [vmem:[%s1475_s4] ss:$0 sm:$0xff] }
 0x132   : > { %1102 = vrsqrt.f32 %v369_v1  ;;  %v363_v5 = vmul.f32 0.010416667, %v351_v3  ;;  %v364_v6 = vmul.f32 0.010416667, %v353_v4 }
 0x133   : > { %1104 = vrsqrt.f32 %v370_v2 }
 0x134   : > { %v371_v7 = vadd.f32 1e-05, %v363_v5  ;;  %v372_v8 = vadd.f32 1e-05, %v364_v6 }
 0x135   : > { %v355_v9 = vpop.xlane.xlu1 %354  ;;  %v357_v10 = vpop.xlane.xlu0 %356 }
 0x136   : > { %1106 = vrsqrt.f32 %v371_v7  ;;  %v365_v11 = vmul.f32 0.010416667, %v355_v9  ;;  %v366_v12 = vmul.f32 0.010416667, %v357_v10 }
 0x137   : > { %1108 = vrsqrt.f32 %v372_v8 }
 0x138   : > { %v373_v13 = vadd.f32 1e-05, %v365_v11  ;;  %v374_v14 = vadd.f32 1e-05, %v366_v12 }
 0x139   : > { %v359_v15 = vpop.xlane.xlu1 %358 }
 0x13a   : > { %1110 = vrsqrt.f32 %v373_v13  ;;  %v367_v16 = vmul.f32 0.010416667, %v359_v15 }
 0x13b   : > { %v1101_v17 = vpop.eup %1100  ;;  %1112 = vrsqrt.f32 %v374_v14 }
 0x13c   : > { %v375_v18 = vadd.f32 1e-05, %v367_v16  ;;  %v384_v19 = vmul.f32 %v1101_v17, %v1214_v20 }
 0x13e   : > { %1114 = vrsqrt.f32 %v375_v18  ;;  %v398_v26 = vmul.f32 %v981_v22, %v384_v19 }
 0x13f   : > { %v1103_v23 = vpop.eup %1102 }
 0x140   : > { %v1105_v24 = vpop.eup %1104  ;;  %v385_v25 = vmul.f32 %v1103_v23, %v1224_v30  ;;  %v412_v20 = vadd.f32 %v982_v27, %v398_v26 }
 0x141   : > { %v386_v28 = vmul.f32 %v1105_v24, %v1217_v21 }
 0x142   : > { %v399_v29 = vmul.f32 %v981_v22, %v385_v25 }
 0x143   : > { %v1107_v32 = vpop.eup %1106  ;;  %v400_v36 = vmul.f32 %v981_v22, %v386_v28 }
 0x144   : > { %v1109_v33 = vpop.eup %1108  ;;  %v413_v34 = vadd.f32 %v982_v27, %v399_v29  ;;  %v387_v35 = vmul.f32 %v1107_v32, %v1227_v31 }
 0x145   : > { %v388_v37 = vmul.f32 %v1109_v33, %v1234_v40  ;;  %v414_v43 = vadd.f32 %v982_v27, %v400_v36 }
 0x146   : > { %v420_v38 = vpack.c.bf16 %v413_v34, %v412_v20  ;;  %v401_v39 = vmul.f32 %v981_v22, %v387_v35 }
 0x147   : > { %v1111_v30 = vpop.eup %1110  ;;  %v402_v21 = vmul.f32 %v981_v22, %v388_v37 }
 0x148   : > { %v1113_v42 = vpop.eup %1112  ;;  %1043 = vmatprep.mubr.bf16.mxu0 %v420_v38  ;;  %v415_v44 = vadd.f32 %v982_v27, %v401_v39  ;;  %v389_v45 = vmul.f32 %v1111_v30, %v1237_v41  ;;  %v1092_v41 = vld [vmem:[%s1476_s5 + $0x38] sm:$0xff]  }
 0x149   : > { %v390_v48 = vmul.f32 %v1113_v42, %v1244_v46  ;;  %v416_v31 = vadd.f32 %v982_v27, %v402_v21  ;;  %1051 = vmatprep.subr.bf16.mxu1 %v1092_v41  ;;  %v1093_v46 = vld [vmem:[%s1476_s5 + $0x30] sm:$0xff]  }
 0x14a   : > { %v421_v49 = vpack.c.bf16 %v415_v44, %v414_v43  ;;  %v403_v50 = vmul.f32 %v981_v22, %v389_v45  ;;  %1052 = vmatpush3.bf16.msra.mxu1 %v1092_v41 }
 0x14b   : > { %v1115_v51 = vpop.eup %1114  ;;  %v404_v53 = vmul.f32 %v981_v22, %v390_v48  ;;  %1053 = vmatprep.subr.bf16.mxu1 %v1093_v46 }
 0x14c   : > { %1044 = vmatmul.mubr.bf16.vlgmr.msra.gmra.mxu0 %v421_v49  ;;  %v417_v52 = vadd.f32 %v982_v27, %v403_v50  ;;  %v391_v40 = vmul.f32 %v1115_v51, %v1247_v47  ;;  %v1094_v47 = vld [vmem:[%s1476_s5 + $0x28] sm:$0xff]  }
 0x14d   : > { %v418_v56 = vadd.f32 %v982_v27, %v404_v53 }
 0x14e   : > { %v422_v54 = vpack.c.bf16 %v417_v52, %v416_v31  ;;  %v405_v55 = vmul.f32 %v981_v22, %v391_v40  ;;  %1054 = vmatpush3.bf16.msra.mxu1 %v1093_v46 }
 0x14f   : > { %1055 = vmatprep.subr.bf16.mxu1 %v1094_v47 }
 0x150   : > { %1047 = vmatprep.mubr.bf16.mxu0 %v422_v54  ;;  %v419_v57 = vadd.f32 %v982_v27, %v405_v55 }
 0x152   : > { %v423_v58 = vpack.c.bf16 %v419_v57, %v418_v56  ;;  %1056 = vmatpush3.bf16.msra.mxu1 %v1094_v47 }
 0x153   : > { %1057 = vmatprep.subr.bf16.mxu1 %v1095_v59 }
 0x154   : > { %1048 = vmatmul.mubr.bf16.gmra.mxu0 %v423_v58 }
 0x156   : > { %1058 = vmatpush3.bf16.msra.mxu1 %v1095_v59 }
 0x157   : > { %1059 = vmatprep.subr.bf16.mxu1 %v1096_v60 }
 0x15a   : > { %1060 = vmatpush3.bf16.msra.mxu1 %v1096_v60 }
 0x15b   : > { %1061 = vmatprep.subr.bf16.mxu1 %v1097_v61 }
 0x15e   : > { %1062 = vmatpush3.bf16.msra.mxu1 %v1097_v61 }
 0x15f   : > { %1063 = vmatprep.subr.bf16.mxu1 %v1098_v62 }
 0x162   : > { %1064 = vmatpush3.bf16.msra.mxu1 %v1098_v62 }
 0x163   : > { %1065 = vmatprep.subr.bf16.mxu1 %v1099_v63 }
 0x166   : > { %1066 = vmatpush3.bf16.msra.mxu1 %v1099_v63 }
 0x20c   : > { %v1045_v1 = vpop.f32.mrf.mxu0 }
 0x20d   : > { %v1318_v2 = vadd.f32 %v1045_v1, %v983_v0 }
 0x20e   : > { %v529_v3 = vpop.f32.mrf.mxu0 }
 0x20f   : > { %v1321_v4 = vmul.f32 0.70710677, %v1318_v2  ;;  %v1323_v5 = vadd.f32 %v983_v0, %v529_v3 }
 0x210   : > { %v1046_v6 = vpop.f32.mrf.mxu0 }
 0x211   : > { %v594_v7 = vand.u32 2147483647, %v1321_v4  ;;  %v1327_v8 = vmul.f32 0.70710677, %v1323_v5  ;;  %v1329_v9 = vadd.f32 %v1046_v6, %v983_v0  ;;  %vm578_vm1 = vcmp.lt.f32.partialorder %v1321_v4, 0.0 }
 0x212   : > { %v532_v10 = vpop.f32.mrf.mxu0 }
 0x213   : > { %v602_v11 = vmul.f32 0.3275911, %v594_v7  ;;  %v592_v12 = vand.u32 2147483647, %v1327_v8  ;;  %v1333_v13 = vmul.f32 0.70710677, %v1329_v9  ;;  %v1335_v14 = vadd.f32 %v983_v0, %v532_v10 }
 0x214   : > { %v1049_v15 = vpop.f32.mrf.mxu0  ;;  %v698_v33 = vsub.f32 0.0, %v594_v7  ;;  %vm576_vm2 = vcmp.lt.f32.partialorder %v1327_v8, 0.0 }
 0x215   : > { %v610_v16 = vadd.f32 1.0, %v602_v11  ;;  %v600_v17 = vmul.f32 0.3275911, %v592_v12  ;;  %v595_v18 = vand.u32 2147483647, %v1333_v13  ;;  %v1342_v27 = vadd.f32 %v1049_v15, %v983_v0 }
 0x216   : > { %v1339_v19 = vmul.f32 0.70710677, %v1335_v14  ;;  %v545_v22 = vpop.f32.mrf.mxu0  ;;  %v696_v39 = vsub.f32 0.0, %v592_v12  ;;  %v706_v42 = vmul.f32 %v698_v33, %v594_v7  ;;  %vm579_vm3 = vcmp.lt.f32.partialorder %v1333_v13, 0.0 }
 0x217   : > { %1116 = vrcp.f32 %v610_v16  ;;  %v608_v23 = vadd.f32 1.0, %v600_v17  ;;  %v603_v24 = vmul.f32 0.3275911, %v595_v18  ;;  %v1344_v29 = vadd.f32 %v983_v0, %v545_v22 }
 0x218   : > { %v1050_v25 = vpop.f32.mrf.mxu0  ;;  %v593_v26 = vand.u32 2147483647, %v1339_v19  ;;  %v1347_v20 = vmul.f32 0.70710677, %v1342_v27  ;;  %v699_v43 = vsub.f32 0.0, %v595_v18  ;;  %v704_v50 = vmul.f32 %v696_v39, %v592_v12 }
 0x219   : > { %1118 = vrcp.f32 %v608_v23  ;;  %v611_v28 = vadd.f32 1.0, %v603_v24  ;;  %v1350_v36 = vmul.f32 0.70710677, %v1344_v29  ;;  %v1352_v37 = vadd.f32 %v1050_v25, %v983_v0 }
 0x21a   : > { %v601_v32 = vmul.f32 0.3275911, %v593_v26  ;;  %v548_v34 = vpop.f32.mrf.mxu0  ;;  %v598_v38 = vand.u32 2147483647, %v1347_v20  ;;  %v716_v40 = vmul.f32 1.442695, %v706_v42  ;;  %v707_v53 = vmul.f32 %v699_v43, %v595_v18 }
 0x21b   : > { %1120 = vrcp.f32 %v611_v28  ;;  %v1355_v30 = vadd.f32 %v983_v0, %v548_v34  ;;  %v596_v45 = vand.u32 2147483647, %v1350_v36  ;;  %v1359_v21 = vmul.f32 0.70710677, %v1352_v37 }
 0x21c   : > { %v609_v35 = vadd.f32 1.0, %v601_v32  ;;  %v606_v44 = vmul.f32 0.3275911, %v598_v38  ;;  %v697_v56 = vsub.f32 0.0, %v593_v26  ;;  %v702_v58 = vsub.f32 0.0, %v598_v38 }
 0x21d   : > { %v604_v49 = vmul.f32 0.3275911, %v596_v45  ;;  %v599_v51 = vand.u32 2147483647, %v1359_v21  ;;  %v1363_v31 = vmul.f32 0.70710677, %v1355_v30 }
 0x21e   : > { %1122 = vrcp.f32 %v609_v35  ;;  %v614_v48 = vadd.f32 1.0, %v606_v44  ;;  %v712_v59 = vmul.f32 1.442695, %v704_v50  ;;  %v718_v61 = vmul.f32 1.442695, %v707_v53 }
 0x21f   : > { %v612_v54 = vadd.f32 1.0, %v604_v49  ;;  %v607_v57 = vmul.f32 0.3275911, %v599_v51  ;;  %v597_v41 = vand.u32 2147483647, %v1363_v31  ;;  %v705_v1 = vmul.f32 %v697_v56, %v593_v26 }
 0x220   : > { %1124 = vrcp.f32 %v614_v48  ;;  %v710_v7 = vmul.f32 %v702_v58, %v598_v38  ;;  %v700_v10 = vsub.f32 0.0, %v596_v45  ;;  %v1156_v12 = vmov 1.0  }
 0x221   : > { %1126 = vrcp.f32 %v612_v54  ;;  %v615_v60 = vadd.f32 1.0, %v607_v57  ;;  %v605_v62 = vmul.f32 0.3275911, %v597_v41  ;;  %v1378_v15 = vsel %vm578_vm1, -1.0, %v1156_v12 }
 0x222   : > { %1128 = vpow2.f32 %v716_v40  ;;  %v703_v22 = vsub.f32 0.0, %v599_v51  ;;  %v714_v24 = vmul.f32 1.442695, %v705_v1  ;;  %v724_v32 = vmul.f32 1.442695, %v710_v7 }
 0x223   : > { %1130 = vrcp.f32 %v615_v60  ;;  %v613_v11 = vadd.f32 1.0, %v605_v62  ;;  %v708_v33 = vmul.f32 %v700_v10, %v596_v45  ;;  %v701_v43 = vsub.f32 0.0, %v597_v41 }
 0x224   : > { %v1365_v52 = vpop.eup %1116  ;;  %1132 = vpow2.f32 %v712_v59  ;;  %v711_v42 = vmul.f32 %v703_v22, %v599_v51  ;;  %v1390_v44 = vsel %vm576_vm2, -1.0, %v1156_v12  ;;  %vm577_vm4 = vcmp.lt.f32.partialorder %v1339_v19, 0.0 }
 0x225   : > { %v626_v55 = vmul.f32 1.0614054, %v1365_v52  ;;  %1134 = vrcp.f32 %v613_v11  ;;  %v720_v53 = vmul.f32 1.442695, %v708_v33  ;;  %v709_v59 = vmul.f32 %v701_v43, %v597_v41 }
 0x226   : > { %v1369_v46 = vpop.eup %1118  ;;  %1136 = vpow2.f32 %v718_v61  ;;  %v562_v19 = vmul.f32 0.5, %v1318_v2  ;;  %vm582_vm5 = vcmp.lt.f32.partialorder %v1347_v20, 0.0  ;;  %vm580_vm6 = vcmp.lt.f32.partialorder %v1350_v36, 0.0 }
 0x227   : > { %v634_v47 = vadd.f32 -1.4531521, %v626_v55  ;;  %v624_v3 = vmul.f32 1.0614054, %v1369_v46  ;;  %1138 = vpow2.f32 %v714_v24  ;;  %vm583_vm7 = vcmp.lt.f32.partialorder %v1359_v21, 0.0 }
 0x228   : > { %v1372_v63 = vpop.eup %1120  ;;  %1140 = vpow2.f32 %v724_v32  ;;  %v591_v21 = vsel %vm583_vm7, -1.0, %v1156_v12  ;;  %vm581_vm8 = vcmp.lt.f32.partialorder %v1363_v31, 0.0  ;;  %v566_v31 = vmul.f32 0.5, %v1342_v27 }
 0x229   : > { %v642_v0 = vmul.f32 %v1365_v52, %v634_v47  ;;  %v627_v6 = vmul.f32 1.0614054, %v1372_v63  ;;  %v632_v16 = vadd.f32 -1.4531521, %v624_v3  ;;  %v726_v47 = vmul.f32 1.442695, %v711_v42 }
 0x22a   : > { %1142 = vpow2.f32 %v720_v53 }
 0x22b   : > { %v650_v4 = vadd.f32 1.4214138, %v642_v0  ;;  %v1380_v17 = vpop.eup %1122  ;;  %v635_v18 = vadd.f32 -1.4531521, %v627_v6  ;;  %v640_v26 = vmul.f32 %v1369_v46, %v632_v16  ;;  %v587_v6 = vsel %vm579_vm3, -1.0, %v1156_v12 }
 0x22c   : > { %v625_v25 = vmul.f32 1.0614054, %v1380_v17  ;;  %1144 = vpow2.f32 %v726_v47 }
 0x22d   : > { %v658_v23 = vmul.f32 %v1365_v52, %v650_v4  ;;  %v643_v28 = vmul.f32 %v1372_v63, %v635_v18  ;;  %v648_v38 = vadd.f32 1.4214138, %v640_v26  ;;  %v1392_v48 = vpop.eup %1124  ;;  %v722_v26 = vmul.f32 1.442695, %v709_v59 }
 0x22e   : > { %v633_v35 = vadd.f32 -1.4531521, %v625_v25  ;;  %v630_v51 = vmul.f32 1.0614054, %v1392_v48  ;;  %v1400_v56 = vpop.eup %1126 }
 0x22f   : > { %v666_v34 = vadd.f32 -0.28449672, %v658_v23  ;;  %v651_v39 = vadd.f32 1.4214138, %v643_v28  ;;  %v656_v45 = vmul.f32 %v1369_v46, %v648_v38  ;;  %v1129_v60 = vpop.eup %1128  ;;  %v628_v62 = vmul.f32 1.0614054, %v1400_v56 }
 0x230   : > { %v641_v50 = vmul.f32 %v1380_v17, %v633_v35  ;;  %v638_v58 = vadd.f32 -1.4531521, %v630_v51  ;;  %v1406_v3 = vpop.eup %1130  ;;  %1146 = vpow2.f32 %v722_v26  ;;  %v561_v26 = vmul.f32 0.5, %v1335_v14 }
 0x231   : > { %v674_v49 = vmul.f32 %v1365_v52, %v666_v34  ;;  %v659_v40 = vmul.f32 %v1372_v63, %v651_v39  ;;  %v664_v55 = vadd.f32 -0.28449672, %v656_v45  ;;  %v631_v11 = vmul.f32 1.0614054, %v1406_v3  ;;  %v1133_v16 = vpop.eup %1132 }
 0x232   : > { %v649_v8 = vadd.f32 1.4214138, %v641_v50  ;;  %v646_v10 = vmul.f32 %v1392_v48, %v638_v58  ;;  %v1415_v24 = vpop.eup %1134 }
 0x233   : > { %v682_v54 = vadd.f32 0.2548296, %v674_v49  ;;  %v667_v57 = vadd.f32 -0.28449672, %v659_v40  ;;  %v672_v1 = vmul.f32 %v1369_v46, %v664_v55  ;;  %v639_v25 = vadd.f32 -1.4531521, %v631_v11  ;;  %v1137_v38 = vpop.eup %1136 }
 0x234   : > { %v657_v0 = vmul.f32 %v1380_v17, %v649_v8  ;;  %v654_v22 = vadd.f32 1.4214138, %v646_v10  ;;  %v629_v34 = vmul.f32 1.0614054, %v1415_v24  ;;  %v1139_v8 = vpop.eup %1138 }
 0x235   : > { %v690_v61 = vmul.f32 %v1365_v52, %v682_v54  ;;  %v675_v7 = vmul.f32 %v1372_v63, %v667_v57  ;;  %v636_v52 = vadd.f32 -1.4531521, %v628_v62  ;;  %v680_v23 = vadd.f32 0.2548296, %v672_v1  ;;  %v1141_v62 = vpop.eup %1140 }
 0x236   : > { %v665_v4 = vadd.f32 -0.28449672, %v657_v0  ;;  %v662_v33 = vmul.f32 %v1392_v48, %v654_v22  ;;  %v647_v43 = vmul.f32 %v1406_v3, %v639_v25  ;;  %v637_v40 = vadd.f32 -1.4531521, %v629_v34 }
 0x237   : > { %v730_v41 = vmul.f32 %v1129_v60, %v690_v61  ;;  %v683_v18 = vadd.f32 0.2548296, %v675_v7  ;;  %v644_v13 = vmul.f32 %v1400_v56, %v636_v52  ;;  %v688_v35 = vmul.f32 %v1369_v46, %v680_v23 }
 0x238   : > { %v673_v28 = vmul.f32 %v1380_v17, %v665_v4  ;;  %v670_v45 = vadd.f32 -0.28449672, %v662_v33  ;;  %v655_v54 = vadd.f32 1.4214138, %v647_v43  ;;  %v645_v57 = vmul.f32 %v1415_v24, %v637_v40 }
 0x239   : > { %v691_v32 = vmul.f32 %v1372_v63, %v683_v18  ;;  %v738_v39 = vsub.f32 1.0, %v730_v41  ;;  %v652_v42 = vadd.f32 1.4214138, %v644_v13  ;;  %v728_v51 = vmul.f32 %v1133_v16, %v688_v35 }
 0x23a   : > { %v681_v49 = vadd.f32 0.2548296, %v673_v28  ;;  %v678_v46 = vmul.f32 %v1392_v48, %v670_v45  ;;  %v663_v60 = vmul.f32 %v1406_v3, %v655_v54  ;;  %v653_v7 = vadd.f32 1.4214138, %v645_v57 }
 0x23b   : > { %v731_v50 = vmul.f32 %v1137_v38, %v691_v32  ;;  %v660_v53 = vmul.f32 %v1400_v56, %v652_v42  ;;  %v736_v58 = vsub.f32 1.0, %v728_v51  ;;  %v746_v47 = vmul.f32 %v738_v39, %v1378_v15 }
 0x23c   : > { %v689_v63 = vmul.f32 %v1380_v17, %v681_v49  ;;  %v686_v1 = vadd.f32 0.2548296, %v678_v46  ;;  %v560_v17 = vmul.f32 0.5, %v1323_v5  ;;  %v671_v52 = vadd.f32 -0.28449672, %v663_v60 }
 0x23d   : > { %v739_v55 = vsub.f32 1.0, %v731_v50  ;;  %v668_v59 = vadd.f32 -0.28449672, %v660_v53  ;;  %v744_v10 = vmul.f32 %v736_v58, %v1390_v44  ;;  %v661_v15 = vmul.f32 %v1415_v24, %v653_v7 }
 0x23e   : > { %v729_v61 = vmul.f32 %v1139_v8, %v689_v63  ;;  %v694_v16 = vmul.f32 %v1392_v48, %v686_v1  ;;  %v585_v18 = vsel %vm577_vm4, -1.0, %v1156_v12  ;;  %v679_v23 = vmul.f32 %v1406_v3, %v671_v52 }
 0x23f   : > { %v747_v0 = vmul.f32 %v739_v55, %v587_v6  ;;  %v676_v41 = vmul.f32 %v1400_v56, %v668_v59  ;;  %v1143_v6 = vpop.eup %1142  ;;  %v752_v13 = vadd.f32 1.0, %v744_v10  ;;  %v754_v5 = vadd.f32 1.0, %v746_v47 }
 0x240   : > { %v737_v11 = vsub.f32 1.0, %v729_v61  ;;  %v563_v25 = vmul.f32 0.5, %v1329_v9  ;;  %v669_v28 = vadd.f32 -0.28449672, %v661_v15  ;;  %v1145_v32 = vpop.eup %1144  ;;  %v734_v48 = vmul.f32 %v1141_v62, %v694_v16 }
 0x241   : > { %v755_v4 = vadd.f32 1.0, %v747_v0  ;;  %v684_v22 = vadd.f32 0.2548296, %v676_v41  ;;  %v687_v34 = vadd.f32 0.2548296, %v679_v23  ;;  %v760_v9 = vmul.f32 %v752_v13, %v560_v17  ;;  %v1147_v51 = vpop.eup %1146 }
 0x242   : > { %v745_v44 = vmul.f32 %v737_v11, %v585_v18  ;;  %v677_v39 = vmul.f32 %v1415_v24, %v669_v28  ;;  %v762_v14 = vmul.f32 %v754_v5, %v562_v19  ;;  %v742_v50 = vsub.f32 1.0, %v734_v48 }
 0x243   : > { %v692_v33 = vmul.f32 %v1400_v56, %v684_v22  ;;  %v763_v38 = vmul.f32 %v755_v4, %v563_v25  ;;  %v695_v43 = vmul.f32 %v1406_v3, %v687_v34  ;;  %v590_v3 = vsel %vm582_vm5, -1.0, %v1156_v12 }
 0x244   : > { %v753_v35 = vadd.f32 1.0, %v745_v44  ;;  %v685_v56 = vadd.f32 0.2548296, %v677_v39  ;;  %v588_v63 = vsel %vm580_vm6, -1.0, %v1156_v12  ;;  %v750_v46 = vmul.f32 %v742_v50, %v590_v3 }
 0x245   : > { %v732_v42 = vmul.f32 %v1143_v6, %v692_v33  ;;  %v735_v40 = vmul.f32 %v1145_v32, %v695_v43  ;;  %v769_v54 = vpack.c.bf16 %v763_v38, %v762_v14  ;;  %v589_v47 = vsel %vm581_vm8, -1.0, %v1156_v12  ;;  %v992_v12 = vld [vmem:[%s1477_s6] ss:$0 sm:$0xff] }
 0x246   : > { %v761_v49 = vmul.f32 %v753_v35, %v561_v26  ;;  %v693_v53 = vmul.f32 %v1415_v24, %v685_v56  ;;  %v758_v60 = vadd.f32 1.0, %v750_v46  ;;  %v567_v61 = vmul.f32 0.5, %v1352_v37 }
 0x247   : > { %v740_v45 = vsub.f32 1.0, %v732_v42  ;;  %v743_v8 = vsub.f32 1.0, %v735_v40  ;;  %v564_v62 = vmul.f32 0.5, %v1344_v29  ;;  %v565_v0 = vmul.f32 0.5, %v1355_v30 }
 0x248   : > { %v768_v2 = vpack.c.bf16 %v761_v49, %v760_v9  ;;  %v733_v55 = vmul.f32 %v1147_v51, %v693_v53  ;;  %v766_v41 = vmul.f32 %v758_v60, %v566_v31 }
 0x249   : > { %v748_v36 = vmul.f32 %v740_v45, %v588_v63  ;;  %v751_v57 = vmul.f32 %v743_v8, %v591_v21 }
 0x24a   : > { %1067 = vmatprep.mubr.bf16.mxu1 %v768_v2  ;;  %v741_v58 = vsub.f32 1.0, %v733_v55 }
 0x24b   : > { %1068 = vmatmul.mubr.bf16.vlgmr.msra.gmra.mxu1 %v769_v54  ;;  %v759_v24 = vadd.f32 1.0, %v751_v57  ;;  %v756_v59 = vadd.f32 1.0, %v748_v36 }
 0x24c   : > { %v749_v20 = vmul.f32 %v741_v58, %v589_v47 }
 0x24d   : > { %v767_v7 = vmul.f32 %v759_v24, %v567_v61  ;;  %v764_v10 = vmul.f32 %v756_v59, %v564_v62 }
 0x24e   : > { %v757_v1 = vadd.f32 1.0, %v749_v20 }
 0x24f   : > { %v771_v11 = vpack.c.bf16 %v767_v7, %v766_v41 }
 0x250   : > { %v765_v17 = vmul.f32 %v757_v1, %v565_v0 }
 0x252   : > { %v770_v52 = vpack.c.bf16 %v765_v17, %v764_v10 }
 0x254   : > { %1071 = vmatprep.mubr.bf16.mxu1 %v770_v52 }
 0x255   : > { %1072 = vmatmul.mubr.bf16.gmra.mxu1 %v771_v11 }
 0x30b   : > { %v1069_v29 = vpop.f32.mrf.mxu1 }
 0x30c   : > { %v886_v37 = vadd.f32 %v1069_v29, %v992_v12 }
 0x30d   : > { %v877_v27 = vpop.f32.mrf.mxu1 }
 0x30e   : > { %910 = vst [vmem:[%s280_s10 + $0x10] sm:$0xff] %v886_v37  ;;  %v878_v30 = vadd.f32 %v992_v12, %v877_v27 }
 0x30f   : > { %v1070_v4 = vpop.f32.mrf.mxu1 }
 0x310   : > { %908 = vst [vmem:[%s280_s10] sm:$0xff] %v878_v30  ;;  %v889_v16 = vadd.f32 %v1070_v4, %v992_v12 }
 0x311   : > { %v880_v15 = vpop.f32.mrf.mxu1 }
 0x312   : > { %911 = vst [vmem:[%s280_s10 + $0x18] sm:$0xff] %v889_v16  ;;  %v881_v18 = vadd.f32 %v992_v12, %v880_v15 }
 0x314   : > { %909 = vst [vmem:[%s280_s10 + $0x8] sm:$0xff] %v881_v18 }
 0x315   : > { %v1073_v6 = vpop.f32.mrf.mxu1 }
 0x316   : > { %v902_v22 = vadd.f32 %v1073_v6, %v992_v12 }
 0x317   : > { %v893_v23 = vpop.f32.mrf.mxu1 }
 0x318   : > { %914 = vst [vmem:[%s280_s10 + $0x30] sm:$0xff] %v902_v22  ;;  %v894_v44 = vadd.f32 %v992_v12, %v893_v23 }
 0x319   : > { %v1074_v13 = vpop.f32.mrf.mxu1 }
 0x31a   : > { %912 = vst [vmem:[%s280_s10 + $0x20] sm:$0xff] %v894_v44  ;;  %v905_v5 = vadd.f32 %v1074_v13, %v992_v12 }
 0x31b   : > { %v896_v25 = vpop.f32.mrf.mxu1 }
 0x31c   : > { %915 = vst [vmem:[%s280_s10 + $0x38] sm:$0xff] %v905_v5  ;;  %v897_v26 = vadd.f32 %v992_v12, %v896_v25 }
 0x31e   : > { %913 = vst [vmem:[%s280_s10 + $0x28] sm:$0xff] %v897_v26 }
 0x31f PF: > { %s17_s24 = sadd.s32 1, %s1154_s24  }
 0x320   : > { %p14_p4 = scmp.ge.s32.totalorder %s17_s24, 4  }
 0x322   :  { %16 = sbr.rel (!%p14_p4) target bundleno = 1 (0x1), region = 78 }

// kernel: token_transformer_forward.9
= control target key start
LH: loop header
LB: loop body
LE: loop exit
PB: predicated region body
PF: predicated region fallthrough
CT: control target
= control target key end

     0   :  { %s1638_s27 = smov 0   ;;  %s1640_s28 = smov 0   ;;  %s1881_s0 = inlined_call_operand.vmem [shape: f32[2,2,1,128], index: 0, kind: input, shape index: {}]   ;;  %s1882_s1 = inlined_call_operand.vmem [shape: f32[2,64,128], index: 1, kind: input, shape index: {}]   ;;  %s1883_s2 = inlined_call_operand.vmem [shape: f32[2,1,128], index: 2, kind: input, shape index: {}]   ;;  %s1884_s3 = inlined_call_operand.vmem [shape: f32[2,1,128], index: 3, kind: input, shape index: {}]   ;;  %s1885_s4 = inlined_call_operand.vmem [shape: bf16[2,128,128], index: 4, kind: input, shape index: {}]   ;;  %s1886_s5 = inlined_call_operand.vmem [shape: bf16[2,128,256], index: 5, kind: input, shape index: {}]   ;;  %s1887_s6 = inlined_call_operand.vmem [shape: bf16[2,128,128], index: 6, kind: input, shape index: {}]   ;;  %s1888_s7 = inlined_call_operand.vmem [shape: f32[2,1,128], index: 7, kind: input, shape index: {}]   ;;  %s1889_s8 = inlined_call_operand.vmem [shape: f32[2,2,64,128], index: 8, kind: output, shape index: {}]  }
   0x1   :  { %s1642_s29 = smov 0   ;;  %s1644_s30 = smov 0  }
   0x2   :  { %s1646_s9 = smov 0  }
   0x3 LB: > { %s27_s10 = sadd.s32 1, %s1582_s29  ;;  %s30_s11 = sadd.s32 1, %s1586_s30  ;;  %s1590_s9 = sphi %s1646_s9, %s18_s9   ;;  %s1586_s30 = sphi %s1644_s30, %s1893_s30   ;;  %s1582_s29 = sphi %s1642_s29, %s1892_s29   ;;  %s1578_s28 = sphi %s1640_s28, %s1891_s28   ;;  %s1574_s27 = sphi %s1638_s27, %s1890_s27  }
   0x4   : > { %p28_p0 = scmp.ge.s32.totalorder %s27_s10, 2  ;;  %p1297_p1 = scmp.ge.s32.totalorder %s1590_s9, 1 }
   0x5   : > { %p344_p2 = scmp.lt.s32.totalorder %s1590_s9, 5 }
   0x6   : > { %s1895_s10 = smov (%p28_p0, %s27_s10), 0  ;;  %s1897_s11 = smov (!%p28_p0, %s30_s11), %s1586_s30 }
   0x7   : > { %p345_p3 = pnand %p1297_p1, %p344_p2  ;;  %p32_p4 = scmp.ge.s32.totalorder %s1897_s11, 2 }
   0x8   : > { %p415_p5 = scmp.lt.s32.totalorder (!%p345_p3), %s1574_s27, 1  ;;  %p413_p6 = scmp.lt.s32.totalorder (!%p345_p3), %s1578_s28, 1 }
   0x9   : > { %s1899_s11 = smov (%p32_p4, %s1897_s11), 0  ;;  %348 = sbr.rel (%p345_p3) target bundleno = 960 (0x3c0), region = 52 }
   0xe   : > { %s1901_s27 = smov (!%p415_p5, %s1574_s27), 1  ;;  %s1903_s28 = smov (!%p413_p6, %s1578_s28), 1  ;;  %vm470_vm0 = vcmask 1040384   ;;  %v475_v10 = vlaneseq }
   0xf   : > { %s1345_s12 = sshll.u32 %s1901_s27, 6  ;;  %s1298_s16 = sshll.u32 %s1903_s28, 1 }
  0x10   : > { %s424_s15 = scalar_lea.vmem %s1882_s1, %s1345_s12  ;;  %s1346_s17 = sshll.u32 %s1903_s28, 6  ;;  %v476_v11 = vand.u32 127, %v475_v10 }
  0x11   : > { %v1676_v0 = vld [vmem:[%s424_s15] sm:$0xff]  ;;  %v1678_v1 = vld [vmem:[%s424_s15 + $0x10] sm:$0xff]  ;;  %v1684_v2 = vld [vmem:[%s424_s15 + $0x8] sm:$0xff]  ;;  %s1691_s20 = scalar_lea.vmem %s1885_s4, %s1346_s17  ;;  %s418_s21 = sadd.s32 %s1298_s16, %s1901_s27 }
  0x12   : > { %490 = vadd.xlane.f32.xlu0 %v1676_v0  ;;  %494 = vadd.xlane.f32.xlu1 %v1678_v1  ;;  %v1686_v3 = vld [vmem:[%s424_s15 + $0x18] sm:$0xff]  ;;  %s1347_s22 = sshll.u32 %s1903_s28, 7  ;;  %v1695_v4 = vld [vmem:[%s424_s15 + $0x20] sm:$0xff]  ;;  %v1697_v5 = vld [vmem:[%s424_s15 + $0x28] sm:$0xff]  ;;  %s419_s25 = scalar_lea.vmem %s1881_s0, %s418_s21  ;;  %vm477_vm1 = vcmp.lt.s32.totalorder %v476_v11, 96 }
  0x13   : > { %s1707_s13 = scalar_lea.vmem %s1886_s5, %s1347_s22  ;;  %v1709_v6 = vld [vmem:[%s424_s15 + $0x30] sm:$0xff]  ;;  %v1711_v7 = vld [vmem:[%s424_s15 + $0x38] sm:$0xff]  ;;  %v1715_v8 = vld [vmem:[%s419_s25] sm:$0x1]  ;;  %s1722_s18 = scalar_lea.vmem %s1887_s6, %s1346_s17 }
  0x14   : > { %v471_v9 = vsel %vm470_vm0, %v1715_v8, 0.0  ;;  %v1462_v52 = vld [vmem:[%s1691_s20 + $0x38] sm:$0xff]   ;;  %v1463_v58 = vld [vmem:[%s1691_s20 + $0x30] sm:$0xff]   ;;  %v1464_v60 = vld [vmem:[%s1691_s20 + $0x28] sm:$0xff]   ;;  %s427_s19 = scalar_lea.vmem %s1883_s2, %s1903_s28  ;;  %s430_s22 = scalar_lea.vmem %s1884_s3, %s1903_s28 }
  0x15   : > { %1373 = vmatprep.subr.bf16.mxu1 %v1462_v52  ;;  %v1465_v61 = vld [vmem:[%s1691_s20 + $0x20] sm:$0xff]   ;;  %v1466_v62 = vld [vmem:[%s1691_s20 + $0x18] sm:$0xff]   ;;  %v1467_v63 = vld [vmem:[%s1691_s20 + $0x10] sm:$0xff]   ;;  %s1307_s23 = sshll.u32 %s1901_s27, 3  ;;  %s1308_s24 = sshll.u32 %s1903_s28, 4 }
  0x16   : > { %492 = vadd.xlane.f32.xlu0 %v1684_v2  ;;  %496 = vadd.xlane.f32.xlu1 %v1686_v3  ;;  %v1472_v11 = vld [vmem:[%s1707_s13 + $0x74] ss:$8 sps:$4 sm:$0xff]   ;;  %s448_s12 = scalar_lea.vmem %s1888_s7, %s1903_s28 }
  0x17   : > { %1374 = vmatpush3.bf16.msra.mxu1 %v1462_v52 }
  0x18   : > { %1375 = vmatprep.subr.bf16.mxu1 %v1463_v58 }
  0x1a   : > { %498 = vadd.xlane.f32.xlu0 %v1695_v4  ;;  %500 = vadd.xlane.f32.xlu1 %v1697_v5 }
  0x1b   : > { %1376 = vmatpush3.bf16.msra.mxu1 %v1463_v58 }
  0x1c   : > { %1377 = vmatprep.subr.bf16.mxu1 %v1464_v60 }
  0x1e   : > { %502 = vadd.xlane.f32.xlu0 %v1709_v6  ;;  %504 = vadd.xlane.f32.xlu1 %v1711_v7 }
  0x1f   : > { %1378 = vmatpush3.bf16.msra.mxu1 %v1464_v60 }
  0x20   : > { %1379 = vmatprep.subr.bf16.mxu1 %v1465_v61 }
  0x22   : > { %472 = vadd.xlane.f32.xlu0 %v471_v9  ;;  %v1469_v9 = vld [vmem:[%s1691_s20] sm:$0xff]  }
  0x23   : > { %1380 = vmatpush3.bf16.msra.mxu1 %v1465_v61 }
  0x24   : > { %1381 = vmatprep.subr.bf16.mxu1 %v1466_v62 }
  0x27   : > { %1382 = vmatpush3.bf16.msra.mxu1 %v1466_v62 }
  0x28   : > { %1383 = vmatprep.subr.bf16.mxu1 %v1467_v63 }
  0x2b   : > { %1384 = vmatpush3.bf16.msra.mxu1 %v1467_v63 }
  0x9b   : > { %v491_v12 = vpop.xlane.xlu0 %490  ;;  %v495_v13 = vpop.xlane.xlu1 %494 }
  0x9c   : > { %v506_v14 = vmul.f32 0.010416667, %v491_v12  ;;  %v508_v15 = vmul.f32 0.010416667, %v495_v13 }
  0x9e   : > { %v514_v16 = vsub.f32 %v1676_v0, %v506_v14  ;;  %v516_v17 = vsub.f32 %v1678_v1, %v508_v15 }
  0x9f   : > { %v493_v18 = vpop.xlane.xlu0 %492  ;;  %v497_v19 = vpop.xlane.xlu1 %496 }
  0xa0   : > { %v507_v20 = vmul.f32 0.010416667, %v493_v18  ;;  %v509_v21 = vmul.f32 0.010416667, %v497_v19  ;;  %v1730_v22 = vsel %vm477_vm1, %v514_v16, 0.0  ;;  %v1733_v23 = vsel %vm477_vm1, %v516_v17, 0.0 }
  0xa1   : > { %v530_v24 = vmul.f32 %v1730_v22, %v1730_v22  ;;  %v532_v29 = vmul.f32 %v1733_v23, %v1733_v23 }
  0xa2   : > { %v515_v25 = vsub.f32 %v1684_v2, %v507_v20  ;;  %v517_v26 = vsub.f32 %v1686_v3, %v509_v21 }
  0xa3   : > { %538 = vadd.xlane.f32.xlu1 %v530_v24  ;;  %v499_v27 = vpop.xlane.xlu0 %498  ;;  %v501_v28 = vpop.xlane.xlu1 %500 }
  0xa4   : > { %v510_v30 = vmul.f32 0.010416667, %v499_v27  ;;  %v511_v31 = vmul.f32 0.010416667, %v501_v28  ;;  %v1742_v32 = vsel %vm477_vm1, %v515_v25, 0.0  ;;  %v1745_v33 = vsel %vm477_vm1, %v517_v26, 0.0 }
  0xa5   : > { %v531_v34 = vmul.f32 %v1742_v32, %v1742_v32  ;;  %v533_v39 = vmul.f32 %v1745_v33, %v1745_v33  ;;  %v588_v27 = vshrl.u32 %v475_v10, 7 }
  0xa6   : > { %v518_v35 = vsub.f32 %v1695_v4, %v510_v30  ;;  %v519_v36 = vsub.f32 %v1697_v5, %v511_v31 }
  0xa7   : > { %542 = vadd.xlane.f32.xlu1 %v532_v29  ;;  %v503_v37 = vpop.xlane.xlu0 %502  ;;  %540 = vadd.xlane.f32.xlu0 %v531_v34  ;;  %v505_v38 = vpop.xlane.xlu1 %504 }
  0xa8   : > { %v512_v40 = vmul.f32 0.010416667, %v503_v37  ;;  %v513_v41 = vmul.f32 0.010416667, %v505_v38  ;;  %v1754_v42 = vsel %vm477_vm1, %v518_v35, 0.0  ;;  %v1757_v43 = vsel %vm477_vm1, %v519_v36, 0.0 }
  0xa9   : > { %v534_v44 = vmul.f32 %v1754_v42, %v1754_v42  ;;  %v535_v48 = vmul.f32 %v1757_v43, %v1757_v43  ;;  %v1796_v36 = vsub.s32 0, %v588_v27  ;;  %v1473_v27 = vld [vmem:[%s1707_s13 + $0x60] ss:$8 sps:$4 sm:$0xff]  }
  0xaa   : > { %v520_v45 = vsub.f32 %v1709_v6, %v512_v40  ;;  %v521_v46 = vsub.f32 %v1711_v7, %v513_v41 }
  0xab   : > { %546 = vadd.xlane.f32.xlu1 %v534_v44  ;;  %544 = vadd.xlane.f32.xlu0 %v533_v39  ;;  %v473_v47 = vpop.xlane.xlu0 %472  ;;  %v1798_v39 = vld [vmem:[%s427_s19] sm:$0x1] }
  0xac   : > { %v474_v49 = vmul.f32 0.010416667, %v473_v47  ;;  %v1766_v50 = vsel %vm477_vm1, %v520_v45, 0.0  ;;  %v1769_v51 = vsel %vm477_vm1, %v521_v46, 0.0  ;;  %v590_v44 = vrot.slane %v1798_v39, %v1796_v36  ;;  %v1807_v47 = vld [vmem:[%s430_s22] sm:$0x1] }
  0xad   : > { %v536_v53 = vmul.f32 %v1766_v50, %v1766_v50  ;;  %v537_v55 = vmul.f32 %v1769_v51, %v1769_v51 }
  0xae   : > { %v478_v54 = vsub.f32 %v1715_v8, %v474_v49  ;;  %v1468_v8 = vld [vmem:[%s1691_s20 + $0x8] sm:$0xff]  }
  0xaf   : > { %550 = vadd.xlane.f32.xlu1 %v536_v53  ;;  %548 = vadd.xlane.f32.xlu0 %v535_v48  ;;  %v604_v53 = vrot.slane %v1807_v47, %v1796_v36 }
  0xb0   : > { %v1778_v56 = vsel %vm477_vm1, %v478_v54, 0.0  ;;  %1385 = vmatprep.subr.bf16.mxu1 %v1468_v8 }
  0xb1   : > { %v480_v57 = vmul.f32 %v1778_v56, %v1778_v56  ;;  %1386 = vmatpush3.bf16.msra.mxu1 %v1468_v8 }
  0xb2   : > { %1387 = vmatprep.subr.bf16.mxu1 %v1469_v9 }
  0xb3   : > { %552 = vadd.xlane.f32.xlu0 %v537_v55  ;;  %v481_v59 = vsel %vm470_vm0, %v480_v57, 0.0 }
  0xb4   : > { %482 = vadd.xlane.f32.xlu1 %v481_v59 }
  0xb5   : > { %1388 = vmatpush3.bf16.msra.mxu1 %v1469_v9 }
  0xb6   : > { %844 = vmatprep.subr.bf16.mxu1 %v1472_v11 }
 0x12c   : > { %v539_v12 = vpop.xlane.xlu1 %538 }
 0x12d   : > { %v554_v13 = vmul.f32 0.010416667, %v539_v12 }
 0x12f   : > { %v562_v14 = vadd.f32 1e-05, %v554_v13 }
 0x130   : > { %v543_v15 = vpop.xlane.xlu1 %542  ;;  %v541_v16 = vpop.xlane.xlu0 %540 }
 0x131   : > { %1502 = vrsqrt.f32 %v562_v14  ;;  %v556_v17 = vmul.f32 0.010416667, %v543_v15  ;;  %v555_v18 = vmul.f32 0.010416667, %v541_v16 }
 0x133   : > { %v564_v19 = vadd.f32 1e-05, %v556_v17  ;;  %v563_v20 = vadd.f32 1e-05, %v555_v18  ;;  %v1470_v18 = vld [vmem:[%s1707_s13 + $0x70] ss:$8 sps:$4 sm:$0xff]  }
 0x134   : > { %v547_v21 = vpop.xlane.xlu1 %546  ;;  %v545_v24 = vpop.xlane.xlu0 %544 }
 0x135   : > { %1504 = vrsqrt.f32 %v564_v19  ;;  %v558_v25 = vmul.f32 0.010416667, %v547_v21  ;;  %v557_v26 = vmul.f32 0.010416667, %v545_v24 }
 0x136   : > { %1506 = vrsqrt.f32 %v563_v20  ;;  %v1475_v20 = vld [vmem:[%s1707_s13 + $0x64] ss:$8 sps:$4 sm:$0xff]  }
 0x137   : > { %v566_v28 = vadd.f32 1e-05, %v558_v25  ;;  %v565_v29 = vadd.f32 1e-05, %v557_v26 }
 0x138   : > { %v551_v30 = vpop.xlane.xlu1 %550  ;;  %v549_v31 = vpop.xlane.xlu0 %548 }
 0x139   : > { %1508 = vrsqrt.f32 %v566_v28  ;;  %v560_v34 = vmul.f32 0.010416667, %v551_v30  ;;  %v559_v35 = vmul.f32 0.010416667, %v549_v31 }
 0x13a   : > { %1510 = vrsqrt.f32 %v565_v29  ;;  %v1478_v29 = vld [vmem:[%s1707_s13 + $0x54] ss:$8 sps:$4 sm:$0xff]  }
 0x13b   : > { %v568_v37 = vadd.f32 1e-05, %v560_v34  ;;  %v567_v38 = vadd.f32 1e-05, %v559_v35  ;;  %v1481_v35 = vld [vmem:[%s1707_s13 + $0x44] ss:$8 sps:$4 sm:$0xff]  }
 0x13c   : > { %v553_v10 = vpop.xlane.xlu0 %552 }
 0x13d   : > { %1512 = vrsqrt.f32 %v568_v37  ;;  %v561_v40 = vmul.f32 0.010416667, %v553_v10  ;;  %v483_v60 = vpop.xlane.xlu1 %482  ;;  %v1479_v37 = vld [vmem:[%s1707_s13 + $0x40] ss:$8 sps:$4 sm:$0xff]   ;;  %v1484_v10 = vld [vmem:[%s1707_s13 + $0x34] ss:$8 sps:$4 sm:$0xff]  }
 0x13e   : > { %v1503_v41 = vpop.eup %1502  ;;  %1514 = vrsqrt.f32 %v567_v38  ;;  %v484_v11 = vmul.f32 0.010416667, %v483_v60  ;;  %v1592_v38 = vmov 0  }
 0x13f   : > { %v569_v45 = vadd.f32 1e-05, %v561_v40  ;;  %v578_v46 = vmul.f32 %v1503_v41, %v1730_v22  ;;  %v1482_v40 = vld [vmem:[%s1707_s13 + $0x30] ss:$8 sps:$4 sm:$0xff]   ;;  %v1487_v41 = vld [vmem:[%s1707_s13 + $0x24] ss:$8 sps:$4 sm:$0xff]  }
 0x140   : > { %v485_v19 = vadd.f32 1e-05, %v484_v11 }
 0x141   : > { %1516 = vrsqrt.f32 %v569_v45  ;;  %v592_v52 = vmul.f32 %v590_v44, %v578_v46  ;;  %v1485_v45 = vld [vmem:[%s1707_s13 + $0x20] ss:$8 sps:$4 sm:$0xff]  }
 0x142   : > { %v1505_v48 = vpop.eup %1504  ;;  %1518 = vrsqrt.f32 %v485_v19  ;;  %v1496_v19 = vld [vmem:[%s1722_s18 + $0x28] sm:$0xff]  }
 0x143   : > { %v1507_v49 = vpop.eup %1506  ;;  %v580_v55 = vmul.f32 %v1505_v48, %v1733_v23  ;;  %v606_v61 = vadd.f32 %v604_v53, %v592_v52  ;;  %v1490_v48 = vld [vmem:[%s1707_s13 + $0x14] ss:$8 sps:$4 sm:$0xff]   ;;  %v1493_v52 = vld [vmem:[%s1707_s13 + $0x4] ss:$8 sps:$4 sm:$0xff]  }
 0x144   : > { %v579_v54 = vmul.f32 %v1507_v49, %v1742_v32  ;;  %v1488_v49 = vld [vmem:[%s1707_s13 + $0x10] ss:$8 sps:$4 sm:$0xff]  }
 0x145   : > { %v594_v63 = vmul.f32 %v590_v44, %v580_v55 }
 0x146   : > { %v1509_v57 = vpop.eup %1508  ;;  %v593_v58 = vmul.f32 %v590_v44, %v579_v54  ;;  %v1491_v54 = vld [vmem:[%s1707_s13] ss:$8 sps:$4 sm:$0xff]  }
 0x147   : > { %v1511_v59 = vpop.eup %1510  ;;  %v582_v8 = vmul.f32 %v1509_v57, %v1754_v42  ;;  %v608_v14 = vadd.f32 %v604_v53, %v594_v63 }
 0x148   : > { %v607_v22 = vadd.f32 %v604_v53, %v593_v58  ;;  %v581_v62 = vmul.f32 %v1511_v59, %v1745_v33 }
 0x149   : > { %v596_v17 = vmul.f32 %v590_v44, %v582_v8 }
 0x14a   : > { %v1513_v9 = vpop.eup %1512  ;;  %v614_v12 = vpack.c.bf16 %v607_v22, %v606_v61  ;;  %v595_v13 = vmul.f32 %v590_v44, %v581_v62 }
 0x14b   : > { %v1515_v32 = vpop.eup %1514  ;;  %v584_v23 = vmul.f32 %v1513_v9, %v1766_v50  ;;  %v610_v50 = vadd.f32 %v604_v53, %v596_v17 }
 0x14c   : > { %1389 = vmatprep.mubr.bf16.mxu1 %v614_v12  ;;  %v609_v15 = vadd.f32 %v604_v53, %v595_v13  ;;  %v583_v16 = vmul.f32 %v1515_v32, %v1757_v43 }
 0x14d   : > { %v598_v25 = vmul.f32 %v590_v44, %v584_v23 }
 0x14e   : > { %v1517_v33 = vpop.eup %1516  ;;  %v615_v42 = vpack.c.bf16 %v609_v15, %v608_v14  ;;  %v597_v21 = vmul.f32 %v590_v44, %v583_v16 }
 0x14f   : > { %v585_v24 = vmul.f32 %v1517_v33, %v1769_v51  ;;  %v612_v30 = vadd.f32 %v604_v53, %v598_v25  ;;  %v1476_v51 = vld [vmem:[%s1707_s13 + $0x50] ss:$8 sps:$4 sm:$0xff]   ;;  %v1501_v25 = vld [vmem:[%s1722_s18] sm:$0xff]   ;;  %s455_s13 = sadd.s32 %s1308_s24, %s1307_s23 }
 0x150   : > { %1390 = vmatmul.mubr.bf16.vlgmr.msra.gmra.mxu1 %v615_v42  ;;  %v611_v26 = vadd.f32 %v604_v53, %v597_v21  ;;  %v1495_v33 = vld [vmem:[%s1722_s18 + $0x30] sm:$0xff]   ;;  %v1497_v42 = vld [vmem:[%s1722_s18 + $0x20] sm:$0xff]   ;;  %s1309_s14 = sshll.u32 %s455_s13, 3 }
 0x151   : > { %845 = vmatpush1.bf16.msra.mxu1 %v1470_v18  ;;  %v599_v43 = vmul.f32 %v590_v44, %v585_v24  ;;  %v1519_v44 = vpop.eup %1518  ;;  %v1494_v18 = vld [vmem:[%s1722_s18 + $0x38] sm:$0xff]   ;;  %v1499_v21 = vld [vmem:[%s1722_s18 + $0x10] sm:$0xff]   ;;  %v1500_v24 = vld [vmem:[%s1722_s18 + $0x8] sm:$0xff]   ;;  %s457_s15 = scalar_lea.vmem %s1889_s8, %s1309_s14 }
 0x152   : > { %846 = vmatprep.subr.bf16.mxu1 %v1475_v20  ;;  %v616_v28 = vpack.c.bf16 %v611_v26, %v610_v50  ;;  %v487_v46 = vmul.f32 %v1519_v44, %v1778_v56  ;;  %1397 = vmatprep.subr.bf16.mxu0 %v1494_v18  ;;  %v1498_v20 = vld [vmem:[%s1722_s18 + $0x18] sm:$0xff]  }
 0x153   : > { %v613_v31 = vadd.f32 %v604_v53, %v599_v43  ;;  %1398 = vmatpush3.bf16.msra.mxu0 %v1494_v18 }
 0x154   : > { %1393 = vmatprep.mubr.bf16.mxu1 %v616_v28  ;;  %v488_v53 = vmul.f32 %v487_v46, %v1798_v39  ;;  %1399 = vmatprep.subr.bf16.mxu0 %v1495_v33 }
 0x155   : > { %847 = vmatpush1.bf16.msra.mxu1 %v1473_v27  ;;  %v617_v34 = vpack.c.bf16 %v613_v31, %v612_v30 }
 0x156   : > { %848 = vmatprep.subr.bf16.mxu1 %v1478_v29  ;;  %v489_v55 = vadd.f32 %v488_v53, %v1807_v47 }
 0x157   : > { %1400 = vmatpush3.bf16.msra.mxu0 %v1495_v33 }
 0x158   : > { %1394 = vmatmul.mubr.bf16.gmra.mxu1 %v617_v34  ;;  %v747_v57 = vpack.c.bf16 %v489_v55, %v489_v55  ;;  %1401 = vmatprep.subr.bf16.mxu0 %v1496_v19 }
 0x159   : > { %849 = vmatpush1.bf16.msra.mxu1 %v1476_v51  ;;  %876 = vmatprep.mubr.bf16.mxu1 %v1592_v38 }
 0x15a   : > { %850 = vmatprep.subr.bf16.mxu1 %v1481_v35 }
 0x15b   : > { %1402 = vmatpush3.bf16.msra.mxu0 %v1496_v19 }
 0x15c   : > { %1403 = vmatprep.subr.bf16.mxu0 %v1497_v42 }
 0x15d   : > { %851 = vmatpush1.bf16.msra.mxu1 %v1479_v37 }
 0x15e   : > { %852 = vmatprep.subr.bf16.mxu1 %v1484_v10 }
 0x15f   : > { %1404 = vmatpush3.bf16.msra.mxu0 %v1497_v42 }
 0x160   : > { %1405 = vmatprep.subr.bf16.mxu0 %v1498_v20 }
 0x161   : > { %853 = vmatpush1.bf16.msra.mxu1 %v1482_v40 }
 0x162   : > { %854 = vmatprep.subr.bf16.mxu1 %v1487_v41 }
 0x163   : > { %1406 = vmatpush3.bf16.msra.mxu0 %v1498_v20 }
 0x164   : > { %1407 = vmatprep.subr.bf16.mxu0 %v1499_v21 }
 0x165   : > { %855 = vmatpush1.bf16.msra.mxu1 %v1485_v45 }
 0x166   : > { %856 = vmatprep.subr.bf16.mxu1 %v1490_v48 }
 0x167   : > { %1408 = vmatpush3.bf16.msra.mxu0 %v1499_v21 }
 0x168   : > { %1409 = vmatprep.subr.bf16.mxu0 %v1500_v24 }
 0x169   : > { %857 = vmatpush1.bf16.msra.mxu1 %v1488_v49 }
 0x16a   : > { %858 = vmatprep.subr.bf16.mxu1 %v1493_v52 }
 0x16b   : > { %1410 = vmatpush3.bf16.msra.mxu0 %v1500_v24 }
 0x16c   : > { %1411 = vmatprep.subr.bf16.mxu0 %v1501_v25 }
 0x16d   : > { %859 = vmatpush1.bf16.msra.mxu1 %v1491_v54 }
 0x16f   : > { %1412 = vmatpush3.bf16.msra.mxu0 %v1501_v25 }
 0x170   : > { %877 = vmatmul.mubr.bf16.vlgmr.msra.gmra.mxu1 %v747_v57 }
 0x210   : > { %v1391_v58 = vpop.f32.mrf.mxu1 }
 0x212   : > { %v716_v59 = vpop.f32.mrf.mxu1 }
 0x214   : > { %v1392_v60 = vpop.f32.mrf.mxu1 }
 0x216   : > { %v719_v56 = vpop.f32.mrf.mxu1 }
 0x218   : > { %v1395_v61 = vpop.f32.mrf.mxu1 }
 0x21a   : > { %v732_v22 = vpop.f32.mrf.mxu1 }
 0x21c   : > { %v1396_v62 = vpop.f32.mrf.mxu1 }
 0x21e   : > { %v735_v63 = vpop.f32.mrf.mxu1 }
 0x230   : > { %v878_v8 = vpop.f32.mrf.mxu1 }
 0x231   : > { %v888_v9 = vrot.slane %v878_v8, %v1796_v36 }
 0x232   : > { %v1837_v39 = vpop.f32.mrf.mxu1 }
 0x233   : > { %v890_v11 = vmul.f32 %v888_v9, %v719_v56  ;;  %v889_v12 = vmul.f32 %v888_v9, %v716_v59  ;;  %v892_v32 = vmul.f32 %v1392_v60, %v888_v9  ;;  %v891_v23 = vmul.f32 %v1391_v58, %v888_v9 }
 0x234   : > { %v882_v13 = vpop.f32.mrf.mxu1  ;;  %v894_v14 = vmul.f32 %v888_v9, %v735_v63  ;;  %v893_v15 = vmul.f32 %v888_v9, %v732_v22  ;;  %v896_v16 = vmul.f32 %v1396_v62, %v888_v9  ;;  %v895_v17 = vmul.f32 %v1395_v61, %v888_v9 }
 0x235   : > { %899 = vadd.xlane.f32.xlu1 %v890_v11  ;;  %897 = vadd.xlane.f32.xlu0 %v889_v12  ;;  %v964_v19 = vrot.slane %v1837_v39, %v1796_v36 }
 0x236   : > { %v883_v47 = vpop.f32.mrf.mxu1 }
 0x239   : > { %903 = vadd.xlane.f32.xlu1 %v892_v32  ;;  %901 = vadd.xlane.f32.xlu0 %v891_v23 }
 0x23d   : > { %907 = vadd.xlane.f32.xlu1 %v894_v14  ;;  %905 = vadd.xlane.f32.xlu0 %v893_v15 }
 0x241   : > { %911 = vadd.xlane.f32.xlu1 %v896_v16  ;;  %909 = vadd.xlane.f32.xlu0 %v895_v17 }
 0x2be   : > { %v900_v50 = vpop.xlane.xlu1 %899  ;;  %v898_v26 = vpop.xlane.xlu0 %897 }
 0x2bf   : > { %v914_v27 = vmul.f32 0.10206208, %v900_v50  ;;  %v913_v43 = vmul.f32 0.10206208, %v898_v26 }
 0x2c1   : > { %v922_v28 = vsub.f32 0.0, %v914_v27  ;;  %v921_v29 = vsub.f32 0.0, %v913_v43 }
 0x2c2   : > { %v904_v30 = vpop.xlane.xlu1 %903  ;;  %v902_v31 = vpop.xlane.xlu0 %901 }
 0x2c3   : > { %v931_v51 = vmul.f32 1.442695, %v922_v28  ;;  %v929_v34 = vmul.f32 1.442695, %v921_v29  ;;  %v916_v35 = vmul.f32 0.10206208, %v904_v30 }
 0x2c4   : > { %v915_v37 = vmul.f32 0.10206208, %v902_v31 }
 0x2c5   : > { %1520 = vpow2.f32 %v931_v51  ;;  %v924_v38 = vsub.f32 0.0, %v916_v35 }
 0x2c6   : > { %1522 = vpow2.f32 %v929_v34  ;;  %v923_v10 = vsub.f32 0.0, %v915_v37  ;;  %v908_v40 = vpop.xlane.xlu1 %907  ;;  %v906_v41 = vpop.xlane.xlu0 %905 }
 0x2c7   : > { %v935_v44 = vmul.f32 1.442695, %v924_v38  ;;  %v918_v45 = vmul.f32 0.10206208, %v908_v40  ;;  %v917_v46 = vmul.f32 0.10206208, %v906_v41 }
 0x2c8   : > { %v933_v48 = vmul.f32 1.442695, %v923_v10  ;;  %v1334_v10 = vld [vmem:[%s448_s12] ss:$0 sm:$0xff] }
 0x2c9   : > { %1524 = vpow2.f32 %v935_v44  ;;  %v926_v49 = vsub.f32 0.0, %v918_v45  ;;  %v925_v52 = vsub.f32 0.0, %v917_v46 }
 0x2ca   : > { %1526 = vpow2.f32 %v933_v48  ;;  %v912_v53 = vpop.xlane.xlu1 %911  ;;  %v910_v54 = vpop.xlane.xlu0 %909 }
 0x2cb   : > { %v939_v55 = vmul.f32 1.442695, %v926_v49  ;;  %v937_v57 = vmul.f32 1.442695, %v925_v52  ;;  %v920_v58 = vmul.f32 0.10206208, %v912_v53 }
 0x2cc   : > { %v919_v59 = vmul.f32 0.10206208, %v910_v54 }
 0x2cd   : > { %1528 = vpow2.f32 %v939_v55  ;;  %v928_v60 = vsub.f32 0.0, %v920_v58 }
 0x2ce   : > { %1530 = vpow2.f32 %v937_v57  ;;  %v927_v56 = vsub.f32 0.0, %v919_v59 }
 0x2cf   : > { %v943_v61 = vmul.f32 1.442695, %v928_v60 }
 0x2d0   : > { %v941_v22 = vmul.f32 1.442695, %v927_v56 }
 0x2d1   : > { %1532 = vpow2.f32 %v943_v61 }
 0x2d2   : > { %v1521_v62 = vpop.eup %1520  ;;  %1534 = vpow2.f32 %v941_v22 }
 0x2d3   : > { %v1523_v63 = vpop.eup %1522  ;;  %v946_v8 = vadd.f32 1.0, %v1521_v62 }
 0x2d4   : > { %v945_v9 = vadd.f32 1.0, %v1523_v63 }
 0x2d5   : > { %1536 = vrcp.f32 %v946_v8 }
 0x2d6   : > { %v1525_v11 = vpop.eup %1524  ;;  %1538 = vrcp.f32 %v945_v9 }
 0x2d7   : > { %v1527_v12 = vpop.eup %1526  ;;  %v948_v13 = vadd.f32 1.0, %v1525_v11 }
 0x2d8   : > { %v947_v47 = vadd.f32 1.0, %v1527_v12 }
 0x2d9   : > { %1540 = vrcp.f32 %v948_v13 }
 0x2da   : > { %v1529_v32 = vpop.eup %1528  ;;  %1542 = vrcp.f32 %v947_v47 }
 0x2db   : > { %v1531_v23 = vpop.eup %1530  ;;  %v950_v14 = vadd.f32 1.0, %v1529_v32 }
 0x2dc   : > { %v949_v15 = vadd.f32 1.0, %v1531_v23 }
 0x2dd   : > { %1544 = vrcp.f32 %v950_v14 }
 0x2de   : > { %v1533_v16 = vpop.eup %1532  ;;  %1546 = vrcp.f32 %v949_v15 }
 0x2df   : > { %v1535_v17 = vpop.eup %1534  ;;  %v952_v18 = vadd.f32 1.0, %v1533_v16 }
 0x2e0   : > { %v951_v33 = vadd.f32 1.0, %v1535_v17 }
 0x2e1   : > { %1548 = vrcp.f32 %v952_v18 }
 0x2e2   : > { %v1537_v42 = vpop.eup %1536  ;;  %1550 = vrcp.f32 %v951_v33 }
 0x2e3   : > { %v1539_v20 = vpop.eup %1538  ;;  %v966_v21 = vmul.f32 %v1537_v42, %v964_v19 }
 0x2e4   : > { %v965_v24 = vmul.f32 %v1539_v20, %v964_v19 }
 0x2e6   : > { %v1541_v25 = vpop.eup %1540  ;;  %v973_v50 = vpack.c.bf16 %v966_v21, %v965_v24 }
 0x2e7   : > { %v1543_v26 = vpop.eup %1542  ;;  %v968_v27 = vmul.f32 %v1541_v25, %v964_v19 }
 0x2e8   : > { %1413 = vmatprep.mubr.bf16.mxu0 %v973_v50  ;;  %v967_v43 = vmul.f32 %v1543_v26, %v964_v19 }
 0x2ea   : > { %v1545_v28 = vpop.eup %1544  ;;  %v974_v29 = vpack.c.bf16 %v968_v27, %v967_v43 }
 0x2eb   : > { %v1547_v30 = vpop.eup %1546  ;;  %v970_v31 = vmul.f32 %v1545_v28, %v964_v19 }
 0x2ec   : > { %1414 = vmatmul.mubr.bf16.vlgmr.msra.gmra.mxu0 %v974_v29  ;;  %v969_v36 = vmul.f32 %v1547_v30, %v964_v19 }
 0x2ee   : > { %v1549_v39 = vpop.eup %1548  ;;  %v975_v51 = vpack.c.bf16 %v970_v31, %v969_v36 }
 0x2ef   : > { %v1551_v34 = vpop.eup %1550  ;;  %v972_v35 = vmul.f32 %v1549_v39, %v964_v19 }
 0x2f0   : > { %1417 = vmatprep.mubr.bf16.mxu0 %v975_v51  ;;  %v971_v37 = vmul.f32 %v1551_v34, %v964_v19 }
 0x2f2   : > { %v976_v38 = vpack.c.bf16 %v972_v35, %v971_v37 }
 0x2f4   : > { %1418 = vmatmul.mubr.bf16.gmra.mxu0 %v976_v38 }
 0x3ac   : > { %v1415_v40 = vpop.f32.mrf.mxu0 }
 0x3ad   : > { %v1091_v41 = vadd.f32 %v1415_v40, %v1334_v10 }
 0x3ae   : > { %v1082_v44 = vpop.f32.mrf.mxu0 }
 0x3af   : > { %v1115_v45 = vadd.f32 %v1091_v41, %v1678_v1  ;;  %v1083_v46 = vadd.f32 %v1334_v10, %v1082_v44 }
 0x3b0   : > { %v1416_v48 = vpop.f32.mrf.mxu0 }
 0x3b1   : > { %1123 = vst [vmem:[%s457_s15 + $0x10] sm:$0xff] %v1115_v45  ;;  %v1113_v49 = vadd.f32 %v1083_v46, %v1676_v0  ;;  %v1094_v52 = vadd.f32 %v1416_v48, %v1334_v10 }
 0x3b2   : > { %v1085_v53 = vpop.f32.mrf.mxu0 }
 0x3b3   : > { %1121 = vst [vmem:[%s457_s15] sm:$0xff] %v1113_v49  ;;  %v1116_v54 = vadd.f32 %v1094_v52, %v1686_v3  ;;  %v1086_v55 = vadd.f32 %v1334_v10, %v1085_v53 }
 0x3b4   : > { %v1419_v57 = vpop.f32.mrf.mxu0 }
 0x3b5   : > { %1124 = vst [vmem:[%s457_s15 + $0x18] sm:$0xff] %v1116_v54  ;;  %v1114_v58 = vadd.f32 %v1086_v55, %v1684_v2  ;;  %v1107_v59 = vadd.f32 %v1419_v57, %v1334_v10 }
 0x3b6   : > { %v1098_v60 = vpop.f32.mrf.mxu0 }
 0x3b7   : > { %1122 = vst [vmem:[%s457_s15 + $0x8] sm:$0xff] %v1114_v58  ;;  %v1119_v1 = vadd.f32 %v1107_v59, %v1709_v6  ;;  %v1099_v56 = vadd.f32 %v1334_v10, %v1098_v60 }
 0x3b8   : > { %v1420_v61 = vpop.f32.mrf.mxu0 }
 0x3b9   : > { %1127 = vst [vmem:[%s457_s15 + $0x30] sm:$0xff] %v1119_v1  ;;  %v1117_v0 = vadd.f32 %v1099_v56, %v1695_v4  ;;  %v1110_v22 = vadd.f32 %v1420_v61, %v1334_v10 }
 0x3ba   : > { %v1101_v62 = vpop.f32.mrf.mxu0 }
 0x3bb   : > { %1125 = vst [vmem:[%s457_s15 + $0x20] sm:$0xff] %v1117_v0  ;;  %v1120_v3 = vadd.f32 %v1110_v22, %v1711_v7  ;;  %v1102_v63 = vadd.f32 %v1334_v10, %v1101_v62 }
 0x3bd   : > { %1128 = vst [vmem:[%s457_s15 + $0x38] sm:$0xff] %v1120_v3  ;;  %v1118_v8 = vadd.f32 %v1102_v63, %v1697_v5 }
 0x3bf   : > { %1126 = vst [vmem:[%s457_s15 + $0x28] sm:$0xff] %v1118_v8 }
 0x3c0 PF: > { %s18_s9 = sadd.s32 1, %s1590_s9   ;;  %s1890_s27 = smov %s1582_s29 }
 0x3c1   : > { %p15_p7 = scmp.ge.s32.totalorder %s18_s9, 6   ;;  %s1891_s28 = smov %s1586_s30 }
 0x3c2   : > { %s1892_s29 = smov %s1895_s10  ;;  %s1893_s30 = smov %s1899_s11 }
 0x3c3   :  { %17 = sbr.rel (!%p15_p7) target bundleno = 3 (0x3), region = 103 }

// kernel: token_transformer_forward.6
= control target key start
LH: loop header
LB: loop body
LE: loop exit
PB: predicated region body
PF: predicated region fallthrough
CT: control target
= control target key end

     0   :  { %s6485_s29 = smov 0   ;;  %s6487_s30 = smov 0   ;;  %s9006_s0 = inlined_call_operand.vmem [shape: f32[2,66,128], index: 0, kind: input, shape index: {}]   ;;  %s9007_s1 = inlined_call_operand.vmem [shape: bf16[2,66,128], index: 1, kind: input, shape index: {}]   ;;  %s9008_s2 = inlined_call_operand.vmem [shape: f32[2,1,128], index: 2, kind: input, shape index: {}]   ;;  %s9009_s3 = inlined_call_operand.vmem [shape: f32[2,1,128], index: 3, kind: input, shape index: {}]   ;;  %s9010_s4 = inlined_call_operand.vmem [shape: bf16[2,128,256], index: 4, kind: input, shape index: {}]   ;;  %s9011_s5 = inlined_call_operand.vmem [shape: bf16[2,128,128], index: 5, kind: input, shape index: {}]   ;;  %s9012_s6 = inlined_call_operand.vmem [shape: bf16[2,128,128], index: 6, kind: input, shape index: {}]   ;;  %s9013_s7 = inlined_call_operand.vmem [shape: f32[2,1,128], index: 7, kind: input, shape index: {}]   ;;  %s9014_s8 = inlined_call_operand.vmem [shape: f32[2,1,128], index: 8, kind: input, shape index: {}]   ;;  %s9015_s9 = inlined_call_operand.vmem [shape: f32[2,1,128], index: 9, kind: input, shape index: {}]   ;;  %s9016_s10 = inlined_call_operand.vmem [shape: bf16[2,128,384], index: 10, kind: input, shape index: {}]   ;;  %s9017_s11 = inlined_call_operand.vmem [shape: f32[2,1,384], index: 11, kind: input, shape index: {}]   ;;  %s9018_s12 = inlined_call_operand.vmem [shape: bf16[2,384,128], index: 12, kind: input, shape index: {}]   ;;  %s9019_s13 = inlined_call_operand.vmem [shape: f32[2,1,128], index: 13, kind: input, shape index: {}]   ;;  %s9020_s14 = inlined_call_operand.vmem [shape: f32[2,66,128], index: 14, kind: output, shape index: {}]  }
   0x1   :  { %9058 = sst [smem:[#allocation31_spill]] %s9006_s0  ;;  %s6489_s15 = smov 0  }
   0x2   :  { %9059 = sst [smem:[#allocation32_spill]] %s9007_s1  ;;  %s6491_s16 = smov 0  }
   0x3   :  { %9060 = sst [smem:[#allocation33_spill]] %s9009_s3  ;;  %s6493_s17 = smov 0  }
   0x4   :  { %9061 = sst [smem:[#allocation34_spill]] %s9010_s4 }
   0x5   :  { %9062 = sst [smem:[#allocation35_spill]] %s9011_s5 }
   0x6   :  { %9063 = sst [smem:[#allocation36_spill]] %s9012_s6 }
   0x7   :  { %9064 = sst [smem:[#allocation37_spill]] %s9015_s9 }
   0x8   :  { %9065 = sst [smem:[#allocation38_spill]] %s9017_s11 }
   0x9   :  { %9066 = sst [smem:[#allocation39_spill]] %s9020_s14 }
   0xa LB: > { %9067 = sst [smem:[#allocation2_spill]] %s6388_s29  ;;  %s33_s18 = sadd.s32 1, %s6396_s15  ;;  %s6404_s17 = sphi %s6493_s17, %s24_s17   ;;  %s6400_s16 = sphi %s6491_s16, %s9192_s16   ;;  %s6396_s15 = sphi %s6489_s15, %s9191_s15   ;;  %s6392_s30 = sphi %s6487_s30, %s9190_s30   ;;  %s6388_s29 = sphi %s6485_s29, %s9189_s29  }
   0xb   : > { %9068 = sst [smem:[#allocation3_spill]] %s6396_s15  ;;  %s36_s19 = sadd.s32 1, %s6400_s16 }
   0xc   : > { %9069 = sst [smem:[#allocation4_spill]] %s6400_s16  ;;  %p34_p0 = scmp.ge.s32.totalorder %s33_s18, 2 }
   0xd   : > { %9070 = sst [smem:[#allocation5_spill]] %s6404_s17  ;;  %p4948_p1 = scmp.ge.s32.totalorder %s6404_s17, 1 }
   0xe   : > { %p541_p2 = scmp.lt.s32.totalorder %s6404_s17, 5  ;;  %s9194_s18 = smov (%p34_p0, %s33_s18), 0 }
   0xf   : > { %9071 = sst [smem:[#allocation6_spill]] %s9194_s18  ;;  %s9196_s19 = smov (!%p34_p0, %s36_s19), %s6400_s16 }
  0x10   : > { %p542_p3 = pnand %p4948_p1, %p541_p2  ;;  %p38_p4 = scmp.ge.s32.totalorder %s9196_s19, 2 }
  0x12   : > { %s9198_s19 = smov (%p38_p4, %s9196_s19), 0  ;;  %545 = sbr.rel (%p542_p3) target bundleno = 3221 (0xc95), region = 76 }
  0x13   : > { %9072 = sst [smem:[#allocation7_spill]] %s9198_s19 }
  0x17   : > { %p639_p5 = scmp.lt.s32.totalorder %s6392_s30, 1  ;;  %p649_p6 = scmp.lt.s32.totalorder %s6388_s29, 1 }
  0x18   : > { %s9073_s0 = sld [smem:[#allocation31_spill]] }
  0x19   : > { %s9200_s30 = smov (!%p639_p5, %s6392_s30), 1  ;;  %s9075_s1 = sld [smem:[#allocation32_spill]] }
  0x1a   : > { %s6519_s20 = scalar_select %p649_p6, %s6388_s29, 1 }
  0x1b   : > { %s5845_s21 = smul.u32 72, %s9200_s30  ;;  %s9076_s4 = sld [smem:[#allocation34_spill]] }
  0x1c   : > { %s5846_s22 = smul.u32 36, %s9200_s30  ;;  %s5085_s14 = sshll.u32 %s6519_s20, 7 }
  0x1d   : > { %s5086_s24 = sshll.u32 %s6519_s20, 6  ;;  %s9077_s5 = sld [smem:[#allocation35_spill]] }
  0x1e   : > { %s6528_s28 = scalar_lea.vmem %s9073_s0, %s5845_s21  ;;  %s9078_s6 = sld [smem:[#allocation36_spill]] }
  0x1f   : > { %s6537_s29 = scalar_lea.vmem %s9075_s1, %s5846_s22  ;;  %s5847_s25 = smul.u32 192, %s6519_s20 }
  0x20   : > { %s5848_s26 = smul.u32 3, %s6519_s20  ;;  %s695_s0 = scalar_lea.vmem %s9019_s13, %s6519_s20 }
  0x21   : > { %s6543_s23 = scalar_lea.vmem %s9076_s4, %s5085_s14  ;;  %s6582_s1 = scalar_lea.vmem %s9018_s12, %s5847_s25 }
  0x22   : > { %s9080_s14 = sld [smem:[#allocation38_spill]] }
  0x23   : > { %s6549_s27 = scalar_lea.vmem %s9077_s5, %s5086_s24  ;;  %s9081_s9 = sld [smem:[#allocation39_spill]] }
  0x24   : > { %s6554_s19 = scalar_lea.vmem %s9078_s6, %s5086_s24  ;;  %s6577_s6 = scalar_lea.vmem %s9016_s10, %s5847_s25 }
  0x25   : > { %s9082_s5 = sld [smem:[#allocation2_spill]] }
  0x28   : > { %s6587_s30 = scalar_lea.vmem %s9080_s14, %s5848_s26 }
  0x29   : > { %s6592_s3 = scalar_lea.vmem %s9081_s9, %s5845_s21 }
  0x2b   : > { %p4960_p7 = scmp.ne.s32.totalorder %s9082_s5, 0 }
  0x2d   : > { %705 = sbr.rel (%p4960_p7) target bundleno = 56 (0x38), region = 80 }
  0x32   : > { %v706_v0 = vld [vmem:[%s6528_s28] sm:$0xff]  ;;  %v707_v1 = vld [vmem:[%s6528_s28 + $0x8] sm:$0xff]  ;;  %v708_v2 = vld [vmem:[%s6528_s28 + $0x10] sm:$0xff] }
  0x33   : > { %715 = vst [vmem:[%s6592_s3] sm:$0xff] %v706_v0  ;;  %716 = vst [vmem:[%s6592_s3 + $0x8] sm:$0xff] %v707_v1  ;;  %v709_v3 = vld [vmem:[%s6528_s28 + $0x18] sm:$0xff]  ;;  %v710_v4 = vld [vmem:[%s6528_s28 + $0x20] sm:$0xff] }
  0x34   : > { %717 = vst [vmem:[%s6592_s3 + $0x10] sm:$0xff] %v708_v2  ;;  %v711_v5 = vld [vmem:[%s6528_s28 + $0x28] sm:$0xff]  ;;  %718 = vst [vmem:[%s6592_s3 + $0x18] sm:$0xff] %v709_v3  ;;  %v712_v6 = vld [vmem:[%s6528_s28 + $0x30] sm:$0xff] }
  0x35   : > { %719 = vst [vmem:[%s6592_s3 + $0x20] sm:$0xff] %v710_v4  ;;  %720 = vst [vmem:[%s6592_s3 + $0x28] sm:$0xff] %v711_v5  ;;  %v713_v7 = vld [vmem:[%s6528_s28 + $0x38] sm:$0xff]  ;;  %v714_v8 = vld [vmem:[%s6528_s28 + $0x40] sm:$0x3] }
  0x36   : > { %721 = vst [vmem:[%s6592_s3 + $0x30] sm:$0xff] %v712_v6  ;;  %722 = vst [vmem:[%s6592_s3 + $0x38] sm:$0xff] %v713_v7 }
  0x37   : > { %723 = vst [vmem:[%s6592_s3 + $0x40] sm:$0x3] %v714_v8 }
  0x38 PF: > { %vm769_vm0 = vcmask 1041408   ;;  %v5893_v19 = vld [vmem:[%s6549_s27 + $0x38] sm:$0xff]   ;;  %v9028_v20 = vmov 0.0   ;;  %v9025_v21 = vlaneseq  ;;  %v5897_v3 = vld [vmem:[%s6549_s27 + $0x30] sm:$0xff]   ;;  %v5898_v6 = vld [vmem:[%s6543_s23 + $0x64] ss:$8 sps:$4 sm:$0xff]   ;;  %s9084_s21 = scalar_lea.vmem %s9008_s2, %s6519_s20  ;;  %s9133_s11 = scalar_lea.vmem %s9013_s7, %s6519_s20 }
  0x39   : > { %5325 = vmatprep.subr.bf16.mxu1 %v9028_v20  ;;  %v5894_v60 = vld [vmem:[%s6543_s23 + $0x74] ss:$8 sps:$4 sm:$0xff]   ;;  %v5896_v0 = vld [vmem:[%s6543_s23 + $0x70] ss:$8 sps:$4 sm:$0xff]   ;;  %v5900_v8 = vld [vmem:[%s6543_s23 + $0x60] ss:$8 sps:$4 sm:$0xff]   ;;  %s9144_s26 = scalar_lea.vmem %s9014_s8, %s6519_s20 }
  0x3a   : > { %v724_v9 = vld [vmem:[%s6592_s3] sm:$0xff]  ;;  %v725_v11 = vld [vmem:[%s6592_s3 + $0x8] sm:$0xff]  ;;  %5326 = vmatpush3.bf16.msra.mxu1 %v5893_v19  ;;  %v6636_v22 = vand.u32 127, %v9025_v21  ;;  %1007 = vmatprep.subr.bf16.mxu0 %v5894_v60  ;;  %v5913_v19 = vld [vmem:[%s6549_s27 + $0x10] sm:$0xff]   ;;  %vm6407_vm2 = vmmov 0   ;;  %vm1663_vm14 = vcmask 1040384  }
  0x3b   : > { %v726_v10 = vld [vmem:[%s6592_s3 + $0x10] sm:$0xff]  ;;  %753 = vadd.xlane.f32.xlu0 %v724_v9  ;;  %v727_v12 = vld [vmem:[%s6592_s3 + $0x18] sm:$0xff]  ;;  %5327 = vmatprep.subr.bf16.mxu1 %v9028_v20  ;;  %s9145_s15 = sld [smem:[#allocation37_spill]] }
  0x3c   : > { %757 = vadd.xlane.f32.xlu1 %v726_v10  ;;  %v728_v13 = vld [vmem:[%s6592_s3 + $0x20] sm:$0xff]  ;;  %v729_v14 = vld [vmem:[%s6592_s3 + $0x28] sm:$0xff]  ;;  %9083 = vst [vmem:[#allocation8_spill] sm:$0xff] %v6636_v22  ;;  %vm784_vm1 = vcmp.lt.s32.totalorder %v6636_v22, 96  ;;  %1008 = vmatpush1.bf16.msra.mxu0 %v5896_v0  ;;  %vm1829_vm3 = vcmp.ge.s32.totalorder %v6636_v22, 32  ;;  %vm1830_vm4 = vcmp.lt.s32.totalorder %v6636_v22, 48 }
  0x3d   : > { %v6620_v15 = vld [vmem:[%s6592_s3 + $0x30] sm:$0xff]  ;;  %v6623_v16 = vld [vmem:[%s6592_s3 + $0x38] sm:$0xff]  ;;  %1009 = vmatprep.subr.bf16.mxu0 %v5898_v6  ;;  %5341 = vmatprep.mubr.msk.bf16.mxu1 %vm6407_vm2, %v9028_v20  ;;  %vm2129_vm5 = vcmp.ge.s32.totalorder %v6636_v22, 48  ;;  %vm2130_vm6 = vcmp.lt.s32.totalorder %v6636_v22, 64  ;;  %vm2429_vm7 = vcmp.ge.s32.totalorder %v6636_v22, 64  ;;  %vm2430_vm8 = vcmp.lt.s32.totalorder %v6636_v22, 80  ;;  %vm1831_vm9 = vmand %vm1829_vm3, %vm1830_vm4 }
  0x3e   : > { %v6626_v17 = vld [vmem:[%s6592_s3 + $0x40] sm:$0x3]  ;;  %5328 = vmatpush3.bf16.msra.mxu1 %v5897_v3  ;;  %vm2729_vm10 = vcmp.ge.s32.totalorder %v6636_v22, 80  ;;  %vm2131_vm11 = vmand %vm2129_vm5, %vm2130_vm6  ;;  %vm1447_vm15 = vcmp.ge.s32.totalorder %v6636_v22, 16  ;;  %vm1448_vm3 = vcmp.lt.s32.totalorder %v6636_v22, 32  ;;  %vm1245_vm4 = vcmp.lt.s32.totalorder %v6636_v22, 16 }
  0x3f   : > { %755 = vadd.xlane.f32.xlu0 %v725_v11  ;;  %v770_v18 = vsel %vm769_vm0, %v6626_v17, 0.0  ;;  %5329 = vmatprep.subr.bf16.mxu1 %v9028_v20  ;;  %vm2431_vm12 = vmand %vm2429_vm7, %vm2430_vm8  ;;  %vm1336_vm6 = vcmask 539648   ;;  %vm1361_vm7 = vcmask 533504  }
  0x40   : > { %759 = vadd.xlane.f32.xlu1 %v727_v12  ;;  %1010 = vmatpush1.bf16.msra.mxu0 %v5900_v8  ;;  %v5089_v8 = vld [vmem:[%s6537_s29] sm:$0xff]   ;;  %vm2730_vm13 = vmand %vm2729_vm10, %vm784_vm1 }
  0x41   : > { %vm1449_vm5 = vmand %vm1447_vm15, %vm1448_vm3  ;;  %s9146_s17 = scalar_lea.vmem %s9145_s15, %s6519_s20 }
  0x43   : > { %761 = vadd.xlane.f32.xlu0 %v728_v13 }
  0x44   : > { %763 = vadd.xlane.f32.xlu1 %v729_v14 }
  0x47   : > { %765 = vadd.xlane.f32.xlu0 %v6620_v15 }
  0x48   : > { %767 = vadd.xlane.f32.xlu1 %v6623_v16 }
  0x4b   : > { %771 = vadd.xlane.f32.xlu0 %v770_v18  ;;  %v5912_v18 = vld [vmem:[%s6543_s23 + $0x30] ss:$8 sps:$4 sm:$0xff]  }
  0xc4   : > { %v754_v23 = vpop.xlane.xlu0 %753 }
  0xc5   : > { %v758_v24 = vpop.xlane.xlu1 %757  ;;  %v773_v25 = vmul.f32 0.010416667, %v754_v23  ;;  %v5914_v23 = vld [vmem:[%s6543_s23 + $0x24] ss:$8 sps:$4 sm:$0xff]  }
  0xc6   : > { %v775_v26 = vmul.f32 0.010416667, %v758_v24  ;;  %v5916_v24 = vld [vmem:[%s6543_s23 + $0x20] ss:$8 sps:$4 sm:$0xff]  }
  0xc7   : > { %v785_v27 = vsub.f32 %v724_v9, %v773_v25  ;;  %v5917_v25 = vld [vmem:[%s6549_s27 + $0x8] sm:$0xff]  }
  0xc8   : > { %v787_v28 = vsub.f32 %v726_v10, %v775_v26  ;;  %v756_v29 = vpop.xlane.xlu0 %755  ;;  %v5901_v10 = vld [vmem:[%s6549_s27 + $0x28] sm:$0xff]   ;;  %v5918_v26 = vld [vmem:[%s6543_s23 + $0x14] ss:$8 sps:$4 sm:$0xff]  }
  0xc9   : > { %v760_v30 = vpop.xlane.xlu1 %759  ;;  %v774_v31 = vmul.f32 0.010416667, %v756_v29  ;;  %v6641_v33 = vsel %vm784_vm1, %v785_v27, 0.0  ;;  %5330 = vmatpush3.bf16.msra.mxu1 %v5901_v10  ;;  %v5920_v27 = vld [vmem:[%s6543_s23 + $0x10] ss:$8 sps:$4 sm:$0xff]   ;;  %v5921_v29 = vld [vmem:[%s6549_s27] sm:$0xff]  }
  0xca   : > { %v776_v32 = vmul.f32 0.010416667, %v760_v30  ;;  %v6645_v34 = vsel %vm784_vm1, %v787_v28, 0.0  ;;  %v803_v35 = vmul.f32 %v6641_v33, %v6641_v33  ;;  %5331 = vmatprep.subr.bf16.mxu1 %v9028_v20  ;;  %v5922_v28 = vld [vmem:[%s6543_s23 + $0x4] ss:$8 sps:$4 sm:$0xff]  }
  0xcb   : > { %v786_v36 = vsub.f32 %v725_v11, %v774_v31  ;;  %v805_v40 = vmul.f32 %v6645_v34, %v6645_v34  ;;  %v5902_v11 = vld [vmem:[%s6543_s23 + $0x54] ss:$8 sps:$4 sm:$0xff]   ;;  %v5924_v30 = vld [vmem:[%s6543_s23] ss:$8 sps:$4 sm:$0xff]   ;;  %v9026_v31 = vmov 0  }
  0xcc   : > { %v788_v37 = vsub.f32 %v727_v12, %v776_v32  ;;  %812 = vadd.xlane.f32.xlu1 %v803_v35  ;;  %v762_v38 = vpop.xlane.xlu0 %761  ;;  %v5904_v12 = vld [vmem:[%s6543_s23 + $0x50] ss:$8 sps:$4 sm:$0xff]   ;;  %1011 = vmatprep.subr.bf16.mxu0 %v5902_v11 }
  0xcd   : > { %v764_v39 = vpop.xlane.xlu1 %763  ;;  %v777_v41 = vmul.f32 0.010416667, %v762_v38  ;;  %v6653_v43 = vsel %vm784_vm1, %v786_v36, 0.0  ;;  %1012 = vmatpush1.bf16.msra.mxu0 %v5904_v12  ;;  %1039 = vmatprep.mubr.bf16.mxu0 %v9026_v31  ;;  %v5090_v12 = vunpack.c.l.bf16 %v5089_v8 }
  0xce   : > { %v778_v42 = vmul.f32 0.010416667, %v764_v39  ;;  %v6657_v44 = vsel %vm784_vm1, %v788_v37, 0.0  ;;  %v804_v45 = vmul.f32 %v6653_v43, %v6653_v43 }
  0xcf   : > { %v789_v46 = vsub.f32 %v728_v13, %v777_v41  ;;  %v806_v50 = vmul.f32 %v6657_v44, %v6657_v44  ;;  %v5905_v13 = vld [vmem:[%s6549_s27 + $0x20] sm:$0xff]  }
  0xd0   : > { %v790_v47 = vsub.f32 %v729_v14, %v778_v42  ;;  %816 = vadd.xlane.f32.xlu1 %v805_v40  ;;  %814 = vadd.xlane.f32.xlu0 %v804_v45  ;;  %v766_v48 = vpop.xlane.xlu0 %765  ;;  %v5906_v14 = vld [vmem:[%s6543_s23 + $0x44] ss:$8 sps:$4 sm:$0xff]  }
  0xd1   : > { %v768_v49 = vpop.xlane.xlu1 %767  ;;  %v779_v51 = vmul.f32 0.010416667, %v766_v48  ;;  %v6665_v53 = vsel %vm784_vm1, %v789_v46, 0.0  ;;  %5332 = vmatpush3.bf16.msra.mxu1 %v5905_v13  ;;  %1013 = vmatprep.subr.bf16.mxu0 %v5906_v14  ;;  %v5091_v14 = vunpack.c.h.bf16 %v5089_v8 }
  0xd2   : > { %v780_v52 = vmul.f32 0.010416667, %v768_v49  ;;  %v6669_v54 = vsel %vm784_vm1, %v790_v47, 0.0  ;;  %v807_v55 = vmul.f32 %v6665_v53, %v6665_v53  ;;  %5333 = vmatprep.subr.bf16.mxu1 %v9028_v20 }
  0xd3   : > { %v791_v56 = vsub.f32 %v6620_v15, %v779_v51  ;;  %v808_v59 = vmul.f32 %v6669_v54, %v6669_v54  ;;  %v5908_v15 = vld [vmem:[%s6543_s23 + $0x40] ss:$8 sps:$4 sm:$0xff]  }
  0xd4   : > { %v792_v57 = vsub.f32 %v6623_v16, %v780_v52  ;;  %818 = vadd.xlane.f32.xlu0 %v806_v50  ;;  %820 = vadd.xlane.f32.xlu1 %v807_v55  ;;  %v772_v58 = vpop.xlane.xlu0 %771  ;;  %v5909_v16 = vld [vmem:[%s6549_s27 + $0x18] sm:$0xff]   ;;  %s9085_s27 = sld [smem:[#allocation33_spill]] }
  0xd5   : > { %v781_v61 = vmul.f32 0.010416667, %v772_v58  ;;  %v6680_v62 = vsel %vm784_vm1, %v791_v56, 0.0  ;;  %1014 = vmatpush1.bf16.msra.mxu0 %v5908_v15  ;;  %5334 = vmatpush3.bf16.msra.mxu1 %v5909_v16 }
  0xd6   : > { %v6684_v63 = vsel %vm784_vm1, %v792_v57, 0.0  ;;  %v809_v1 = vmul.f32 %v6680_v62, %v6680_v62  ;;  %5335 = vmatprep.subr.bf16.mxu1 %v9028_v20 }
  0xd7   : > { %v793_v2 = vsub.f32 %v6626_v17, %v781_v61  ;;  %v810_v4 = vmul.f32 %v6684_v63, %v6684_v63  ;;  %v5910_v17 = vld [vmem:[%s6543_s23 + $0x34] ss:$8 sps:$4 sm:$0xff]   ;;  %v6736_v61 = vld [vmem:[%s9084_s21] ss:$0 sm:$0xff] }
  0xd8   : > { %822 = vadd.xlane.f32.xlu0 %v808_v59  ;;  %824 = vadd.xlane.f32.xlu1 %v809_v1 }
  0xd9   : > { %v6695_v5 = vsel %vm784_vm1, %v793_v2, 0.0  ;;  %1015 = vmatprep.subr.bf16.mxu0 %v5910_v17  ;;  %5336 = vmatpush3.bf16.msra.mxu1 %v5913_v19 }
  0xda   : > { %v811_v7 = vmul.f32 %v6695_v5, %v6695_v5  ;;  %1016 = vmatpush1.bf16.msra.mxu0 %v5912_v18  ;;  %5337 = vmatprep.subr.bf16.mxu1 %v9028_v20  ;;  %s9086_s22 = scalar_lea.vmem %s9085_s27, %s6519_s20 }
  0xdb   : > { %1017 = vmatprep.subr.bf16.mxu0 %v5914_v23 }
  0xdc   : > { %826 = vadd.xlane.f32.xlu0 %v810_v4  ;;  %v828_v9 = vsel %vm769_vm0, %v811_v7, 0.0  ;;  %v6745_v7 = vld [vmem:[%s9086_s22] ss:$0 sm:$0xff] }
  0xdd   : > { %829 = vadd.xlane.f32.xlu1 %v828_v9  ;;  %5338 = vmatpush3.bf16.msra.mxu1 %v5917_v25 }
  0xde   : > { %1018 = vmatpush1.bf16.msra.mxu0 %v5916_v24  ;;  %5339 = vmatprep.subr.bf16.mxu1 %v9028_v20 }
  0xdf   : > { %1019 = vmatprep.subr.bf16.mxu0 %v5918_v26 }
  0xe1   : > { %5340 = vmatpush3.bf16.msra.mxu1 %v5921_v29 }
  0xe2   : > { %1020 = vmatpush1.bf16.msra.mxu0 %v5920_v27  ;;  %5391 = vmatprep.subr.bf16.mxu1 %v9028_v20 }
  0xe3   : > { %1021 = vmatprep.subr.bf16.mxu0 %v5922_v28  ;;  %v5104_v28 = vld [vmem:[%s6537_s29 + $0x8] sm:$0xff]  }
  0xe6   : > { %1022 = vmatpush1.bf16.msra.mxu0 %v5924_v30  ;;  %v5095_v30 = vunpack.c.h.bf16 %v5104_v28 }
  0xe7   : > { %5361 = vmatprep.subr.bf16.mxu0 %v9028_v20 }
 0x155   : > { %v813_v32 = vpop.xlane.xlu1 %812 }
 0x156   : > { %v831_v35 = vmul.f32 0.010416667, %v813_v32 }
 0x158   : > { %v840_v36 = vadd.f32 1e-05, %v831_v35 }
 0x159   : > { %v817_v37 = vpop.xlane.xlu1 %816  ;;  %v815_v38 = vpop.xlane.xlu0 %814 }
 0x15a   : > { %5989 = vrsqrt.f32 %v840_v36  ;;  %v833_v39 = vmul.f32 0.010416667, %v817_v37  ;;  %v832_v40 = vmul.f32 0.010416667, %v815_v38  ;;  %v5094_v36 = vunpack.c.l.bf16 %v5104_v28 }
 0x15c   : > { %v842_v41 = vadd.f32 1e-05, %v833_v39  ;;  %v841_v42 = vadd.f32 1e-05, %v832_v40 }
 0x15d   : > { %v821_v45 = vpop.xlane.xlu1 %820  ;;  %v819_v46 = vpop.xlane.xlu0 %818 }
 0x15e   : > { %5991 = vrsqrt.f32 %v842_v41  ;;  %v835_v47 = vmul.f32 0.010416667, %v821_v45  ;;  %v834_v48 = vmul.f32 0.010416667, %v819_v46  ;;  %v5105_v46 = vld [vmem:[%s6537_s29 + $0x10] sm:$0xff]  }
 0x15f   : > { %5993 = vrsqrt.f32 %v841_v42 }
 0x160   : > { %v843_v49 = vadd.f32 1e-05, %v834_v48  ;;  %v844_v51 = vadd.f32 1e-05, %v835_v47 }
 0x161   : > { %v823_v50 = vpop.xlane.xlu0 %822  ;;  %v825_v55 = vpop.xlane.xlu1 %824 }
 0x162   : > { %v836_v52 = vmul.f32 0.010416667, %v823_v50  ;;  %5995 = vrsqrt.f32 %v843_v49  ;;  %v837_v60 = vmul.f32 0.010416667, %v825_v55  ;;  %v5099_v49 = vunpack.c.h.bf16 %v5105_v46 }
 0x163   : > { %5997 = vrsqrt.f32 %v844_v51  ;;  %v5098_v51 = vunpack.c.l.bf16 %v5105_v46 }
 0x164   : > { %v845_v56 = vadd.f32 1e-05, %v836_v52  ;;  %v846_v6 = vadd.f32 1e-05, %v837_v60  ;;  %v5106_v60 = vld [vmem:[%s6537_s29 + $0x18] sm:$0xff]  }
 0x165   : > { %v827_v57 = vpop.xlane.xlu0 %826 }
 0x166   : > { %v838_v58 = vmul.f32 0.010416667, %v827_v57  ;;  %5999 = vrsqrt.f32 %v845_v56  ;;  %v830_v2 = vpop.xlane.xlu1 %829 }
 0x167   : > { %v5990_v59 = vpop.eup %5989  ;;  %v839_v10 = vmul.f32 0.010416667, %v830_v2  ;;  %v5103_v2 = vunpack.c.h.bf16 %v5106_v60 }
 0x168   : > { %v858_v0 = vmul.f32 %v5990_v59, %v6641_v33  ;;  %v847_v1 = vadd.f32 1e-05, %v838_v58 }
 0x169   : > { %v848_v17 = vadd.f32 1e-05, %v839_v10 }
 0x16a   : > { %v873_v3 = vmul.f32 %v6736_v61, %v858_v0  ;;  %6001 = vrsqrt.f32 %v847_v1 }
 0x16b   : > { %v5992_v4 = vpop.eup %5991  ;;  %6003 = vrsqrt.f32 %v846_v6 }
 0x16c   : > { %v5994_v9 = vpop.eup %5993  ;;  %v888_v33 = vadd.f32 %v6745_v7, %v873_v3  ;;  %v860_v15 = vmul.f32 %v5992_v4, %v6645_v34  ;;  %6005 = vrsqrt.f32 %v848_v17  ;;  %v5102_v4 = vunpack.c.l.bf16 %v5106_v60 }
 0x16d   : > { %v859_v11 = vmul.f32 %v5994_v9, %v6653_v43  ;;  %v741_v9 = vld [vmem:[%s6537_s29 + $0x20] sm:$0x1]  ;;  %v5011_v17 = vsel %vm2431_vm12, 1.0, %v9028_v20 }
 0x16e   : > { %v897_v23 = vadd.f32 %v5090_v12, %v888_v33  ;;  %v875_v26 = vmul.f32 %v6736_v61, %v860_v15 }
 0x16f   : > { %v874_v13 = vmul.f32 %v6736_v61, %v859_v11  ;;  %v5996_v16 = vpop.eup %5995 }
 0x170   : > { %v861_v19 = vmul.f32 %v5996_v16, %v6657_v44  ;;  %v5998_v24 = vpop.eup %5997  ;;  %v890_v44 = vadd.f32 %v6745_v7, %v875_v26  ;;  %v5005_v16 = vsel %vm2131_vm11, 1.0, %v9028_v20 }
 0x171   : > { %v889_v18 = vadd.f32 %v6745_v7, %v874_v13  ;;  %v862_v37 = vmul.f32 %v5998_v24, %v6665_v53  ;;  %v6810_v26 = vpack.c.bf16 %v5005_v16, %v5005_v16 }
 0x172   : > { %v876_v27 = vmul.f32 %v6736_v61, %v861_v19  ;;  %v899_v42 = vadd.f32 %v5094_v36, %v890_v44 }
 0x173   : > { %v1088_v25 = vpack.c.bf16 %v889_v18, %v888_v33  ;;  %v898_v43 = vadd.f32 %v5091_v14, %v889_v18  ;;  %v6000_v29 = vpop.eup %5999  ;;  %v877_v45 = vmul.f32 %v6736_v61, %v862_v37  ;;  %v5017_v18 = vsel %vm2730_vm13, 1.0, %v9028_v20  ;;  %9087 = vst [vmem:[#allocation9_spill] sm:$0xff] %v6810_v26 }
 0x174   : > { %v891_v32 = vadd.f32 %v6745_v7, %v876_v27  ;;  %v863_v35 = vmul.f32 %v6000_v29, %v6669_v54  ;;  %v6812_v27 = vpack.c.bf16 %v5011_v17, %v5011_v17  ;;  %v6814_v28 = vpack.c.bf16 %v5017_v18, %v5017_v18 }
 0x175   : > { %5342 = vmatmul.mubr.bf16.vlgmr.msra.gmra.mxu1 %v1088_v25  ;;  %v906_v34 = vpack.c.bf16 %v898_v43, %v897_v23  ;;  %v892_v50 = vadd.f32 %v6745_v7, %v877_v45 }
 0x176   : > { %5345 = vmatprep.mubr.msk.bf16.mxu1 %vm6407_vm2, %v9028_v20  ;;  %v900_v38 = vadd.f32 %v5095_v30, %v891_v32  ;;  %v878_v39 = vmul.f32 %v6736_v61, %v863_v35  ;;  %v1089_v41 = vpack.c.bf16 %v891_v32, %v890_v44  ;;  %9088 = vst [vmem:[#allocation10_spill] sm:$0xff] %v6812_v27  ;;  %9089 = vst [vmem:[#allocation11_spill] sm:$0xff] %v6814_v28 }
 0x177   : > { %1040 = vmatmul.mubr.bf16.vlgmr.msra.gmra.mxu0 %v906_v34  ;;  %v6002_v40 = vpop.eup %6001  ;;  %v901_v59 = vadd.f32 %v5098_v51, %v892_v50 }
 0x178   : > { %1049 = vmatprep.mubr.bf16.mxu0 %v9026_v31  ;;  %v6004_v54 = vpop.eup %6003  ;;  %v907_v47 = vpack.c.bf16 %v900_v38, %v899_v42  ;;  %v893_v48 = vadd.f32 %v6745_v7, %v878_v39  ;;  %v865_v53 = vmul.f32 %v6002_v40, %v6684_v63 }
 0x179   : > { %v864_v52 = vmul.f32 %v6004_v54, %v6680_v62  ;;  %v6006_v57 = vpop.eup %6005 }
 0x17a   : > { %v902_v55 = vadd.f32 %v5099_v49, %v893_v48  ;;  %v880_v56 = vmul.f32 %v6736_v61, %v865_v53  ;;  %v1090_v58 = vpack.c.bf16 %v893_v48, %v892_v50  ;;  %v866_v3 = vmul.f32 %v6006_v57, %v6695_v5 }
 0x17b   : > { %v879_v63 = vmul.f32 %v6736_v61, %v864_v52  ;;  %v750_v5 = vunpack.c.l.bf16 %v741_v9 }
 0x17c   : > { %v908_v0 = vpack.c.bf16 %v902_v55, %v901_v59  ;;  %v895_v1 = vadd.f32 %v6745_v7, %v880_v56  ;;  %v881_v8 = vmul.f32 %v6736_v61, %v866_v3 }
 0x17d   : > { %5346 = vmatmul.mubr.bf16.gmra.mxu1 %v1089_v41  ;;  %v894_v62 = vadd.f32 %v6745_v7, %v879_v63 }
 0x17e   : > { %5349 = vmatprep.mubr.msk.bf16.mxu1 %vm6407_vm2, %v9028_v20  ;;  %v904_v6 = vadd.f32 %v5103_v2, %v895_v1  ;;  %v896_v12 = vadd.f32 %v6745_v7, %v881_v8  ;;  %v4999_v7 = vsel %vm1831_vm9, 1.0, %v9028_v20 }
 0x17f   : > { %1050 = vmatmul.mubr.bf16.gmra.mxu0 %v907_v47  ;;  %v1091_v10 = vpack.c.bf16 %v895_v1, %v894_v62  ;;  %v903_v11 = vadd.f32 %v5102_v4, %v894_v62  ;;  %v6806_v24 = vpack.c.bf16 %v4999_v7, %v4999_v7 }
 0x180   : > { %1059 = vmatprep.mubr.bf16.mxu0 %v9026_v31  ;;  %v905_v13 = vadd.f32 %v896_v12, %v750_v5  ;;  %v1092_v14 = vpack.c.bf16 %v896_v12, %v896_v12 }
 0x181   : > { %v909_v33 = vpack.c.bf16 %v904_v6, %v903_v11 }
 0x182   : > { %v910_v15 = vpack.c.bf16 %v905_v13, %v905_v13 }
 0x185   : > { %5350 = vmatmul.mubr.bf16.gmra.mxu1 %v1090_v58 }
 0x186   : > { %5353 = vmatprep.mubr.msk.bf16.mxu1 %vm6407_vm2, %v9028_v20 }
 0x187   : > { %1060 = vmatmul.mubr.bf16.gmra.mxu0 %v908_v0 }
 0x188   : > { %1069 = vmatprep.mubr.bf16.mxu0 %v9026_v31 }
 0x18d   : > { %5354 = vmatmul.mubr.bf16.gmra.mxu1 %v1091_v10 }
 0x18e   : > { %5357 = vmatprep.mubr.msk.bf16.mxu1 %vm6407_vm2, %v9028_v20 }
 0x18f   : > { %1070 = vmatmul.mubr.bf16.gmra.mxu0 %v909_v33 }
 0x190   : > { %1079 = vmatprep.mubr.bf16.mxu0 %v9026_v31 }
 0x195   : > { %5358 = vmatmul.mubr.bf16.gmra.mxu1 %v1092_v14 }
 0x196   : > { %5401 = vmatprep.mubr.msk.bf16.mxu1 %vm6407_vm2, %v9028_v20 }
 0x197   : > { %1080 = vmatmul.mubr.bf16.gmra.mxu0 %v910_v15 }
 0x198   : > { %5371 = vmatprep.mubr.msk.bf16.mxu0 %vm6407_vm2, %v9028_v20 }
 0x235   : > { %v1191_v61 = vpop.f32.mrf.mxu1 }
 0x237   : > { %v1041_v19 = vpop.f32.mrf.mxu0  ;;  %v5343_v23 = vpop.f32.mrf.mxu1 }
 0x239   : > { %v6808_v25 = vpop.f32.mrf.mxu0  ;;  %v1194_v43 = vpop.f32.mrf.mxu1 }
 0x23a   : > { %v6816_v29 = vpack.c.bf16 %v1194_v43, %v1191_v61 }
 0x23b   : > { %v1045_v30 = vpop.f32.mrf.mxu0  ;;  %v5344_v34 = vpop.f32.mrf.mxu1 }
 0x23c   : > { %v6818_v32 = vpack.c.bf16 %v1045_v30, %v1041_v19 }
 0x23d   : > { %v6822_v44 = vpop.f32.mrf.mxu0  ;;  %v1199_v36 = vpop.f32.mrf.mxu1 }
 0x23f   : > { %v1051_v40 = vpop.f32.mrf.mxu0  ;;  %v5347_v41 = vpop.f32.mrf.mxu1 }
 0x241   : > { %v6830_v42 = vpop.f32.mrf.mxu0  ;;  %v1202_v45 = vpop.f32.mrf.mxu1 }
 0x242   : > { %v6832_v54 = vpack.c.bf16 %v1202_v45, %v1199_v36 }
 0x243   : > { %v1055_v46 = vpop.f32.mrf.mxu0  ;;  %v5348_v47 = vpop.f32.mrf.mxu1 }
 0x244   : > { %v6834_v48 = vpack.c.bf16 %v1055_v46, %v1051_v40 }
 0x245   : > { %v6838_v53 = vpop.f32.mrf.mxu0  ;;  %v1207_v50 = vpop.f32.mrf.mxu1 }
 0x247   : > { %v1061_v56 = vpop.f32.mrf.mxu0  ;;  %v5351_v57 = vpop.f32.mrf.mxu1 }
 0x249   : > { %v1063_v58 = vpop.f32.mrf.mxu0  ;;  %v1210_v59 = vpop.f32.mrf.mxu1 }
 0x24a   : > { %v6846_v63 = vpack.c.bf16 %v1210_v59, %v1207_v50 }
 0x24b   : > { %v1065_v60 = vpop.f32.mrf.mxu0  ;;  %v5352_v0 = vpop.f32.mrf.mxu1 }
 0x24c   : > { %v6848_v1 = vpack.c.bf16 %v1065_v60, %v1061_v56 }
 0x24d   : > { %v1067_v3 = vpop.f32.mrf.mxu0  ;;  %v1215_v62 = vpop.f32.mrf.mxu1 }
 0x24f   : > { %v1071_v9 = vpop.f32.mrf.mxu0  ;;  %v5355_v10 = vpop.f32.mrf.mxu1 }
 0x250   : > { %v6908_v10 = vpack.c.bf16 %v6838_v53, %v6830_v42  ;;  %v4987_v42 = vsel %vm1245_vm4, 1.0, %v9028_v20  ;;  %v4988_v53 = vsel %vm1449_vm5, 1.0, %v9028_v20 }
 0x251   : > { %v1073_v11 = vpop.f32.mrf.mxu0  ;;  %v1218_v33 = vpop.f32.mrf.mxu1 }
 0x252   : > { %v6858_v12 = vpack.c.bf16 %v1218_v33, %v1215_v62 }
 0x253   : > { %v1075_v5 = vpop.f32.mrf.mxu0  ;;  %v5356_v13 = vpop.f32.mrf.mxu1 }
 0x254   : > { %v6860_v14 = vpack.c.bf16 %v1075_v5, %v1071_v9  ;;  %v6900_v9 = vpack.c.bf16 %v1067_v3, %v1063_v58  ;;  %v6919_v58 = vpack.c.bf16 %v6822_v44, %v6808_v25  ;;  %v6925_v3 = vpack.c.bf16 %v4987_v42, %v4987_v42 }
 0x255   : > { %v1077_v61 = vpop.f32.mrf.mxu0  ;;  %v1223_v7 = vpop.f32.mrf.mxu1 }
 0x256   : > { %v1243_v19 = vpack.c.bf16 %v1223_v7, %v1223_v7  ;;  %v6894_v62 = vpack.c.bf16 %v1077_v61, %v1073_v11  ;;  %v6927_v11 = vpack.c.bf16 %v4988_v53, %v4988_v53  ;;  %v1250_v44 = vmul.bf16 %v6925_v3, %v6818_v32 }
 0x257   : > { %v6870_v23 = vpop.f32.mrf.mxu0  ;;  %v5359_v43 = vpop.f32.mrf.mxu1  ;;  %v1253_v42 = vmul.bf16 %v6925_v3, %v6860_v14 }
 0x258   : > { %v2029_v30 = vmul.bf16 %v6806_v24, %v1243_v19  ;;  %v2329_v40 = vmul.bf16 %v6810_v26, %v1243_v19  ;;  %v2629_v41 = vmul.bf16 %v6812_v27, %v1243_v19  ;;  %v2928_v45 = vmul.bf16 %v6814_v28, %v1243_v19 }
 0x259   : > { %v1083_v34 = vpop.f32.mrf.mxu0  ;;  %v1226_v36 = vpop.f32.mrf.mxu1  ;;  %v1647_v33 = vmul.bf16 %v6927_v11, %v1243_v19  ;;  %v1446_v25 = vmul.bf16 %v6925_v3, %v1243_v19  ;;  %v1453_v5 = vmul.bf16 %v6927_v11, %v6818_v32  ;;  %v1646_v7 = vmul.bf16 %v6927_v11, %v6858_v12 }
 0x25a   : > { %v6876_v46 = vpack.c.bf16 %v1083_v34, %v1083_v34  ;;  %v6881_v56 = vsel %vm1663_vm14, %v2029_v30, 0  ;;  %v6884_v57 = vsel %vm1663_vm14, %v2329_v40, 0  ;;  %v6887_v59 = vsel %vm1663_vm14, %v2629_v41, 0 }
 0x25b   : > { %v1085_v47 = vpop.f32.mrf.mxu0  ;;  %v5360_v50 = vpop.f32.mrf.mxu1  ;;  %9090 = vst [vmem:[#allocation12_spill] sm:$0xff] %v6887_v59  ;;  %v6892_v0 = vsel %vm1663_vm14, %v2928_v45, 0  ;;  %v1665_v13 = vsel %vm1663_vm14, %v1647_v33, 0  ;;  %v1755_v61 = vsel %vm1663_vm14, %v1446_v25, 0  ;;  %v1445_v19 = vmul.bf16 %v6925_v3, %v6858_v12 }
 0x25c   : > { %5362 = vmatpush3.bf16.xpose.msra.mxu0 %v6876_v46  ;;  %5392 = vmatpush3.bf16.xpose.msra.mxu1 %v6876_v46  ;;  %9091 = vst [vmem:[#allocation13_spill] sm:$0xff] %v6892_v0  ;;  %v1251_v43 = vmul.bf16 %v6925_v3, %v6834_v48  ;;  %v1454_v30 = vmul.bf16 %v6927_v11, %v6834_v48 }
 0x25d   : > { %v1086_v60 = vpop.f32.mrf.mxu0  ;;  %5363 = vmatprep.subr.bf16.mxu0 %v9028_v20  ;;  %5393 = vmatprep.subr.bf16.mxu1 %v9028_v20  ;;  %v1645_v34 = vmul.bf16 %v6927_v11, %v6846_v63  ;;  %v1444_v36 = vmul.bf16 %v6925_v3, %v6846_v63  ;;  %v1644_v40 = vmul.bf16 %v6927_v11, %v6832_v54 }
 0x25e   : > { %v1443_v41 = vmul.bf16 %v6925_v3, %v6832_v54  ;;  %v1252_v45 = vmul.bf16 %v6925_v3, %v6848_v1  ;;  %v1455_v47 = vmul.bf16 %v6927_v11, %v6848_v1  ;;  %v1643_v50 = vmul.bf16 %v6927_v11, %v6816_v29 }
 0x25f   : > { %v1442_v60 = vmul.bf16 %v6925_v3, %v6816_v29  ;;  %v1456_v53 = vmul.bf16 %v6927_v11, %v6860_v14  ;;  %v6995_v33 = vpack.c.bf16 %v6870_v23, %v6870_v23 }
 0x261   : > { %v1254_v25 = vmul.bf16 %v6925_v3, %v6995_v33 }
 0x264   : > { %5364 = vmatpush3.bf16.xpose.msra.mxu0 %v6894_v62  ;;  %5394 = vmatpush3.bf16.xpose.msra.mxu1 %v6894_v62 }
 0x265   : > { %5365 = vmatprep.subr.bf16.mxu0 %v9028_v20  ;;  %5395 = vmatprep.subr.bf16.mxu1 %v9028_v20 }
 0x26c   : > { %5366 = vmatpush3.bf16.xpose.msra.mxu0 %v6900_v9  ;;  %5396 = vmatpush3.bf16.xpose.msra.mxu1 %v6900_v9 }
 0x26d   : > { %5367 = vmatprep.subr.bf16.mxu0 %v9028_v20  ;;  %5397 = vmatprep.subr.bf16.mxu1 %v9028_v20 }
 0x274   : > { %5368 = vmatpush3.bf16.xpose.msra.mxu0 %v6908_v10  ;;  %5398 = vmatpush3.bf16.xpose.msra.mxu1 %v6908_v10 }
 0x275   : > { %5369 = vmatprep.subr.bf16.mxu0 %v9028_v20  ;;  %5399 = vmatprep.subr.bf16.mxu1 %v9028_v20 }
 0x27c   : > { %5370 = vmatpush3.bf16.xpose.msra.mxu0 %v6919_v58  ;;  %5400 = vmatpush3.bf16.xpose.msra.mxu1 %v6919_v58 }
 0x27d   : > { %5421 = vmatprep.subr.bf16.mxu0 %v9028_v20  ;;  %5451 = vmatprep.subr.bf16.mxu1 %v9028_v20 }
 0x283   : > { %5372 = vmatmul.mubr.bf16.vlgmr.msra.gmra.mxu0 %v1250_v44  ;;  %5402 = vmatmul.mubr.bf16.vlgmr.msra.gmra.mxu1 %v1453_v5  ;;  %v1457_v44 = vmul.bf16 %v6927_v11, %v6995_v33 }
 0x284   : > { %5422 = vmatpush3.bf16.msra.mxu0 %v1665_v13  ;;  %5452 = vmatpush3.bf16.msra.mxu1 %v1755_v61 }
 0x285   : > { %5423 = vmatprep.subr.bf16.mxu0 %v9028_v20  ;;  %5453 = vmatprep.subr.bf16.mxu1 %v9028_v20 }
 0x286   : > { %5375 = vmatprep.mubr.msk.bf16.mxu0 %vm6407_vm2, %v9028_v20  ;;  %5405 = vmatprep.mubr.msk.bf16.mxu1 %vm6407_vm2, %v9028_v20 }
 0x288   : > { %5424 = vmatpush3.bf16.msra.mxu0 %v1646_v7  ;;  %5454 = vmatpush3.bf16.msra.mxu1 %v1445_v19 }
 0x289   : > { %5425 = vmatprep.subr.bf16.mxu0 %v9028_v20  ;;  %5455 = vmatprep.subr.bf16.mxu1 %v9028_v20 }
 0x28b   : > { %5376 = vmatmul.mubr.bf16.gmra.mxu0 %v1251_v43  ;;  %5406 = vmatmul.mubr.bf16.gmra.mxu1 %v1454_v30 }
 0x28c   : > { %5426 = vmatpush3.bf16.msra.mxu0 %v1645_v34  ;;  %5456 = vmatpush3.bf16.msra.mxu1 %v1444_v36 }
 0x28d   : > { %5427 = vmatprep.subr.bf16.mxu0 %v9028_v20  ;;  %5457 = vmatprep.subr.bf16.mxu1 %v9028_v20 }
 0x28e   : > { %5379 = vmatprep.mubr.msk.bf16.mxu0 %vm6407_vm2, %v9028_v20  ;;  %5409 = vmatprep.mubr.msk.bf16.mxu1 %vm6407_vm2, %v9028_v20 }
 0x290   : > { %5428 = vmatpush3.bf16.msra.mxu0 %v1644_v40  ;;  %5458 = vmatpush3.bf16.msra.mxu1 %v1443_v41 }
 0x291   : > { %5429 = vmatprep.subr.bf16.mxu0 %v9028_v20  ;;  %5459 = vmatprep.subr.bf16.mxu1 %v9028_v20 }
 0x293   : > { %5380 = vmatmul.mubr.bf16.gmra.mxu0 %v1252_v45  ;;  %5410 = vmatmul.mubr.bf16.gmra.mxu1 %v1455_v47 }
 0x294   : > { %5430 = vmatpush3.bf16.msra.mxu0 %v1643_v50  ;;  %5460 = vmatpush3.bf16.msra.mxu1 %v1442_v60 }
 0x295   : > { %5383 = vmatprep.mubr.msk.bf16.mxu0 %vm6407_vm2, %v9028_v20  ;;  %5413 = vmatprep.mubr.msk.bf16.mxu1 %vm6407_vm2, %v9028_v20 }
 0x296   : > { %5481 = vmatprep.subr.bf16.mxu0 %v9028_v20  ;;  %5511 = vmatprep.subr.bf16.mxu1 %v9028_v20 }
 0x29b   : > { %5384 = vmatmul.mubr.bf16.gmra.mxu0 %v1253_v42  ;;  %5414 = vmatmul.mubr.bf16.gmra.mxu1 %v1456_v53 }
 0x29c   : > { %5387 = vmatprep.mubr.msk.bf16.mxu0 %vm6407_vm2, %v9028_v20  ;;  %5417 = vmatprep.mubr.msk.bf16.mxu1 %vm6407_vm2, %v9028_v20 }
 0x2a3   : > { %5388 = vmatmul.mubr.bf16.gmra.mxu0 %v1254_v25  ;;  %5418 = vmatmul.mubr.bf16.gmra.mxu1 %v1457_v44 }
 0x2a4   : > { %5431 = vmatprep.mubr.msk.bf16.mxu0 %vm6407_vm2, %v9028_v20  ;;  %5461 = vmatprep.mubr.msk.bf16.mxu1 %vm6407_vm2, %v9028_v20 }
 0x343   : > { %v7005_v5 = vpop.f32.mrf.mxu0  ;;  %v1492_v13 = vpop.f32.mrf.mxu1 }
 0x344   : > { %v7007_v23 = vmul.f32 0.25, %v1492_v13 }
 0x345   : > { %v5373_v61 = vpop.f32.mrf.mxu0  ;;  %v5403_v7 = vpop.f32.mrf.mxu1 }
 0x346   : > { %v1539_v3 = vsel %vm1336_vm6, %v7007_v23, -inf }
 0x347   : > { %1540 = vmax.xlane.f32.xlu0 %v1539_v3  ;;  %v7011_v11 = vpop.f32.mrf.mxu0  ;;  %v1495_v19 = vpop.f32.mrf.mxu1 }
 0x348   : > { %v7013_v43 = vmul.f32 0.25, %v1495_v19 }
 0x349   : > { %v5374_v30 = vpop.f32.mrf.mxu0  ;;  %v5404_v34 = vpop.f32.mrf.mxu1 }
 0x34a   : > { %v1542_v36 = vsel %vm1336_vm6, %v7013_v43, -inf }
 0x34b   : > { %1543 = vmax.xlane.f32.xlu1 %v1542_v36  ;;  %v7017_v40 = vpop.f32.mrf.mxu0  ;;  %v1500_v41 = vpop.f32.mrf.mxu1 }
 0x34c   : > { %v1532_v45 = vmul.f32 0.25, %v1500_v41 }
 0x34d   : > { %v5377_v47 = vpop.f32.mrf.mxu0  ;;  %v5407_v50 = vpop.f32.mrf.mxu1 }
 0x34e   : > { %v1545_v60 = vsel %vm1336_vm6, %v1532_v45, -inf }
 0x34f   : > { %1546 = vmax.xlane.f32.xlu0 %v1545_v60  ;;  %v7020_v42 = vpop.f32.mrf.mxu0  ;;  %v1503_v53 = vpop.f32.mrf.mxu1 }
 0x350   : > { %v1533_v25 = vmul.f32 0.25, %v1503_v53 }
 0x351   : > { %v5378_v44 = vpop.f32.mrf.mxu0  ;;  %v5408_v13 = vpop.f32.mrf.mxu1 }
 0x352   : > { %v1548_v61 = vsel %vm1336_vm6, %v1533_v25, -inf }
 0x353   : > { %1549 = vmax.xlane.f32.xlu1 %v1548_v61  ;;  %v7023_v7 = vpop.f32.mrf.mxu0  ;;  %v1508_v3 = vpop.f32.mrf.mxu1 }
 0x354   : > { %v1534_v19 = vmul.f32 0.25, %v1508_v3 }
 0x355   : > { %v5381_v30 = vpop.f32.mrf.mxu0  ;;  %v5411_v34 = vpop.f32.mrf.mxu1 }
 0x356   : > { %v1551_v36 = vsel %vm1336_vm6, %v1534_v19, -inf }
 0x357   : > { %1552 = vmax.xlane.f32.xlu0 %v1551_v36  ;;  %v7026_v41 = vpop.f32.mrf.mxu0  ;;  %v1511_v47 = vpop.f32.mrf.mxu1 }
 0x358   : > { %v1535_v50 = vmul.f32 0.25, %v1511_v47 }
 0x359   : > { %v5382_v60 = vpop.f32.mrf.mxu0  ;;  %v5412_v53 = vpop.f32.mrf.mxu1 }
 0x35a   : > { %v1554_v44 = vsel %vm1336_vm6, %v1535_v50, -inf }
 0x35b   : > { %1555 = vmax.xlane.f32.xlu1 %v1554_v44  ;;  %v7029_v13 = vpop.f32.mrf.mxu0  ;;  %v1516_v61 = vpop.f32.mrf.mxu1 }
 0x35c   : > { %v1536_v21 = vmul.f32 0.25, %v1516_v61 }
 0x35d   : > { %v5385_v31 = vpop.f32.mrf.mxu0  ;;  %v5415_v3 = vpop.f32.mrf.mxu1 }
 0x35e   : > { %v1557_v30 = vsel %vm1336_vm6, %v1536_v21, -inf }
 0x35f   : > { %1558 = vmax.xlane.f32.xlu0 %v1557_v30  ;;  %v7032_v34 = vpop.f32.mrf.mxu0  ;;  %v1519_v36 = vpop.f32.mrf.mxu1 }
 0x360   : > { %v1537_v39 = vmul.f32 0.25, %v1519_v36 }
 0x361   : > { %v5386_v55 = vpop.f32.mrf.mxu0  ;;  %v5416_v47 = vpop.f32.mrf.mxu1 }
 0x362   : > { %v1560_v60 = vsel %vm1336_vm6, %v1537_v39, -inf }
 0x363   : > { %1561 = vmax.xlane.f32.xlu1 %v1560_v60  ;;  %v7035_v53 = vpop.f32.mrf.mxu0  ;;  %v1524_v44 = vpop.f32.mrf.mxu1 }
 0x364   : > { %v1538_v8 = vmul.f32 0.25, %v1524_v44 }
 0x365   : > { %v5389_v61 = vpop.f32.mrf.mxu0  ;;  %v5419_v31 = vpop.f32.mrf.mxu1 }
 0x366   : > { %v1563_v3 = vsel %vm1361_vm7, %v1538_v8, -inf }
 0x367   : > { %1564 = vmax.xlane.f32.xlu0 %v1563_v3  ;;  %v1324_v30 = vpop.f32.mrf.mxu0  ;;  %v1527_v18 = vpop.f32.mrf.mxu1 }
 0x369   : > { %v5390_v38 = vpop.f32.mrf.mxu0  ;;  %v5420_v52 = vpop.f32.mrf.mxu1 }
 0x3d0   : > { %v1541_v36 = vpop.xlane.xlu0 %1540 }
 0x3d1   : > { %v1566_v55 = vsub.f32 %v7007_v23, %v1541_v36 }
 0x3d3   : > { %v1575_v47 = vmul.f32 1.442695, %v1566_v55 }
 0x3d4   : > { %v1544_v6 = vpop.xlane.xlu1 %1543 }
 0x3d5   : > { %6007 = vpow2.f32 %v1575_v47  ;;  %v1567_v60 = vsub.f32 %v7013_v43, %v1544_v6 }
 0x3d7   : > { %v1577_v17 = vmul.f32 1.442695, %v1567_v60 }
 0x3d8   : > { %v1547_v37 = vpop.xlane.xlu0 %1546 }
 0x3d9   : > { %6009 = vpow2.f32 %v1577_v17  ;;  %v1568_v44 = vsub.f32 %v1532_v45, %v1547_v37 }
 0x3db   : > { %v1579_v61 = vmul.f32 1.442695, %v1568_v44 }
 0x3dc   : > { %v1550_v31 = vpop.xlane.xlu1 %1549 }
 0x3dd   : > { %6011 = vpow2.f32 %v1579_v61  ;;  %v1569_v3 = vsub.f32 %v1533_v25, %v1550_v31 }
 0x3df   : > { %v1581_v30 = vmul.f32 1.442695, %v1569_v3 }
 0x3e0   : > { %v1553_v18 = vpop.xlane.xlu0 %1552 }
 0x3e1   : > { %6013 = vpow2.f32 %v1581_v30  ;;  %v1570_v38 = vsub.f32 %v1534_v19, %v1553_v18 }
 0x3e2   : > { %v7040_v52 = vpop.eup %6007 }
 0x3e3   : > { %v1583_v23 = vmul.f32 1.442695, %v1570_v38  ;;  %v1593_v36 = vsel %vm1336_vm6, %v7040_v52, 0.0 }
 0x3e4   : > { %v1556_v55 = vpop.xlane.xlu1 %1555  ;;  %1594 = vadd.xlane.f32.xlu1 %v1593_v36 }
 0x3e5   : > { %6015 = vpow2.f32 %v1583_v23  ;;  %v1571_v6 = vsub.f32 %v1535_v50, %v1556_v55 }
 0x3e6   : > { %v7044_v17 = vpop.eup %6009 }
 0x3e7   : > { %v1585_v37 = vmul.f32 1.442695, %v1571_v6  ;;  %v1596_v43 = vsel %vm1336_vm6, %v7044_v17, 0.0 }
 0x3e8   : > { %v1559_v45 = vpop.xlane.xlu0 %1558  ;;  %1597 = vadd.xlane.f32.xlu0 %v1596_v43 }
 0x3e9   : > { %6017 = vpow2.f32 %v1585_v37  ;;  %v1572_v25 = vsub.f32 %v1536_v21, %v1559_v45  ;;  %v7071_v37 = vmul.f32 0.25, %v7005_v5  ;;  %v7088_v5 = vmul.f32 0.25, %v7020_v42 }
 0x3ea   : > { %v7048_v19 = vpop.eup %6011 }
 0x3eb   : > { %v1587_v47 = vmul.f32 1.442695, %v1572_v25  ;;  %v1599_v60 = vsel %vm1336_vm6, %v7048_v19, 0.0  ;;  %v7078_v25 = vmul.f32 0.25, %v7011_v11  ;;  %v1346_v42 = vsel %vm1336_vm6, %v7088_v5, -inf }
 0x3ec   : > { %1600 = vadd.xlane.f32.xlu1 %v1599_v60  ;;  %v1562_v44 = vpop.xlane.xlu1 %1561 }
 0x3ed   : > { %6019 = vpow2.f32 %v1587_v47  ;;  %v1573_v50 = vsub.f32 %v1537_v39, %v1562_v44  ;;  %v7081_v47 = vmul.f32 0.25, %v7017_v40  ;;  %v1337_v44 = vsel %vm1336_vm6, %v7071_v37, -inf }
 0x3ee   : > { %v7052_v61 = vpop.eup %6013  ;;  %v1340_v11 = vsel %vm1336_vm6, %v7078_v25, -inf }
 0x3ef   : > { %v1589_v31 = vmul.f32 1.442695, %v1573_v50  ;;  %v1602_v3 = vsel %vm1336_vm6, %v7052_v61, 0.0  ;;  %v7091_v50 = vmul.f32 0.25, %v7023_v7  ;;  %v1343_v40 = vsel %vm1336_vm6, %v7081_v47, -inf }
 0x3f0   : > { %1603 = vadd.xlane.f32.xlu0 %v1602_v3  ;;  %v1565_v30 = vpop.xlane.xlu0 %1564  ;;  %v7101_v3 = vmul.f32 0.25, %v7029_v13 }
 0x3f1   : > { %6021 = vpow2.f32 %v1589_v31  ;;  %v1574_v21 = vsub.f32 %v1538_v8, %v1565_v30  ;;  %v7098_v31 = vmul.f32 0.25, %v7026_v41  ;;  %v1349_v7 = vsel %vm1336_vm6, %v7091_v50, -inf }
 0x3f2   : > { %v7056_v18 = vpop.eup %6015  ;;  %v7108_v30 = vmul.f32 0.25, %v7032_v34  ;;  %v1355_v13 = vsel %vm1336_vm6, %v7101_v3, -inf }
 0x3f3   : > { %v1591_v38 = vmul.f32 1.442695, %v1574_v21  ;;  %v1605_v23 = vsel %vm1336_vm6, %v7056_v18, 0.0  ;;  %v7111_v21 = vmul.f32 0.25, %v7035_v53  ;;  %v1352_v41 = vsel %vm1336_vm6, %v7098_v31, -inf }
 0x3f4   : > { %1606 = vadd.xlane.f32.xlu1 %v1605_v23 }
 0x3f5   : > { %6023 = vpow2.f32 %v1591_v38  ;;  %v1358_v38 = vsel %vm1336_vm6, %v7108_v30, -inf  ;;  %v1362_v23 = vsel %vm1361_vm7, %v7111_v21, -inf }
 0x3f6   : > { %v7060_v36 = vpop.eup %6017 }
 0x3f7   : > { %v1608_v39 = vsel %vm1336_vm6, %v7060_v36, 0.0 }
 0x3f8   : > { %1609 = vadd.xlane.f32.xlu0 %v1608_v39 }
 0x3fa   : > { %v7064_v55 = vpop.eup %6019 }
 0x3fb   : > { %v1611_v6 = vsel %vm1336_vm6, %v7064_v55, 0.0 }
 0x3fc   : > { %1612 = vadd.xlane.f32.xlu1 %v1611_v6 }
 0x3fe   : > { %v7068_v8 = vpop.eup %6021 }
 0x3ff   : > { %v1614_v43 = vsel %vm1336_vm6, %v7068_v8, 0.0 }
 0x400   : > { %1615 = vadd.xlane.f32.xlu0 %v1614_v43 }
 0x402   : > { %v7075_v45 = vpop.eup %6023 }
 0x403   : > { %v1617_v60 = vsel %vm1361_vm7, %v7075_v45, 0.0 }
 0x404   : > { %1618 = vadd.xlane.f32.xlu1 %v1617_v60  ;;  %1338 = vmax.xlane.f32.xlu0 %v1337_v44 }
 0x408   : > { %1341 = vmax.xlane.f32.xlu1 %v1340_v11  ;;  %1344 = vmax.xlane.f32.xlu0 %v1343_v40 }
 0x40c   : > { %1347 = vmax.xlane.f32.xlu1 %v1346_v42  ;;  %1350 = vmax.xlane.f32.xlu0 %v1349_v7 }
 0x410   : > { %1353 = vmax.xlane.f32.xlu1 %v1352_v41  ;;  %1356 = vmax.xlane.f32.xlu0 %v1355_v13 }
 0x414   : > { %1359 = vmax.xlane.f32.xlu1 %v1358_v38  ;;  %1363 = vmax.xlane.f32.xlu0 %v1362_v23 }
 0x46d   : > { %v1595_v34 = vpop.xlane.xlu1 %1594 }
 0x46e   : > { %6025 = vrcp.f32 %v1595_v34 }
 0x471   : > { %v1598_v53 = vpop.xlane.xlu0 %1597 }
 0x472   : > { %6027 = vrcp.f32 %v1598_v53 }
 0x475   : > { %v1601_v39 = vpop.xlane.xlu1 %1600 }
 0x476   : > { %6029 = vrcp.f32 %v1601_v39 }
 0x479   : > { %v1604_v6 = vpop.xlane.xlu0 %1603 }
 0x47a   : > { %6031 = vrcp.f32 %v1604_v6 }
 0x47b   : > { %v6026_v43 = vpop.eup %6025 }
 0x47c   : > { %v1629_v11 = vmul.f32 %v6026_v43, %v7040_v52 }
 0x47d   : > { %v1607_v60 = vpop.xlane.xlu1 %1606 }
 0x47e   : > { %6033 = vrcp.f32 %v1607_v60 }
 0x47f   : > { %v6028_v44 = vpop.eup %6027 }
 0x480   : > { %v1630_v40 = vmul.f32 %v6028_v44, %v7044_v17 }
 0x481   : > { %v1610_v42 = vpop.xlane.xlu0 %1609 }
 0x482   : > { %6035 = vrcp.f32 %v1610_v42  ;;  %v1638_v7 = vpack.c.bf16 %v1630_v40, %v1629_v11 }
 0x483   : > { %v6030_v41 = vpop.eup %6029 }
 0x484   : > { %5432 = vmatmul.mubr.msk.bf16.vlgmr.msra.gmra.mxu0 %vm1336_vm6, %v1638_v7  ;;  %v1631_v52 = vmul.f32 %v6030_v41, %v7048_v19  ;;  %v1838_v41 = vmul.bf16 %v6806_v24, %v6860_v14 }
 0x485   : > { %5482 = vmatpush3.bf16.xpose.msra.mxu0 %v6876_v46  ;;  %v1613_v13 = vpop.xlane.xlu1 %1612  ;;  %5435 = vmatprep.mubr.msk.bf16.mxu0 %vm6407_vm2, %v9028_v20 }
 0x486   : > { %5483 = vmatprep.subr.bf16.mxu0 %v9028_v20  ;;  %6037 = vrcp.f32 %v1613_v13  ;;  %v1839_v13 = vmul.bf16 %v6806_v24, %v6995_v33 }
 0x487   : > { %v6032_v38 = vpop.eup %6031 }
 0x488   : > { %v1632_v17 = vmul.f32 %v6032_v38, %v7052_v61  ;;  %v2135_v38 = vmul.bf16 %v6810_v26, %v6818_v32 }
 0x489   : > { %v1616_v23 = vpop.xlane.xlu0 %1615 }
 0x48a   : > { %6039 = vrcp.f32 %v1616_v23  ;;  %v1639_v34 = vpack.c.bf16 %v1632_v17, %v1631_v52  ;;  %v2136_v52 = vmul.bf16 %v6810_v26, %v6834_v48  ;;  %v2137_v17 = vmul.bf16 %v6810_v26, %v6848_v1 }
 0x48b   : > { %v6034_v53 = vpop.eup %6033  ;;  %v2138_v23 = vmul.bf16 %v6810_v26, %v6860_v14 }
 0x48c   : > { %5436 = vmatmul.mubr.msk.bf16.gmra.mxu0 %vm1336_vm6, %v1639_v34  ;;  %v1633_v19 = vmul.f32 %v6034_v53, %v7056_v18  ;;  %v2139_v34 = vmul.bf16 %v6810_v26, %v6995_v33  ;;  %v2435_v53 = vmul.bf16 %v6812_v27, %v6818_v32 }
 0x48d   : > { %5484 = vmatpush3.bf16.xpose.msra.mxu0 %v6894_v62  ;;  %v1619_v39 = vpop.xlane.xlu1 %1618  ;;  %5439 = vmatprep.mubr.msk.bf16.mxu0 %vm6407_vm2, %v9028_v20 }
 0x48e   : > { %6041 = vrcp.f32 %v1619_v39  ;;  %5485 = vmatprep.subr.bf16.mxu0 %v9028_v20  ;;  %v2436_v39 = vmul.bf16 %v6812_v27, %v6834_v48 }
 0x48f   : > { %v6036_v6 = vpop.eup %6035 }
 0x490   : > { %v1634_v61 = vmul.f32 %v6036_v6, %v7060_v36  ;;  %v2437_v6 = vmul.bf16 %v6812_v27, %v6848_v1 }
 0x492   : > { %v1640_v43 = vpack.c.bf16 %v1634_v61, %v1633_v19 }
 0x493   : > { %v6038_v60 = vpop.eup %6037 }
 0x494   : > { %5440 = vmatmul.mubr.msk.bf16.gmra.mxu0 %vm1336_vm6, %v1640_v43  ;;  %v1635_v11 = vmul.f32 %v6038_v60, %v7064_v55  ;;  %v1835_v55 = vmul.bf16 %v6806_v24, %v6818_v32 }
 0x495   : > { %5486 = vmatpush3.bf16.xpose.msra.mxu0 %v6900_v9  ;;  %5443 = vmatprep.mubr.msk.bf16.mxu0 %vm6407_vm2, %v9028_v20 }
 0x496   : > { %5487 = vmatprep.subr.bf16.mxu0 %v9028_v20 }
 0x497   : > { %v6040_v44 = vpop.eup %6039 }
 0x498   : > { %v1636_v40 = vmul.f32 %v6040_v44, %v7068_v8  ;;  %v1836_v8 = vmul.bf16 %v6806_v24, %v6834_v48 }
 0x49a   : > { %v1641_v42 = vpack.c.bf16 %v1636_v40, %v1635_v11 }
 0x49b   : > { %v6042_v18 = vpop.eup %6041 }
 0x49c   : > { %5444 = vmatmul.mubr.msk.bf16.gmra.mxu0 %vm1336_vm6, %v1641_v42  ;;  %v1637_v36 = vmul.f32 %v6042_v18, %v7075_v45  ;;  %v1837_v45 = vmul.bf16 %v6806_v24, %v6848_v1 }
 0x49d   : > { %5488 = vmatpush3.bf16.xpose.msra.mxu0 %v6908_v10  ;;  %5447 = vmatprep.mubr.msk.bf16.mxu0 %vm6407_vm2, %v9028_v20 }
 0x49e   : > { %5489 = vmatprep.subr.bf16.mxu0 %v9028_v20  ;;  %v1642_v7 = vpack.c.bf16 %v1637_v36, %v1637_v36 }
 0x4a4   : > { %5448 = vmatmul.mubr.msk.bf16.gmra.mxu0 %vm1336_vm6, %v1642_v7 }
 0x4a5   : > { %5490 = vmatpush3.bf16.xpose.msra.mxu0 %v6919_v58  ;;  %5491 = vmatprep.mubr.msk.bf16.mxu0 %vm6407_vm2, %v9028_v20 }
 0x4a6   : > { %5541 = vmatprep.subr.bf16.mxu0 %v9028_v20 }
 0x4ac   : > { %5492 = vmatmul.mubr.bf16.vlgmr.msra.gmra.mxu0 %v1835_v55 }
 0x4ad   : > { %5542 = vmatpush3.bf16.xpose.msra.mxu0 %v6876_v46  ;;  %5495 = vmatprep.mubr.msk.bf16.mxu0 %vm6407_vm2, %v9028_v20 }
 0x4ae   : > { %5543 = vmatprep.subr.bf16.mxu0 %v9028_v20 }
 0x4b4   : > { %5496 = vmatmul.mubr.bf16.gmra.mxu0 %v1836_v8 }
 0x4b5   : > { %5544 = vmatpush3.bf16.xpose.msra.mxu0 %v6894_v62  ;;  %5499 = vmatprep.mubr.msk.bf16.mxu0 %vm6407_vm2, %v9028_v20 }
 0x4b6   : > { %5545 = vmatprep.subr.bf16.mxu0 %v9028_v20 }
 0x4bc   : > { %5500 = vmatmul.mubr.bf16.gmra.mxu0 %v1837_v45 }
 0x4bd   : > { %5546 = vmatpush3.bf16.xpose.msra.mxu0 %v6900_v9  ;;  %5503 = vmatprep.mubr.msk.bf16.mxu0 %vm6407_vm2, %v9028_v20 }
 0x4be   : > { %5547 = vmatprep.subr.bf16.mxu0 %v9028_v20 }
 0x4c4   : > { %5504 = vmatmul.mubr.bf16.gmra.mxu0 %v1838_v41 }
 0x4c5   : > { %5548 = vmatpush3.bf16.xpose.msra.mxu0 %v6908_v10  ;;  %5507 = vmatprep.mubr.msk.bf16.mxu0 %vm6407_vm2, %v9028_v20 }
 0x4c6   : > { %5549 = vmatprep.subr.bf16.mxu0 %v9028_v20 }
 0x4cc   : > { %5508 = vmatmul.mubr.bf16.gmra.mxu0 %v1839_v13 }
 0x4cd   : > { %5550 = vmatpush3.bf16.xpose.msra.mxu0 %v6919_v58  ;;  %5551 = vmatprep.mubr.msk.bf16.mxu0 %vm6407_vm2, %v9028_v20 }
 0x4ce   : > { %5601 = vmatprep.subr.bf16.mxu0 %v9028_v20 }
 0x4d4   : > { %5552 = vmatmul.mubr.bf16.vlgmr.msra.gmra.mxu0 %v2135_v38 }
 0x4d5   : > { %5602 = vmatpush3.bf16.xpose.msra.mxu0 %v6876_v46  ;;  %5555 = vmatprep.mubr.msk.bf16.mxu0 %vm6407_vm2, %v9028_v20 }
 0x4d6   : > { %5603 = vmatprep.subr.bf16.mxu0 %v9028_v20 }
 0x4dc   : > { %5556 = vmatmul.mubr.bf16.gmra.mxu0 %v2136_v52 }
 0x4dd   : > { %5604 = vmatpush3.bf16.xpose.msra.mxu0 %v6894_v62  ;;  %5559 = vmatprep.mubr.msk.bf16.mxu0 %vm6407_vm2, %v9028_v20 }
 0x4de   : > { %5605 = vmatprep.subr.bf16.mxu0 %v9028_v20 }
 0x4e4   : > { %5560 = vmatmul.mubr.bf16.gmra.mxu0 %v2137_v17 }
 0x4e5   : > { %5606 = vmatpush3.bf16.xpose.msra.mxu0 %v6900_v9  ;;  %5563 = vmatprep.mubr.msk.bf16.mxu0 %vm6407_vm2, %v9028_v20 }
 0x4e6   : > { %5607 = vmatprep.subr.bf16.mxu0 %v9028_v20 }
 0x4ec   : > { %5564 = vmatmul.mubr.bf16.gmra.mxu0 %v2138_v23 }
 0x4ed   : > { %5608 = vmatpush3.bf16.xpose.msra.mxu0 %v6908_v10  ;;  %5567 = vmatprep.mubr.msk.bf16.mxu0 %vm6407_vm2, %v9028_v20 }
 0x4ee   : > { %5609 = vmatprep.subr.bf16.mxu0 %v9028_v20 }
 0x4f4   : > { %5568 = vmatmul.mubr.bf16.gmra.mxu0 %v2139_v34 }
 0x4f5   : > { %5610 = vmatpush3.bf16.xpose.msra.mxu0 %v6919_v58  ;;  %5611 = vmatprep.mubr.msk.bf16.mxu0 %vm6407_vm2, %v9028_v20 }
 0x4f6   : > { %5661 = vmatprep.subr.bf16.mxu0 %v9028_v20 }
 0x4fc   : > { %5612 = vmatmul.mubr.bf16.vlgmr.msra.gmra.mxu0 %v2435_v53 }
 0x4fd   : > { %5662 = vmatpush3.bf16.xpose.msra.mxu0 %v6876_v46  ;;  %5615 = vmatprep.mubr.msk.bf16.mxu0 %vm6407_vm2, %v9028_v20  ;;  %v2438_v46 = vmul.bf16 %v6812_v27, %v6860_v14 }
 0x4fe   : > { %5663 = vmatprep.subr.bf16.mxu0 %v9028_v20 }
 0x504   : > { %5616 = vmatmul.mubr.bf16.gmra.mxu0 %v2436_v39 }
 0x505   : > { %5664 = vmatpush3.bf16.xpose.msra.mxu0 %v6894_v62  ;;  %5619 = vmatprep.mubr.msk.bf16.mxu0 %vm6407_vm2, %v9028_v20  ;;  %v2439_v62 = vmul.bf16 %v6812_v27, %v6995_v33 }
 0x506   : > { %5665 = vmatprep.subr.bf16.mxu0 %v9028_v20 }
 0x50c   : > { %5620 = vmatmul.mubr.bf16.gmra.mxu0 %v2437_v6 }
 0x50d   : > { %5666 = vmatpush3.bf16.xpose.msra.mxu0 %v6900_v9  ;;  %5623 = vmatprep.mubr.msk.bf16.mxu0 %vm6407_vm2, %v9028_v20  ;;  %v2734_v9 = vmul.bf16 %v6814_v28, %v6818_v32  ;;  %v2737_v32 = vmul.bf16 %v6814_v28, %v6860_v14 }
 0x50e   : > { %5667 = vmatprep.subr.bf16.mxu0 %v9028_v20 }
 0x514   : > { %5624 = vmatmul.mubr.bf16.gmra.mxu0 %v2438_v46 }
 0x515   : > { %5668 = vmatpush3.bf16.xpose.msra.mxu0 %v6908_v10  ;;  %5627 = vmatprep.mubr.msk.bf16.mxu0 %vm6407_vm2, %v9028_v20  ;;  %v2735_v10 = vmul.bf16 %v6814_v28, %v6834_v48  ;;  %v2738_v48 = vmul.bf16 %v6814_v28, %v6995_v33 }
 0x516   : > { %5669 = vmatprep.subr.bf16.mxu0 %v9028_v20 }
 0x51c   : > { %5628 = vmatmul.mubr.bf16.gmra.mxu0 %v2439_v62 }
 0x51d   : > { %5670 = vmatpush3.bf16.xpose.msra.mxu0 %v6919_v58  ;;  %5671 = vmatprep.mubr.msk.bf16.mxu0 %vm6407_vm2, %v9028_v20  ;;  %v2736_v58 = vmul.bf16 %v6814_v28, %v6848_v1 }
 0x51e   : > { %5721 = vmatprep.subr.bf16.mxu0 %v9028_v20 }
 0x524   : > { %5672 = vmatmul.mubr.bf16.vlgmr.msra.gmra.mxu0 %v2734_v9 }
 0x525   : > { %5675 = vmatprep.mubr.msk.bf16.mxu0 %vm6407_vm2, %v9028_v20 }
 0x52c   : > { %5676 = vmatmul.mubr.bf16.gmra.mxu0 %v2735_v10 }
 0x52d   : > { %5679 = vmatprep.mubr.msk.bf16.mxu0 %vm6407_vm2, %v9028_v20 }
 0x534   : > { %5680 = vmatmul.mubr.bf16.gmra.mxu0 %v2736_v58 }
 0x535   : > { %5683 = vmatprep.mubr.msk.bf16.mxu0 %vm6407_vm2, %v9028_v20 }
 0x53c   : > { %5684 = vmatmul.mubr.bf16.gmra.mxu0 %v2737_v32 }
 0x53d   : > { %5687 = vmatprep.mubr.msk.bf16.mxu0 %vm6407_vm2, %v9028_v20 }
 0x544   : > { %v7263_v19 = vpop.f32.mrf.mxu0  ;;  %5688 = vmatmul.mubr.bf16.gmra.mxu0 %v2738_v48 }
 0x545   : > { %9092 = vst [vmem:[#allocation14_spill] sm:$0xff] %v7263_v19  ;;  %5737 = vmatprep.mubr.msk.bf16.mxu0 %vm6407_vm2, %v9028_v20 }
 0x546   : > { %v5433_v1 = vpop.f32.mrf.mxu0 }
 0x548   : > { %v7267_v61 = vpop.f32.mrf.mxu0 }
 0x549   : > { %9093 = vst [vmem:[#allocation15_spill] sm:$0xff] %v7267_v61 }
 0x54a   : > { %v5434_v43 = vpop.f32.mrf.mxu0 }
 0x54c   : > { %v7269_v60 = vpop.f32.mrf.mxu0 }
 0x54d   : > { %9094 = vst [vmem:[#allocation16_spill] sm:$0xff] %v7269_v60 }
 0x54e   : > { %v5437_v14 = vpop.f32.mrf.mxu0 }
 0x550   : > { %v7271_v44 = vpop.f32.mrf.mxu0 }
 0x551   : > { %9095 = vst [vmem:[#allocation17_spill] sm:$0xff] %v7271_v44 }
 0x552   : > { %v5438_v11 = vpop.f32.mrf.mxu0 }
 0x554   : > { %v7273_v40 = vpop.f32.mrf.mxu0 }
 0x555   : > { %9096 = vst [vmem:[#allocation18_spill] sm:$0xff] %v7273_v40 }
 0x556   : > { %v5441_v42 = vpop.f32.mrf.mxu0 }
 0x558   : > { %v7275_v33 = vpop.f32.mrf.mxu0 }
 0x559   : > { %9097 = vst [vmem:[#allocation19_spill] sm:$0xff] %v7275_v33 }
 0x55a   : > { %v5442_v18 = vpop.f32.mrf.mxu0 }
 0x55c   : > { %v7277_v36 = vpop.f32.mrf.mxu0 }
 0x55d   : > { %9098 = vst [vmem:[#allocation20_spill] sm:$0xff] %v7277_v36 }
 0x55e   : > { %v5445_v7 = vpop.f32.mrf.mxu0 }
 0x560   : > { %v7279_v55 = vpop.f32.mrf.mxu0 }
 0x561   : > { %9099 = vst [vmem:[#allocation21_spill] sm:$0xff] %v7279_v55 }
 0x562   : > { %v5446_v8 = vpop.f32.mrf.mxu0 }
 0x564   : > { %v7281_v45 = vpop.f32.mrf.mxu0 }
 0x565   : > { %9100 = vst [vmem:[#allocation22_spill] sm:$0xff] %v7281_v45 }
 0x566   : > { %v5449_v41 = vpop.f32.mrf.mxu0 }
 0x568   : > { %v1736_v13 = vpop.f32.mrf.mxu0 }
 0x56a   : > { %v5450_v38 = vpop.f32.mrf.mxu0 }
 0x56c   : > { %v1874_v52 = vpop.f32.mrf.mxu0 }
 0x56d   : > { %v7283_v17 = vmul.f32 0.25, %v1874_v52 }
 0x56e   : > { %v5493_v23 = vpop.f32.mrf.mxu0 }
 0x56f   : > { %v1921_v34 = vsel %vm1336_vm6, %v7283_v17, -inf }
 0x570   : > { %1922 = vmax.xlane.f32.xlu1 %v1921_v34  ;;  %v1877_v53 = vpop.f32.mrf.mxu0 }
 0x571   : > { %v7287_v39 = vmul.f32 0.25, %v1877_v53  ;;  %v1339_v53 = vpop.xlane.xlu0 %1338 }
 0x572   : > { %v5494_v6 = vpop.f32.mrf.mxu0 }
 0x573   : > { %v1924_v46 = vsel %vm1336_vm6, %v7287_v39, -inf }
 0x574   : > { %1925 = vmax.xlane.f32.xlu0 %v1924_v46  ;;  %v1882_v62 = vpop.f32.mrf.mxu0 }
 0x575   : > { %v7291_v9 = vmul.f32 0.25, %v1882_v62 }
 0x576   : > { %v5497_v10 = vpop.f32.mrf.mxu0 }
 0x577   : > { %v1927_v58 = vsel %vm1336_vm6, %v7291_v9, -inf  ;;  %v1365_v10 = vsub.f32 %v7071_v37, %v1339_v53 }
 0x578   : > { %1928 = vmax.xlane.f32.xlu1 %v1927_v58  ;;  %v1885_v32 = vpop.f32.mrf.mxu0 }
 0x579   : > { %v7295_v48 = vmul.f32 0.25, %v1885_v32  ;;  %v1342_v32 = vpop.xlane.xlu1 %1341 }
 0x57a   : > { %v5498_v1 = vpop.f32.mrf.mxu0 }
 0x57b   : > { %v1930_v43 = vsel %vm1336_vm6, %v7295_v48, -inf }
 0x57c   : > { %1931 = vmax.xlane.f32.xlu0 %v1930_v43  ;;  %v1890_v14 = vpop.f32.mrf.mxu0 }
 0x57d   : > { %v7299_v11 = vmul.f32 0.25, %v1890_v14 }
 0x57e   : > { %v5501_v42 = vpop.f32.mrf.mxu0 }
 0x57f   : > { %v1933_v18 = vsel %vm1336_vm6, %v7299_v11, -inf  ;;  %v1374_v42 = vmul.f32 1.442695, %v1365_v10 }
 0x580   : > { %1934 = vmax.xlane.f32.xlu1 %v1933_v18  ;;  %v1893_v7 = vpop.f32.mrf.mxu0  ;;  %v1366_v18 = vsub.f32 %v7078_v25, %v1342_v32 }
 0x581   : > { %v7303_v8 = vmul.f32 0.25, %v1893_v7  ;;  %6043 = vpow2.f32 %v1374_v42 }
 0x582   : > { %v5502_v41 = vpop.f32.mrf.mxu0  ;;  %v1376_v37 = vmul.f32 1.442695, %v1366_v18 }
 0x583   : > { %v1936_v13 = vsel %vm1336_vm6, %v7303_v8, -inf  ;;  %v1345_v41 = vpop.xlane.xlu0 %1344 }
 0x584   : > { %1937 = vmax.xlane.f32.xlu0 %v1936_v13  ;;  %v1898_v38 = vpop.f32.mrf.mxu0  ;;  %6045 = vpow2.f32 %v1376_v37 }
 0x585   : > { %v7307_v52 = vmul.f32 0.25, %v1898_v38 }
 0x586   : > { %v5505_v23 = vpop.f32.mrf.mxu0 }
 0x587   : > { %v1939_v34 = vsel %vm1336_vm6, %v7307_v52, -inf  ;;  %v1367_v23 = vsub.f32 %v7081_v47, %v1345_v41 }
 0x588   : > { %1940 = vmax.xlane.f32.xlu1 %v1939_v34  ;;  %v1901_v6 = vpop.f32.mrf.mxu0  ;;  %v1348_v34 = vpop.xlane.xlu1 %1347 }
 0x589   : > { %v7311_v46 = vmul.f32 0.25, %v1901_v6  ;;  %v1378_v10 = vmul.f32 1.442695, %v1367_v23  ;;  %v1368_v25 = vsub.f32 %v7088_v5, %v1348_v34 }
 0x58a   : > { %v5506_v62 = vpop.f32.mrf.mxu0 }
 0x58b   : > { %v1942_v58 = vsel %vm1336_vm6, %v7311_v46, -inf  ;;  %6047 = vpow2.f32 %v1378_v10 }
 0x58c   : > { %1943 = vmax.xlane.f32.xlu0 %v1942_v58  ;;  %v1906_v1 = vpop.f32.mrf.mxu0  ;;  %v1351_v58 = vpop.xlane.xlu0 %1350 }
 0x58d   : > { %v7316_v43 = vmul.f32 0.25, %v1906_v1  ;;  %v1369_v42 = vsub.f32 %v7091_v50, %v1351_v58  ;;  %v1354_v47 = vpop.xlane.xlu1 %1353 }
 0x58e   : > { %v5509_v14 = vpop.f32.mrf.mxu0  ;;  %v1370_v23 = vsub.f32 %v7098_v31, %v1354_v47 }
 0x58f   : > { %v1945_v7 = vsel %vm1361_vm7, %v7316_v43, -inf }
 0x590   : > { %1946 = vmax.xlane.f32.xlu1 %v1945_v7  ;;  %v1909_v13 = vpop.f32.mrf.mxu0  ;;  %v1380_v7 = vmul.f32 1.442695, %v1368_v25  ;;  %v1357_v34 = vpop.xlane.xlu0 %1356 }
 0x591   : > { %v1371_v58 = vsub.f32 %v7101_v3, %v1357_v34 }
 0x592   : > { %v5510_v38 = vpop.f32.mrf.mxu0  ;;  %6049 = vpow2.f32 %v1380_v7 }
 0x593   : > { %v1382_v38 = vmul.f32 1.442695, %v1369_v42 }
 0x594   : > { %v2174_v53 = vpop.f32.mrf.mxu0  ;;  %v1364_v34 = vpop.xlane.xlu0 %1363 }
 0x595   : > { %v7322_v6 = vmul.f32 0.25, %v2174_v53  ;;  %v7337_v53 = vpop.eup %6043  ;;  %6051 = vpow2.f32 %v1382_v38 }
 0x596   : > { %v5553_v62 = vpop.f32.mrf.mxu0  ;;  %v1392_v31 = vsel %vm1336_vm6, %v7337_v53, 0.0 }
 0x597   : > { %v2221_v32 = vsel %vm1336_vm6, %v7322_v6, -inf  ;;  %v1360_v62 = vpop.xlane.xlu1 %1359 }
 0x598   : > { %2222 = vmax.xlane.f32.xlu0 %v2221_v32  ;;  %v2177_v1 = vpop.f32.mrf.mxu0  ;;  %v1372_v42 = vsub.f32 %v7108_v30, %v1360_v62 }
 0x599   : > { %v7327_v14 = vmul.f32 0.25, %v2177_v1  ;;  %v1384_v1 = vmul.f32 1.442695, %v1370_v23 }
 0x59a   : > { %v5554_v18 = vpop.f32.mrf.mxu0  ;;  %v1388_v3 = vmul.f32 1.442695, %v1372_v42 }
 0x59b   : > { %v2224_v41 = vsel %vm1336_vm6, %v7327_v14, -inf  ;;  %v7347_v18 = vpop.eup %6045  ;;  %6053 = vpow2.f32 %v1384_v1 }
 0x59c   : > { %2225 = vmax.xlane.f32.xlu1 %v2224_v41  ;;  %v2182_v13 = vpop.f32.mrf.mxu0  ;;  %v1395_v30 = vsel %vm1336_vm6, %v7347_v18, 0.0  ;;  %v7355_v23 = vpop.eup %6047 }
 0x59d   : > { %v7332_v5 = vmul.f32 0.25, %v2182_v13  ;;  %v1386_v13 = vmul.f32 1.442695, %v1371_v58  ;;  %v1373_v58 = vsub.f32 %v7111_v21, %v1364_v34 }
 0x59e   : > { %v5557_v37 = vpop.f32.mrf.mxu0 }
 0x59f   : > { %v2227_v50 = vsel %vm1336_vm6, %v7332_v5, -inf  ;;  %6055 = vpow2.f32 %v1386_v13  ;;  %v7364_v42 = vpop.eup %6049  ;;  %v1390_v13 = vmul.f32 1.442695, %v1373_v58 }
 0x5a0   : > { %2228 = vmax.xlane.f32.xlu0 %v2227_v50  ;;  %v2185_v10 = vpop.f32.mrf.mxu0  ;;  %6057 = vpow2.f32 %v1388_v3  ;;  %v1401_v21 = vsel %vm1336_vm6, %v7364_v42, 0.0 }
 0x5a1   : > { %v7339_v25 = vmul.f32 0.25, %v2185_v10  ;;  %6059 = vpow2.f32 %v1390_v13 }
 0x5a2   : > { %v5558_v32 = vpop.f32.mrf.mxu0 }
 0x5a3   : > { %v2230_v47 = vsel %vm1336_vm6, %v7339_v25, -inf  ;;  %v1398_v32 = vsel %vm1336_vm6, %v7355_v23, 0.0 }
 0x5a4   : > { %1393 = vadd.xlane.f32.xlu0 %v1392_v31  ;;  %2231 = vmax.xlane.f32.xlu1 %v2230_v47  ;;  %v2190_v7 = vpop.f32.mrf.mxu0 }
 0x5a5   : > { %v7349_v41 = vmul.f32 0.25, %v2190_v7 }
 0x5a6   : > { %v5561_v38 = vpop.f32.mrf.mxu0 }
 0x5a7   : > { %v2233_v37 = vsel %vm1336_vm6, %v7349_v41, -inf  ;;  %v7368_v38 = vpop.eup %6051 }
 0x5a8   : > { %1396 = vadd.xlane.f32.xlu1 %v1395_v30  ;;  %2234 = vmax.xlane.f32.xlu0 %v2233_v37  ;;  %v2193_v50 = vpop.f32.mrf.mxu0  ;;  %v7380_v58 = vpop.eup %6053 }
 0x5a9   : > { %v7357_v62 = vmul.f32 0.25, %v2193_v50  ;;  %v1404_v50 = vsel %vm1336_vm6, %v7368_v38, 0.0 }
 0x5aa   : > { %v5562_v10 = vpop.f32.mrf.mxu0 }
 0x5ab   : > { %v2236_v1 = vsel %vm1336_vm6, %v7357_v62, -inf }
 0x5ac   : > { %1399 = vadd.xlane.f32.xlu0 %v1398_v32  ;;  %2237 = vmax.xlane.f32.xlu1 %v2236_v1  ;;  %v2198_v31 = vpop.f32.mrf.mxu0 }
 0x5ad   : > { %v7366_v47 = vmul.f32 0.25, %v2198_v31 }
 0x5ae   : > { %v5565_v7 = vpop.f32.mrf.mxu0 }
 0x5af   : > { %v2239_v3 = vsel %vm1336_vm6, %v7366_v47, -inf  ;;  %v7384_v7 = vpop.eup %6055 }
 0x5b0   : > { %1402 = vadd.xlane.f32.xlu1 %v1401_v21  ;;  %2240 = vmax.xlane.f32.xlu0 %v2239_v3  ;;  %v2201_v30 = vpop.f32.mrf.mxu0  ;;  %v1407_v21 = vsel %vm1336_vm6, %v7380_v58, 0.0  ;;  %v7390_v3 = vpop.eup %6057 }
 0x5b1   : > { %v7374_v37 = vmul.f32 0.25, %v2201_v30  ;;  %v7400_v16 = vpop.eup %6059 }
 0x5b2   : > { %v5566_v34 = vpop.f32.mrf.mxu0 }
 0x5b3   : > { %v2242_v10 = vsel %vm1336_vm6, %v7374_v37, -inf }
 0x5b4   : > { %1405 = vadd.xlane.f32.xlu0 %v1404_v50  ;;  %2243 = vmax.xlane.f32.xlu1 %v2242_v10  ;;  %v2206_v32 = vpop.f32.mrf.mxu0  ;;  %v1410_v50 = vsel %vm1336_vm6, %v7384_v7, 0.0  ;;  %v1413_v10 = vsel %vm1336_vm6, %v7390_v3, 0.0 }
 0x5b5   : > { %v7382_v1 = vmul.f32 0.25, %v2206_v32 }
 0x5b6   : > { %v5569_v31 = vpop.f32.mrf.mxu0 }
 0x5b7   : > { %v2245_v13 = vsel %vm1361_vm7, %v7382_v1, -inf }
 0x5b8   : > { %1408 = vadd.xlane.f32.xlu1 %v1407_v21  ;;  %2246 = vmax.xlane.f32.xlu0 %v2245_v13  ;;  %v2209_v30 = vpop.f32.mrf.mxu0 }
 0x5ba   : > { %v5570_v34 = vpop.f32.mrf.mxu0 }
 0x5bb   : > { %v1416_v34 = vsel %vm1361_vm7, %v7400_v16, 0.0 }
 0x5bc   : > { %1411 = vadd.xlane.f32.xlu1 %v1410_v50  ;;  %1414 = vadd.xlane.f32.xlu0 %v1413_v10  ;;  %v2474_v32 = vpop.f32.mrf.mxu0 }
 0x5bd   : > { %v7396_v31 = vmul.f32 0.25, %v2474_v32 }
 0x5be   : > { %v5613_v51 = vpop.f32.mrf.mxu0 }
 0x5bf   : > { %v2521_v4 = vsel %vm1336_vm6, %v7396_v31, -inf }
 0x5c0   : > { %2522 = vmax.xlane.f32.xlu1 %v2521_v4  ;;  %v2477_v21 = vpop.f32.mrf.mxu0 }
 0x5c1   : > { %v7402_v13 = vmul.f32 0.25, %v2477_v21 }
 0x5c2   : > { %v5614_v30 = vpop.f32.mrf.mxu0 }
 0x5c3   : > { %v2524_v50 = vsel %vm1336_vm6, %v7402_v13, -inf }
 0x5c4   : > { %1417 = vadd.xlane.f32.xlu1 %v1416_v34  ;;  %2525 = vmax.xlane.f32.xlu0 %v2524_v50  ;;  %v2482_v10 = vpop.f32.mrf.mxu0 }
 0x5c5   : > { %v7408_v51 = vmul.f32 0.25, %v2482_v10 }
 0x5c6   : > { %v5617_v32 = vpop.f32.mrf.mxu0 }
 0x5c7   : > { %v2527_v35 = vsel %vm1336_vm6, %v7408_v51, -inf }
 0x5c8   : > { %2528 = vmax.xlane.f32.xlu0 %v2527_v35  ;;  %v2485_v4 = vpop.f32.mrf.mxu0 }
 0x5c9   : > { %v7412_v21 = vmul.f32 0.25, %v2485_v4 }
 0x5ca   : > { %v5618_v30 = vpop.f32.mrf.mxu0 }
 0x5cb   : > { %v2530_v49 = vsel %vm1336_vm6, %v7412_v21, -inf }
 0x5cc   : > { %2531 = vmax.xlane.f32.xlu1 %v2530_v49  ;;  %v2490_v2 = vpop.f32.mrf.mxu0 }
 0x5ce   : > { %v5621_v15 = vpop.f32.mrf.mxu0 }
 0x5d0   : > { %v2493_v34 = vpop.f32.mrf.mxu0 }
 0x5d2   : > { %v5622_v50 = vpop.f32.mrf.mxu0 }
 0x5d4   : > { %v7416_v20 = vpop.f32.mrf.mxu0 }
 0x5d6   : > { %v5625_v10 = vpop.f32.mrf.mxu0 }
 0x5d8   : > { %v7418_v32 = vpop.f32.mrf.mxu0 }
 0x5da   : > { %v5626_v22 = vpop.f32.mrf.mxu0 }
 0x5dc   : > { %v7420_v45 = vpop.f32.mrf.mxu0 }
 0x5de   : > { %v5629_v35 = vpop.f32.mrf.mxu0 }
 0x5e0   : > { %v2509_v4 = vpop.f32.mrf.mxu0 }
 0x5e2   : > { %v5630_v55 = vpop.f32.mrf.mxu0 }
 0x5e4   : > { %v7422_v30 = vpop.f32.mrf.mxu0 }
 0x5e6   : > { %v5673_v36 = vpop.f32.mrf.mxu0 }
 0x5e8   : > { %v7424_v33 = vpop.f32.mrf.mxu0 }
 0x5ea   : > { %v5674_v49 = vpop.f32.mrf.mxu0 }
 0x5ec   : > { %v7426_v15 = vpop.f32.mrf.mxu0 }
 0x5ee   : > { %v5677_v50 = vpop.f32.mrf.mxu0 }
 0x5f0   : > { %v7428_v40 = vpop.f32.mrf.mxu0 }
 0x5f2   : > { %v5678_v10 = vpop.f32.mrf.mxu0 }
 0x5f4   : > { %v7430_v44 = vpop.f32.mrf.mxu0 }
 0x5f6   : > { %v5681_v22 = vpop.f32.mrf.mxu0 }
 0x5f8   : > { %v7432_v60 = vpop.f32.mrf.mxu0 }
 0x5f9   : > { %v1923_v35 = vpop.xlane.xlu1 %1922 }
 0x5fa   : > { %v1948_v55 = vsub.f32 %v7283_v17, %v1923_v35  ;;  %v5682_v4 = vpop.f32.mrf.mxu0 }
 0x5fc   : > { %v1957_v61 = vmul.f32 1.442695, %v1948_v55  ;;  %v7435_v36 = vpop.f32.mrf.mxu0 }
 0x5fd   : > { %v1926_v19 = vpop.xlane.xlu0 %1925 }
 0x5fe   : > { %6061 = vpow2.f32 %v1957_v61  ;;  %v1949_v49 = vsub.f32 %v7287_v39, %v1926_v19  ;;  %v5685_v50 = vpop.f32.mrf.mxu0 }
 0x600   : > { %v1959_v28 = vmul.f32 1.442695, %v1949_v49  ;;  %v7438_v0 = vpop.f32.mrf.mxu0 }
 0x601   : > { %v1929_v10 = vpop.xlane.xlu1 %1928 }
 0x602   : > { %6063 = vpow2.f32 %v1959_v28  ;;  %v1950_v22 = vsub.f32 %v7291_v9, %v1929_v10  ;;  %v5686_v27 = vpop.f32.mrf.mxu0  ;;  %v7447_v28 = vmul.f32 0.25, %v2490_v2 }
 0x604   : > { %v1961_v59 = vmul.f32 1.442695, %v1950_v22  ;;  %v7441_v26 = vpop.f32.mrf.mxu0  ;;  %v7454_v22 = vmul.f32 0.25, %v2493_v34  ;;  %v2533_v2 = vsel %vm1336_vm6, %v7447_v28, -inf }
 0x605   : > { %v1932_v17 = vpop.xlane.xlu0 %1931 }
 0x606   : > { %6065 = vpow2.f32 %v1961_v59  ;;  %v1951_v35 = vsub.f32 %v7295_v48, %v1932_v17  ;;  %v5689_v55 = vpop.f32.mrf.mxu0 }
 0x608   : > { %v1963_v61 = vmul.f32 1.442695, %v1951_v35  ;;  %v2808_v4 = vpop.f32.mrf.mxu0 }
 0x609   : > { %v1935_v19 = vpop.xlane.xlu1 %1934 }
 0x60a   : > { %6067 = vpow2.f32 %v1963_v61  ;;  %v1952_v39 = vsub.f32 %v7299_v11, %v1935_v19  ;;  %v5690_v49 = vpop.f32.mrf.mxu0  ;;  %v2536_v19 = vsel %vm1336_vm6, %v7454_v22, -inf }
 0x60b   : > { %v7445_v50 = vpop.eup %6061 }
 0x60c   : > { %v1965_v27 = vmul.f32 1.442695, %v1952_v39  ;;  %v1975_v9 = vsel %vm1336_vm6, %v7445_v50, 0.0 }
 0x60d   : > { %v1938_v10 = vpop.xlane.xlu0 %1937  ;;  %1976 = vadd.xlane.f32.xlu0 %v1975_v9 }
 0x60e   : > { %6069 = vpow2.f32 %v1965_v27  ;;  %v1953_v59 = vsub.f32 %v7303_v8, %v1938_v10  ;;  %v7464_v8 = vmul.f32 0.25, %v7416_v20 }
 0x60f   : > { %v7452_v48 = vpop.eup %6063 }
 0x610   : > { %v1967_v17 = vmul.f32 1.442695, %v1953_v59  ;;  %v1978_v11 = vsel %vm1336_vm6, %v7452_v48, 0.0  ;;  %v2539_v10 = vsel %vm1336_vm6, %v7464_v8, -inf }
 0x611   : > { %v1941_v35 = vpop.xlane.xlu1 %1940  ;;  %1979 = vadd.xlane.f32.xlu1 %v1978_v11  ;;  %2534 = vmax.xlane.f32.xlu0 %v2533_v2 }
 0x612   : > { %6071 = vpow2.f32 %v1967_v17  ;;  %v1954_v55 = vsub.f32 %v7307_v52, %v1941_v35  ;;  %v7474_v52 = vmul.f32 0.25, %v7418_v32 }
 0x613   : > { %v7461_v61 = vpop.eup %6065 }
 0x614   : > { %v1969_v34 = vmul.f32 1.442695, %v1954_v55  ;;  %v1981_v4 = vsel %vm1336_vm6, %v7461_v61, 0.0  ;;  %v2542_v35 = vsel %vm1336_vm6, %v7474_v52, -inf }
 0x615   : > { %v1944_v39 = vpop.xlane.xlu0 %1943  ;;  %1982 = vadd.xlane.f32.xlu0 %v1981_v4  ;;  %2537 = vmax.xlane.f32.xlu1 %v2536_v19 }
 0x616   : > { %6073 = vpow2.f32 %v1969_v34  ;;  %v1955_v49 = vsub.f32 %v7311_v46, %v1944_v39  ;;  %v7484_v46 = vmul.f32 0.25, %v7420_v45  ;;  %v7500_v39 = vmul.f32 0.25, %v7422_v30 }
 0x617   : > { %v7471_v27 = vpop.eup %6067 }
 0x618   : > { %v1971_v20 = vmul.f32 1.442695, %v1955_v49  ;;  %v1984_v9 = vsel %vm1336_vm6, %v7471_v27, 0.0  ;;  %v2545_v34 = vsel %vm1361_vm7, %v7484_v46, -inf  ;;  %v2820_v30 = vsel %vm1336_vm6, %v7500_v39, -inf }
 0x619   : > { %v1947_v59 = vpop.xlane.xlu1 %1946  ;;  %1985 = vadd.xlane.f32.xlu1 %v1984_v9  ;;  %2540 = vmax.xlane.f32.xlu0 %v2539_v10 }
 0x61a   : > { %6075 = vpow2.f32 %v1971_v20  ;;  %v1956_v17 = vsub.f32 %v7316_v43, %v1947_v59 }
 0x61b   : > { %v7481_v11 = vpop.eup %6069 }
 0x61c   : > { %v1973_v32 = vmul.f32 1.442695, %v1956_v17  ;;  %v1987_v2 = vsel %vm1336_vm6, %v7481_v11, 0.0  ;;  %v7508_v17 = vmul.f32 0.25, %v7424_v33  ;;  %v7520_v33 = vmul.f32 0.25, %v7426_v15 }
 0x61d   : > { %1988 = vadd.xlane.f32.xlu0 %v1987_v2  ;;  %2543 = vmax.xlane.f32.xlu1 %v2542_v35 }
 0x61e   : > { %6077 = vpow2.f32 %v1973_v32 }
 0x61f   : > { %v7490_v55 = vpop.eup %6071 }
 0x620   : > { %v1990_v43 = vsel %vm1336_vm6, %v7490_v55, 0.0 }
 0x621   : > { %v2223_v45 = vpop.xlane.xlu0 %2222  ;;  %1991 = vadd.xlane.f32.xlu1 %v1990_v43  ;;  %2546 = vmax.xlane.f32.xlu0 %v2545_v34  ;;  %v7523_v34 = vmul.f32 0.25, %v7428_v40 }
 0x622   : > { %v2248_v4 = vsub.f32 %v7322_v6, %v2223_v45 }
 0x623   : > { %v7497_v19 = vpop.eup %6073  ;;  %v2829_v15 = vsel %vm1336_vm6, %v7523_v34, -inf }
 0x624   : > { %v2257_v49 = vmul.f32 1.442695, %v2248_v4  ;;  %v1993_v20 = vsel %vm1336_vm6, %v7497_v19, 0.0 }
 0x625   : > { %v2226_v9 = vpop.xlane.xlu1 %2225  ;;  %1994 = vadd.xlane.f32.xlu1 %v1993_v20 }
 0x626   : > { %6079 = vpow2.f32 %v2257_v49  ;;  %v2249_v10 = vsub.f32 %v7327_v14, %v2226_v9  ;;  %v2823_v14 = vsel %vm1336_vm6, %v7508_v17, -inf }
 0x627   : > { %v7505_v59 = vpop.eup %6075 }
 0x628   : > { %v2259_v6 = vmul.f32 1.442695, %v2249_v10  ;;  %v1996_v32 = vsel %vm1336_vm6, %v7505_v59, 0.0  ;;  %v2826_v10 = vsel %vm1336_vm6, %v7520_v33, -inf }
 0x629   : > { %v2229_v2 = vpop.xlane.xlu0 %2228  ;;  %1997 = vadd.xlane.f32.xlu0 %v1996_v32  ;;  %2821 = vmax.xlane.f32.xlu1 %v2820_v30 }
 0x62a   : > { %6081 = vpow2.f32 %v2259_v6  ;;  %v2250_v35 = vsub.f32 %v7332_v5, %v2229_v2 }
 0x62b   : > { %v7515_v43 = vpop.eup %6077 }
 0x62c   : > { %v2261_v45 = vmul.f32 1.442695, %v2250_v35  ;;  %v1999_v4 = vsel %vm1361_vm7, %v7515_v43, 0.0 }
 0x62d   : > { %v1394_v49 = vpop.xlane.xlu0 %1393  ;;  %v2232_v20 = vpop.xlane.xlu1 %2231  ;;  %2000 = vadd.xlane.f32.xlu1 %v1999_v4  ;;  %2824 = vmax.xlane.f32.xlu0 %v2823_v14 }
 0x62e   : > { %6083 = vpow2.f32 %v2261_v45  ;;  %v2251_v5 = vsub.f32 %v7339_v25, %v2232_v20  ;;  %v7536_v25 = vmul.f32 0.25, %v7430_v44 }
 0x62f   : > { %6085 = vrcp.f32 %v1394_v49 }
 0x630   : > { %v2263_v9 = vmul.f32 1.442695, %v2251_v5  ;;  %v2832_v5 = vsel %vm1336_vm6, %v7536_v25, -inf }
 0x631   : > { %v1397_v40 = vpop.xlane.xlu1 %1396  ;;  %v2235_v6 = vpop.xlane.xlu0 %2234  ;;  %2827 = vmax.xlane.f32.xlu0 %v2826_v10  ;;  %2830 = vmax.xlane.f32.xlu1 %v2829_v15 }
 0x632   : > { %6087 = vpow2.f32 %v2263_v9  ;;  %v2252_v32 = vsub.f32 %v7349_v41, %v2235_v6  ;;  %v7544_v41 = vmul.f32 0.25, %v7432_v60  ;;  %v7554_v60 = vmul.f32 0.25, %v7435_v36 }
 0x633   : > { %v7533_v30 = vpop.eup %6079  ;;  %6089 = vrcp.f32 %v1397_v40 }
 0x634   : > { %v2265_v2 = vmul.f32 1.442695, %v2252_v32  ;;  %v2275_v35 = vsel %vm1336_vm6, %v7533_v30, 0.0  ;;  %v2835_v32 = vsel %vm1336_vm6, %v7544_v41, -inf }
 0x635   : > { %v1400_v14 = vpop.xlane.xlu0 %1399  ;;  %v2238_v45 = vpop.xlane.xlu1 %2237  ;;  %2276 = vadd.xlane.f32.xlu0 %v2275_v35 }
 0x636   : > { %6091 = vpow2.f32 %v2265_v2  ;;  %v2253_v4 = vsub.f32 %v7357_v62, %v2238_v45 }
 0x637   : > { %v7541_v49 = vpop.eup %6081  ;;  %6093 = vrcp.f32 %v1400_v14 }
 0x638   : > { %v2267_v20 = vmul.f32 1.442695, %v2253_v4  ;;  %v2278_v44 = vsel %vm1336_vm6, %v7541_v49, 0.0 }
 0x639   : > { %v1403_v9 = vpop.xlane.xlu1 %1402  ;;  %v2241_v10 = vpop.xlane.xlu0 %2240  ;;  %2279 = vadd.xlane.f32.xlu1 %v2278_v44  ;;  %2833 = vmax.xlane.f32.xlu0 %v2832_v5  ;;  %v2838_v44 = vsel %vm1336_vm6, %v7554_v60, -inf  ;;  %v7568_v5 = vmul.f32 0.25, %v7438_v0 }
 0x63a   : > { %6095 = vpow2.f32 %v2267_v20  ;;  %v2254_v62 = vsub.f32 %v7366_v47, %v2241_v10 }
 0x63b   : > { %v7551_v15 = vpop.eup %6083  ;;  %6097 = vrcp.f32 %v1403_v9 }
 0x63c   : > { %v2269_v40 = vmul.f32 1.442695, %v2254_v62  ;;  %v2281_v6 = vsel %vm1336_vm6, %v7551_v15, 0.0  ;;  %v6086_v14 = vpop.eup %6085 }
 0x63d   : > { %v1406_v2 = vpop.xlane.xlu0 %1405  ;;  %v2244_v35 = vpop.xlane.xlu1 %2243  ;;  %2282 = vadd.xlane.f32.xlu0 %v2281_v6  ;;  %2836 = vmax.xlane.f32.xlu1 %v2835_v32  ;;  %v1428_v9 = vmul.f32 %v6086_v14, %v7337_v53 }
 0x63e   : > { %6099 = vpow2.f32 %v2269_v40  ;;  %v2255_v47 = vsub.f32 %v7374_v37, %v2244_v35 }
 0x63f   : > { %v7561_v45 = vpop.eup %6087  ;;  %6101 = vrcp.f32 %v1406_v2  ;;  %v2841_v2 = vsel %vm1336_vm6, %v7568_v5, -inf }
 0x640   : > { %v6090_v4 = vpop.eup %6089  ;;  %v2271_v36 = vmul.f32 1.442695, %v2255_v47  ;;  %v2284_v20 = vsel %vm1336_vm6, %v7561_v45, 0.0  ;;  %v9101_v47 = vmov 0.0  }
 0x641   : > { %v1429_v10 = vmul.f32 %v6090_v4, %v7347_v18  ;;  %v1409_v62 = vpop.xlane.xlu1 %1408  ;;  %v2247_v37 = vpop.xlane.xlu0 %2246  ;;  %2285 = vadd.xlane.f32.xlu1 %v2284_v20  ;;  %2839 = vmax.xlane.f32.xlu0 %v2838_v44 }
 0x642   : > { %6103 = vpow2.f32 %v2271_v36  ;;  %v2256_v40 = vsub.f32 %v7382_v1, %v2247_v37 }
 0x643   : > { %v7573_v6 = vpop.eup %6091  ;;  %v1437_v32 = vpack.c.bf16 %v1429_v10, %v1428_v9  ;;  %6105 = vrcp.f32 %v1409_v62 }
 0x644   : > { %v2273_v35 = vmul.f32 1.442695, %v2256_v40  ;;  %v2287_v0 = vsel %vm1336_vm6, %v7573_v6, 0.0  ;;  %v6094_v14 = vpop.eup %6093 }
 0x645   : > { %5462 = vmatmul.mubr.msk.bf16.vlgmr.msra.gmra.mxu1 %vm1336_vm6, %v1437_v32  ;;  %v1412_v53 = vpop.xlane.xlu1 %1411  ;;  %v1415_v18 = vpop.xlane.xlu0 %1414  ;;  %2288 = vadd.xlane.f32.xlu0 %v2287_v0  ;;  %v1430_v44 = vmul.f32 %v6094_v14, %v7355_v23 }
 0x646   : > { %6107 = vpow2.f32 %v2273_v35  ;;  %5512 = vmatpush3.bf16.msra.mxu1 %v6881_v56  ;;  %2842 = vmax.xlane.f32.xlu1 %v2841_v2  ;;  %v9102_v56 = vmul.bf16 %v6806_v24, %v6858_v12 }
 0x647   : > { %v7581_v1 = vpop.eup %6095  ;;  %6109 = vrcp.f32 %v1412_v53  ;;  %5513 = vmatprep.subr.bf16.mxu1 %v9101_v47  ;;  %5465 = vmatprep.mubr.msk.bf16.mxu1 %vm6407_vm2, %v9101_v47 }
 0x648   : > { %v6098_v4 = vpop.eup %6097  ;;  %6111 = vrcp.f32 %v1415_v18  ;;  %v2290_v36 = vsel %vm1336_vm6, %v7581_v1, 0.0 }
 0x649   : > { %v2523_v20 = vpop.xlane.xlu1 %2522  ;;  %v1431_v9 = vmul.f32 %v6098_v4, %v7364_v42  ;;  %v7612_v4 = vmul.f32 0.25, %v7441_v26 }
 0x64a   : > { %5514 = vmatpush3.bf16.msra.mxu1 %v9102_v56  ;;  %v2548_v10 = vsub.f32 %v7396_v31, %v2523_v20  ;;  %2291 = vadd.xlane.f32.xlu1 %v2290_v36  ;;  %v9103_v31 = vmul.bf16 %v6806_v24, %v6846_v63 }
 0x64b   : > { %v7594_v62 = vpop.eup %6099  ;;  %5515 = vmatprep.subr.bf16.mxu1 %v9101_v47  ;;  %v1438_v37 = vpack.c.bf16 %v1431_v9, %v1430_v44  ;;  %v9104_v44 = vmul.bf16 %v6806_v24, %v6832_v54 }
 0x64c   : > { %v2557_v40 = vmul.f32 1.442695, %v2548_v10  ;;  %v2293_v32 = vsel %vm1336_vm6, %v7594_v62, 0.0  ;;  %v6102_v35 = vpop.eup %6101 }
 0x64d   : > { %5466 = vmatmul.mubr.msk.bf16.gmra.mxu1 %vm1336_vm6, %v1438_v37  ;;  %v1418_v23 = vpop.xlane.xlu1 %1417  ;;  %v2526_v42 = vpop.xlane.xlu0 %2525  ;;  %2294 = vadd.xlane.f32.xlu0 %v2293_v32  ;;  %v2844_v32 = vsel %vm1361_vm7, %v7612_v4, -inf }
 0x64e   : > { %6113 = vpow2.f32 %v2557_v40  ;;  %5516 = vmatpush3.bf16.msra.mxu1 %v9103_v31  ;;  %v2549_v0 = vsub.f32 %v7402_v13, %v2526_v42  ;;  %5469 = vmatprep.mubr.msk.bf16.mxu1 %vm6407_vm2, %v9101_v47  ;;  %v1432_v13 = vmul.f32 %v6102_v35, %v7368_v38 }
 0x64f   : > { %v7606_v53 = vpop.eup %6103  ;;  %6115 = vrcp.f32 %v1418_v23  ;;  %5517 = vmatprep.subr.bf16.mxu1 %v9101_v47 }
 0x650   : > { %v6106_v18 = vpop.eup %6105  ;;  %v2559_v2 = vmul.f32 1.442695, %v2549_v0  ;;  %v2296_v14 = vsel %vm1336_vm6, %v7606_v53, 0.0 }
 0x651   : > { %v2529_v36 = vpop.xlane.xlu0 %2528  ;;  %2297 = vadd.xlane.f32.xlu1 %v2296_v14  ;;  %v1433_v20 = vmul.f32 %v6106_v18, %v7380_v58 }
 0x652   : > { %6117 = vpow2.f32 %v2559_v2  ;;  %5518 = vmatpush3.bf16.msra.mxu1 %v9104_v44  ;;  %v2550_v9 = vsub.f32 %v7408_v51, %v2529_v36  ;;  %v9105_v51 = vmul.bf16 %v6806_v24, %v6816_v29 }
 0x653   : > { %v7620_v56 = vpop.eup %6107  ;;  %5519 = vmatprep.subr.bf16.mxu1 %v9101_v47  ;;  %v1439_v10 = vpack.c.bf16 %v1433_v20, %v1432_v13 }
 0x654   : > { %v6110_v26 = vpop.eup %6109  ;;  %v2561_v37 = vmul.f32 1.442695, %v2550_v9  ;;  %v2299_v40 = vsel %vm1361_vm7, %v7620_v56, 0.0 }
 0x655   : > { %v6112_v38 = vpop.eup %6111  ;;  %5470 = vmatmul.mubr.msk.bf16.gmra.mxu1 %vm1336_vm6, %v1439_v10  ;;  %v2532_v58 = vpop.xlane.xlu1 %2531  ;;  %2300 = vadd.xlane.f32.xlu0 %v2299_v40  ;;  %v1434_v42 = vmul.f32 %v6110_v26, %v7384_v7 }
 0x656   : > { %6119 = vpow2.f32 %v2561_v37  ;;  %5520 = vmatpush3.bf16.msra.mxu1 %v9105_v51  ;;  %v2551_v23 = vsub.f32 %v7412_v21, %v2532_v58  ;;  %2845 = vmax.xlane.f32.xlu1 %v2844_v32  ;;  %v1435_v35 = vmul.f32 %v6112_v38, %v7390_v3 }
 0x657   : > { %5473 = vmatprep.mubr.msk.bf16.mxu1 %vm6407_vm2, %v9101_v47  ;;  %5571 = vmatprep.subr.bf16.mxu1 %v9101_v47 }
 0x658   : > { %v2563_v31 = vmul.f32 1.442695, %v2551_v23  ;;  %v1440_v18 = vpack.c.bf16 %v1435_v35, %v1434_v42 }
 0x65a   : > { %6121 = vpow2.f32 %v2563_v31 }
 0x65b   : > { %v7637_v0 = vpop.eup %6113 }
 0x65c   : > { %v6116_v2 = vpop.eup %6115  ;;  %v2575_v24 = vsel %vm1336_vm6, %v7637_v0, 0.0 }
 0x65d   : > { %5474 = vmatmul.mubr.msk.bf16.gmra.mxu1 %vm1336_vm6, %v1440_v18  ;;  %2576 = vadd.xlane.f32.xlu0 %v2575_v24  ;;  %v1436_v3 = vmul.f32 %v6116_v2, %v7400_v16 }
 0x65e   : > { %5477 = vmatprep.mubr.msk.bf16.mxu1 %vm6407_vm2, %v9101_v47 }
 0x65f   : > { %v7644_v7 = vpop.eup %6117  ;;  %v1441_v36 = vpack.c.bf16 %v1436_v3, %v1436_v3 }
 0x660   : > { %v2578_v21 = vsel %vm1336_vm6, %v7644_v7, 0.0 }
 0x661   : > { %2579 = vadd.xlane.f32.xlu1 %v2578_v21 }
 0x663   : > { %v7649_v14 = vpop.eup %6119 }
 0x664   : > { %v2581_v13 = vsel %vm1336_vm6, %v7649_v14, 0.0 }
 0x665   : > { %5478 = vmatmul.mubr.msk.bf16.gmra.mxu1 %vm1336_vm6, %v1441_v36  ;;  %2582 = vadd.xlane.f32.xlu0 %v2581_v13 }
 0x666   : > { %5521 = vmatprep.mubr.msk.bf16.mxu1 %vm6407_vm2, %v9101_v47 }
 0x667   : > { %v7656_v20 = vpop.eup %6121 }
 0x668   : > { %v2584_v16 = vsel %vm1336_vm6, %v7656_v20, 0.0 }
 0x669   : > { %2585 = vadd.xlane.f32.xlu1 %v2584_v16 }
 0x696   : > { %v1977_v44 = vpop.xlane.xlu0 %1976 }
 0x697   : > { %6123 = vrcp.f32 %v1977_v44 }
 0x69a   : > { %v1980_v9 = vpop.xlane.xlu1 %1979  ;;  %v2535_v10 = vpop.xlane.xlu0 %2534 }
 0x69b   : > { %6125 = vrcp.f32 %v1980_v9  ;;  %v2552_v26 = vsub.f32 %v7447_v28, %v2535_v10 }
 0x69d   : > { %v2565_v37 = vmul.f32 1.442695, %v2552_v26 }
 0x69e   : > { %v1983_v40 = vpop.xlane.xlu0 %1982  ;;  %v2538_v38 = vpop.xlane.xlu1 %2537 }
 0x69f   : > { %6127 = vpow2.f32 %v2565_v37  ;;  %v2553_v58 = vsub.f32 %v7454_v22, %v2538_v38  ;;  %v9106_v37 = vld [vmem:[#allocation9_spill] sm:$0xff] }
 0x6a0   : > { %6129 = vrcp.f32 %v1983_v40  ;;  %v9107_v40 = vmul.bf16 %v9106_v37, %v6858_v12 }
 0x6a1   : > { %v2567_v32 = vmul.f32 1.442695, %v2553_v58 }
 0x6a2   : > { %v1986_v51 = vpop.xlane.xlu1 %1985  ;;  %v2541_v23 = vpop.xlane.xlu0 %2540 }
 0x6a3   : > { %6131 = vpow2.f32 %v2567_v32  ;;  %v2554_v42 = vsub.f32 %v7464_v8, %v2541_v23 }
 0x6a4   : > { %6133 = vrcp.f32 %v1986_v51  ;;  %v6124_v31 = vpop.eup %6123 }
 0x6a5   : > { %v2569_v35 = vmul.f32 1.442695, %v2554_v42  ;;  %v2011_v3 = vmul.f32 %v6124_v31, %v7445_v50 }
 0x6a6   : > { %v1989_v18 = vpop.xlane.xlu0 %1988  ;;  %v2544_v2 = vpop.xlane.xlu1 %2543 }
 0x6a7   : > { %6135 = vpow2.f32 %v2569_v35  ;;  %v2555_v28 = vsub.f32 %v7474_v52, %v2544_v2 }
 0x6a8   : > { %v6126_v24 = vpop.eup %6125  ;;  %6137 = vrcp.f32 %v1989_v18 }
 0x6a9   : > { %v2012_v22 = vmul.f32 %v6126_v24, %v7452_v48  ;;  %v2571_v21 = vmul.f32 1.442695, %v2555_v28 }
 0x6aa   : > { %v1992_v36 = vpop.xlane.xlu1 %1991  ;;  %v2547_v13 = vpop.xlane.xlu0 %2546 }
 0x6ab   : > { %v2020_v16 = vpack.c.bf16 %v2012_v22, %v2011_v3  ;;  %6139 = vpow2.f32 %v2571_v21  ;;  %v2556_v8 = vsub.f32 %v7484_v46, %v2547_v13 }
 0x6ac   : > { %v7667_v44 = vpop.eup %6127  ;;  %6141 = vrcp.f32 %v1992_v36 }
 0x6ad   : > { %v2573_v9 = vmul.f32 1.442695, %v2556_v8  ;;  %5522 = vmatmul.mubr.msk.bf16.vlgmr.msra.gmra.mxu1 %vm1336_vm6, %v2020_v16  ;;  %v2587_v52 = vsel %vm1336_vm6, %v7667_v44, 0.0  ;;  %v6130_v48 = vpop.eup %6129  ;;  %v9109_v16 = vmul.bf16 %v9106_v37, %v6832_v54 }
 0x6ae   : > { %5572 = vmatpush3.bf16.msra.mxu1 %v6884_v57  ;;  %v1995_v50 = vpop.xlane.xlu1 %1994  ;;  %2588 = vadd.xlane.f32.xlu0 %v2587_v52  ;;  %v2013_v58 = vmul.f32 %v6130_v48, %v7461_v61 }
 0x6af   : > { %6143 = vpow2.f32 %v2573_v9  ;;  %5573 = vmatprep.subr.bf16.mxu1 %v9101_v47  ;;  %5525 = vmatprep.mubr.msk.bf16.mxu1 %vm6407_vm2, %v9101_v47 }
 0x6b0   : > { %v7676_v46 = vpop.eup %6131  ;;  %6145 = vrcp.f32 %v1995_v50 }
 0x6b1   : > { %v6134_v10 = vpop.eup %6133  ;;  %v2590_v26 = vsel %vm1336_vm6, %v7676_v46, 0.0 }
 0x6b2   : > { %5574 = vmatpush3.bf16.msra.mxu1 %v9107_v40  ;;  %v1998_v57 = vpop.xlane.xlu0 %1997  ;;  %v2822_v38 = vpop.xlane.xlu1 %2821  ;;  %2591 = vadd.xlane.f32.xlu1 %v2590_v26  ;;  %v2014_v32 = vmul.f32 %v6134_v10, %v7471_v27  ;;  %v9108_v27 = vmul.bf16 %v9106_v37, %v6846_v63 }
 0x6b3   : > { %6147 = vrcp.f32 %v1998_v57  ;;  %v2847_v51 = vsub.f32 %v7500_v39, %v2822_v38  ;;  %5575 = vmatprep.subr.bf16.mxu1 %v9101_v47 }
 0x6b4   : > { %v7687_v23 = vpop.eup %6135  ;;  %v2021_v42 = vpack.c.bf16 %v2014_v32, %v2013_v58 }
 0x6b5   : > { %v2856_v35 = vmul.f32 1.442695, %v2847_v51  ;;  %v2593_v31 = vsel %vm1336_vm6, %v7687_v23, 0.0  ;;  %v6138_v61 = vpop.eup %6137 }
 0x6b6   : > { %5526 = vmatmul.mubr.msk.bf16.gmra.mxu1 %vm1336_vm6, %v2021_v42  ;;  %v2001_v18 = vpop.xlane.xlu1 %2000  ;;  %v2825_v2 = vpop.xlane.xlu0 %2824  ;;  %2594 = vadd.xlane.f32.xlu0 %v2593_v31  ;;  %v2015_v13 = vmul.f32 %v6138_v61, %v7481_v11 }
 0x6b7   : > { %6149 = vpow2.f32 %v2856_v35  ;;  %5576 = vmatpush3.bf16.msra.mxu1 %v9108_v27  ;;  %v2848_v39 = vsub.f32 %v7508_v17, %v2825_v2  ;;  %5529 = vmatprep.mubr.msk.bf16.mxu1 %vm6407_vm2, %v9101_v47 }
 0x6b8   : > { %v7698_v28 = vpop.eup %6139  ;;  %6151 = vrcp.f32 %v2001_v18  ;;  %5577 = vmatprep.subr.bf16.mxu1 %v9101_v47 }
 0x6b9   : > { %v6142_v24 = vpop.eup %6141  ;;  %v2858_v3 = vmul.f32 1.442695, %v2848_v39  ;;  %v2596_v22 = vsel %vm1336_vm6, %v7698_v28, 0.0 }
 0x6ba   : > { %v2828_v21 = vpop.xlane.xlu0 %2827  ;;  %v2831_v36 = vpop.xlane.xlu1 %2830  ;;  %2597 = vadd.xlane.f32.xlu1 %v2596_v22  ;;  %v2016_v17 = vmul.f32 %v6142_v24, %v7490_v55 }
 0x6bb   : > { %6153 = vpow2.f32 %v2858_v3  ;;  %5578 = vmatpush3.bf16.msra.mxu1 %v9109_v16  ;;  %v2849_v8 = vsub.f32 %v7520_v33, %v2828_v21  ;;  %v2850_v9 = vsub.f32 %v7523_v34, %v2831_v36  ;;  %v9110_v33 = vmul.bf16 %v9106_v37, %v6816_v29 }
 0x6bc   : > { %v7710_v52 = vpop.eup %6143  ;;  %5579 = vmatprep.subr.bf16.mxu1 %v9101_v47  ;;  %v2022_v50 = vpack.c.bf16 %v2016_v17, %v2015_v13 }
 0x6bd   : > { %v2860_v48 = vmul.f32 1.442695, %v2849_v8  ;;  %v2862_v10 = vmul.f32 1.442695, %v2850_v9  ;;  %v2599_v11 = vsel %vm1361_vm7, %v7710_v52, 0.0  ;;  %v6146_v55 = vpop.eup %6145 }
 0x6be   : > { %5530 = vmatmul.mubr.msk.bf16.gmra.mxu1 %vm1336_vm6, %v2022_v50  ;;  %v2277_v26 = vpop.xlane.xlu0 %2276  ;;  %2600 = vadd.xlane.f32.xlu0 %v2599_v11  ;;  %v2017_v40 = vmul.f32 %v6146_v55, %v7497_v19 }
 0x6bf   : > { %6155 = vpow2.f32 %v2860_v48  ;;  %5580 = vmatpush3.bf16.msra.mxu1 %v9110_v33  ;;  %5533 = vmatprep.mubr.msk.bf16.mxu1 %vm6407_vm2, %v9101_v47 }
 0x6c0   : > { %v6148_v34 = vpop.eup %6147  ;;  %6157 = vpow2.f32 %v2862_v10  ;;  %5631 = vmatprep.subr.bf16.mxu1 %v9101_v47 }
 0x6c1   : > { %6159 = vrcp.f32 %v2277_v26  ;;  %v2018_v57 = vmul.f32 %v6148_v34, %v7505_v59 }
 0x6c2   : > { %v2280_v38 = vpop.xlane.xlu1 %2279  ;;  %v2834_v58 = vpop.xlane.xlu0 %2833 }
 0x6c3   : > { %6161 = vrcp.f32 %v2280_v38  ;;  %v2851_v32 = vsub.f32 %v7536_v25, %v2834_v58  ;;  %v2023_v51 = vpack.c.bf16 %v2018_v57, %v2017_v40  ;;  %v9111_v40 = vld [vmem:[#allocation12_spill] sm:$0xff] }
 0x6c4   : > { %v7725_v37 = vpop.eup %6149 }
 0x6c5   : > { %v6152_v42 = vpop.eup %6151  ;;  %v2864_v35 = vmul.f32 1.442695, %v2851_v32  ;;  %v2874_v31 = vsel %vm1336_vm6, %v7725_v37, 0.0 }
 0x6c6   : > { %5534 = vmatmul.mubr.msk.bf16.gmra.mxu1 %vm1336_vm6, %v2023_v51  ;;  %v2283_v18 = vpop.xlane.xlu0 %2282  ;;  %v2837_v2 = vpop.xlane.xlu1 %2836  ;;  %2875 = vadd.xlane.f32.xlu1 %v2874_v31  ;;  %v2019_v25 = vmul.f32 %v6152_v42, %v7515_v43  ;;  %v9112_v51 = vld [vmem:[#allocation10_spill] sm:$0xff] }
 0x6c7   : > { %6163 = vpow2.f32 %v2864_v35  ;;  %v2852_v19 = vsub.f32 %v7544_v41, %v2837_v2  ;;  %5537 = vmatprep.mubr.msk.bf16.mxu1 %vm6407_vm2, %v9101_v47  ;;  %v9113_v42 = vmul.bf16 %v9112_v51, %v6858_v12 }
 0x6c8   : > { %v7733_v59 = vpop.eup %6153  ;;  %6165 = vrcp.f32 %v2283_v18  ;;  %v2024_v41 = vpack.c.bf16 %v2019_v25, %v2019_v25 }
 0x6c9   : > { %v2866_v61 = vmul.f32 1.442695, %v2852_v19  ;;  %v2877_v27 = vsel %vm1336_vm6, %v7733_v59, 0.0 }
 0x6ca   : > { %v2286_v39 = vpop.xlane.xlu1 %2285  ;;  %2878 = vadd.xlane.f32.xlu0 %v2877_v27  ;;  %v2840_v24 = vpop.xlane.xlu0 %2839 }
 0x6cb   : > { %6167 = vpow2.f32 %v2866_v61  ;;  %v2853_v3 = vsub.f32 %v7554_v60, %v2840_v24 }
 0x6cc   : > { %v7739_v22 = vpop.eup %6155  ;;  %6169 = vrcp.f32 %v2286_v39 }
 0x6cd   : > { %v7741_v21 = vpop.eup %6157  ;;  %v2868_v36 = vmul.f32 1.442695, %v2853_v3  ;;  %v2880_v43 = vsel %vm1336_vm6, %v7739_v22, 0.0  ;;  %v9115_v3 = vmul.bf16 %v9112_v51, %v6832_v54 }
 0x6ce   : > { %v6160_v13 = vpop.eup %6159  ;;  %5538 = vmatmul.mubr.msk.bf16.gmra.mxu1 %vm1336_vm6, %v2024_v41  ;;  %v2883_v17 = vsel %vm1336_vm6, %v7741_v21, 0.0  ;;  %2881 = vadd.xlane.f32.xlu1 %v2880_v43  ;;  %v2289_v8 = vpop.xlane.xlu0 %2288 }
 0x6cf   : > { %6171 = vpow2.f32 %v2868_v36  ;;  %2884 = vadd.xlane.f32.xlu0 %v2883_v17  ;;  %v2843_v60 = vpop.xlane.xlu1 %2842  ;;  %5581 = vmatprep.mubr.msk.bf16.mxu1 %vm6407_vm2, %v9101_v47  ;;  %v2311_v50 = vmul.f32 %v6160_v13, %v7533_v30 }
 0x6d0   : > { %v6162_v16 = vpop.eup %6161  ;;  %v2854_v9 = vsub.f32 %v7568_v5, %v2843_v60  ;;  %6173 = vrcp.f32 %v2289_v8  ;;  %v9116_v60 = vmul.bf16 %v9112_v51, %v6816_v29 }
 0x6d1   : > { %v2312_v48 = vmul.f32 %v6162_v16, %v7541_v49 }
 0x6d2   : > { %v2870_v10 = vmul.f32 1.442695, %v2854_v9 }
 0x6d3   : > { %v2320_v11 = vpack.c.bf16 %v2312_v48, %v2311_v50  ;;  %v2292_v55 = vpop.xlane.xlu1 %2291 }
 0x6d4   : > { %v7753_v26 = vpop.eup %6163  ;;  %6175 = vpow2.f32 %v2870_v10 }
 0x6d5   : > { %6177 = vrcp.f32 %v2292_v55  ;;  %v2886_v33 = vsel %vm1336_vm6, %v7753_v26, 0.0  ;;  %v6166_v5 = vpop.eup %6165 }
 0x6d6   : > { %5582 = vmatmul.mubr.msk.bf16.vlgmr.msra.gmra.mxu1 %vm1336_vm6, %v2320_v11  ;;  %v2295_v34 = vpop.xlane.xlu0 %2294  ;;  %2887 = vadd.xlane.f32.xlu1 %v2886_v33  ;;  %v2313_v58 = vmul.f32 %v6166_v5, %v7551_v15  ;;  %v9114_v15 = vmul.bf16 %v9112_v51, %v6846_v63 }
 0x6d7   : > { %5632 = vmatpush3.bf16.msra.mxu1 %v9111_v40  ;;  %5585 = vmatprep.mubr.msk.bf16.mxu1 %vm6407_vm2, %v9101_v47  ;;  %6179 = vrcp.f32 %v2295_v34 }
 0x6d8   : > { %v7761_v30 = vpop.eup %6167  ;;  %5633 = vmatprep.subr.bf16.mxu1 %v9101_v47 }
 0x6d9   : > { %v6170_v49 = vpop.eup %6169  ;;  %v2889_v57 = vsel %vm1336_vm6, %v7761_v30, 0.0 }
 0x6da   : > { %2890 = vadd.xlane.f32.xlu0 %v2889_v57  ;;  %v2298_v38 = vpop.xlane.xlu1 %2297  ;;  %v2314_v32 = vmul.f32 %v6170_v49, %v7561_v45  ;;  %v9117_v57 = vld [vmem:[#allocation13_spill] sm:$0xff] }
 0x6db   : > { %5634 = vmatpush3.bf16.msra.mxu1 %v9113_v42  ;;  %6181 = vrcp.f32 %v2298_v38 }
 0x6dc   : > { %v7771_v35 = vpop.eup %6171  ;;  %5635 = vmatprep.subr.bf16.mxu1 %v9101_v47  ;;  %v2321_v31 = vpack.c.bf16 %v2314_v32, %v2313_v58 }
 0x6dd   : > { %v2892_v18 = vsel %vm1336_vm6, %v7771_v35, 0.0  ;;  %v6174_v19 = vpop.eup %6173 }
 0x6de   : > { %5586 = vmatmul.mubr.msk.bf16.gmra.mxu1 %vm1336_vm6, %v2321_v31  ;;  %v2301_v2 = vpop.xlane.xlu0 %2300  ;;  %2893 = vadd.xlane.f32.xlu1 %v2892_v18  ;;  %v2315_v41 = vmul.f32 %v6174_v19, %v7573_v6 }
 0x6df   : > { %5636 = vmatpush3.bf16.msra.mxu1 %v9114_v15  ;;  %v2846_v45 = vpop.xlane.xlu1 %2845  ;;  %5589 = vmatprep.mubr.msk.bf16.mxu1 %vm6407_vm2, %v9101_v47  ;;  %6183 = vrcp.f32 %v2301_v2 }
 0x6e0   : > { %v2855_v25 = vsub.f32 %v7612_v4, %v2846_v45  ;;  %5637 = vmatprep.subr.bf16.mxu1 %v9101_v47 }
 0x6e1   : > { %v7784_v61 = vpop.eup %6175 }
 0x6e2   : > { %v6178_v27 = vpop.eup %6177  ;;  %v2872_v39 = vmul.f32 1.442695, %v2855_v25  ;;  %v2895_v24 = vsel %vm1336_vm6, %v7784_v61, 0.0 }
 0x6e3   : > { %5638 = vmatpush3.bf16.msra.mxu1 %v9115_v3  ;;  %2896 = vadd.xlane.f32.xlu0 %v2895_v24  ;;  %v2316_v36 = vmul.f32 %v6178_v27, %v7581_v1 }
 0x6e4   : > { %6185 = vpow2.f32 %v2872_v39  ;;  %5639 = vmatprep.subr.bf16.mxu1 %v9101_v47  ;;  %v6180_v43 = vpop.eup %6179 }
 0x6e5   : > { %v2322_v4 = vpack.c.bf16 %v2316_v36, %v2315_v41  ;;  %v2317_v6 = vmul.f32 %v6180_v43, %v7594_v62 }
 0x6e6   : > { %v2577_v13 = vpop.xlane.xlu0 %2576 }
 0x6e7   : > { %5590 = vmatmul.mubr.msk.bf16.gmra.mxu1 %vm1336_vm6, %v2322_v4  ;;  %6187 = vrcp.f32 %v2577_v13 }
 0x6e8   : > { %v6182_v17 = vpop.eup %6181  ;;  %5640 = vmatpush3.bf16.msra.mxu1 %v9116_v60  ;;  %5593 = vmatprep.mubr.msk.bf16.mxu1 %vm6407_vm2, %v9101_v47 }
 0x6e9   : > { %v2318_v1 = vmul.f32 %v6182_v17, %v7606_v53  ;;  %5691 = vmatprep.subr.bf16.mxu1 %v9101_v47 }
 0x6ea   : > { %v2580_v16 = vpop.xlane.xlu1 %2579 }
 0x6eb   : > { %6189 = vrcp.f32 %v2580_v16  ;;  %v2323_v8 = vpack.c.bf16 %v2318_v1, %v2317_v6 }
 0x6ec   : > { %v6184_v9 = vpop.eup %6183 }
 0x6ed   : > { %v2319_v10 = vmul.f32 %v6184_v9, %v7620_v56 }
 0x6ee   : > { %v2583_v50 = vpop.xlane.xlu0 %2582 }
 0x6ef   : > { %5594 = vmatmul.mubr.msk.bf16.gmra.mxu1 %vm1336_vm6, %v2323_v8  ;;  %6191 = vrcp.f32 %v2583_v50  ;;  %v2324_v11 = vpack.c.bf16 %v2319_v10, %v2319_v10 }
 0x6f0   : > { %5597 = vmatprep.mubr.msk.bf16.mxu1 %vm6407_vm2, %v9101_v47 }
 0x6f1   : > { %v7806_v48 = vpop.eup %6185 }
 0x6f2   : > { %v2898_v62 = vsel %vm1361_vm7, %v7806_v48, 0.0  ;;  %v2586_v53 = vpop.xlane.xlu1 %2585 }
 0x6f3   : > { %2899 = vadd.xlane.f32.xlu1 %v2898_v62  ;;  %6193 = vrcp.f32 %v2586_v53  ;;  %v5925_v62 = vld [vmem:[%s6554_s19 + $0x38] sm:$0xff]  }
 0x6f4   : > { %v6188_v55 = vpop.eup %6187  ;;  %5722 = vmatpush3.bf16.msra.mxu0 %v5925_v62 }
 0x6f5   : > { %v2611_v34 = vmul.f32 %v6188_v55, %v7637_v0  ;;  %v9118_v0 = vld [vmem:[#allocation11_spill] sm:$0xff]  ;;  %v5926_v55 = vld [vmem:[%s6554_s19 + $0x30] sm:$0xff]   ;;  %5723 = vmatprep.subr.bf16.mxu0 %v9101_v47 }
 0x6f6   : > { %v9120_v31 = vmul.bf16 %v9118_v0, %v6846_v63  ;;  %v9122_v63 = vmul.bf16 %v9118_v0, %v6816_v29 }
 0x6f7   : > { %5598 = vmatmul.mubr.msk.bf16.gmra.mxu1 %vm1336_vm6, %v2324_v11 }
 0x6f8   : > { %v6190_v33 = vpop.eup %6189  ;;  %5641 = vmatprep.mubr.msk.bf16.mxu1 %vm6407_vm2, %v9101_v47  ;;  %5724 = vmatpush3.bf16.msra.mxu0 %v5926_v55 }
 0x6f9   : > { %v2612_v5 = vmul.f32 %v6190_v33, %v7644_v7  ;;  %v9119_v7 = vmul.bf16 %v9118_v0, %v6858_v12  ;;  %5725 = vmatprep.subr.bf16.mxu0 %v9101_v47 }
 0x6fb   : > { %v2620_v40 = vpack.c.bf16 %v2612_v5, %v2611_v34 }
 0x6fc   : > { %v6192_v56 = vpop.eup %6191 }
 0x6fd   : > { %v2613_v38 = vmul.f32 %v6192_v56, %v7649_v14 }
 0x6ff   : > { %5642 = vmatmul.mubr.msk.bf16.vlgmr.msra.gmra.mxu1 %vm1336_vm6, %v2620_v40 }
 0x700   : > { %v6194_v49 = vpop.eup %6193  ;;  %5692 = vmatpush3.bf16.msra.mxu1 %v9117_v57  ;;  %5645 = vmatprep.mubr.msk.bf16.mxu1 %vm6407_vm2, %v9101_v47 }
 0x701   : > { %5693 = vmatprep.subr.bf16.mxu1 %v9101_v47  ;;  %v2614_v58 = vmul.f32 %v6194_v49, %v7656_v20  ;;  %v9121_v20 = vmul.bf16 %v9118_v0, %v6832_v54 }
 0x703   : > { %v2621_v32 = vpack.c.bf16 %v2614_v58, %v2613_v38 }
 0x704   : > { %5694 = vmatpush3.bf16.msra.mxu1 %v9119_v7 }
 0x705   : > { %v7826_v51 = vpop.f32.mrf.mxu1  ;;  %5695 = vmatprep.subr.bf16.mxu1 %v9101_v47 }
 0x707   : > { %5646 = vmatmul.mubr.msk.bf16.gmra.mxu1 %vm1336_vm6, %v2621_v32  ;;  %v5463_v42 = vpop.f32.mrf.mxu1 }
 0x708   : > { %5696 = vmatpush3.bf16.msra.mxu1 %v9120_v31  ;;  %5649 = vmatprep.mubr.msk.bf16.mxu1 %vm6407_vm2, %v9101_v47 }
 0x709   : > { %v7835_v14 = vpop.f32.mrf.mxu1  ;;  %5697 = vmatprep.subr.bf16.mxu1 %v9101_v47 }
 0x70b   : > { %v5464_v12 = vpop.f32.mrf.mxu1 }
 0x70c   : > { %5698 = vmatpush3.bf16.msra.mxu1 %v9121_v20 }
 0x70d   : > { %v7841_v18 = vpop.f32.mrf.mxu1  ;;  %5699 = vmatprep.subr.bf16.mxu1 %v9101_v47 }
 0x70f   : > { %v5467_v2 = vpop.f32.mrf.mxu1 }
 0x710   : > { %5700 = vmatpush3.bf16.msra.mxu1 %v9122_v63 }
 0x711   : > { %v7847_v15 = vpop.f32.mrf.mxu1 }
 0x713   : > { %v5468_v45 = vpop.f32.mrf.mxu1 }
 0x715   : > { %v7849_v19 = vpop.f32.mrf.mxu1 }
 0x717   : > { %v5471_v25 = vpop.f32.mrf.mxu1 }
 0x719   : > { %v7851_v27 = vpop.f32.mrf.mxu1 }
 0x71b   : > { %v5472_v39 = vpop.f32.mrf.mxu1 }
 0x71d   : > { %v7853_v54 = vpop.f32.mrf.mxu1 }
 0x71f   : > { %v5475_v24 = vpop.f32.mrf.mxu1 }
 0x721   : > { %v7855_v3 = vpop.f32.mrf.mxu1 }
 0x723   : > { %v5476_v41 = vpop.f32.mrf.mxu1 }
 0x725   : > { %v7857_v36 = vpop.f32.mrf.mxu1 }
 0x727   : > { %v5479_v4 = vpop.f32.mrf.mxu1 }
 0x729   : > { %v1826_v29 = vpop.f32.mrf.mxu1 }
 0x72b   : > { %v5480_v43 = vpop.f32.mrf.mxu1 }
 0x737   : > { %v2589_v13 = vpop.xlane.xlu0 %2588 }
 0x738   : > { %6195 = vrcp.f32 %v2589_v13 }
 0x73b   : > { %v2592_v17 = vpop.xlane.xlu1 %2591 }
 0x73c   : > { %6197 = vrcp.f32 %v2592_v17 }
 0x73f   : > { %v2595_v60 = vpop.xlane.xlu0 %2594 }
 0x740   : > { %6199 = vrcp.f32 %v2595_v60 }
 0x743   : > { %v2598_v6 = vpop.xlane.xlu1 %2597 }
 0x744   : > { %6201 = vrcp.f32 %v2598_v6  ;;  %v9125_v6 = vld [vmem:[#allocation16_spill] sm:$0xff] }
 0x745   : > { %v6196_v1 = vpop.eup %6195 }
 0x746   : > { %v2615_v9 = vmul.f32 %v6196_v1, %v7667_v44  ;;  %v1800_v1 = vadd.f32 %v7841_v18, %v9125_v6 }
 0x747   : > { %v2601_v16 = vpop.xlane.xlu0 %2600 }
 0x748   : > { %6203 = vrcp.f32 %v2601_v16 }
 0x749   : > { %v6198_v8 = vpop.eup %6197 }
 0x74a   : > { %v2616_v50 = vmul.f32 %v6198_v8, %v7676_v46 }
 0x74c   : > { %v2622_v10 = vpack.c.bf16 %v2616_v50, %v2615_v9  ;;  %v9126_v50 = vld [vmem:[#allocation17_spill] sm:$0xff] }
 0x74d   : > { %v6200_v53 = vpop.eup %6199 }
 0x74e   : > { %5650 = vmatmul.mubr.msk.bf16.gmra.mxu1 %vm1336_vm6, %v2622_v10  ;;  %v2617_v34 = vmul.f32 %v6200_v53, %v7687_v23  ;;  %v1803_v10 = vadd.f32 %v7847_v15, %v9126_v50  ;;  %v9128_v15 = vld [vmem:[#allocation19_spill] sm:$0xff] }
 0x74f   : > { %v2876_v11 = vpop.xlane.xlu1 %2875  ;;  %5653 = vmatprep.mubr.msk.bf16.mxu1 %vm6407_vm2, %v9101_v47 }
 0x750   : > { %6205 = vrcp.f32 %v2876_v11 }
 0x751   : > { %v6202_v33 = vpop.eup %6201 }
 0x752   : > { %v2618_v44 = vmul.f32 %v6202_v33, %v7698_v28  ;;  %v9127_v33 = vld [vmem:[#allocation18_spill] sm:$0xff] }
 0x753   : > { %v2879_v46 = vpop.xlane.xlu0 %2878 }
 0x754   : > { %6207 = vrcp.f32 %v2879_v46  ;;  %v2623_v5 = vpack.c.bf16 %v2618_v44, %v2617_v34  ;;  %v1808_v34 = vadd.f32 %v7849_v19, %v9127_v33 }
 0x755   : > { %v6204_v40 = vpop.eup %6203 }
 0x756   : > { %5654 = vmatmul.mubr.msk.bf16.gmra.mxu1 %vm1336_vm6, %v2623_v5  ;;  %v2619_v57 = vmul.f32 %v6204_v40, %v7710_v52 }
 0x757   : > { %v2882_v56 = vpop.xlane.xlu1 %2881  ;;  %5657 = vmatprep.mubr.msk.bf16.mxu1 %vm6407_vm2, %v9101_v47 }
 0x758   : > { %v2885_v49 = vpop.xlane.xlu0 %2884  ;;  %6209 = vrcp.f32 %v2882_v56  ;;  %v2624_v23 = vpack.c.bf16 %v2619_v57, %v2619_v57  ;;  %v9129_v57 = vld [vmem:[#allocation20_spill] sm:$0xff] }
 0x759   : > { %6211 = vrcp.f32 %v2885_v49 }
 0x75d   : > { %v6206_v28 = vpop.eup %6205 }
 0x75e   : > { %5658 = vmatmul.mubr.msk.bf16.gmra.mxu1 %vm1336_vm6, %v2624_v23  ;;  %v2910_v32 = vmul.f32 %v6206_v28, %v7725_v37  ;;  %v9123_v37 = vld [vmem:[#allocation14_spill] sm:$0xff]  ;;  %v1816_v23 = vadd.f32 %v7853_v54, %v9129_v57 }
 0x75f   : > { %v2888_v38 = vpop.xlane.xlu1 %2887  ;;  %5701 = vmatprep.mubr.msk.bf16.mxu1 %vm6407_vm2, %v9101_v47 }
 0x760   : > { %6213 = vrcp.f32 %v2888_v38 }
 0x761   : > { %v6208_v58 = vpop.eup %6207 }
 0x762   : > { %v2911_v0 = vmul.f32 %v6208_v58, %v7733_v59  ;;  %v1792_v59 = vadd.f32 %v7826_v51, %v9123_v37  ;;  %v9130_v58 = vld [vmem:[#allocation21_spill] sm:$0xff] }
 0x763   : > { %v2891_v7 = vpop.xlane.xlu0 %2890 }
 0x764   : > { %v2919_v42 = vpack.c.bf16 %v2911_v0, %v2910_v32  ;;  %6215 = vrcp.f32 %v2891_v7  ;;  %v1819_v32 = vadd.f32 %v7855_v3, %v9130_v58 }
 0x765   : > { %v6210_v31 = vpop.eup %6209 }
 0x766   : > { %v6212_v52 = vpop.eup %6211  ;;  %5702 = vmatmul.mubr.msk.bf16.vlgmr.msra.gmra.mxu1 %vm1336_vm6, %v2919_v42  ;;  %v2912_v20 = vmul.f32 %v6210_v31, %v7739_v22  ;;  %v9124_v22 = vld [vmem:[#allocation15_spill] sm:$0xff] }
 0x767   : > { %5705 = vmatprep.mubr.msk.bf16.mxu1 %vm6407_vm2, %v9101_v47  ;;  %v2894_v12 = vpop.xlane.xlu1 %2893  ;;  %v2913_v2 = vmul.f32 %v6212_v52, %v7741_v21  ;;  %v1795_v21 = vadd.f32 %v7835_v14, %v9124_v22  ;;  %v9131_v52 = vld [vmem:[#allocation22_spill] sm:$0xff] }
 0x768   : > { %6217 = vrcp.f32 %v2894_v12  ;;  %v1824_v12 = vadd.f32 %v7857_v36, %v9131_v52  ;;  %v5928_v36 = vld [vmem:[%s6554_s19 + $0x20] sm:$0xff]  }
 0x769   : > { %v2920_v45 = vpack.c.bf16 %v2913_v2, %v2912_v20 }
 0x76c   : > { %v2897_v63 = vpop.xlane.xlu0 %2896 }
 0x76d   : > { %6219 = vrcp.f32 %v2897_v63  ;;  %v2082_v25 = vpop.f32.mrf.mxu1  ;;  %v6214_v24 = vpop.eup %6213  ;;  %v5927_v63 = vld [vmem:[%s6554_s19 + $0x28] sm:$0xff]  }
 0x76e   : > { %v7886_v39 = vadd.f32 %v2082_v25, %v1792_v59  ;;  %5706 = vmatmul.mubr.msk.bf16.gmra.mxu1 %vm1336_vm6, %v2920_v45  ;;  %v2914_v51 = vmul.f32 %v6214_v24, %v7753_v26  ;;  %v9132_v59 = vmov 0   ;;  %5726 = vmatpush3.bf16.msra.mxu0 %v5927_v63 }
 0x76f   : > { %v5523_v41 = vpop.f32.mrf.mxu1  ;;  %5709 = vmatprep.mubr.msk.bf16.mxu1 %vm6407_vm2, %v9101_v47  ;;  %5727 = vmatprep.subr.bf16.mxu0 %v9101_v47 }
 0x771   : > { %v6216_v4 = vpop.eup %6215  ;;  %v2085_v29 = vpop.f32.mrf.mxu1 }
 0x772   : > { %v2121_v43 = vadd.f32 %v2085_v29, %v1795_v21  ;;  %v2915_v13 = vmul.f32 %v6216_v4, %v7761_v30  ;;  %5728 = vmatpush3.bf16.msra.mxu0 %v5928_v36  ;;  %v5929_v4 = vld [vmem:[%s6554_s19 + $0x18] sm:$0xff]  }
 0x773   : > { %v5524_v17 = vpop.f32.mrf.mxu1  ;;  %5729 = vmatprep.subr.bf16.mxu0 %v9101_v47 }
 0x774   : > { %v2921_v60 = vpack.c.bf16 %v2915_v13, %v2914_v51  ;;  %v5930_v17 = vld [vmem:[%s6554_s19 + $0x10] sm:$0xff]  }
 0x775   : > { %v6218_v14 = vpop.eup %6217 }
 0x776   : > { %v2090_v16 = vpop.f32.mrf.mxu1  ;;  %5710 = vmatmul.mubr.msk.bf16.gmra.mxu1 %vm1336_vm6, %v2921_v60  ;;  %v2916_v53 = vmul.f32 %v6218_v14, %v7771_v35  ;;  %v1811_v35 = vadd.f32 %v7851_v27, %v9128_v15  ;;  %5730 = vmatpush3.bf16.msra.mxu0 %v5929_v4 }
 0x777   : > { %v2122_v8 = vadd.f32 %v2090_v16, %v1800_v1  ;;  %5713 = vmatprep.mubr.msk.bf16.mxu1 %vm6407_vm2, %v9101_v47  ;;  %5731 = vmatprep.subr.bf16.mxu0 %v9101_v47  ;;  %v5931_v16 = vld [vmem:[%s6554_s19 + $0x8] sm:$0xff]  }
 0x778   : > { %v5527_v9 = vpop.f32.mrf.mxu1 }
 0x77a   : > { %v6220_v26 = vpop.eup %6219  ;;  %v2093_v62 = vpop.f32.mrf.mxu1  ;;  %5732 = vmatpush3.bf16.msra.mxu0 %v5930_v17 }
 0x77b   : > { %v2123_v30 = vadd.f32 %v2093_v62, %v1803_v10  ;;  %v2917_v11 = vmul.f32 %v6220_v26, %v7784_v61  ;;  %5733 = vmatprep.subr.bf16.mxu0 %v9101_v47  ;;  %v5932_v10 = vld [vmem:[%s6554_s19] sm:$0xff]  }
 0x77c   : > { %v5528_v18 = vpop.f32.mrf.mxu1  ;;  %v2900_v55 = vpop.xlane.xlu1 %2899 }
 0x77d   : > { %6221 = vrcp.f32 %v2900_v55  ;;  %v2922_v44 = vpack.c.bf16 %v2917_v11, %v2916_v53 }
 0x77e   : > { %v2098_v46 = vpop.f32.mrf.mxu1  ;;  %5734 = vmatpush3.bf16.msra.mxu0 %v5931_v16 }
 0x77f   : > { %v2124_v5 = vadd.f32 %v2098_v46, %v1808_v34  ;;  %5714 = vmatmul.mubr.msk.bf16.gmra.mxu1 %vm1336_vm6, %v2922_v44  ;;  %5735 = vmatprep.subr.bf16.mxu0 %v9101_v47 }
 0x780   : > { %v5531_v40 = vpop.f32.mrf.mxu1  ;;  %5717 = vmatprep.mubr.msk.bf16.mxu1 %vm6407_vm2, %v9101_v47 }
 0x782   : > { %v2101_v56 = vpop.f32.mrf.mxu1  ;;  %5736 = vmatpush3.bf16.msra.mxu0 %v5932_v10 }
 0x783   : > { %v2125_v61 = vadd.f32 %v2101_v56, %v1811_v35  ;;  %5757 = vmatprep.subr.bf16.mxu0 %v9101_v47 }
 0x784   : > { %v5532_v49 = vpop.f32.mrf.mxu1 }
 0x786   : > { %v2106_v19 = vpop.f32.mrf.mxu1 }
 0x787   : > { %v2126_v28 = vadd.f32 %v2106_v19, %v1816_v23 }
 0x788   : > { %v5535_v38 = vpop.f32.mrf.mxu1 }
 0x78a   : > { %v6222_v0 = vpop.eup %6221  ;;  %v2109_v7 = vpop.f32.mrf.mxu1 }
 0x78b   : > { %v2127_v42 = vadd.f32 %v2109_v7, %v1819_v32  ;;  %v2918_v31 = vmul.f32 %v6222_v0, %v7806_v48 }
 0x78c   : > { %v5536_v27 = vpop.f32.mrf.mxu1 }
 0x78d   : > { %v2923_v20 = vpack.c.bf16 %v2918_v31, %v2918_v31 }
 0x78e   : > { %v2114_v2 = vpop.f32.mrf.mxu1 }
 0x78f   : > { %v2128_v54 = vadd.f32 %v2114_v2, %v1824_v12  ;;  %5718 = vmatmul.mubr.msk.bf16.gmra.mxu1 %vm1336_vm6, %v2923_v20 }
 0x790   : > { %v5539_v37 = vpop.f32.mrf.mxu1  ;;  %3541 = vmatprep.mubr.bf16.mxu1 %v9132_v59 }
 0x792   : > { %v2117_v3 = vpop.f32.mrf.mxu1 }
 0x794   : > { %v5540_v45 = vpop.f32.mrf.mxu1 }
 0x796   : > { %v2382_v25 = vpop.f32.mrf.mxu1 }
 0x797   : > { %v2420_v48 = vadd.f32 %v2382_v25, %v7886_v39 }
 0x798   : > { %v5583_v24 = vpop.f32.mrf.mxu1 }
 0x79a   : > { %v2385_v41 = vpop.f32.mrf.mxu1 }
 0x79b   : > { %v2421_v22 = vadd.f32 %v2385_v41, %v2121_v43 }
 0x79c   : > { %v5584_v21 = vpop.f32.mrf.mxu1 }
 0x79e   : > { %v2390_v29 = vpop.f32.mrf.mxu1 }
 0x79f   : > { %v2422_v51 = vadd.f32 %v2390_v29, %v2122_v8 }
 0x7a0   : > { %v5587_v13 = vpop.f32.mrf.mxu1 }
 0x7a2   : > { %v2393_v60 = vpop.f32.mrf.mxu1 }
 0x7a3   : > { %v2423_v39 = vadd.f32 %v2393_v60, %v2123_v30 }
 0x7a4   : > { %v5588_v6 = vpop.f32.mrf.mxu1 }
 0x7a7   : > { %v2398_v1 = vpop.f32.mrf.mxu1 }
 0x7a8   : > { %v7930_v14 = vadd.f32 %v2398_v1, %v2124_v5 }
 0x7a9   : > { %v5591_v43 = vpop.f32.mrf.mxu1 }
 0x7ab   : > { %v2401_v8 = vpop.f32.mrf.mxu1 }
 0x7ac   : > { %v2425_v9 = vadd.f32 %v2401_v8, %v2125_v61 }
 0x7ad   : > { %v5592_v50 = vpop.f32.mrf.mxu1 }
 0x7af   : > { %v2406_v26 = vpop.f32.mrf.mxu1 }
 0x7b0   : > { %v7934_v62 = vadd.f32 %v2406_v26, %v2126_v28 }
 0x7b1   : > { %v5595_v30 = vpop.f32.mrf.mxu1 }
 0x7b3   : > { %v2409_v53 = vpop.f32.mrf.mxu1 }
 0x7b4   : > { %v7937_v11 = vadd.f32 %v2409_v53, %v2127_v42 }
 0x7b5   : > { %v5596_v18 = vpop.f32.mrf.mxu1 }
 0x7b7   : > { %v2414_v55 = vpop.f32.mrf.mxu1 }
 0x7b8   : > { %v7939_v33 = vadd.f32 %v2414_v55, %v2128_v54 }
 0x7b9   : > { %v5599_v34 = vpop.f32.mrf.mxu1 }
 0x7bb   : > { %v2417_v44 = vpop.f32.mrf.mxu1 }
 0x7bd   : > { %v5600_v46 = vpop.f32.mrf.mxu1 }
 0x7bf   : > { %v2682_v5 = vpop.f32.mrf.mxu1 }
 0x7c0   : > { %v2720_v40 = vadd.f32 %v2682_v5, %v2420_v48 }
 0x7c1   : > { %v5643_v15 = vpop.f32.mrf.mxu1 }
 0x7c2   : > { %v5023_v15 = vld [vmem:[%s9133_s11] ss:$0 sm:$0xff] }
 0x7c3   : > { %v2685_v35 = vpop.f32.mrf.mxu1 }
 0x7c4   : > { %v2721_v56 = vadd.f32 %v2685_v35, %v2421_v22 }
 0x7c5   : > { %v5644_v61 = vpop.f32.mrf.mxu1 }
 0x7c6   : > { %v6349_v61 = vld [vmem:[%s6592_s3] sm:$0xff] }
 0x7c7   : > { %v2690_v49 = vpop.f32.mrf.mxu1 }
 0x7c8   : > { %v2722_v57 = vadd.f32 %v2690_v49, %v2422_v51 }
 0x7c9   : > { %v5647_v23 = vpop.f32.mrf.mxu1 }
 0x7cb   : > { %v2693_v19 = vpop.f32.mrf.mxu1 }
 0x7cc   : > { %v2723_v28 = vadd.f32 %v2693_v19, %v2423_v39 }
 0x7cd   : > { %v5648_v38 = vpop.f32.mrf.mxu1 }
 0x80e   : > { %v2698_v58 = vpop.f32.mrf.mxu1 }
 0x80f   : > { %v2724_v60 = vadd.f32 %v2698_v58, %v7930_v14 }
 0x810   : > { %v5651_v32 = vpop.f32.mrf.mxu1 }
 0x812   : > { %v2701_v0 = vpop.f32.mrf.mxu1 }
 0x813   : > { %v2725_v39 = vadd.f32 %v2701_v0, %v2425_v9 }
 0x814   : > { %v5652_v7 = vpop.f32.mrf.mxu1 }
 0x815   : > { %v6351_v7 = vld [vmem:[%s6592_s3 + $0x10] sm:$0xff] }
 0x816   : > { %v2706_v42 = vpop.f32.mrf.mxu1 }
 0x817   : > { %v2726_v26 = vadd.f32 %v2706_v42, %v7934_v62 }
 0x818   : > { %v5655_v31 = vpop.f32.mrf.mxu1 }
 0x81a   : > { %v2709_v27 = vpop.f32.mrf.mxu1 }
 0x81b   : > { %v2727_v30 = vadd.f32 %v2709_v27, %v7937_v11 }
 0x81c   : > { %v5656_v52 = vpop.f32.mrf.mxu1 }
 0x81e   : > { %v2714_v12 = vpop.f32.mrf.mxu1 }
 0x81f   : > { %v2728_v34 = vadd.f32 %v2714_v12, %v7939_v33  ;;  %v6352_v12 = vld [vmem:[%s6592_s3 + $0x18] sm:$0xff] }
 0x820   : > { %v5659_v20 = vpop.f32.mrf.mxu1 }
 0x822   : > { %v2717_v2 = vpop.f32.mrf.mxu1 }
 0x824   : > { %v5660_v54 = vpop.f32.mrf.mxu1 }
 0x826   : > { %v2981_v37 = vpop.f32.mrf.mxu1 }
 0x827   : > { %v3019_v45 = vadd.f32 %v2981_v37, %v2720_v40 }
 0x828   : > { %v5703_v3 = vpop.f32.mrf.mxu1 }
 0x829   : > { %v6353_v3 = vld [vmem:[%s6592_s3 + $0x20] sm:$0xff] }
 0x82a   : > { %v2984_v63 = vpop.f32.mrf.mxu1 }
 0x82b   : > { %v3020_v25 = vadd.f32 %v2984_v63, %v2721_v56 }
 0x82c   : > { %v5704_v48 = vpop.f32.mrf.mxu1 }
 0x82d   : > { %v3028_v36 = vpack.c.bf16 %v3020_v25, %v3019_v45 }
 0x82e   : > { %v2989_v24 = vpop.f32.mrf.mxu1 }
 0x82f   : > { %5738 = vmatmul.mubr.bf16.vlgmr.msra.gmra.mxu0 %v3028_v36  ;;  %v3021_v21 = vadd.f32 %v2989_v24, %v2722_v57  ;;  %v6354_v36 = vld [vmem:[%s6592_s3 + $0x28] sm:$0xff] }
 0x830   : > { %v5707_v41 = vpop.f32.mrf.mxu1  ;;  %5741 = vmatprep.mubr.msk.bf16.mxu0 %vm6407_vm2, %v9101_v47 }
 0x832   : > { %v2992_v22 = vpop.f32.mrf.mxu1 }
 0x833   : > { %v3022_v4 = vadd.f32 %v2992_v22, %v2723_v28  ;;  %v6350_v28 = vld [vmem:[%s6592_s3 + $0x8] sm:$0xff] }
 0x834   : > { %v5708_v29 = vpop.f32.mrf.mxu1 }
 0x835   : > { %v3029_v51 = vpack.c.bf16 %v3022_v4, %v3021_v21  ;;  %v6355_v4 = vld [vmem:[%s6592_s3 + $0x30] sm:$0xff] }
 0x836   : > { %v2997_v13 = vpop.f32.mrf.mxu1 }
 0x837   : > { %5742 = vmatmul.mubr.bf16.gmra.mxu0 %v3029_v51  ;;  %v3023_v1 = vadd.f32 %v2997_v13, %v2724_v60  ;;  %v6356_v60 = vld [vmem:[%s6592_s3 + $0x38] sm:$0xff] }
 0x838   : > { %v5711_v17 = vpop.f32.mrf.mxu1  ;;  %5745 = vmatprep.mubr.msk.bf16.mxu0 %vm6407_vm2, %v9101_v47 }
 0x83a   : > { %v3000_v6 = vpop.f32.mrf.mxu1 }
 0x83b   : > { %v3024_v16 = vadd.f32 %v3000_v6, %v2725_v39 }
 0x83c   : > { %v5712_v43 = vpop.f32.mrf.mxu1 }
 0x83d   : > { %v3030_v8 = vpack.c.bf16 %v3024_v16, %v3023_v1  ;;  %v6357_v43 = vld [vmem:[%s6592_s3 + $0x40] sm:$0x3] }
 0x83f   : > { %v3005_v50 = vpop.f32.mrf.mxu1  ;;  %5746 = vmatmul.mubr.bf16.gmra.mxu0 %v3030_v8 }
 0x840   : > { %5749 = vmatprep.mubr.msk.bf16.mxu0 %vm6407_vm2, %v9101_v47  ;;  %v3025_v18 = vadd.f32 %v3005_v50, %v2726_v26 }
 0x841   : > { %v5715_v10 = vpop.f32.mrf.mxu1 }
 0x843   : > { %v3008_v53 = vpop.f32.mrf.mxu1 }
 0x844   : > { %v3026_v14 = vadd.f32 %v3008_v53, %v2727_v30  ;;  %v5933_v30 = vld [vmem:[%s6577_s6 + $0xa8] ss:$12 sps:$4 sm:$0xff]   ;;  %v5935_v53 = vld [vmem:[%s6577_s6 + $0xac] ss:$12 sps:$4 sm:$0xff]  }
 0x845   : > { %v5716_v9 = vpop.f32.mrf.mxu1  ;;  %3509 = vmatprep.subr.bf16.mxu1 %v5935_v53  ;;  %v5955_v53 = vld [vmem:[%s6577_s6 + $0x50] ss:$12 sps:$4 sm:$0xff]  }
 0x846   : > { %v3031_v55 = vpack.c.bf16 %v3026_v14, %v3025_v18  ;;  %v5938_v18 = vld [vmem:[%s6577_s6 + $0x94] ss:$12 sps:$4 sm:$0xff]   ;;  %v5939_v14 = vld [vmem:[%s6577_s6 + $0xb0] ss:$12 sps:$4 sm:$0xff]   ;;  %3510 = vmatpush1.bf16.msra.mxu1 %v5933_v30 }
 0x847   : > { %v5936_v9 = vld [vmem:[%s6577_s6 + $0x90] ss:$12 sps:$4 sm:$0xff]   ;;  %5758 = vmatpush3.bf16.msra.mxu0 %v5939_v14  ;;  %3511 = vmatprep.subr.bf16.mxu1 %v5938_v18  ;;  %v5948_v30 = vld [vmem:[%s6577_s6 + $0x48] ss:$12 sps:$4 sm:$0xff]  }
 0x848   : > { %5750 = vmatmul.mubr.bf16.gmra.mxu0 %v3031_v55  ;;  %5759 = vmatprep.subr.bf16.mxu0 %v9101_v47  ;;  %v5954_v14 = vld [vmem:[%s6577_s6 + $0x34] ss:$12 sps:$4 sm:$0xff]  }
 0x849   : > { %5753 = vmatprep.mubr.msk.bf16.mxu0 %vm6407_vm2, %v9101_v47 }
 0x84a   : > { %3512 = vmatpush1.bf16.msra.mxu1 %v5936_v9 }
 0x84f   : > { %v3013_v44 = vpop.f32.mrf.mxu1 }
 0x850   : > { %v3027_v46 = vadd.f32 %v3013_v44, %v2728_v34 }
 0x851   : > { %v5719_v5 = vpop.f32.mrf.mxu1 }
 0x852   : > { %v3032_v62 = vpack.c.bf16 %v3027_v46, %v3027_v46 }
 0x853   : > { %v3016_v40 = vpop.f32.mrf.mxu1 }
 0x854   : > { %5754 = vmatmul.mubr.bf16.gmra.mxu0 %v3032_v62 }
 0x855   : > { %v5720_v11 = vpop.f32.mrf.mxu1  ;;  %5773 = vmatprep.mubr.msk.bf16.mxu0 %vm6407_vm2, %v9101_v47 }
 0x8ef   : > { %v3138_v35 = vpop.f32.mrf.mxu0 }
 0x8f0   : > { %v3139_v56 = vadd.f32 %v5023_v15, %v3138_v35 }
 0x8f1   : > { %v5739_v33 = vpop.f32.mrf.mxu0 }
 0x8f2   : > { %v7961_v49 = vadd.f32 %v6349_v61, %v3139_v56 }
 0x8f3   : > { %v3141_v57 = vpop.f32.mrf.mxu0 }
 0x8f4   : > { %9134 = vst [vmem:[#allocation9_spill] sm:$0xff] %v7961_v49  ;;  %v3142_v23 = vadd.f32 %v5023_v15, %v3141_v57  ;;  %3187 = vadd.xlane.f32.xlu0 %v7961_v49 }
 0x8f5   : > { %v5740_v19 = vpop.f32.mrf.mxu0 }
 0x8f6   : > { %v7965_v38 = vadd.f32 %v6350_v28, %v3142_v23 }
 0x8f7   : > { %v3146_v58 = vpop.f32.mrf.mxu0 }
 0x8f8   : > { %9135 = vst [vmem:[#allocation12_spill] sm:$0xff] %v7965_v38  ;;  %v3147_v32 = vadd.f32 %v5023_v15, %v3146_v58  ;;  %3189 = vadd.xlane.f32.xlu1 %v7965_v38 }
 0x8f9   : > { %v5743_v0 = vpop.f32.mrf.mxu0 }
 0x8fa   : > { %v7969_v42 = vadd.f32 %v6351_v7, %v3147_v32 }
 0x8fb   : > { %v3149_v31 = vpop.f32.mrf.mxu0 }
 0x8fc   : > { %9136 = vst [vmem:[#allocation10_spill] sm:$0xff] %v7969_v42  ;;  %v3150_v27 = vadd.f32 %v5023_v15, %v3149_v31  ;;  %3191 = vadd.xlane.f32.xlu0 %v7969_v42 }
 0x8fd   : > { %v5744_v52 = vpop.f32.mrf.mxu0 }
 0x8fe   : > { %v7973_v20 = vadd.f32 %v6352_v12, %v3150_v27 }
 0x8ff   : > { %v3154_v2 = vpop.f32.mrf.mxu0 }
 0x900   : > { %9137 = vst [vmem:[#allocation13_spill] sm:$0xff] %v7973_v20  ;;  %v3155_v54 = vadd.f32 %v5023_v15, %v3154_v2  ;;  %3193 = vadd.xlane.f32.xlu1 %v7973_v20 }
 0x901   : > { %v5747_v37 = vpop.f32.mrf.mxu0 }
 0x902   : > { %v7977_v63 = vadd.f32 %v6353_v3, %v3155_v54  ;;  %v5943_v3 = vld [vmem:[%s6577_s6 + $0x98] ss:$12 sps:$4 sm:$0xff]  }
 0x903   : > { %v3157_v45 = vpop.f32.mrf.mxu0  ;;  %5760 = vmatpush3.bf16.msra.mxu0 %v5943_v3 }
 0x904   : > { %9138 = vst [vmem:[#allocation11_spill] sm:$0xff] %v7977_v63  ;;  %v3158_v25 = vadd.f32 %v5023_v15, %v3157_v45  ;;  %3195 = vadd.xlane.f32.xlu0 %v7977_v63  ;;  %5761 = vmatprep.subr.bf16.mxu0 %v9101_v47 }
 0x905   : > { %v5748_v48 = vpop.f32.mrf.mxu0 }
 0x906   : > { %v7981_v24 = vadd.f32 %v6354_v36, %v3158_v25  ;;  %v5942_v36 = vld [vmem:[%s6577_s6 + $0x7c] ss:$12 sps:$4 sm:$0xff]  }
 0x907   : > { %3513 = vmatprep.subr.bf16.mxu1 %v5942_v36 }
 0x908   : > { %9139 = vst [vmem:[#allocation14_spill] sm:$0xff] %v7981_v24  ;;  %v3162_v41 = vpop.f32.mrf.mxu0  ;;  %3197 = vadd.xlane.f32.xlu1 %v7981_v24 }
 0x909   : > { %v3163_v22 = vadd.f32 %v5023_v15, %v3162_v41 }
 0x90a   : > { %v5751_v21 = vpop.f32.mrf.mxu0 }
 0x90b   : > { %v7985_v29 = vadd.f32 %v6355_v4, %v3163_v22  ;;  %v5940_v21 = vld [vmem:[%s6577_s6 + $0x78] ss:$12 sps:$4 sm:$0xff]   ;;  %v5947_v4 = vld [vmem:[%s6577_s6 + $0x80] ss:$12 sps:$4 sm:$0xff]  }
 0x90c   : > { %v3165_v51 = vpop.f32.mrf.mxu0  ;;  %3514 = vmatpush1.bf16.msra.mxu1 %v5940_v21  ;;  %5762 = vmatpush3.bf16.msra.mxu0 %v5947_v4  ;;  %v8099_v4 = vld [vmem:[%s9144_s26] ss:$0 sm:$0xff] }
 0x90d   : > { %9140 = vst [vmem:[#allocation15_spill] sm:$0xff] %v7985_v29  ;;  %v3166_v13 = vadd.f32 %v5023_v15, %v3165_v51  ;;  %3199 = vadd.xlane.f32.xlu0 %v7985_v29  ;;  %5763 = vmatprep.subr.bf16.mxu0 %v9101_v47 }
 0x90e   : > { %v5752_v17 = vpop.f32.mrf.mxu0 }
 0x90f   : > { %v7989_v39 = vadd.f32 %v6356_v60, %v3166_v13  ;;  %v5946_v17 = vld [vmem:[%s6577_s6 + $0x64] ss:$12 sps:$4 sm:$0xff]  }
 0x910   : > { %3515 = vmatprep.subr.bf16.mxu1 %v5946_v17 }
 0x911   : > { %9141 = vst [vmem:[#allocation16_spill] sm:$0xff] %v7989_v39  ;;  %3201 = vadd.xlane.f32.xlu1 %v7989_v39 }
 0x914   : > { %v3170_v6 = vpop.f32.mrf.mxu0 }
 0x915   : > { %v3171_v1 = vadd.f32 %v5023_v15, %v3170_v6 }
 0x916   : > { %v5755_v16 = vpop.f32.mrf.mxu0 }
 0x917   : > { %v7993_v8 = vadd.f32 %v6357_v43, %v3171_v1  ;;  %v5944_v1 = vld [vmem:[%s6577_s6 + $0x60] ss:$12 sps:$4 sm:$0xff]   ;;  %v5951_v43 = vld [vmem:[%s6577_s6 + $0x68] ss:$12 sps:$4 sm:$0xff]  }
 0x918   : > { %v3173_v50 = vpop.f32.mrf.mxu0  ;;  %3516 = vmatpush1.bf16.msra.mxu1 %v5944_v1  ;;  %5764 = vmatpush3.bf16.msra.mxu0 %v5951_v43 }
 0x919   : > { %9142 = vst [vmem:[#allocation17_spill] sm:$0xff] %v7993_v8  ;;  %v3203_v10 = vsel %vm769_vm0, %v7993_v8, 0.0  ;;  %5765 = vmatprep.subr.bf16.mxu0 %v9101_v47 }
 0x91a   : > { %3204 = vadd.xlane.f32.xlu0 %v3203_v10  ;;  %v5756_v26 = vpop.f32.mrf.mxu0  ;;  %v5950_v10 = vld [vmem:[%s6577_s6 + $0x4c] ss:$12 sps:$4 sm:$0xff]  }
 0x91b   : > { %3517 = vmatprep.subr.bf16.mxu1 %v5950_v10 }
 0x91c   : > { %3518 = vmatpush1.bf16.msra.mxu1 %v5948_v30  ;;  %5766 = vmatpush3.bf16.msra.mxu0 %v5955_v53 }
 0x91d   : > { %5767 = vmatprep.subr.bf16.mxu0 %v9101_v47  ;;  %3519 = vmatprep.subr.bf16.mxu1 %v5954_v14 }
 0x97d   : > { %v3188_v55 = vpop.xlane.xlu0 %3187 }
 0x97e   : > { %v3206_v34 = vmul.f32 0.010416667, %v3188_v55  ;;  %v5952_v55 = vld [vmem:[%s6577_s6 + $0x30] ss:$12 sps:$4 sm:$0xff]  }
 0x97f   : > { %3520 = vmatpush1.bf16.msra.mxu1 %v5952_v55 }
 0x980   : > { %v3215_v44 = vsub.f32 %v7961_v49, %v3206_v34  ;;  %v5956_v34 = vld [vmem:[%s6577_s6 + $0x38] ss:$12 sps:$4 sm:$0xff]  }
 0x981   : > { %v3190_v46 = vpop.xlane.xlu1 %3189  ;;  %5768 = vmatpush3.bf16.msra.mxu0 %v5956_v34  ;;  %v5975_v49 = vld [vmem:[%s6582_s1 + $0x20] sm:$0xff]  }
 0x982   : > { %v8006_v62 = vsel %vm784_vm1, %v3215_v44, 0.0  ;;  %v3207_v40 = vmul.f32 0.010416667, %v3190_v46  ;;  %5769 = vmatprep.subr.bf16.mxu0 %v9101_v47 }
 0x983   : > { %v3233_v11 = vmul.f32 %v8006_v62, %v8006_v62 }
 0x984   : > { %v3216_v15 = vsub.f32 %v7965_v38, %v3207_v40  ;;  %v5959_v40 = vld [vmem:[%s6577_s6 + $0x1c] ss:$12 sps:$4 sm:$0xff]  }
 0x985   : > { %v3192_v35 = vpop.xlane.xlu0 %3191  ;;  %3242 = vadd.xlane.f32.xlu1 %v3233_v11  ;;  %v5957_v11 = vld [vmem:[%s6577_s6 + $0x18] ss:$12 sps:$4 sm:$0xff]   ;;  %3521 = vmatprep.subr.bf16.mxu1 %v5959_v40 }
 0x986   : > { %v8013_v56 = vsel %vm784_vm1, %v3216_v15, 0.0  ;;  %v3208_v33 = vmul.f32 0.010416667, %v3192_v35  ;;  %v5960_v15 = vld [vmem:[%s6577_s6 + $0x20] ss:$12 sps:$4 sm:$0xff]   ;;  %3522 = vmatpush1.bf16.msra.mxu1 %v5957_v11 }
 0x987   : > { %v3234_v61 = vmul.f32 %v8013_v56, %v8013_v56  ;;  %5770 = vmatpush3.bf16.msra.mxu0 %v5960_v15 }
 0x988   : > { %v3217_v57 = vsub.f32 %v7969_v42, %v3208_v33  ;;  %5771 = vmatprep.subr.bf16.mxu0 %v9101_v47 }
 0x989   : > { %v3194_v23 = vpop.xlane.xlu1 %3193  ;;  %3244 = vadd.xlane.f32.xlu0 %v3234_v61  ;;  %v5963_v61 = vld [vmem:[%s6577_s6 + $0x4] ss:$12 sps:$4 sm:$0xff]  }
 0x98a   : > { %v8020_v19 = vsel %vm784_vm1, %v3217_v57, 0.0  ;;  %v3209_v28 = vmul.f32 0.010416667, %v3194_v23  ;;  %v5961_v23 = vld [vmem:[%s6577_s6] ss:$12 sps:$4 sm:$0xff]   ;;  %3523 = vmatprep.subr.bf16.mxu1 %v5963_v61 }
 0x98b   : > { %v3235_v58 = vmul.f32 %v8020_v19, %v8020_v19  ;;  %3524 = vmatpush1.bf16.msra.mxu1 %v5961_v23 }
 0x98c   : > { %v3218_v32 = vsub.f32 %v7973_v20, %v3209_v28  ;;  %v5964_v28 = vld [vmem:[%s6577_s6 + $0x8] ss:$12 sps:$4 sm:$0xff]  }
 0x98d   : > { %v3196_v0 = vpop.xlane.xlu0 %3195  ;;  %3246 = vadd.xlane.f32.xlu1 %v3235_v58  ;;  %5772 = vmatpush3.bf16.msra.mxu0 %v5964_v28 }
 0x98e   : > { %v8027_v7 = vsel %vm784_vm1, %v3218_v32, 0.0  ;;  %v3210_v31 = vmul.f32 0.010416667, %v3196_v0  ;;  %5793 = vmatprep.subr.bf16.mxu0 %v9101_v47 }
 0x98f   : > { %v3236_v27 = vmul.f32 %v8027_v7, %v8027_v7 }
 0x990   : > { %v3219_v52 = vsub.f32 %v7977_v63, %v3210_v31 }
 0x991   : > { %v3198_v12 = vpop.xlane.xlu1 %3197  ;;  %3248 = vadd.xlane.f32.xlu0 %v3236_v27 }
 0x992   : > { %v8034_v2 = vsel %vm784_vm1, %v3219_v52, 0.0  ;;  %v3211_v54 = vmul.f32 0.010416667, %v3198_v12 }
 0x993   : > { %v3237_v37 = vmul.f32 %v8034_v2, %v8034_v2 }
 0x994   : > { %v3220_v45 = vsub.f32 %v7981_v24, %v3211_v54  ;;  %v5973_v24 = vld [vmem:[%s6582_s1 + $0xa8] sm:$0xff]  }
 0x995   : > { %3250 = vadd.xlane.f32.xlu1 %v3237_v37 }
 0x996   : > { %v8042_v25 = vsel %vm784_vm1, %v3220_v45, 0.0  ;;  %v3200_v48 = vpop.xlane.xlu0 %3199 }
 0x997   : > { %v3212_v41 = vmul.f32 0.010416667, %v3200_v48  ;;  %v3238_v22 = vmul.f32 %v8042_v25, %v8042_v25 }
 0x999   : > { %v3221_v51 = vsub.f32 %v7985_v29, %v3212_v41  ;;  %3252 = vadd.xlane.f32.xlu0 %v3238_v22 }
 0x99a   : > { %v3202_v13 = vpop.xlane.xlu1 %3201 }
 0x99b   : > { %v8054_v60 = vsel %vm784_vm1, %v3221_v51, 0.0  ;;  %v3213_v6 = vmul.f32 0.010416667, %v3202_v13 }
 0x99c   : > { %v3239_v16 = vmul.f32 %v8054_v60, %v8054_v60 }
 0x99d   : > { %v3222_v50 = vsub.f32 %v7989_v39, %v3213_v6 }
 0x99e   : > { %3254 = vadd.xlane.f32.xlu1 %v3239_v16 }
 0x99f   : > { %v8065_v26 = vsel %vm784_vm1, %v3222_v50, 0.0 }
 0x9a0   : > { %v3240_v18 = vmul.f32 %v8065_v26, %v8065_v26 }
 0x9a2   : > { %3256 = vadd.xlane.f32.xlu0 %v3240_v18 }
 0x9a3   : > { %v3205_v9 = vpop.xlane.xlu0 %3204 }
 0x9a4   : > { %v3214_v44 = vmul.f32 0.010416667, %v3205_v9 }
 0x9a6   : > { %v3223_v46 = vsub.f32 %v7993_v8, %v3214_v44 }
 0x9a8   : > { %v8083_v35 = vsel %vm784_vm1, %v3223_v46, 0.0 }
 0x9a9   : > { %v3241_v33 = vmul.f32 %v8083_v35, %v8083_v35 }
 0x9ab   : > { %v3258_v57 = vsel %vm769_vm0, %v3241_v33, 0.0 }
 0x9ac   : > { %3259 = vadd.xlane.f32.xlu1 %v3258_v57 }
 0xa0e   : > { %v3243_v5 = vpop.xlane.xlu1 %3242 }
 0xa0f   : > { %v3261_v58 = vmul.f32 0.010416667, %v3243_v5 }
 0xa11   : > { %v3270_v32 = vadd.f32 1e-05, %v3261_v58 }
 0xa12   : > { %v3245_v0 = vpop.xlane.xlu0 %3244 }
 0xa13   : > { %6223 = vrsqrt.f32 %v3270_v32  ;;  %v3262_v31 = vmul.f32 0.010416667, %v3245_v0 }
 0xa15   : > { %v3271_v27 = vadd.f32 1e-05, %v3262_v31 }
 0xa16   : > { %v3247_v52 = vpop.xlane.xlu1 %3246 }
 0xa17   : > { %6225 = vrsqrt.f32 %v3271_v27  ;;  %v3263_v12 = vmul.f32 0.010416667, %v3247_v52 }
 0xa19   : > { %v3272_v54 = vadd.f32 1e-05, %v3263_v12 }
 0xa1a   : > { %v3249_v37 = vpop.xlane.xlu0 %3248 }
 0xa1b   : > { %6227 = vrsqrt.f32 %v3272_v54  ;;  %v3264_v3 = vmul.f32 0.010416667, %v3249_v37 }
 0xa1d   : > { %v3273_v45 = vadd.f32 1e-05, %v3264_v3 }
 0xa1e   : > { %v3251_v48 = vpop.xlane.xlu1 %3250 }
 0xa1f   : > { %6229 = vrsqrt.f32 %v3273_v45  ;;  %v3265_v36 = vmul.f32 0.010416667, %v3251_v48 }
 0xa20   : > { %v6224_v41 = vpop.eup %6223 }
 0xa21   : > { %v3288_v22 = vmul.f32 %v6224_v41, %v8006_v62  ;;  %v3274_v21 = vadd.f32 1e-05, %v3265_v36  ;;  %v8108_v62 = vld [vmem:[%s9146_s17] ss:$0 sm:$0xff] }
 0xa22   : > { %v3253_v51 = vpop.xlane.xlu0 %3252 }
 0xa23   : > { %6231 = vrsqrt.f32 %v3274_v21  ;;  %v3266_v13 = vmul.f32 0.010416667, %v3253_v51  ;;  %v3303_v6 = vmul.f32 %v8099_v4, %v3288_v22 }
 0xa24   : > { %v6226_v17 = vpop.eup %6225 }
 0xa25   : > { %v3289_v1 = vmul.f32 %v6226_v17, %v8013_v56  ;;  %v3275_v16 = vadd.f32 1e-05, %v3266_v13  ;;  %v3318_v53 = vadd.f32 %v8108_v62, %v3303_v6  ;;  %v5965_v13 = vld [vmem:[%s6582_s1 + $0x78] sm:$0xff]  }
 0xa26   : > { %v5966_v17 = vld [vmem:[%s6582_s1 + $0x38] sm:$0xff]   ;;  %5266 = vmatprep.subr.bf16.mxu1 %v5965_v13 }
 0xa27   : > { %v3304_v43 = vmul.f32 %v8099_v4, %v3289_v1  ;;  %6233 = vrsqrt.f32 %v3275_v16  ;;  %v3255_v50 = vpop.xlane.xlu1 %3254 }
 0xa28   : > { %v6228_v10 = vpop.eup %6227  ;;  %v3267_v30 = vmul.f32 0.010416667, %v3255_v50 }
 0xa29   : > { %v3319_v18 = vadd.f32 %v8108_v62, %v3304_v43  ;;  %v3290_v14 = vmul.f32 %v6228_v10, %v8020_v19 }
 0xa2a   : > { %v3276_v56 = vadd.f32 1e-05, %v3267_v30 }
 0xa2b   : > { %v3257_v9 = vpop.xlane.xlu0 %3256  ;;  %v3327_v55 = vpack.c.bf16 %v3319_v18, %v3318_v53  ;;  %v3305_v40 = vmul.f32 %v8099_v4, %v3290_v14 }
 0xa2c   : > { %v6230_v34 = vpop.eup %6229  ;;  %6235 = vrsqrt.f32 %v3276_v56  ;;  %v3268_v44 = vmul.f32 0.010416667, %v3257_v9  ;;  %v5967_v9 = vld [vmem:[%s6582_s1 + $0x70] sm:$0xff]  }
 0xa2d   : > { %3542 = vmatmul.mubr.bf16.vlgmr.msra.gmra.mxu1 %v3327_v55  ;;  %5774 = vmatmul.mubr.bf16.vlgmr.msra.gmra.mxu0 %v3327_v55  ;;  %v3291_v46 = vmul.f32 %v6230_v34, %v8027_v7  ;;  %v3320_v33 = vadd.f32 %v8108_v62, %v3305_v40 }
 0xa2e   : > { %v3277_v11 = vadd.f32 1e-05, %v3268_v44  ;;  %3551 = vmatprep.mubr.bf16.mxu1 %v9132_v59  ;;  %5777 = vmatprep.mubr.msk.bf16.mxu0 %vm6407_vm2, %v9101_v47 }
 0xa2f   : > { %v3306_v19 = vmul.f32 %v8099_v4, %v3291_v46  ;;  %5267 = vmatpush3.bf16.msra.mxu1 %v5966_v17 }
 0xa30   : > { %v6232_v15 = vpop.eup %6231  ;;  %6237 = vrsqrt.f32 %v3277_v11  ;;  %5268 = vmatprep.subr.bf16.mxu1 %v5967_v9  ;;  %v5969_v11 = vld [vmem:[%s6582_s1 + $0xb8] sm:$0xff]  }
 0xa31   : > { %v3321_v61 = vadd.f32 %v8108_v62, %v3306_v19  ;;  %v3292_v57 = vmul.f32 %v6232_v15, %v8034_v2  ;;  %5794 = vmatpush3.bf16.msra.mxu0 %v5969_v11 }
 0xa32   : > { %5795 = vmatprep.subr.bf16.mxu0 %v9101_v47 }
 0xa33   : > { %v3328_v23 = vpack.c.bf16 %v3321_v61, %v3320_v33  ;;  %v3307_v58 = vmul.f32 %v8099_v4, %v3292_v57 }
 0xa34   : > { %v6234_v7 = vpop.eup %6233 }
 0xa35   : > { %v3260_v28 = vpop.xlane.xlu1 %3259  ;;  %3552 = vmatmul.mubr.bf16.gmra.mxu1 %v3328_v23  ;;  %5778 = vmatmul.mubr.bf16.gmra.mxu0 %v3328_v23  ;;  %v3293_v5 = vmul.f32 %v6234_v7, %v8042_v25  ;;  %v3322_v2 = vadd.f32 %v8108_v62, %v3307_v58 }
 0xa36   : > { %v3269_v32 = vmul.f32 0.010416667, %v3260_v28  ;;  %3561 = vmatprep.mubr.bf16.mxu1 %v9132_v59  ;;  %5781 = vmatprep.mubr.msk.bf16.mxu0 %vm6407_vm2, %v9101_v47 }
 0xa37   : > { %v3308_v0 = vmul.f32 %v8099_v4, %v3293_v5 }
 0xa38   : > { %v3278_v31 = vadd.f32 1e-05, %v3269_v32 }
 0xa39   : > { %v6236_v27 = vpop.eup %6235  ;;  %v3323_v52 = vadd.f32 %v8108_v62, %v3308_v0 }
 0xa3a   : > { %6239 = vrsqrt.f32 %v3278_v31  ;;  %v3294_v12 = vmul.f32 %v6236_v27, %v8054_v60 }
 0xa3b   : > { %v3329_v25 = vpack.c.bf16 %v3323_v52, %v3322_v2 }
 0xa3c   : > { %v3309_v3 = vmul.f32 %v8099_v4, %v3294_v12 }
 0xa3d   : > { %v6238_v54 = vpop.eup %6237  ;;  %3562 = vmatmul.mubr.bf16.gmra.mxu1 %v3329_v25  ;;  %5782 = vmatmul.mubr.bf16.gmra.mxu0 %v3329_v25 }
 0xa3e   : > { %3571 = vmatprep.mubr.bf16.mxu1 %v9132_v59  ;;  %5785 = vmatprep.mubr.msk.bf16.mxu0 %vm6407_vm2, %v9101_v47  ;;  %v3295_v37 = vmul.f32 %v6238_v54, %v8065_v26  ;;  %v3324_v48 = vadd.f32 %v8108_v62, %v3309_v3  ;;  %v5971_v3 = vld [vmem:[%s6582_s1 + $0xb0] sm:$0xff]  }
 0xa3f   : > { %5796 = vmatpush3.bf16.msra.mxu0 %v5971_v3 }
 0xa40   : > { %v3310_v45 = vmul.f32 %v8099_v4, %v3295_v37  ;;  %v5968_v37 = vld [vmem:[%s6582_s1 + $0x30] sm:$0xff]   ;;  %5797 = vmatprep.subr.bf16.mxu0 %v9101_v47 }
 0xa41   : > { %5269 = vmatpush3.bf16.msra.mxu1 %v5968_v37 }
 0xa42   : > { %v3325_v60 = vadd.f32 %v8108_v62, %v3310_v45 }
 0xa43   : > { %5798 = vmatpush3.bf16.msra.mxu0 %v5973_v24 }
 0xa44   : > { %v3330_v36 = vpack.c.bf16 %v3325_v60, %v3324_v48  ;;  %5799 = vmatprep.subr.bf16.mxu0 %v9101_v47 }
 0xa46   : > { %3572 = vmatmul.mubr.bf16.gmra.mxu1 %v3330_v36  ;;  %5786 = vmatmul.mubr.bf16.gmra.mxu0 %v3330_v36 }
 0xa47   : > { %v6240_v41 = vpop.eup %6239  ;;  %3581 = vmatprep.mubr.bf16.mxu1 %v9132_v59  ;;  %5789 = vmatprep.mubr.msk.bf16.mxu0 %vm6407_vm2, %v9101_v47  ;;  %v9147_v59 = vlaneseq }
 0xa48   : > { %v3296_v26 = vmul.f32 %v6240_v41, %v8083_v35  ;;  %v3364_v35 = vld [vmem:[%s6587_s30] sm:$0x7] }
 0xa49   : > { %v3367_v6 = vshrl.u32 %v9147_v59, 7 }
 0xa4a   : > { %v3311_v22 = vmul.f32 %v8099_v4, %v3296_v26 }
 0xa4b   : > { %v3368_v1 = vsub.s32 0, %v3367_v6  ;;  %v3376_v16 = vsub.s32 2, %v3367_v6  ;;  %v3372_v43 = vsub.s32 1, %v3367_v6 }
 0xa4c   : > { %v3326_v21 = vadd.f32 %v8108_v62, %v3311_v22 }
 0xa4d   : > { %v8152_v4 = vrot.slane %v3364_v35, %v3368_v1  ;;  %v8154_v62 = vrot.slane %v3364_v35, %v3376_v16  ;;  %v8156_v30 = vrot.slane %v3364_v35, %v3372_v43 }
 0xa4e   : > { %v3331_v51 = vpack.c.bf16 %v3326_v21, %v3326_v21 }
 0xa50   : > { %3582 = vmatmul.mubr.bf16.gmra.mxu1 %v3331_v51  ;;  %5790 = vmatmul.mubr.bf16.gmra.mxu0 %v3331_v51 }
 0xa51   : > { %5809 = vmatprep.mubr.msk.bf16.mxu0 %vm6407_vm2, %v9101_v47 }
 0xaed   : > { %v3543_v50 = vpop.f32.mrf.mxu1  ;;  %v3624_v10 = vpop.f32.mrf.mxu0 }
 0xaee   : > { %v8159_v53 = vadd.f32 %v3543_v50, %v8152_v4  ;;  %v8162_v18 = vadd.f32 %v3624_v10, %v8154_v62  ;;  %v5970_v10 = vld [vmem:[%s6582_s1 + $0x68] sm:$0xff]  }
 0xaef   : > { %v3545_v14 = vpop.f32.mrf.mxu1  ;;  %v5775_v56 = vpop.f32.mrf.mxu0  ;;  %5270 = vmatprep.subr.bf16.mxu1 %v5970_v10 }
 0xaf0   : > { %v8166_v55 = vmul.f32 0.70710677, %v8159_v53  ;;  %v8169_v34 = vmul.f32 0.70710677, %v8162_v18  ;;  %v8172_v44 = vadd.f32 %v3545_v14, %v8156_v30  ;;  %v5972_v14 = vld [vmem:[%s6582_s1 + $0x28] sm:$0xff]  }
 0xaf1   : > { %v3547_v46 = vpop.f32.mrf.mxu1  ;;  %v3627_v40 = vpop.f32.mrf.mxu0  ;;  %5271 = vmatpush3.bf16.msra.mxu1 %v5972_v14 }
 0xaf2   : > { %v3770_v19 = vand.u32 2147483647, %v8166_v55  ;;  %v8177_v15 = vand.u32 2147483647, %v8169_v34  ;;  %v8180_v33 = vmul.f32 0.70710677, %v8172_v44  ;;  %v8185_v28 = vadd.f32 %v3547_v46, %v8152_v4 }
 0xaf3   : > { %v3549_v61 = vpop.f32.mrf.mxu1  ;;  %v5776_v57 = vpop.f32.mrf.mxu0  ;;  %v8191_v27 = vadd.f32 %v3627_v40, %v8154_v62  ;;  %vm3716_vm0 = vcmp.lt.f32.partialorder %v8166_v55, 0.0  ;;  %vm3718_vm1 = vcmp.lt.f32.partialorder %v8169_v34, 0.0 }
 0xaf4   : > { %v3797_v23 = vmul.f32 0.3275911, %v3770_v19  ;;  %v3799_v7 = vmul.f32 0.3275911, %v8177_v15  ;;  %v8188_v31 = vand.u32 2147483647, %v8180_v33  ;;  %v8221_v16 = vadd.f32 %v3549_v61, %v8156_v30 }
 0xaf5   : > { %v3553_v5 = vpop.f32.mrf.mxu1  ;;  %v3632_v58 = vpop.f32.mrf.mxu0  ;;  %v8196_v12 = vmul.f32 0.70710677, %v8185_v28  ;;  %v8207_v60 = vmul.f32 0.70710677, %v8191_v27  ;;  %v4121_v22 = vsub.f32 0.0, %v3770_v19  ;;  %v4123_v9 = vsub.f32 0.0, %v8177_v15 }
 0xaf6   : > { %v3824_v32 = vadd.f32 1.0, %v3797_v23  ;;  %v3826_v0 = vadd.f32 1.0, %v3799_v7  ;;  %v3798_v45 = vmul.f32 0.3275911, %v8188_v31  ;;  %v8218_v6 = vadd.f32 %v3553_v5, %v8152_v4  ;;  %9148 = vst [vmem:[#allocation18_spill] sm:$0xff] %v8221_v16 }
 0xaf7   : > { %v8193_v2 = vpop.f32.mrf.mxu1  ;;  %v5779_v52 = vpop.f32.mrf.mxu0  ;;  %v3773_v48 = vand.u32 2147483647, %v8196_v12  ;;  %v3775_v21 = vand.u32 2147483647, %v8207_v60  ;;  %v8224_v35 = vadd.f32 %v3632_v58, %v8154_v62  ;;  %v4148_v56 = vmul.f32 %v4121_v22, %v3770_v19 }
 0xaf8   : > { %6241 = vrcp.f32 %v3824_v32  ;;  %v3825_v17 = vadd.f32 1.0, %v3798_v45  ;;  %v8236_v61 = vmul.f32 0.70710677, %v8218_v6  ;;  %v8239_v57 = vmul.f32 0.70710677, %v8221_v16  ;;  %v5978_v16 = vld [vmem:[%s6582_s1 + $0x18] sm:$0xff]  }
 0xaf9   : > { %6243 = vrcp.f32 %v3826_v0  ;;  %v8198_v25 = vpop.f32.mrf.mxu1  ;;  %v8200_v54 = vpop.f32.mrf.mxu0  ;;  %v3800_v26 = vmul.f32 0.3275911, %v3773_v48  ;;  %v3802_v1 = vmul.f32 0.3275911, %v3775_v21  ;;  %v8242_v23 = vmul.f32 0.70710677, %v8224_v35 }
 0xafa   : > { %v8247_v5 = vand.u32 2147483647, %v8236_v61  ;;  %v4175_v32 = vmul.f32 1.442695, %v4148_v56  ;;  %v4150_v0 = vmul.f32 %v4123_v9, %v8177_v15  ;;  %v4124_v45 = vsub.f32 0.0, %v3773_v48 }
 0xafb   : > { %v8209_v36 = vpop.f32.mrf.mxu1  ;;  %v5780_v41 = vpop.f32.mrf.mxu0  ;;  %v3827_v59 = vadd.f32 1.0, %v3800_v26  ;;  %v3829_v46 = vadd.f32 1.0, %v3802_v1  ;;  %v8253_v52 = vand.u32 2147483647, %v8242_v23  ;;  %v8265_v15 = vand.u32 2147483647, %v8239_v57 }
 0xafc   : > { %v3803_v41 = vmul.f32 0.3275911, %v8247_v5  ;;  %v4179_v9 = vmul.f32 1.442695, %v4150_v0  ;;  %v4151_v8 = vmul.f32 %v4124_v45, %v3773_v48  ;;  %v8280_v0 = vadd.f32 %v8193_v2, %v8156_v30 }
 0xafd   : > { %v8213_v51 = vpop.f32.mrf.mxu1  ;;  %v8215_v13 = vpop.f32.mrf.mxu0  ;;  %6245 = vrcp.f32 %v3827_v59  ;;  %v4126_v59 = vsub.f32 0.0, %v3775_v21  ;;  %v3665_v55 = vmul.f32 0.5, %v8185_v28  ;;  %vm3719_vm8 = vcmp.lt.f32.partialorder %v8196_v12, 0.0  ;;  %v5987_v28 = vld [vmem:[%s6582_s1 + $0x40] sm:$0xff]  }
 0xafe   : > { %6247 = vrcp.f32 %v3825_v17  ;;  %9150 = vst [vmem:[#allocation20_spill] sm:$0xff] %v8280_v0  ;;  %vm3721_vm9 = vcmp.lt.f32.partialorder %v8207_v60, 0.0  ;;  %vm3717_vm10 = vcmp.lt.f32.partialorder %v8180_v33, 0.0  ;;  %vm3720_vm11 = vcmp.lt.f32.partialorder %v8239_v57, 0.0 }
 0xaff   : > { %v8226_v43 = vpop.f32.mrf.mxu1  ;;  %v5783_v50 = vpop.f32.mrf.mxu0  ;;  %6249 = vrcp.f32 %v3829_v46  ;;  %v3805_v46 = vmul.f32 0.3275911, %v8253_v52  ;;  %vm3722_vm12 = vcmp.lt.f32.partialorder %v8236_v61, 0.0  ;;  %vm3724_vm13 = vcmp.lt.f32.partialorder %v8242_v23, 0.0 }
 0xb00   : > { %v3830_v50 = vadd.f32 1.0, %v3803_v41  ;;  %6251 = vpow2.f32 %v4175_v32  ;;  %v4153_v41 = vmul.f32 %v4126_v59, %v3775_v21  ;;  %v4181_v59 = vmul.f32 1.442695, %v4151_v8 }
 0xb01   : > { %v8231_v40 = vpop.f32.mrf.mxu1  ;;  %v8233_v11 = vpop.f32.mrf.mxu0 }
 0xb02   : > { %6253 = vrcp.f32 %v3830_v50 }
 0xb03   : > { %v8244_v19 = vpop.f32.mrf.mxu1  ;;  %v5784_v7 = vpop.f32.mrf.mxu0  ;;  %6255 = vpow2.f32 %v4179_v9 }
 0xb05   : > { %v8249_v58 = vpop.eup %6241 }
 0xb06   : > { %v8255_v37 = vpop.eup %6243  ;;  %v3878_v3 = vmul.f32 1.0614054, %v8249_v58  ;;  %v8259_v26 = vpop.f32.mrf.mxu1 }
 0xb07   : > { %v8261_v22 = vpop.f32.mrf.mxu0  ;;  %v3880_v17 = vmul.f32 1.0614054, %v8255_v37 }
 0xb08   : > { %v3905_v1 = vadd.f32 -1.4531521, %v3878_v3  ;;  %v8267_v10 = vpop.f32.mrf.mxu1 }
 0xb09   : > { %v5787_v14 = vpop.f32.mrf.mxu0  ;;  %v3907_v56 = vadd.f32 -1.4531521, %v3880_v17 }
 0xb0a   : > { %v3932_v7 = vmul.f32 %v8249_v58, %v3905_v1  ;;  %v8271_v39 = vpop.f32.mrf.mxu1  ;;  %v3801_v14 = vmul.f32 0.3275911, %v8265_v15  ;;  %v8282_v48 = vpop.eup %6245  ;;  %v3832_v1 = vadd.f32 1.0, %v3805_v46 }
 0xb0b   : > { %v8273_v29 = vpop.f32.mrf.mxu0  ;;  %v3934_v3 = vmul.f32 %v8255_v37, %v3907_v56  ;;  %v3881_v21 = vmul.f32 1.0614054, %v8282_v48  ;;  %v8290_v2 = vpop.eup %6247 }
 0xb0c   : > { %9149 = vst [vmem:[#allocation19_spill] sm:$0xff] %v8273_v29  ;;  %v3959_v32 = vadd.f32 1.4214138, %v3932_v7  ;;  %v8287_v56 = vpop.f32.mrf.mxu1  ;;  %v5976_v7 = vld [vmem:[%s6582_s1 + $0xa0] sm:$0xff]   ;;  %v3828_v63 = vadd.f32 1.0, %v3801_v14  ;;  %6257 = vrcp.f32 %v3832_v1  ;;  %v9049_v29 = vmov 1.0  }
 0xb0d   : > { %v5788_v17 = vpop.f32.mrf.mxu0  ;;  %v3961_v45 = vadd.f32 1.4214138, %v3934_v3  ;;  %9151 = vst [vmem:[#allocation21_spill] sm:$0xff] %v8287_v56  ;;  %v8293_v3 = vpop.eup %6249  ;;  %v3908_v46 = vadd.f32 -1.4531521, %v3881_v21  ;;  %5800 = vmatpush3.bf16.msra.mxu0 %v5976_v7  ;;  %6259 = vpow2.f32 %v4181_v59 }
 0xb0e   : > { %v3986_v50 = vmul.f32 %v8249_v58, %v3959_v32  ;;  %v4185_v17 = vmul.f32 1.442695, %v4153_v41  ;;  %v8296_v32 = vmul.f32 0.70710677, %v8280_v0  ;;  %v3883_v38 = vmul.f32 1.0614054, %v8293_v3  ;;  %5801 = vmatprep.subr.bf16.mxu0 %v9101_v47 }
 0xb0f   : > { %v3988_v24 = vmul.f32 %v8255_v37, %v3961_v45  ;;  %v5974_v41 = vld [vmem:[%s6582_s1 + $0x60] sm:$0xff]   ;;  %v3935_v45 = vmul.f32 %v8282_v48, %v3908_v46  ;;  %v5979_v0 = vld [vmem:[%s6582_s1 + $0x98] sm:$0xff]   ;;  %6261 = vrcp.f32 %v3828_v63 }
 0xb10   : > { %v4013_v9 = vadd.f32 -0.28449672, %v3986_v50  ;;  %v8298_v8 = vpop.f32.mrf.mxu1  ;;  %v8300_v20 = vpop.f32.mrf.mxu0  ;;  %v3910_v1 = vadd.f32 -1.4531521, %v3883_v38  ;;  %5272 = vmatprep.subr.bf16.mxu1 %v5974_v41  ;;  %6263 = vpow2.f32 %v4185_v17  ;;  %vm3723_vm6 = vcmp.lt.f32.partialorder %v8296_v32, 0.0 }
 0xb11   : > { %9152 = vst [vmem:[#allocation22_spill] sm:$0xff] %v8298_v8  ;;  %9153 = vst [vmem:[#allocation8_spill] sm:$0xff] %v8300_v20  ;;  %v4015_v42 = vadd.f32 -0.28449672, %v3988_v24  ;;  %v3879_v24 = vmul.f32 1.0614054, %v8290_v2  ;;  %5273 = vmatpush3.bf16.msra.mxu1 %v5975_v49  ;;  %5802 = vmatpush3.bf16.msra.mxu0 %v5979_v0  ;;  %v6252_v38 = vpop.eup %6251 }
 0xb12   : > { %v4040_v14 = vmul.f32 %v8249_v58, %v4013_v9  ;;  %v8307_v50 = vpop.f32.mrf.mxu1  ;;  %v5791_v21 = vpop.f32.mrf.mxu0  ;;  %v3962_v8 = vadd.f32 1.4214138, %v3935_v45  ;;  %v8314_v9 = vand.u32 2147483647, %v8296_v32  ;;  %5803 = vmatprep.subr.bf16.mxu0 %v9101_v47 }
 0xb13   : > { %9154 = vst [vmem:[#allocation23_spill] sm:$0xff] %v8307_v50  ;;  %v4042_v7 = vmul.f32 %v8255_v37, %v4015_v42  ;;  %v3937_v50 = vmul.f32 %v8293_v3, %v3910_v1  ;;  %v5977_v42 = vld [vmem:[%s6582_s1 + $0x58] sm:$0xff]   ;;  %v8323_v49 = vpop.eup %6253  ;;  %v3906_v1 = vadd.f32 -1.4531521, %v3879_v24 }
 0xb14   : > { %v4067_v20 = vadd.f32 0.2548296, %v4040_v14  ;;  %v3587_v59 = vpop.f32.mrf.mxu1  ;;  %v3659_v46 = vpop.f32.mrf.mxu0  ;;  %v3989_v41 = vmul.f32 %v8282_v48, %v3962_v8  ;;  %5274 = vmatprep.subr.bf16.mxu1 %v5977_v42  ;;  %v3804_v56 = vmul.f32 0.3275911, %v8314_v9  ;;  %v5981_v8 = vld [vmem:[%s6582_s1 + $0x10] sm:$0xff]   ;;  %v8341_v42 = vmul.f32 0.5, %v8162_v18 }
 0xb15   : > { %v4069_v21 = vadd.f32 0.2548296, %v4042_v7  ;;  %v5982_v59 = vld [vmem:[%s6582_s1 + $0x90] sm:$0xff]   ;;  %v3964_v7 = vadd.f32 1.4214138, %v3937_v50  ;;  %5275 = vmatpush3.bf16.msra.mxu1 %v5978_v16  ;;  %v5984_v16 = vld [vmem:[%s6582_s1 + $0x88] sm:$0xff]  }
 0xb16   : > { %v4094_v63 = vmul.f32 %v8249_v58, %v4067_v20  ;;  %v3588_v14 = vpop.f32.mrf.mxu1  ;;  %v5792_v45 = vpop.f32.mrf.mxu0  ;;  %v4016_v46 = vadd.f32 -0.28449672, %v3989_v41  ;;  %5804 = vmatpush3.bf16.msra.mxu0 %v5982_v59  ;;  %v5980_v58 = vld [vmem:[%s6582_s1 + $0x50] sm:$0xff]   ;;  %v3884_v24 = vmul.f32 1.0614054, %v8323_v49  ;;  %v3745_v18 = vsel %vm3718_vm1, -1.0, %v9049_v29 }
 0xb17   : > { %v4096_v0 = vmul.f32 %v8255_v37, %v4069_v21  ;;  %v3991_v20 = vmul.f32 %v8293_v3, %v3964_v7  ;;  %5805 = vmatprep.subr.bf16.mxu0 %v9101_v47  ;;  %v6256_v14 = vpop.eup %6255  ;;  %v4122_v37 = vsub.f32 0.0, %v8188_v31  ;;  %v8338_v21 = vmul.f32 0.5, %v8159_v53  ;;  %5276 = vmatprep.subr.bf16.mxu1 %v5980_v58 }
 0xb18   : > { %v4229_v17 = vmul.f32 %v6252_v38, %v4094_v63  ;;  %v4043_v50 = vmul.f32 %v8282_v48, %v4016_v46  ;;  %v3933_v45 = vmul.f32 %v8290_v2, %v3906_v1  ;;  %v3831_v7 = vadd.f32 1.0, %v3804_v56  ;;  %v5983_v46 = vld [vmem:[%s6582_s1 + $0x48] sm:$0xff]  }
 0xb19   : > { %v4231_v38 = vmul.f32 %v6256_v14, %v4096_v0  ;;  %v4018_v63 = vadd.f32 -0.28449672, %v3991_v20  ;;  %5277 = vmatpush3.bf16.msra.mxu1 %v5981_v8  ;;  %v3743_v53 = vsel %vm3716_vm0, -1.0, %v9049_v29  ;;  %v5985_v56 = vld [vmem:[%s6582_s1 + $0x8] sm:$0xff]   ;;  %v8358_v1 = vpop.eup %6257  ;;  %v4149_v20 = vmul.f32 %v4122_v37, %v8188_v31  ;;  %v5986_v8 = vld [vmem:[%s6582_s1 + $0x80] sm:$0xff]  }
 0xb1a   : > { %v4256_v41 = vsub.f32 1.0, %v4229_v17  ;;  %v4070_v59 = vadd.f32 0.2548296, %v4043_v50  ;;  %5806 = vmatpush3.bf16.msra.mxu0 %v5984_v16  ;;  %v8354_v17 = vadd.f32 %v8198_v25, %v8152_v4  ;;  %v3911_v34 = vadd.f32 -1.4531521, %v3884_v24  ;;  %5278 = vmatprep.subr.bf16.mxu1 %v5983_v46  ;;  %v6260_v14 = vpop.eup %6259  ;;  %v5988_v46 = vld [vmem:[%s6582_s1] sm:$0xff]  }
 0xb1b   : > { %v4045_v0 = vmul.f32 %v8293_v3, %v4018_v63  ;;  %5807 = vmatprep.subr.bf16.mxu0 %v9101_v47  ;;  %v4258_v50 = vsub.f32 1.0, %v4231_v38  ;;  %v3960_v31 = vadd.f32 1.4214138, %v3933_v45  ;;  %6265 = vrcp.f32 %v3831_v7 }
 0xb1c   : > { %v4097_v58 = vmul.f32 %v8282_v48, %v4070_v59  ;;  %v8366_v16 = vpop.eup %6261  ;;  %v4283_v63 = vmul.f32 %v4256_v41, %v3743_v53  ;;  %v3667_v48 = vmul.f32 0.5, %v8191_v27  ;;  %v3886_v38 = vmul.f32 1.0614054, %v8358_v1 }
 0xb1d   : > { %v4072_v25 = vadd.f32 0.2548296, %v4045_v0  ;;  %5279 = vmatpush3.bf16.msra.mxu1 %v5985_v56  ;;  %v8374_v59 = vmul.f32 0.70710677, %v8354_v17  ;;  %v6264_v0 = vpop.eup %6263  ;;  %v4177_v41 = vmul.f32 1.442695, %v4149_v20  ;;  %v3938_v53 = vmul.f32 %v8323_v49, %v3911_v34 }
 0xb1e   : > { %v4232_v37 = vmul.f32 %v6260_v14, %v4097_v58  ;;  %5808 = vmatpush3.bf16.msra.mxu0 %v5986_v8  ;;  %v3746_v45 = vsel %vm3719_vm8, -1.0, %v9049_v29  ;;  %5280 = vmatprep.subr.bf16.mxu1 %v5987_v28  ;;  %v4285_v27 = vmul.f32 %v4258_v50, %v3745_v18  ;;  %v3882_v58 = vmul.f32 1.0614054, %v8366_v16 }
 0xb1f   : > { %v4099_v24 = vmul.f32 %v8293_v3, %v4072_v25  ;;  %v3748_v3 = vsel %vm3721_vm9, -1.0, %v9049_v29  ;;  %v4310_v8 = vadd.f32 1.0, %v4283_v63  ;;  %v4127_v20 = vsub.f32 0.0, %v8247_v5 }
 0xb20   : > { %v4259_v7 = vsub.f32 1.0, %v4232_v37  ;;  %v3987_v12 = vmul.f32 %v8290_v2, %v3960_v31  ;;  %v3913_v34 = vadd.f32 -1.4531521, %v3886_v38  ;;  %v8389_v18 = vand.u32 2147483647, %v8374_v59 }
 0xb21   : > { %v4234_v56 = vmul.f32 %v6264_v0, %v4099_v24  ;;  %5281 = vmatpush3.bf16.msra.mxu1 %v5988_v46  ;;  %v4125_v50 = vsub.f32 0.0, %v8265_v15  ;;  %v3965_v37 = vadd.f32 1.4214138, %v3938_v53  ;;  %v8395_v63 = vadd.f32 %v8200_v54, %v8154_v62 }
 0xb22   : > { %v4286_v14 = vmul.f32 %v4259_v7, %v3746_v45  ;;  %5829 = vmatprep.subr.bf16.mxu1 %v9101_v47  ;;  %v4312_v28 = vadd.f32 1.0, %v4285_v27  ;;  %v3909_v46 = vadd.f32 -1.4531521, %v3882_v58  ;;  %v3806_v31 = vmul.f32 0.3275911, %v8389_v18 }
 0xb23   : > { %v4261_v25 = vsub.f32 1.0, %v4234_v56  ;;  %v8399_v38 = vmul.f32 %v4310_v8, %v8338_v21  ;;  %v4154_v45 = vmul.f32 %v4127_v20, %v8247_v5  ;;  %v4129_v7 = vsub.f32 0.0, %v8253_v52 }
 0xb24   : > { %v4313_v60 = vadd.f32 1.0, %v4286_v14  ;;  %v4014_v56 = vadd.f32 -0.28449672, %v3987_v12  ;;  %v3940_v14 = vmul.f32 %v8358_v1, %v3913_v34  ;;  %v3833_v54 = vadd.f32 1.0, %v3806_v31 }
 0xb25   : > { %v4288_v24 = vmul.f32 %v4261_v25, %v3748_v3  ;;  %9155 = vst [vmem:[#allocation24_spill] sm:$0xff] %v8399_v38  ;;  %v3992_v3 = vmul.f32 %v8323_v49, %v3965_v37  ;;  %v8410_v58 = vmul.f32 0.70710677, %v8395_v63  ;;  %v8414_v21 = vadd.f32 %v8209_v36, %v8156_v30 }
 0xb26   : > { %v8401_v0 = vmul.f32 %v4313_v60, %v3665_v55  ;;  %v4339_v5 = vmul.f32 %v4312_v28, %v8341_v42  ;;  %v3936_v8 = vmul.f32 %v8366_v16, %v3909_v46  ;;  %6267 = vrcp.f32 %v3833_v54 }
 0xb27   : > { %v4315_v53 = vadd.f32 1.0, %v4288_v24  ;;  %9157 = vst [vmem:[#allocation26_spill] sm:$0xff] %v8414_v21  ;;  %v8419_v20 = vmul.f32 0.5, %v8172_v44  ;;  %v8424_v12 = vsel %vm3717_vm10, -1.0, %v9049_v29  ;;  %6269 = vpow2.f32 %v4177_v41 }
 0xb28   : > { %9156 = vst [vmem:[#allocation25_spill] sm:$0xff] %v8401_v0  ;;  %v4187_v25 = vmul.f32 1.442695, %v4154_v45  ;;  %v8426_v34 = vpop.eup %6265  ;;  %v8431_v42 = vsel %vm3720_vm11, -1.0, %v9049_v29  ;;  %v3967_v44 = vadd.f32 1.4214138, %v3940_v14  ;;  %v4152_v60 = vmul.f32 %v4125_v50, %v8265_v15 }
 0xb29   : > { %v4342_v55 = vmul.f32 %v4315_v53, %v3667_v48  ;;  %9158 = vst [vmem:[#allocation27_spill] sm:$0xff] %v8419_v20  ;;  %v8434_v48 = vmul.f32 0.5, %v8218_v6  ;;  %v4019_v33 = vadd.f32 -0.28449672, %v3992_v3  ;;  %v8439_v41 = vand.u32 2147483647, %v8410_v58 }
 0xb2a   : > { %v4041_v37 = vmul.f32 %v8290_v2, %v4014_v56  ;;  %v3963_v28 = vadd.f32 1.4214138, %v3936_v8  ;;  %v4156_v24 = vmul.f32 %v4129_v7, %v8253_v52  ;;  %v8444_v57 = vmul.f32 0.70710677, %v8414_v21 }
 0xb2b   : > { %v4366_v36 = vpack.c.bf16 %v4342_v55, %v4339_v5  ;;  %6271 = vpow2.f32 %v4187_v25  ;;  %v3885_v6 = vmul.f32 1.0614054, %v8426_v34  ;;  %v4130_v15 = vsub.f32 0.0, %v8389_v18 }
 0xb2c   : > { %v3808_v50 = vmul.f32 0.3275911, %v8439_v41  ;;  %v3994_v46 = vmul.f32 %v8358_v1, %v3967_v44  ;;  %v4128_v52 = vsub.f32 0.0, %v8314_v9  ;;  %v8456_v31 = vadd.f32 %v8213_v51, %v8152_v4 }
 0xb2d   : > { %5810 = vmatmul.mubr.bf16.vlgmr.msra.gmra.mxu0 %v4366_v36  ;;  %v4183_v45 = vmul.f32 1.442695, %v4152_v60  ;;  %v4046_v7 = vmul.f32 %v8323_v49, %v4019_v33  ;;  %v8460_v53 = vand.u32 2147483647, %v8444_v57  ;;  %v4068_v14 = vadd.f32 0.2548296, %v4041_v37 }
 0xb2e   : > { %5813 = vmatprep.mubr.msk.bf16.mxu0 %vm6407_vm2, %v9101_v47  ;;  %v3835_v56 = vadd.f32 1.0, %v3808_v50  ;;  %v3990_v54 = vmul.f32 %v8366_v16, %v3963_v28  ;;  %v8464_v3 = vmul.f32 0.5, %v8224_v35  ;;  %v4191_v5 = vmul.f32 1.442695, %v4156_v24 }
 0xb2f   : > { %v8469_v55 = vsel %vm3722_vm12, -1.0, %v9049_v29  ;;  %v3912_v51 = vadd.f32 -1.4531521, %v3885_v6  ;;  %v4157_v8 = vmul.f32 %v4130_v15, %v8389_v18  ;;  %v8475_v25 = vsel %vm3724_vm13, -1.0, %v9049_v29 }
 0xb30   : > { %6273 = vrcp.f32 %v3835_v56  ;;  %v4021_v36 = vadd.f32 -0.28449672, %v3994_v46  ;;  %v4155_v44 = vmul.f32 %v4128_v52, %v8314_v9  ;;  %v8479_v35 = vmul.f32 0.70710677, %v8456_v31 }
 0xb31   : > { %6275 = vpow2.f32 %v4183_v45  ;;  %v4073_v60 = vadd.f32 0.2548296, %v4046_v7  ;;  %v3807_v61 = vmul.f32 0.3275911, %v8460_v53  ;;  %v8484_v33 = vadd.f32 %v8215_v13, %v8154_v62 }
 0xb32   : > { %v4095_v18 = vmul.f32 %v8290_v2, %v4068_v14  ;;  %v4017_v37 = vadd.f32 -0.28449672, %v3990_v54  ;;  %6277 = vpow2.f32 %v4191_v5  ;;  %v8488_v23 = vand.u32 2147483647, %v8479_v35 }
 0xb33   : > { %v8490_v28 = vpop.eup %6267  ;;  %v3939_v9 = vmul.f32 %v8426_v34, %v3912_v51  ;;  %v4193_v24 = vmul.f32 1.442695, %v4157_v8  ;;  %v8494_v6 = vmul.f32 0.70710677, %v8484_v33  ;;  %v8498_v15 = vadd.f32 %v8226_v43, %v8156_v30 }
 0xb34   : > { %v6270_v13 = vpop.eup %6269  ;;  %v4048_v2 = vmul.f32 %v8358_v1, %v4021_v36  ;;  %v4189_v50 = vmul.f32 1.442695, %v4155_v44  ;;  %v3887_v46 = vmul.f32 1.0614054, %v8490_v28  ;;  %v3809_v52 = vmul.f32 0.3275911, %v8488_v23 }
 0xb35   : > { %9159 = vst [vmem:[#allocation28_spill] sm:$0xff] %v8498_v15  ;;  %v4100_v45 = vmul.f32 %v8323_v49, %v4073_v60  ;;  %v4132_v7 = vsub.f32 0.0, %v8439_v41  ;;  %v3834_v56 = vadd.f32 1.0, %v3807_v61  ;;  %v8506_v14 = vand.u32 2147483647, %v8494_v6 }
 0xb36   : > { %v8508_v54 = vmul.f32 %v6270_v13, %v4095_v18  ;;  %v4044_v43 = vmul.f32 %v8366_v16, %v4017_v37  ;;  %v3914_v5 = vadd.f32 -1.4531521, %v3887_v46  ;;  %v3836_v51 = vadd.f32 1.0, %v3809_v52 }
 0xb37   : > { %v3966_v8 = vadd.f32 1.4214138, %v3939_v9  ;;  %6279 = vpow2.f32 %v4193_v24  ;;  %v3811_v36 = vmul.f32 0.3275911, %v8506_v14  ;;  %v8513_v44 = vmul.f32 0.70710677, %v8498_v15 }
 0xb38   : > { %v6272_v49 = vpop.eup %6271  ;;  %v4075_v60 = vadd.f32 0.2548296, %v4048_v2  ;;  %v3941_v61 = vmul.f32 %v8490_v28, %v3914_v5  ;;  %6281 = vrcp.f32 %v3836_v51  ;;  %v8518_v18 = vadd.f32 %v8231_v40, %v8152_v4 }
 0xb39   : > { %9160 = vst [vmem:[#allocation29_spill] sm:$0xff] %v8513_v44  ;;  %v4235_v13 = vmul.f32 %v6272_v49, %v4100_v45  ;;  %v4159_v37 = vmul.f32 %v4132_v7, %v8439_v41  ;;  %6283 = vrcp.f32 %v3834_v56  ;;  %v3838_v9 = vadd.f32 1.0, %v3811_v36 }
 0xb3a   : > { %v8522_v24 = vmul.f32 0.5, %v8354_v17  ;;  %v3968_v46 = vadd.f32 1.4214138, %v3941_v61  ;;  %v8525_v52 = vmul.f32 0.5, %v8395_v63  ;;  %v8528_v2 = vand.u32 2147483647, %v8513_v44 }
 0xb3b   : > { %v4071_v51 = vadd.f32 0.2548296, %v4044_v43  ;;  %vm3725_vm14 = vcmp.lt.f32.partialorder %v8374_v59, 0.0  ;;  %6285 = vrcp.f32 %v3838_v9  ;;  %v4102_v41 = vmul.f32 %v8358_v1, %v4075_v60 }
 0xb3c   : > { %v3993_v17 = vmul.f32 %v8426_v34, %v3966_v8  ;;  %v3995_v45 = vmul.f32 %v8490_v28, %v3968_v46  ;;  %v8538_v63 = vmul.f32 0.70710677, %v8518_v18  ;;  %v4262_v7 = vsub.f32 1.0, %v4235_v13 }
 0xb3d   : > { %v8532_v40 = vpop.eup %6273  ;;  %v4197_v36 = vmul.f32 1.442695, %v4159_v37  ;;  %v8543_v43 = vadd.f32 %v8233_v11, %v8154_v62  ;;  %6287 = vpow2.f32 %v4189_v50  ;;  %v3810_v1 = vmul.f32 0.3275911, %v8528_v2 }
 0xb3e   : > { %v3889_v56 = vmul.f32 1.0614054, %v8532_v40  ;;  %v6276_v49 = vpop.eup %6275  ;;  %v4022_v61 = vadd.f32 -0.28449672, %v3995_v45  ;;  %v8547_v8 = vand.u32 2147483647, %v8538_v63  ;;  %v4098_v9 = vmul.f32 %v8366_v16, %v4071_v51 }
 0xb3f   : > { %v6278_v60 = vpop.eup %6277  ;;  %v3752_v13 = vsel %vm3725_vm14, -1.0, %v9049_v29  ;;  %v4133_v46 = vsub.f32 0.0, %v8488_v23  ;;  %v4020_v27 = vadd.f32 -0.28449672, %v3993_v17  ;;  %vm3727_vm15 = vcmp.lt.f32.partialorder %v8410_v58, 0.0 }
 0xb40   : > { %v3916_v37 = vadd.f32 -1.4531521, %v3889_v56  ;;  %v4237_v11 = vmul.f32 %v6278_v60, %v4102_v41  ;;  %v4049_v50 = vmul.f32 %v8490_v28, %v4022_v61  ;;  %v3812_v45 = vmul.f32 0.3275911, %v8547_v8 }
 0xb41   : > { %6289 = vpow2.f32 %v4197_v36  ;;  %v8559_v16 = vmul.f32 0.70710677, %v8543_v43  ;;  %v4289_v59 = vmul.f32 %v4262_v7, %v8469_v55  ;;  %v3837_v56 = vadd.f32 1.0, %v3810_v1 }
 0xb42   : > { %v3943_v5 = vmul.f32 %v8532_v40, %v3916_v37  ;;  %v4076_v51 = vadd.f32 0.2548296, %v4049_v50  ;;  %v3839_v29 = vadd.f32 1.0, %v3812_v45  ;;  %v8562_v15 = vmul.f32 %v6276_v49, %v4098_v9 }
 0xb43   : > { %v4160_v17 = vmul.f32 %v4133_v46, %v8488_v23  ;;  %v8566_v61 = vand.u32 2147483647, %v8559_v16  ;;  %v4264_v38 = vsub.f32 1.0, %v4237_v11  ;;  %v8571_v37 = vadd.f32 %v8244_v19, %v8156_v30 }
 0xb44   : > { %v3970_v41 = vadd.f32 1.4214138, %v3943_v5  ;;  %v6280_v60 = vpop.eup %6279  ;;  %v4103_v36 = vmul.f32 %v8490_v28, %v4076_v51  ;;  %6291 = vrcp.f32 %v3839_v29  ;;  %v4047_v7 = vmul.f32 %v8426_v34, %v4020_v27 }
 0xb45   : > { %9161 = vst [vmem:[#allocation30_spill] sm:$0xff] %v8571_v37  ;;  %v8573_v55 = vpop.eup %6281  ;;  %v9162_v49 = vmov 1.0   ;;  %v3814_v1 = vmul.f32 0.3275911, %v8566_v61  ;;  %v4316_v28 = vadd.f32 1.0, %v4289_v59  ;;  %6293 = vrcp.f32 %v3837_v56 }
 0xb46   : > { %v3754_v23 = vsel %vm3727_vm15, -1.0, %v9162_v49  ;;  %v3997_v5 = vmul.f32 %v8532_v40, %v3970_v41  ;;  %v8581_v9 = vpop.eup %6283  ;;  %v4238_v29 = vmul.f32 %v6280_v60, %v4103_v36  ;;  %v3890_v46 = vmul.f32 1.0614054, %v8573_v55 }
 0xb47   : > { %v4199_v11 = vmul.f32 1.442695, %v4160_v17  ;;  %v4135_v50 = vsub.f32 0.0, %v8506_v14  ;;  %v3841_v27 = vadd.f32 1.0, %v3814_v1  ;;  %v4291_v58 = vmul.f32 %v4264_v38, %v8475_v25 }
 0xb48   : > { %v4024_v19 = vadd.f32 -0.28449672, %v3997_v5  ;;  %v8585_v45 = vpop.eup %6285  ;;  %v4265_v51 = vsub.f32 1.0, %v4238_v29  ;;  %v3917_v41 = vadd.f32 -1.4531521, %v3890_v46  ;;  %v4136_v1 = vsub.f32 0.0, %v8547_v8 }
 0xb49   : > { %v8589_v0 = vmul.f32 0.70710677, %v8571_v37  ;;  %v3888_v60 = vmul.f32 1.0614054, %v8581_v9  ;;  %v3892_v56 = vmul.f32 1.0614054, %v8585_v45  ;;  %6295 = vrcp.f32 %v3841_v27 }
 0xb4a   : > { %v4051_v59 = vmul.f32 %v8532_v40, %v4024_v19  ;;  %v4074_v17 = vadd.f32 0.2548296, %v4047_v7  ;;  %v4292_v36 = vmul.f32 %v4265_v51, %v3752_v13  ;;  %v3944_v5 = vmul.f32 %v8573_v55, %v3917_v41  ;;  %v6288_v44 = vpop.eup %6287 }
 0xb4b   : > { %v8597_v38 = vmul.f32 %v4316_v28, %v8434_v48  ;;  %v3919_v29 = vadd.f32 -1.4531521, %v3892_v56  ;;  %v4162_v46 = vmul.f32 %v4135_v50, %v8506_v14  ;;  %v4318_v19 = vadd.f32 1.0, %v4291_v58 }
 0xb4c   : > { %v4078_v25 = vadd.f32 0.2548296, %v4051_v59  ;;  %v4319_v37 = vadd.f32 1.0, %v4292_v36  ;;  %v3971_v21 = vadd.f32 1.4214138, %v3944_v5  ;;  %6297 = vpow2.f32 %v4199_v11 }
 0xb4d   : > { %v8601_v20 = vand.u32 2147483647, %v8589_v0  ;;  %v3915_v7 = vadd.f32 -1.4531521, %v3888_v60  ;;  %v3946_v27 = vmul.f32 %v8585_v45, %v3919_v29  ;;  %v4163_v14 = vmul.f32 %v4136_v1, %v8547_v8 }
 0xb4e   : > { %v4105_v13 = vmul.f32 %v8532_v40, %v4078_v25  ;;  %v6290_v51 = vpop.eup %6289  ;;  %v8606_v48 = vmul.f32 %v4319_v37, %v8522_v24  ;;  %v3998_v28 = vmul.f32 %v8573_v55, %v3971_v21  ;;  %v4203_v59 = vmul.f32 1.442695, %v4162_v46 }
 0xb4f   : > { %v3813_v50 = vmul.f32 0.3275911, %v8601_v20  ;;  %v3973_v41 = vadd.f32 1.4214138, %v3946_v27  ;;  %v4138_v56 = vsub.f32 0.0, %v8566_v61  ;;  %v8616_v24 = vadd.f32 %v8259_v26, %v8152_v4 }
 0xb50   : > { %v4240_v58 = vmul.f32 %v6290_v51, %v4105_v13  ;;  %v4367_v40 = vpack.c.bf16 %v8606_v48, %v8597_v38  ;;  %v4025_v11 = vadd.f32 -0.28449672, %v3998_v28  ;;  %v3942_v8 = vmul.f32 %v8581_v9, %v3915_v7 }
 0xb51   : > { %v3840_v60 = vadd.f32 1.0, %v3813_v50  ;;  %v8618_v37 = vpop.eup %6291  ;;  %v4131_v36 = vsub.f32 0.0, %v8460_v53  ;;  %v4000_v5 = vmul.f32 %v8585_v45, %v3973_v41  ;;  %v4205_v29 = vmul.f32 1.442695, %v4163_v14 }
 0xb52   : > { %v4267_v21 = vsub.f32 1.0, %v4240_v58  ;;  %v4052_v1 = vmul.f32 %v8573_v55, %v4025_v11  ;;  %v3893_v25 = vmul.f32 1.0614054, %v8618_v37  ;;  %v8625_v46 = vpop.eup %6293  ;;  %v4165_v27 = vmul.f32 %v4138_v56, %v8566_v61 }
 0xb53   : > { %6299 = vrcp.f32 %v3840_v60  ;;  %v4027_v26 = vadd.f32 -0.28449672, %v4000_v5  ;;  %v4101_v51 = vmul.f32 %v8426_v34, %v4074_v17  ;;  %v8630_v50 = vmul.f32 0.70710677, %v8616_v24 }
 0xb54   : > { %v4294_v13 = vmul.f32 %v4267_v21, %v3754_v23  ;;  %6301 = vpow2.f32 %v4203_v59  ;;  %v4079_v7 = vadd.f32 0.2548296, %v4052_v1  ;;  %v3920_v28 = vadd.f32 -1.4531521, %v3893_v25 }
 0xb55   : > { %v4345_v58 = vmul.f32 %v4318_v19, %v8464_v3  ;;  %v4158_v14 = vmul.f32 %v4131_v36, %v8460_v53  ;;  %v4054_v11 = vmul.f32 %v8585_v45, %v4027_v26  ;;  %v3969_v23 = vadd.f32 1.4214138, %v3942_v8 }
 0xb56   : > { %v4321_v41 = vadd.f32 1.0, %v4294_v13  ;;  %v8635_v60 = vpop.eup %6295  ;;  %v3891_v59 = vmul.f32 1.0614054, %v8625_v46  ;;  %v3947_v61 = vmul.f32 %v8618_v37, %v3920_v28  ;;  %6303 = vpow2.f32 %v4205_v29 }
 0xb57   : > { %v4134_v17 = vsub.f32 0.0, %v8528_v2  ;;  %v3895_v56 = vmul.f32 1.0614054, %v8635_v60  ;;  %v4209_v3 = vmul.f32 1.442695, %v4165_v27  ;;  %v4260_v19 = vsub.f32 1.0, %v8562_v15 }
 0xb58   : > { %v4348_v34 = vmul.f32 %v4321_v41, %v8525_v52  ;;  %v4106_v53 = vmul.f32 %v8573_v55, %v4079_v7  ;;  %v3974_v21 = vadd.f32 1.4214138, %v3947_v61  ;;  %v8645_v36 = vand.u32 2147483647, %v8630_v50 }
 0xb59   : > { %v8647_v8 = vmul.f32 %v6288_v44, %v4101_v51  ;;  %v4081_v1 = vadd.f32 0.2548296, %v4054_v11  ;;  %v3922_v25 = vadd.f32 -1.4531521, %v3895_v56  ;;  %v6298_v29 = vpop.eup %6297  ;;  %v3996_v52 = vmul.f32 %v8581_v9, %v3969_v23 }
 0xb5a   : > { %v4369_v5 = vpack.c.bf16 %v4348_v34, %v4345_v58  ;;  %vm3728_vm3 = vcmp.lt.f32.partialorder %v8479_v35, 0.0  ;;  %v3918_v13 = vadd.f32 -1.4531521, %v3891_v59  ;;  %v4001_v26 = vmul.f32 %v8618_v37, %v3974_v21 }
 0xb5b   : > { %v4195_v27 = vmul.f32 1.442695, %v4158_v14  ;;  %v4161_v55 = vmul.f32 %v4134_v17, %v8528_v2  ;;  %v3949_v7 = vmul.f32 %v8635_v60, %v3922_v25  ;;  %6305 = vpow2.f32 %v4209_v3 }
 0xb5c   : > { %5814 = vmatmul.mubr.bf16.gmra.mxu0 %v4369_v5  ;;  %v8655_v44 = vmul.f32 0.5, %v8456_v31  ;;  %v4241_v51 = vmul.f32 %v6298_v29, %v4106_v53  ;;  %v4028_v28 = vadd.f32 -0.28449672, %v4001_v26  ;;  %v3815_v58 = vmul.f32 0.3275911, %v8645_v36 }
 0xb5d   : > { %5817 = vmatprep.mubr.msk.bf16.mxu0 %vm6407_vm2, %v9101_v47  ;;  %v3755_v35 = vsel %vm3728_vm3, -1.0, %v9162_v49  ;;  %v8662_v41 = vmul.f32 0.5, %v8484_v33  ;;  %v4108_v2 = vmul.f32 %v8585_v45, %v4081_v1  ;;  %v3976_v14 = vadd.f32 1.4214138, %v3949_v7 }
 0xb5e   : > { %v4023_v11 = vadd.f32 -0.28449672, %v3996_v52  ;;  %vm3730_vm4 = vcmp.lt.f32.partialorder %v8494_v6, 0.0  ;;  %v3945_v31 = vmul.f32 %v8625_v46, %v3918_v13  ;;  %v4055_v23 = vmul.f32 %v8618_v37, %v4028_v28 }
 0xb5f   : > { %6307 = vpow2.f32 %v4195_v27  ;;  %v4201_v61 = vmul.f32 1.442695, %v4161_v55  ;;  %vm3731_vm5 = vcmp.lt.f32.partialorder %v8538_v63, 0.0  ;;  %v4003_v34 = vmul.f32 %v8635_v60, %v3976_v14 }
 0xb60   : > { %v8668_v59 = vpop.eup %6299  ;;  %v4268_v17 = vsub.f32 1.0, %v4241_v51  ;;  %v4082_v56 = vadd.f32 0.2548296, %v4055_v23  ;;  %v3842_v3 = vadd.f32 1.0, %v3815_v58  ;;  %v3757_v6 = vsel %vm3730_vm4, -1.0, %v9162_v49 }
 0xb61   : > { %v6302_v33 = vpop.eup %6301  ;;  %v3894_v45 = vmul.f32 1.0614054, %v8668_v59  ;;  %v4030_v21 = vadd.f32 -0.28449672, %v4003_v34  ;;  %v4137_v5 = vsub.f32 0.0, %v8601_v20  ;;  %v4050_v1 = vmul.f32 %v8581_v9, %v4023_v11 }
 0xb62   : > { %v4243_v53 = vmul.f32 %v6302_v33, %v4108_v2  ;;  %v3972_v25 = vadd.f32 1.4214138, %v3945_v31  ;;  %v4109_v29 = vmul.f32 %v8618_v37, %v4082_v56  ;;  %6309 = vpow2.f32 %v4201_v61 }
 0xb63   : > { %v3921_v52 = vadd.f32 -1.4531521, %v3894_v45  ;;  %v6304_v13 = vpop.eup %6303  ;;  %v3677_v26 = vmul.f32 0.5, %v8518_v18  ;;  %v3758_v27 = vsel %vm3731_vm5, -1.0, %v9162_v49  ;;  %v4057_v55 = vmul.f32 %v8635_v60, %v4030_v21 }
 0xb64   : > { %v4295_v7 = vmul.f32 %v4268_v17, %v3755_v35  ;;  %v4244_v51 = vmul.f32 %v6304_v13, %v4109_v29  ;;  %6311 = vrcp.f32 %v3842_v3  ;;  %v4270_v58 = vsub.f32 1.0, %v4243_v53 }
 0xb65   : > { %v3948_v28 = vmul.f32 %v8668_v59, %v3921_v52  ;;  %v4084_v37 = vadd.f32 0.2548296, %v4057_v55  ;;  %v4164_v2 = vmul.f32 %v4137_v5, %v8601_v20  ;;  %v8687_v18 = vadd.f32 %v8267_v10, %v8156_v30 }
 0xb66   : > { %v4077_v14 = vadd.f32 0.2548296, %v4050_v1  ;;  %v3999_v63 = vmul.f32 %v8625_v46, %v3972_v25  ;;  %v4271_v11 = vsub.f32 1.0, %v4244_v51  ;;  %vm3733_vm7 = vcmp.lt.f32.partialorder %v8559_v16, 0.0 }
 0xb67   : > { %v3975_v31 = vadd.f32 1.4214138, %v3948_v28  ;;  %v4111_v35 = vmul.f32 %v8635_v60, %v4084_v37  ;;  %v8693_v23 = vmul.f32 0.70710677, %v8687_v18  ;;  %v8697_v61 = vadd.f32 %v8271_v39, %v8152_v4 }
 0xb68   : > { %v6306_v20 = vpop.eup %6305  ;;  %v4322_v34 = vadd.f32 1.0, %v4295_v7  ;;  %v4298_v10 = vmul.f32 %v4271_v11, %v3758_v27  ;;  %v8702_v17 = vadd.f32 %v8261_v22, %v8154_v62  ;;  %v4297_v56 = vmul.f32 %v4270_v58, %v3757_v6  ;;  %v9163_v27 = vld [vmem:[#allocation19_spill] sm:$0xff] }
 0xb69   : > { %v4002_v33 = vmul.f32 %v8668_v59, %v3975_v31  ;;  %v4246_v45 = vmul.f32 %v6306_v20, %v4111_v35  ;;  %v4207_v3 = vmul.f32 1.442695, %v4164_v2  ;;  %v8705_v60 = vand.u32 2147483647, %v8693_v23 }
 0xb6a   : > { %v4104_v53 = vmul.f32 %v8581_v9, %v4077_v14  ;;  %v4026_v21 = vadd.f32 -0.28449672, %v3999_v63  ;;  %v4325_v39 = vadd.f32 1.0, %v4298_v10  ;;  %v3760_v1 = vsel %vm3733_vm7, -1.0, %v9162_v49 }
 0xb6b   : > { %v4029_v5 = vadd.f32 -0.28449672, %v4002_v33  ;;  %v4273_v25 = vsub.f32 1.0, %v4246_v45  ;;  %v3816_v29 = vmul.f32 0.3275911, %v8705_v60  ;;  %v8716_v52 = vmul.f32 %v4322_v34, %v8655_v44 }
 0xb6c   : > { %v8713_v22 = vmul.f32 0.70710677, %v8697_v61  ;;  %v6308_v6 = vpop.eup %6307  ;;  %v8718_v13 = vmul.f32 %v4325_v39, %v3677_v26  ;;  %v8721_v9 = vmul.f32 0.70710677, %v8702_v17  ;;  %v8725_v55 = vadd.f32 %v9163_v27, %v8154_v62 }
 0xb6d   : > { %v4324_v16 = vadd.f32 1.0, %v4297_v56  ;;  %v4300_v7 = vmul.f32 %v4273_v25, %v3760_v1  ;;  %6313 = vpow2.f32 %v4207_v3  ;;  %v3843_v51 = vadd.f32 1.0, %v3816_v29  ;;  %v9166_v25 = vld [vmem:[#allocation18_spill] sm:$0xff] }
 0xb6e   : > { %v4239_v28 = vmul.f32 %v6308_v6, %v4104_v53  ;;  %v4053_v58 = vmul.f32 %v8625_v46, %v4026_v21  ;;  %v4370_v44 = vpack.c.bf16 %v8718_v13, %v8716_v52  ;;  %v3679_v26 = vmul.f32 0.5, %v8543_v43 }
 0xb6f   : > { %v4327_v37 = vadd.f32 1.0, %v4300_v7  ;;  %v4056_v2 = vmul.f32 %v8668_v59, %v4029_v5  ;;  %6315 = vrcp.f32 %v3843_v51  ;;  %v8733_v14 = vand.u32 2147483647, %v8713_v22  ;;  %v6310_v63 = vpop.eup %6309 }
 0xb70   : > { %v9164_v11 = vsub.f32 1.0, %v8508_v54  ;;  %v3750_v35 = vsel %vm3723_vm6, -1.0, %v9162_v49  ;;  %v8742_v20 = vand.u32 2147483647, %v8721_v9  ;;  %v8745_v43 = vmul.f32 0.70710677, %v8725_v55 }
 0xb71   : > { %v8747_v34 = vpop.eup %6311  ;;  %v4287_v10 = vmul.f32 %v4260_v19, %v8431_v42  ;;  %v4351_v33 = vmul.f32 %v4324_v16, %v8662_v41  ;;  %v4354_v54 = vmul.f32 %v4327_v37, %v3679_v26  ;;  %v4263_v32 = vsub.f32 1.0, %v8647_v8  ;;  %v9165_v8 = vld [vmem:[#allocation21_spill] sm:$0xff]  ;;  %v9168_v37 = vld [vmem:[#allocation20_spill] sm:$0xff] }
 0xb72   : > { %v4284_v31 = vmul.f32 %v9164_v11, %v8424_v12  ;;  %v3818_v12 = vmul.f32 0.3275911, %v8733_v14  ;;  %vm3726_vm0 = vcmp.lt.f32.partialorder %v8444_v57, 0.0  ;;  %v4080_v56 = vadd.f32 0.2548296, %v4053_v58  ;;  %v9167_v58 = vld [vmem:[#allocation22_spill] sm:$0xff] }
 0xb73   : > { %v8757_v45 = vand.u32 2147483647, %v8745_v43  ;;  %v4266_v3 = vsub.f32 1.0, %v4239_v28  ;;  %v4372_v53 = vpack.c.bf16 %v4354_v54, %v4351_v33  ;;  %v4083_v21 = vadd.f32 0.2548296, %v4056_v2 }
 0xb74   : > { %v3845_v39 = vadd.f32 1.0, %v3818_v12  ;;  %v3896_v15 = vmul.f32 1.0614054, %v8747_v34  ;;  %v3817_v42 = vmul.f32 0.3275911, %v8742_v20  ;;  %v4311_v41 = vadd.f32 1.0, %v4284_v31 }
 0xb75   : > { %v3820_v19 = vmul.f32 0.3275911, %v8757_v45  ;;  %v4314_v5 = vadd.f32 1.0, %v4287_v10  ;;  %v8764_v1 = vadd.f32 %v9165_v8, %v8156_v30  ;;  %5818 = vmatmul.mubr.bf16.gmra.mxu0 %v4372_v53  ;;  %v3666_v29 = vmul.f32 0.5, %v9166_v25  ;;  %v9170_v12 = vld [vmem:[#allocation26_spill] sm:$0xff]  ;;  %v9172_v8 = vld [vmem:[#allocation8_spill] sm:$0xff] }
 0xb76   : > { %6317 = vrcp.f32 %v3845_v39  ;;  %v4290_v6 = vmul.f32 %v4263_v32, %v3750_v35  ;;  %v4107_v27 = vmul.f32 %v8625_v46, %v4080_v56  ;;  %v3753_v7 = vsel %vm3726_vm0, -1.0, %v9162_v49  ;;  %v9169_v46 = vld [vmem:[#allocation27_spill] sm:$0xff]  ;;  %v9171_v56 = vld [vmem:[#allocation29_spill] sm:$0xff] }
 0xb77   : > { %v3847_v16 = vadd.f32 1.0, %v3820_v19  ;;  %v4110_v51 = vmul.f32 %v8668_v59, %v4083_v21  ;;  %v8773_v28 = vmul.f32 0.70710677, %v8764_v1  ;;  %v8777_v26 = vadd.f32 %v9167_v58, %v8152_v4 }
 0xb78   : > { %v3669_v2 = vmul.f32 0.5, %v9168_v37  ;;  %v4293_v11 = vmul.f32 %v4266_v3, %v3753_v7  ;;  %v3923_v31 = vadd.f32 -1.4531521, %v3896_v15  ;;  %v3844_v35 = vadd.f32 1.0, %v3817_v42 }
 0xb79   : > { %v4338_v10 = vmul.f32 %v4311_v41, %v9169_v46  ;;  %v4341_v33 = vmul.f32 %v4314_v5, %v3666_v29  ;;  %6319 = vrcp.f32 %v3847_v16  ;;  %v3792_v57 = vand.u32 2147483647, %v8773_v28 }
 0xb7a   : > { %v6314_v54 = vpop.eup %6313  ;;  %v4317_v59 = vadd.f32 1.0, %v4290_v6  ;;  %v3672_v32 = vmul.f32 0.5, %v9170_v12  ;;  %vm3729_vm1 = vcmp.lt.f32.partialorder %v9171_v56, 0.0  ;;  %v4242_v53 = vmul.f32 %v6310_v63, %v4107_v27 }
 0xb7b   : > { %vm3732_vm8 = vcmp.lt.f32.partialorder %v8589_v0, 0.0  ;;  %v4245_v4 = vmul.f32 %v6314_v54, %v4110_v51  ;;  %v3819_v21 = vmul.f32 0.3275911, %v3792_v57  ;;  %v8786_v3 = vmul.f32 0.70710677, %v8777_v26 }
 0xb7c   : > { %v8788_v39 = vpop.eup %6315  ;;  %v4320_v15 = vadd.f32 1.0, %v4293_v11  ;;  %v3950_v42 = vmul.f32 %v8747_v34, %v3923_v31  ;;  %6321 = vrcp.f32 %v3844_v35  ;;  %v4142_v19 = vsub.f32 0.0, %v8733_v14 }
 0xb7d   : > { %v3897_v41 = vmul.f32 1.0614054, %v8788_v39  ;;  %v4140_v5 = vsub.f32 0.0, %v8705_v60  ;;  %v3846_v63 = vadd.f32 1.0, %v3819_v21  ;;  %v8796_v25 = vadd.f32 %v9172_v8, %v8154_v62 }
 0xb7e   : > { %v4344_v29 = vmul.f32 %v4317_v59, %v3669_v2  ;;  %v4269_v6 = vsub.f32 1.0, %v4242_v53  ;;  %v4139_v27 = vsub.f32 0.0, %v8645_v36  ;;  %v8800_v16 = vand.u32 2147483647, %v8786_v3 }
 0xb7f   : > { %v3756_v7 = vsel %vm3729_vm1, -1.0, %v9162_v49  ;;  %v4272_v51 = vsub.f32 1.0, %v4245_v4  ;;  %v3924_v58 = vadd.f32 -1.4531521, %v3897_v41  ;;  %6323 = vrcp.f32 %v3846_v63 }
 0xb80   : > { %v3759_v37 = vsel %vm3732_vm8, -1.0, %v9162_v49  ;;  %v3977_v62 = vadd.f32 1.4214138, %v3950_v42  ;;  %v4169_v2 = vmul.f32 %v4142_v19, %v8733_v14  ;;  %v3821_v11 = vmul.f32 0.3275911, %v8800_v16 }
 0xb81   : > { %v4347_v31 = vmul.f32 %v4320_v15, %v3672_v32  ;;  %v3951_v35 = vmul.f32 %v8788_v39, %v3924_v58  ;;  %v4167_v46 = vmul.f32 %v4140_v5, %v8705_v60  ;;  %v8813_v54 = vmul.f32 0.70710677, %v8796_v25  ;;  %v9173_v60 = vld [vmem:[#allocation23_spill] sm:$0xff]  ;;  %v9176_v58 = vld [vmem:[#allocation24_spill] sm:$0xff] }
 0xb82   : > { %v4296_v12 = vmul.f32 %v4269_v6, %v3756_v7  ;;  %v4166_v56 = vmul.f32 %v4139_v27, %v8645_v36  ;;  %v4143_v0 = vsub.f32 0.0, %v3792_v57  ;;  %v3848_v53 = vadd.f32 1.0, %v3821_v11 }
 0xb83   : > { %v8815_v59 = vpop.eup %6317  ;;  %v4299_v4 = vmul.f32 %v4272_v51, %v3759_v37  ;;  %v3978_v21 = vadd.f32 1.4214138, %v3951_v35  ;;  %v4365_v42 = vpack.c.bf16 %v4341_v33, %v4338_v10  ;;  %v4004_v32 = vmul.f32 %v8747_v34, %v3977_v62  ;;  %v9174_v33 = vld [vmem:[#allocation30_spill] sm:$0xff]  ;;  %v9175_v51 = vld [vmem:[#allocation25_spill] sm:$0xff]  ;;  %v6358_v35 = vld [vmem:[%s6582_s1 + $0xb8] sm:$0xff]  }
 0xb84   : > { %v3899_v14 = vmul.f32 1.0614054, %v8815_v59  ;;  %v4217_v15 = vmul.f32 1.442695, %v4169_v2  ;;  %6325 = vrcp.f32 %v3848_v53  ;;  %v8822_v19 = vadd.f32 %v9173_v60, %v8156_v30 }
 0xb85   : > { %v4005_v41 = vmul.f32 %v8788_v39, %v3978_v21  ;;  %v4213_v5 = vmul.f32 1.442695, %v4167_v46  ;;  %v8826_v63 = vand.u32 2147483647, %v8813_v54  ;;  %4610 = vmatprep.mubr.bf16.mxu1 %v4365_v42  ;;  %v4323_v10 = vadd.f32 1.0, %v4296_v12  ;;  %v9178_v21 = vld [vmem:[#allocation28_spill] sm:$0xff] }
 0xb86   : > { %v3926_v36 = vadd.f32 -1.4531521, %v3899_v14  ;;  %v8828_v8 = vpop.eup %6319  ;;  %v3678_v6 = vmul.f32 0.5, %v9174_v33  ;;  %v4211_v27 = vmul.f32 1.442695, %v4166_v56  ;;  %v4170_v7 = vmul.f32 %v4143_v0, %v3792_v57 }
 0xb87   : > { %v9177_v30 = vpack.c.bf16 %v9175_v51, %v9176_v58  ;;  %v4326_v37 = vadd.f32 1.0, %v4299_v4  ;;  %v4032_v62 = vadd.f32 -0.28449672, %v4005_v41  ;;  %v3823_v11 = vmul.f32 0.3275911, %v8826_v63 }
 0xb88   : > { %v3953_v2 = vmul.f32 %v8815_v59, %v3926_v36  ;;  %v4031_v46 = vadd.f32 -0.28449672, %v4004_v32  ;;  %6327 = vpow2.f32 %v4217_v15  ;;  %v8838_v12 = vmul.f32 0.70710677, %v8822_v19 }
 0xb89   : > { %4611 = vmatmul.mubr.bf16.vlgmr.msra.gmra.mxu1 %v9177_v30  ;;  %v4368_v57 = vpack.c.bf16 %v4347_v31, %v4344_v29  ;;  %v8841_v56 = vpop.eup %6321  ;;  %6329 = vpow2.f32 %v4213_v5  ;;  %v3901_v53 = vmul.f32 1.0614054, %v8828_v8  ;;  %v3850_v4 = vadd.f32 1.0, %v3823_v11  ;;  %v6359_v31 = vld [vmem:[%s6582_s1 + $0xb0] sm:$0xff]  }
 0xb8a   : > { %5837 = vmatpush3.bf16.msra.mxu1 %v6358_v35  ;;  %v3980_v0 = vadd.f32 1.4214138, %v3953_v2  ;;  %v3675_v14 = vmul.f32 0.5, %v9178_v21  ;;  %6331 = vpow2.f32 %v4211_v27  ;;  %v4219_v42 = vmul.f32 1.442695, %v4170_v7  ;;  %v6360_v35 = vld [vmem:[%s6582_s1 + $0xa8] sm:$0xff]  }
 0xb8b   : > { %5830 = vmatprep.subr.bf16.mxu1 %v9101_v47  ;;  %v8846_v32 = vand.u32 2147483647, %v8838_v12  ;;  %4618 = vmatprep.mubr.bf16.mxu1 %v4368_v57  ;;  %v4353_v15 = vmul.f32 %v4326_v37, %v3678_v6  ;;  %v4059_v60 = vmul.f32 %v8788_v39, %v4032_v62  ;;  %6333 = vrcp.f32 %v3850_v4 }
 0xb8c   : > { %v4007_v29 = vmul.f32 %v8815_v59, %v3980_v0  ;;  %v8851_v41 = vpop.eup %6323  ;;  %v4058_v5 = vmul.f32 %v8747_v34, %v4031_v46  ;;  %v3898_v36 = vmul.f32 1.0614054, %v8841_v56  ;;  %v4145_v33 = vsub.f32 0.0, %v8800_v16 }
 0xb8d   : > { %v3822_v27 = vmul.f32 0.3275911, %v8846_v32  ;;  %v4350_v6 = vmul.f32 %v4323_v10, %v3675_v14  ;;  %v3928_v51 = vadd.f32 -1.4531521, %v3901_v53  ;;  %v3900_v58 = vmul.f32 1.0614054, %v8851_v41 }
 0xb8e   : > { %5838 = vmatpush3.bf16.msra.mxu1 %v6359_v31  ;;  %v4034_v7 = vadd.f32 -0.28449672, %v4007_v29  ;;  %v4141_v30 = vsub.f32 0.0, %v8742_v20  ;;  %6335 = vpow2.f32 %v4219_v42  ;;  %v4086_v62 = vadd.f32 0.2548296, %v4059_v60  ;;  %v6361_v29 = vld [vmem:[%s6582_s1 + $0xa0] sm:$0xff]  }
 0xb8f   : > { %5831 = vmatprep.subr.bf16.mxu1 %v9101_v47  ;;  %v3849_v37 = vadd.f32 1.0, %v3822_v27  ;;  %v3927_v11 = vadd.f32 -1.4531521, %v3900_v58  ;;  %v4371_v46 = vpack.c.bf16 %v4353_v15, %v4350_v6  ;;  %v4085_v10 = vadd.f32 0.2548296, %v4058_v5 }
 0xb90   : > { %v4061_v2 = vmul.f32 %v8815_v59, %v4034_v7  ;;  %v3925_v57 = vadd.f32 -1.4531521, %v3898_v36  ;;  %v3955_v4 = vmul.f32 %v8828_v8, %v3928_v51  ;;  %v4172_v48 = vmul.f32 %v4145_v33, %v8800_v16 }
 0xb91   : > { %4619 = vmatmul.mubr.bf16.gmra.mxu1 %v4367_v40  ;;  %6337 = vrcp.f32 %v3849_v37  ;;  %v8866_v0 = vpop.eup %6325  ;;  %v3954_v38 = vmul.f32 %v8851_v41, %v3927_v11  ;;  %vm3734_vm9 = vcmp.lt.f32.partialorder %v8630_v50, 0.0  ;;  %v4144_v40 = vsub.f32 0.0, %v8757_v45 }
 0xb92   : > { %5839 = vmatpush3.bf16.msra.mxu1 %v6360_v35  ;;  %v4088_v53 = vadd.f32 0.2548296, %v4061_v2  ;;  %4626 = vmatprep.mubr.bf16.mxu1 %v4371_v46  ;;  %v3902_v21 = vmul.f32 1.0614054, %v8866_v0  ;;  %v4168_v14 = vmul.f32 %v4141_v30, %v8742_v20  ;;  %v4113_v42 = vmul.f32 %v8788_v39, %v4086_v62  ;;  %v6362_v2 = vld [vmem:[%s6582_s1 + $0x98] sm:$0xff]  }
 0xb93   : > { %5832 = vmatprep.subr.bf16.mxu1 %v9101_v47  ;;  %v3981_v60 = vadd.f32 1.4214138, %v3954_v38  ;;  %v4112_v31 = vmul.f32 %v8747_v34, %v4085_v10  ;;  %v3952_v16 = vmul.f32 %v8841_v56, %v3925_v57  ;;  %vm3735_vm10 = vcmp.lt.f32.partialorder %v8693_v23, 0.0 }
 0xb94   : > { %v4115_v15 = vmul.f32 %v8815_v59, %v4088_v53  ;;  %v3929_v50 = vadd.f32 -1.4531521, %v3902_v21  ;;  %v3761_v20 = vsel %vm3734_vm9, -1.0, %v9162_v49  ;;  %v3982_v36 = vadd.f32 1.4214138, %v3955_v4  ;;  %v6363_v21 = vld [vmem:[%s6582_s1 + $0x90] sm:$0xff]  }
 0xb95   : > { %v6328_v5 = vpop.eup %6327  ;;  %v4008_v39 = vmul.f32 %v8851_v41, %v3981_v60  ;;  %v4223_v59 = vmul.f32 1.442695, %v4172_v48  ;;  %v4171_v6 = vmul.f32 %v4144_v40, %v8757_v45  ;;  %v4146_v7 = vsub.f32 0.0, %v8846_v32 }
 0xb96   : > { %5840 = vmatpush3.bf16.msra.mxu1 %v6361_v29  ;;  %v6330_v33 = vpop.eup %6329  ;;  %v4250_v27 = vmul.f32 %v6328_v5, %v4115_v15  ;;  %v3956_v34 = vmul.f32 %v8866_v0, %v3929_v50  ;;  %v4215_v58 = vmul.f32 1.442695, %v4168_v14  ;;  %v3762_v30 = vsel %vm3735_vm10, -1.0, %v9162_v49 }
 0xb97   : > { %5833 = vmatprep.subr.bf16.mxu1 %v9101_v47  ;;  %v6332_v51 = vpop.eup %6331  ;;  %v4248_v37 = vmul.f32 %v6330_v33, %v4113_v42  ;;  %v4035_v62 = vadd.f32 -0.28449672, %v4008_v39  ;;  %v3979_v35 = vadd.f32 1.4214138, %v3952_v16  ;;  %vm3737_vm11 = vcmp.lt.f32.partialorder %v8713_v22, 0.0 }
 0xb98   : > { %v8894_v11 = vpop.eup %6333  ;;  %v4247_v45 = vmul.f32 %v6332_v51, %v4112_v31  ;;  %v3983_v46 = vadd.f32 1.4214138, %v3956_v34  ;;  %v4009_v52 = vmul.f32 %v8828_v8, %v3982_v36  ;;  %6339 = vpow2.f32 %v4223_v59 }
 0xb99   : > { %4627 = vmatmul.mubr.bf16.gmra.mxu1 %v4370_v44  ;;  %v4062_v13 = vmul.f32 %v8851_v41, %v4035_v62  ;;  %v3904_v23 = vmul.f32 1.0614054, %v8894_v11  ;;  %v4277_v44 = vsub.f32 1.0, %v4250_v27  ;;  %v4221_v10 = vmul.f32 1.442695, %v4171_v6  ;;  %v6364_v6 = vld [vmem:[%s6582_s1 + $0x88] sm:$0xff]  }
 0xb9a   : > { %5841 = vmatpush3.bf16.msra.mxu1 %v6362_v2  ;;  %v4010_v57 = vmul.f32 %v8866_v0, %v3983_v46  ;;  %v4173_v53 = vmul.f32 %v4146_v7, %v8846_v32  ;;  %v4275_v38 = vsub.f32 1.0, %v4248_v37  ;;  %v3764_v22 = vsel %vm3737_vm11, -1.0, %v9162_v49 }
 0xb9b   : > { %5834 = vmatprep.subr.bf16.mxu1 %v9101_v47  ;;  %v6336_v4 = vpop.eup %6335  ;;  %v4089_v48 = vadd.f32 0.2548296, %v4062_v13  ;;  %v3931_v40 = vadd.f32 -1.4531521, %v3904_v23  ;;  %v4274_v14 = vsub.f32 1.0, %v4247_v45  ;;  %v4006_v42 = vmul.f32 %v8841_v56, %v3979_v35 }
 0xb9c   : > { %vm3738_vm12 = vcmp.lt.f32.partialorder %v8773_v28, 0.0  ;;  %v4037_v15 = vadd.f32 -0.28449672, %v4010_v57  ;;  %v4036_v32 = vadd.f32 -0.28449672, %v4009_v52  ;;  %v4147_v16 = vsub.f32 0.0, %v8826_v63 }
 0xb9d   : > { %v4116_v29 = vmul.f32 %v8851_v41, %v4089_v48  ;;  %v3958_v31 = vmul.f32 %v8894_v11, %v3931_v40  ;;  %v4304_v50 = vmul.f32 %v4277_v44, %v3764_v22  ;;  %v4225_v39 = vmul.f32 1.442695, %v4173_v53  ;;  %v6365_v52 = vld [vmem:[%s6582_s1 + $0x80] sm:$0xff]  }
 0xb9e   : > { %5842 = vmatpush3.bf16.msra.mxu1 %v6363_v21  ;;  %v8908_v60 = vpop.eup %6337  ;;  %v4064_v5 = vmul.f32 %v8866_v0, %v4037_v15  ;;  %6341 = vpow2.f32 %v4215_v58  ;;  %v4302_v59 = vmul.f32 %v4275_v38, %v3762_v30  ;;  %v4301_v34 = vmul.f32 %v4274_v14, %v3761_v20 }
 0xb9f   : > { %5835 = vmatprep.subr.bf16.mxu1 %v9101_v47  ;;  %v3903_v36 = vmul.f32 1.0614054, %v8908_v60  ;;  %v4251_v33 = vmul.f32 %v6336_v4, %v4116_v29  ;;  %v3985_v27 = vadd.f32 1.4214138, %v3958_v31  ;;  %v3765_v41 = vsel %vm3738_vm12, -1.0, %v9162_v49 }
 0xba0   : > { %v4091_v7 = vadd.f32 0.2548296, %v4064_v5  ;;  %v4033_v37 = vadd.f32 -0.28449672, %v4006_v42  ;;  %6343 = vpow2.f32 %v4221_v10  ;;  %v4174_v58 = vmul.f32 %v4147_v16, %v8826_v63 }
 0xba1   : > { %v3930_v51 = vadd.f32 -1.4531521, %v3903_v36  ;;  %v4278_v62 = vsub.f32 1.0, %v4251_v33  ;;  %v4331_v30 = vadd.f32 1.0, %v4304_v50  ;;  %v4063_v2 = vmul.f32 %v8828_v8, %v4036_v32 }
 0xba2   : > { %5843 = vmatpush3.bf16.msra.mxu1 %v6364_v6  ;;  %6345 = vpow2.f32 %v4225_v39  ;;  %v4329_v20 = vadd.f32 1.0, %v4302_v59  ;;  %v4118_v28 = vmul.f32 %v8866_v0, %v4091_v7  ;;  %v4012_v46 = vmul.f32 %v8894_v11, %v3985_v27 }
 0xba3   : > { %5836 = vmatprep.subr.bf16.mxu1 %v9101_v47  ;;  %v3957_v45 = vmul.f32 %v8908_v60, %v3930_v51  ;;  %v4305_v35 = vmul.f32 %v4278_v62, %v3765_v41  ;;  %v4328_v13 = vadd.f32 1.0, %v4301_v34  ;;  %v3681_v23 = vmul.f32 0.5, %v8687_v18 }
 0xba4   : > { %v3683_v44 = vmul.f32 0.5, %v8697_v61  ;;  %v4060_v10 = vmul.f32 %v8841_v56, %v4033_v37  ;;  %v3684_v57 = vmul.f32 0.5, %v8764_v1  ;;  %v4227_v4 = vmul.f32 1.442695, %v4174_v58 }
 0xba5   : > { %v3984_v63 = vadd.f32 1.4214138, %v3957_v45  ;;  %v4332_v53 = vadd.f32 1.0, %v4305_v35  ;;  %v6340_v38 = vpop.eup %6339  ;;  %v3680_v22 = vmul.f32 0.5, %v8616_v24  ;;  %v4090_v48 = vadd.f32 0.2548296, %v4063_v2 }
 0xba6   : > { %5844 = vmatpush3.bf16.msra.mxu1 %v6365_v52  ;;  %v4358_v0 = vmul.f32 %v4331_v30, %v3683_v44  ;;  %v4356_v21 = vmul.f32 %v4329_v20, %v3681_v23  ;;  %v4253_v42 = vmul.f32 %v6340_v38, %v4118_v28  ;;  %v4039_v18 = vadd.f32 -0.28449672, %v4012_v46 }
 0xba7   : > { %v4011_v40 = vmul.f32 %v8908_v60, %v3984_v63  ;;  %v4359_v14 = vmul.f32 %v4332_v53, %v3684_v57  ;;  %v4355_v15 = vmul.f32 %v4328_v13, %v3680_v22  ;;  %v4087_v32 = vadd.f32 0.2548296, %v4060_v10 }
 0xba8   : > { %6347 = vpow2.f32 %v4227_v4  ;;  %v4117_v16 = vmul.f32 %v8828_v8, %v4090_v48  ;;  %vm3740_vm13 = vcmp.lt.f32.partialorder %v8786_v3, 0.0  ;;  %v4280_v24 = vsub.f32 1.0, %v4253_v42 }
 0xba9   : > { %v4038_v61 = vadd.f32 -0.28449672, %v4011_v40  ;;  %v4374_v29 = vpack.c.bf16 %v4359_v14, %v4356_v21  ;;  %v4373_v31 = vpack.c.bf16 %v4358_v0, %v4355_v15  ;;  %v4066_v50 = vmul.f32 %v8894_v11, %v4039_v18 }
 0xbaa   : > { %v4114_v39 = vmul.f32 %v8841_v56, %v4087_v32  ;;  %v3767_v33 = vsel %vm3740_vm13, -1.0, %v9162_v49  ;;  %vm3741_vm14 = vcmp.lt.f32.partialorder %v8838_v12, 0.0  ;;  %vm3739_vm15 = vcmp.lt.f32.partialorder %v8745_v43, 0.0 }
 0xbab   : > { %v4065_v1 = vmul.f32 %v8908_v60, %v4038_v61  ;;  %4634 = vmatprep.mubr.bf16.mxu1 %v4374_v29  ;;  %v6342_v5 = vpop.eup %6341  ;;  %v4307_v41 = vmul.f32 %v4280_v24, %v3767_v33  ;;  %v4093_v8 = vadd.f32 0.2548296, %v4066_v50  ;;  %v3768_v58 = vsel %vm3741_vm14, -1.0, %v9162_v49  ;;  %v9179_v33 = vld [vmem:[#allocation9_spill] sm:$0xff] }
 0xbac   : > { %4635 = vmatmul.mubr.bf16.gmra.mxu1 %v4373_v31  ;;  %v4249_v7 = vmul.f32 %v6342_v5, %v4114_v39  ;;  %vm3736_vm3 = vcmp.lt.f32.partialorder %v8721_v9, 0.0  ;;  %v3686_v2 = vmul.f32 0.5, %v8777_v26  ;;  %v3766_v12 = vsel %vm3739_vm15, -1.0, %v9162_v49 }
 0xbad   : > { %v4092_v36 = vadd.f32 0.2548296, %v4065_v1  ;;  %v6344_v59 = vpop.eup %6343  ;;  %v4334_v62 = vadd.f32 1.0, %v4307_v41  ;;  %v4120_v56 = vmul.f32 %v8894_v11, %v4093_v8  ;;  %v3687_v20 = vmul.f32 0.5, %v8822_v19 }
 0xbae   : > { %v4252_v34 = vmul.f32 %v6344_v59, %v4117_v16  ;;  %v3763_v52 = vsel %vm3736_vm3, -1.0, %v9162_v49  ;;  %vm3742_vm4 = vcmp.lt.f32.partialorder %v8813_v54, 0.0  ;;  %v3685_v10 = vmul.f32 0.5, %v8725_v55 }
 0xbaf   : > { %v4119_v27 = vmul.f32 %v8908_v60, %v4092_v36  ;;  %v6346_v6 = vpop.eup %6345  ;;  %v4276_v60 = vsub.f32 1.0, %v4249_v7  ;;  %v4361_v28 = vmul.f32 %v4334_v62, %v3686_v2  ;;  %v3769_v19 = vsel %vm3742_vm4, -1.0, %v9162_v49  ;;  %v9180_v7 = vld [vmem:[#allocation12_spill] sm:$0xff] }
 0xbb0   : > { %v4279_v37 = vsub.f32 1.0, %v4252_v34  ;;  %v3682_v57 = vmul.f32 0.5, %v8702_v17  ;;  %v3688_v54 = vmul.f32 0.5, %v8796_v25 }
 0xbb1   : > { %v4254_v3 = vmul.f32 %v6346_v6, %v4119_v27  ;;  %v4303_v13 = vmul.f32 %v4276_v60, %v3763_v52  ;;  %v4376_v63 = vpack.c.bf16 %v4361_v28, %v4361_v28  ;;  %v9181_v60 = vld [vmem:[#allocation10_spill] sm:$0xff]  ;;  %v9182_v28 = vld [vmem:[#allocation13_spill] sm:$0xff] }
 0xbb2   : > { %v4306_v43 = vmul.f32 %v4279_v37, %v3766_v12 }
 0xbb3   : > { %v4281_v51 = vsub.f32 1.0, %v4254_v3  ;;  %v4330_v26 = vadd.f32 1.0, %v4303_v13 }
 0xbb4   : > { %v4333_v44 = vadd.f32 1.0, %v4306_v43 }
 0xbb5   : > { %v4308_v30 = vmul.f32 %v4281_v51, %v3768_v58  ;;  %v6348_v45 = vpop.eup %6347  ;;  %v4357_v38 = vmul.f32 %v4330_v26, %v3682_v57 }
 0xbb6   : > { %v4255_v46 = vmul.f32 %v6348_v45, %v4120_v56  ;;  %v4360_v53 = vmul.f32 %v4333_v44, %v3685_v10  ;;  %v9183_v44 = vld [vmem:[#allocation11_spill] sm:$0xff]  ;;  %v9184_v10 = vld [vmem:[#allocation14_spill] sm:$0xff] }
 0xbb7   : > { %v4335_v35 = vadd.f32 1.0, %v4308_v30 }
 0xbb8   : > { %v4282_v9 = vsub.f32 1.0, %v4255_v46  ;;  %v4375_v22 = vpack.c.bf16 %v4360_v53, %v4357_v38 }
 0xbb9   : > { %v4362_v11 = vmul.f32 %v4335_v35, %v3687_v20 }
 0xbba   : > { %v4309_v4 = vmul.f32 %v4282_v9, %v3769_v19 }
 0xbbb   : > { %v4377_v23 = vpack.c.bf16 %v4362_v11, %v4362_v11 }
 0xbbc   : > { %v4336_v0 = vadd.f32 1.0, %v4309_v4 }
 0xbbd   : > { %4642 = vmatprep.mubr.bf16.mxu1 %v4377_v23 }
 0xbbe   : > { %4643 = vmatmul.mubr.bf16.gmra.mxu1 %v4376_v63  ;;  %v4363_v55 = vmul.f32 %v4336_v0, %v3688_v54 }
 0xbbf   : > { %5821 = vmatprep.mubr.msk.bf16.mxu1 %vm6407_vm2, %v9101_v47 }
 0xbc0   : > { %v4378_v48 = vpack.c.bf16 %v4363_v55, %v4363_v55 }
 0xbc6   : > { %5822 = vmatmul.mubr.bf16.vlgmr.msra.gmra.mxu1 %v4375_v22 }
 0xbc7   : > { %5825 = vmatprep.mubr.msk.bf16.mxu1 %vm6407_vm2, %v9101_v47  ;;  %v8962_v47 = vld [vmem:[%s695_s0] ss:$0 sm:$0xff] }
 0xbce   : > { %5826 = vmatmul.mubr.bf16.gmra.mxu1 %v4378_v48 }
 0xbed   : > { %v4684_v49 = vpop.f32.mrf.mxu0 }
 0xbef   : > { %v5811_v40 = vpop.f32.mrf.mxu0 }
 0xbf1   : > { %v4687_v21 = vpop.f32.mrf.mxu0 }
 0xbf3   : > { %v5812_v14 = vpop.f32.mrf.mxu0 }
 0xc1c   : > { %v4692_v17 = vpop.f32.mrf.mxu0 }
 0xc1e   : > { %v5815_v42 = vpop.f32.mrf.mxu0 }
 0xc20   : > { %v4695_v18 = vpop.f32.mrf.mxu0 }
 0xc22   : > { %v5816_v15 = vpop.f32.mrf.mxu0 }
 0xc35   : > { %v4700_v61 = vpop.f32.mrf.mxu0 }
 0xc37   : > { %v5819_v32 = vpop.f32.mrf.mxu0 }
 0xc39   : > { %v4703_v25 = vpop.f32.mrf.mxu0 }
 0xc3b   : > { %v5820_v29 = vpop.f32.mrf.mxu0 }
 0xc49   : > { %v5282_v31 = vpop.f32.mrf.mxu1 }
 0xc4b   : > { %v5283_v1 = vpop.f32.mrf.mxu1 }
 0xc4c   : > { %v5284_v16 = vadd.f32 %v5283_v1, %v5282_v31  ;;  %v9186_v31 = vld [vmem:[#allocation16_spill] sm:$0xff] }
 0xc4d   : > { %v5285_v24 = vpop.f32.mrf.mxu1 }
 0xc4e   : > { %v4613_v50 = vadd.f32 %v5284_v16, %v8962_v47 }
 0xc4f   : > { %v5286_v5 = vpop.f32.mrf.mxu1 }
 0xc50   : > { %v4685_v36 = vadd.f32 %v4684_v49, %v4613_v50  ;;  %v5287_v39 = vadd.f32 %v5286_v5, %v5285_v24 }
 0xc51   : > { %v5288_v59 = vpop.f32.mrf.mxu1 }
 0xc52   : > { %v4722_v27 = vadd.f32 %v4685_v36, %v9179_v33  ;;  %v4616_v6 = vadd.f32 %v5287_v39, %v8962_v47  ;;  %v9187_v36 = vld [vmem:[#allocation17_spill] sm:$0xff] }
 0xc53   : > { %v5289_v34 = vpop.f32.mrf.mxu1 }
 0xc54   : > { %4731 = vst [vmem:[%s6592_s3] sm:$0xff] %v4722_v27  ;;  %v4688_v41 = vadd.f32 %v4687_v21, %v4616_v6  ;;  %v5290_v8 = vadd.f32 %v5289_v34, %v5288_v59 }
 0xc55   : > { %v5291_v3 = vpop.f32.mrf.mxu1 }
 0xc56   : > { %v4723_v51 = vadd.f32 %v4688_v41, %v9180_v7  ;;  %v4621_v37 = vadd.f32 %v5290_v8, %v8962_v47 }
 0xc57   : > { %v5292_v62 = vpop.f32.mrf.mxu1 }
 0xc58   : > { %4732 = vst [vmem:[%s6592_s3 + $0x8] sm:$0xff] %v4723_v51  ;;  %v4693_v56 = vadd.f32 %v4692_v17, %v4621_v37  ;;  %v5293_v58 = vadd.f32 %v5292_v62, %v5291_v3 }
 0xc59   : > { %v5294_v30 = vpop.f32.mrf.mxu1 }
 0xc5a   : > { %v4724_v2 = vadd.f32 %v4693_v56, %v9181_v60  ;;  %v4624_v45 = vadd.f32 %v5293_v58, %v8962_v47 }
 0xc5b   : > { %v5295_v12 = vpop.f32.mrf.mxu1 }
 0xc5c   : > { %4733 = vst [vmem:[%s6592_s3 + $0x10] sm:$0xff] %v4724_v2  ;;  %v4696_v20 = vadd.f32 %v4695_v18, %v4624_v45  ;;  %v5296_v35 = vadd.f32 %v5295_v12, %v5294_v30  ;;  %v9185_v18 = vld [vmem:[#allocation15_spill] sm:$0xff] }
 0xc5d   : > { %v5297_v43 = vpop.f32.mrf.mxu1 }
 0xc5e   : > { %v4725_v46 = vadd.f32 %v4696_v20, %v9182_v28  ;;  %v4629_v52 = vadd.f32 %v5296_v35, %v8962_v47 }
 0xc5f   : > { %v5298_v11 = vpop.f32.mrf.mxu1 }
 0xc60   : > { %4734 = vst [vmem:[%s6592_s3 + $0x18] sm:$0xff] %v4725_v46  ;;  %v4701_v13 = vadd.f32 %v4700_v61, %v4629_v52  ;;  %v5299_v23 = vadd.f32 %v5298_v11, %v5297_v43 }
 0xc62   : > { %v4726_v63 = vadd.f32 %v4701_v13, %v9183_v44  ;;  %v4632_v9 = vadd.f32 %v5299_v23, %v8962_v47 }
 0xc64   : > { %4735 = vst [vmem:[%s6592_s3 + $0x20] sm:$0xff] %v4726_v63  ;;  %v4704_v26 = vadd.f32 %v4703_v25, %v4632_v9 }
 0xc66   : > { %v4727_v19 = vadd.f32 %v4704_v26, %v9184_v10 }
 0xc68   : > { %4736 = vst [vmem:[%s6592_s3 + $0x28] sm:$0xff] %v4727_v19 }
 0xc6c   : > { %v5300_v57 = vpop.f32.mrf.mxu1 }
 0xc6e   : > { %v5301_v53 = vpop.f32.mrf.mxu1 }
 0xc6f   : > { %v5302_v54 = vadd.f32 %v5301_v53, %v5300_v57 }
 0xc70   : > { %v5303_v4 = vpop.f32.mrf.mxu1 }
 0xc71   : > { %v4637_v40 = vadd.f32 %v5302_v54, %v8962_v47 }
 0xc72   : > { %v5304_v38 = vpop.f32.mrf.mxu1 }
 0xc73   : > { %v5305_v49 = vadd.f32 %v5304_v38, %v5303_v4 }
 0xc75   : > { %v4640_v61 = vadd.f32 %v5305_v49, %v8962_v47 }
 0xc7e   : > { %v5306_v22 = vpop.f32.mrf.mxu1 }
 0xc80   : > { %v5307_v0 = vpop.f32.mrf.mxu1 }
 0xc81   : > { %v5308_v42 = vadd.f32 %v5307_v0, %v5306_v22 }
 0xc82   : > { %v5309_v55 = vpop.f32.mrf.mxu1 }
 0xc83   : > { %v4645_v16 = vadd.f32 %v5308_v42, %v8962_v47 }
 0xc84   : > { %v5310_v48 = vpop.f32.mrf.mxu1 }
 0xc86   : > { %v4708_v21 = vpop.f32.mrf.mxu1 }
 0xc87   : > { %v4709_v14 = vadd.f32 %v4708_v21, %v4637_v40 }
 0xc88   : > { %v5823_v17 = vpop.f32.mrf.mxu1 }
 0xc89   : > { %v4728_v15 = vadd.f32 %v4709_v14, %v9185_v18 }
 0xc8a   : > { %v4711_v32 = vpop.f32.mrf.mxu1 }
 0xc8b   : > { %4737 = vst [vmem:[%s6592_s3 + $0x30] sm:$0xff] %v4728_v15  ;;  %v4712_v25 = vadd.f32 %v4711_v32, %v4640_v61 }
 0xc8c   : > { %v5824_v29 = vpop.f32.mrf.mxu1 }
 0xc8d   : > { %v4729_v1 = vadd.f32 %v4712_v25, %v9186_v31 }
 0xc8e   : > { %v4716_v24 = vpop.f32.mrf.mxu1 }
 0xc8f   : > { %4738 = vst [vmem:[%s6592_s3 + $0x38] sm:$0xff] %v4729_v1  ;;  %v4717_v50 = vadd.f32 %v4716_v24, %v4645_v16 }
 0xc90   : > { %v5827_v5 = vpop.f32.mrf.mxu1 }
 0xc91   : > { %v4730_v39 = vadd.f32 %v4717_v50, %v9187_v36 }
 0xc92   : > { %v4719_v59 = vpop.f32.mrf.mxu1 }
 0xc93   : > { %4739 = vst [vmem:[%s6592_s3 + $0x40] sm:$0x3] %v4730_v39 }
 0xc94   : > { %v5828_v33 = vpop.f32.mrf.mxu1 }
 0xc95 PF: > { %s9188_s20 = sld [smem:[#allocation5_spill]] }
 0xc96   : > { %s9189_s29 = sld [smem:[#allocation3_spill]] }
 0xc97   : > { %s9190_s30 = sld [smem:[#allocation4_spill]] }
 0xc98   : > { %s9191_s15 = sld [smem:[#allocation6_spill]] }
 0xc99   : > { %s9192_s16 = sld [smem:[#allocation7_spill]] }
 0xc9b   : > { %s24_s17 = sadd.s32 1, %s9188_s20  }
 0xc9c   : > { %p21_p8 = scmp.ge.s32.totalorder %s24_s17, 6  }
 0xc9e   :  { %23 = sbr.rel (!%p21_p8) target bundleno = 10 (0xa), region = 149 }

</bundles_post_ra>
